<compile_context>
chip_gen: v7x
topology: tpu7x:2x2x1
jax: 0.10.0
libtpu: 0.0.40
codegen_flags: <defaults>
</compile_context>

<pallas_src>
import functools

import jax
import jax.numpy as jnp
from jax.experimental import pallas as pl
from jax.experimental.pallas import tpu as pltpu


def _round_up(n, m):
    return ((n + m - 1) // m) * m


def _leaky_relu(x, negative_slope=0.2):
    return jnp.where(x > 0, x, negative_slope * x)


def generator_kernel(x_ref,
                     w1_ref, b1_ref,
                     w2_ref, b2_ref,
                     w3_ref, b3_ref,
                     w4_ref, b4_ref,
                     out_ref):
    """Fused 4-layer MLP: 3x (x@W+b -> LeakyReLU(0.2)) then sigmoid(x@W4+b4).

    x / W are bf16 (MXU-friendly); accumulation, bias and activation math in
    f32; activations re-cast to bf16 between layers to halve vreg pressure.
    """
    h = x_ref[...]                                                     # bf16

    h = jnp.dot(h, w1_ref[...], preferred_element_type=jnp.float32) + b1_ref[...]
    h = _leaky_relu(h).astype(jnp.bfloat16)

    h = jnp.dot(h, w2_ref[...], preferred_element_type=jnp.float32) + b2_ref[...]
    h = _leaky_relu(h).astype(jnp.bfloat16)

    h = jnp.dot(h, w3_ref[...], preferred_element_type=jnp.float32) + b3_ref[...]
    h = _leaky_relu(h).astype(jnp.bfloat16)

    h = jnp.dot(h, w4_ref[...], preferred_element_type=jnp.float32) + b4_ref[...]
    # TODO(synk): if a bundle dump ever shows VALU as the binding slot, swap to
    # EUP exp + pl.reciprocal(approx=True); at these sizes the kernel is
    # MXU/weight-DMA bound so the plain sigmoid is free filler.
    out_ref[...] = jax.nn.sigmoid(h).astype(out_ref.dtype)             # sigmoid in f32


@functools.partial(
    jax.jit,
    static_argnames=("bb", "out_dtype", "weight_buffers", "vmem_limit"))
def _generator_forward_impl(xb, w1, b1, w2, b2, w3, b3, w4, b4, *,
                            bb, out_dtype, weight_buffers, vmem_limit):
    B, d_in = xb.shape
    d_out = w4.shape[1]

    B_pad = _round_up(B, bb)
    if B_pad != B:
        xb = jnp.pad(xb, ((0, B_pad - B), (0, 0)))

    grid = (B_pad // bb,)

    def const_spec(arr):
        # Whole weight/bias resident in VMEM with a constant block index.
        if weight_buffers == 1:
            # Fetched once, never revisited with a new index: the default
            # second pipeline buffer is pure waste.
            return pl.BlockSpec(arr.shape, lambda i: (0, 0),
                                pipeline_mode=pl.Buffered(1))
        return pl.BlockSpec(arr.shape, lambda i: (0, 0))

    in_specs = [pl.BlockSpec((bb, d_in), lambda i: (i, 0))]
    for arr in (w1, b1, w2, b2, w3, b3, w4, b4):
        in_specs.append(const_spec(arr))

    out_spec = pl.BlockSpec((bb, d_out), lambda i: (i, 0))

    out = pl.pallas_call(
        generator_kernel,
        out_shape=jax.ShapeDtypeStruct((B_pad, d_out), out_dtype),
        grid_spec=pltpu.PrefetchScalarGridSpec(
            num_scalar_prefetch=0,
            grid=grid,
            in_specs=in_specs,
            out_specs=out_spec,
        ),
        compiler_params=pltpu.CompilerParams(
            dimension_semantics=("parallel",),
            vmem_limit_bytes=vmem_limit,
        ),
    )(xb, w1, b1, w2, b2, w3, b3, w4, b4)

    return out[:B] if B_pad != B else out


def _num_tensorcores_per_chip():
    """v7x has 2 TensorCores per chip; v5e/v6e have 1.  Best-effort detection."""
    try:
        kind = jax.devices()[0].device_kind.lower()
        return 2 if "v7" in kind else 1
    except Exception:
        return 1


def _choose_block_b(batch, block_b, num_tc):
    if block_b is None:
        # Fewer, fatter steps: one step per TensorCore amortizes the ~0.35 us
        # per-grid-step overhead and the weight-DMA prologue (the real
        # bottleneck at small batch).  Cap the tile at 1024 rows so the f32
        # staging of the 1024-wide hidden layer stays inside scoped VMEM.
        block_b = pl.cdiv(batch, num_tc)
    block_b = min(block_b, 1024, _round_up(batch, 16))
    # bf16 packs 16 rows per packed vreg: keep the tile a multiple of 16.
    return max(16, _round_up(block_b, 16))


def generator_forward(x, params, block_b=None, out_dtype=jnp.bfloat16):
    """Fused Generator forward pass.

    x: (B, g_input_dim) bf16 (preferred, avoids a cast round trip) or f32.
    params: from prepare_params(): bf16 (in, out) weights, f32 (1, out) biases.
    """
    batch = x.shape[0]
    num_tc = _num_tensorcores_per_chip()
    bb = _choose_block_b(batch, block_b, num_tc)

    # Scoped-VMEM insurance: v5e defaults to 16 MiB scoped; only go past
    # 32 MiB for 1024-row tiles, and stay lower on v7x (64 MiB physical/TC).
    if bb >= 1024:
        vmem_limit = (48 if num_tc > 1 else 64) * 1024 * 1024
    else:
        vmem_limit = 32 * 1024 * 1024

    xb = x if x.dtype == jnp.bfloat16 else x.astype(jnp.bfloat16)

    args = (xb, params["w1"], params["b1"], params["w2"], params["b2"],
            params["w3"], params["b3"], params["w4"], params["b4"])
    common = dict(bb=bb, out_dtype=out_dtype, vmem_limit=vmem_limit)
    try:
        # Single-buffer the constant weight/bias blocks (fetched once).
        return _generator_forward_impl(*args, weight_buffers=1, **common)
    except Exception:  # fallback only flips buffering if pipeline_mode rejected
        return _generator_forward_impl(*args, weight_buffers=2, **common)


def init_generator_params(key, g_input_dim, g_output_dim):
    """Deterministic PyTorch-style (uniform +-1/sqrt(fan_in)) init, f32, (in, out)."""
    dims = [(g_input_dim, 256), (256, 512), (512, 1024), (1024, g_output_dim)]
    params = {}
    keys = jax.random.split(key, len(dims) * 2)
    for idx, (fan_in, fan_out) in enumerate(dims):
        bound = 1.0 / jnp.sqrt(fan_in)
        w = jax.random.uniform(keys[2 * idx], (fan_in, fan_out),
                               jnp.float32, -bound, bound)
        b = jax.random.uniform(keys[2 * idx + 1], (1, fan_out),
                               jnp.float32, -bound, bound)
        params[f"w{idx + 1}"] = w
        params[f"b{idx + 1}"] = b
    return params


def prepare_params(params):
    """Kernel layout: bf16 weights (in, out), f32 biases (1, out).

    No lane padding of w1: the fc1 blocks cover the full input dim and Mosaic
    pads lanes internally, so x never takes a pad/cast round trip in HBM.
    # TODO(synk): on v7x only, fp8 weights would halve the weight-DMA prologue.
    """
    prepped = {}
    for i in (1, 2, 3, 4):
        prepped[f"w{i}"] = params[f"w{i}"].astype(jnp.bfloat16)
        prepped[f"b{i}"] = params[f"b{i}"].astype(jnp.float32)
    return prepped


def generator_reference_f32(x, params):
    """Pure-JAX f32 reference of the PyTorch forward (original params)."""
    h = x.astype(jnp.float32)
    for i in (1, 2, 3):
        h = h @ params[f"w{i}"] + params[f"b{i}"]
        h = jnp.where(h > 0, h, 0.2 * h)
    h = h @ params["w4"] + params["b4"]
    return jax.nn.sigmoid(h)


def generator_reference_mixed(x, prepped):
    """Pure-JAX reference mirroring the kernel's bf16/f32 mixed precision."""
    h = x.astype(jnp.bfloat16)
    for i in (1, 2, 3):
        h = jnp.dot(h, prepped[f"w{i}"],
                    preferred_element_type=jnp.float32) + prepped[f"b{i}"]
        h = jnp.where(h > 0, h, 0.2 * h).astype(jnp.bfloat16)
    h = jnp.dot(h, prepped["w4"],
                preferred_element_type=jnp.float32) + prepped["b4"]
    return jax.nn.sigmoid(h)


if __name__ == "__main__":
    key = jax.random.PRNGKey(0)
    k_param, k_x = jax.random.split(key)

    g_input_dim = 64      # latent dim (full-extent last-dim block, lanes padded by Mosaic)
    g_output_dim = 256    # lane-dense output (2 x 128)
    batch = 64            # small demo batch, multiple of 16

    raw_params = init_generator_params(k_param, g_input_dim, g_output_dim)
    params = prepare_params(raw_params)

    # Generate the latent directly in bf16: no cast/pad round trip in HBM.
    x = jax.random.normal(k_x, (batch, g_input_dim), jnp.bfloat16)

    out = generator_forward(x, params)            # bf16 output by default
    out = jax.block_until_ready(out)
    assert out.shape == (batch, g_output_dim)
    assert out.dtype == jnp.bfloat16

    out_f32 = out.astype(jnp.float32)

    # Tight check vs a reference that mirrors the kernel's mixed precision
    # (dominant error is the bf16 quantization of the sigmoid output).
    ref_mixed = generator_reference_mixed(x, params).astype(jnp.float32)
    assert jnp.allclose(out_f32, ref_mixed, atol=2e-2, rtol=2e-2), \
        "mismatch vs mixed-precision reference"

    # Loose check vs the exact f32 PyTorch semantics (bf16 weights/activations).
    ref_f32 = generator_reference_f32(x, raw_params)
    assert jnp.allclose(out_f32, ref_f32, atol=5e-2, rtol=5e-2), \
        "mismatch vs f32 reference"

    print("KERNEL_OK")
</pallas_src>

<mosaic_0001>
module attributes {stable_mosaic.version = 11 : i64} {
  func.func @generator_kernel(%arg0: i32, %arg1: memref<64x64xbf16, #tpu.memory_space<vmem>>, %arg2: memref<64x256xbf16, #tpu.memory_space<vmem>>, %arg3: memref<1x256xf32, #tpu.memory_space<vmem>>, %arg4: memref<256x512xbf16, #tpu.memory_space<vmem>>, %arg5: memref<1x512xf32, #tpu.memory_space<vmem>>, %arg6: memref<512x1024xbf16, #tpu.memory_space<vmem>>, %arg7: memref<1x1024xf32, #tpu.memory_space<vmem>>, %arg8: memref<1024x256xbf16, #tpu.memory_space<vmem>>, %arg9: memref<1x256xf32, #tpu.memory_space<vmem>>, %arg10: memref<64x256xbf16, #tpu.memory_space<vmem>>) attributes {dimension_semantics = [#tpu.dimension_semantics<parallel>], iteration_bounds = array<i64: 1>, scalar_prefetch = 0 : i64, scratch_operands = 0 : i64, tpu.core_type = #tpu.core_type<tc>, window_params = [{transform_indices = @transform_0, window_bounds = array<i64: 64, 64>}, {pipeline_mode = #tpu.pipeline_mode<synchronous>, transform_indices = @transform_1, window_bounds = array<i64: 64, 256>}, {pipeline_mode = #tpu.pipeline_mode<synchronous>, transform_indices = @transform_2, window_bounds = array<i64: 1, 256>}, {pipeline_mode = #tpu.pipeline_mode<synchronous>, transform_indices = @transform_3, window_bounds = array<i64: 256, 512>}, {pipeline_mode = #tpu.pipeline_mode<synchronous>, transform_indices = @transform_4, window_bounds = array<i64: 1, 512>}, {pipeline_mode = #tpu.pipeline_mode<synchronous>, transform_indices = @transform_5, window_bounds = array<i64: 512, 1024>}, {pipeline_mode = #tpu.pipeline_mode<synchronous>, transform_indices = @transform_6, window_bounds = array<i64: 1, 1024>}, {pipeline_mode = #tpu.pipeline_mode<synchronous>, transform_indices = @transform_7, window_bounds = array<i64: 1024, 256>}, {pipeline_mode = #tpu.pipeline_mode<synchronous>, transform_indices = @transform_8, window_bounds = array<i64: 1, 256>}, {transform_indices = @transform_9, window_bounds = array<i64: 64, 256>}]} {
    %c0 = arith.constant 0 : index
    %c0_0 = arith.constant 0 : index
    %0 = vector.load %arg1[%c0, %c0_0] : memref<64x64xbf16, #tpu.memory_space<vmem>>, vector<64x64xbf16>
    %c0_1 = arith.constant 0 : index
    %c0_2 = arith.constant 0 : index
    %1 = vector.load %arg2[%c0_1, %c0_2] : memref<64x256xbf16, #tpu.memory_space<vmem>>, vector<64x256xbf16>
    %cst = arith.constant dense<0.000000e+00> : vector<64x256xf32>
    %2 = tpu.matmul %0, %1, %cst {dimension_numbers = #tpu.dot_dimension_numbers<[1], [0], [0], [1], [0, 0, 1, 1], [], []>} : vector<64x64xbf16>, vector<64x256xbf16>, vector<64x256xf32> -> vector<64x256xf32>
    %c0_3 = arith.constant 0 : index
    %c0_4 = arith.constant 0 : index
    %3 = vector.load %arg3[%c0_3, %c0_4] : memref<1x256xf32, #tpu.memory_space<vmem>>, vector<1x256xf32>
    %4 = vector.broadcast %3 : vector<1x256xf32> to vector<64x256xf32>
    %5 = arith.addf %2, %4 : vector<64x256xf32>
    %cst_5 = arith.constant 0.000000e+00 : f32
    %6 = vector.broadcast %cst_5 : f32 to vector<64x256xf32>
    %7 = arith.cmpf ogt, %5, %6 : vector<64x256xf32>
    %cst_6 = arith.constant 2.000000e-01 : f32
    %8 = vector.broadcast %cst_6 : f32 to vector<64x256xf32>
    %9 = arith.mulf %8, %5 : vector<64x256xf32>
    %10 = arith.select %7, %5, %9 : vector<64x256xi1>, vector<64x256xf32>
    %11 = arith.truncf %10 : vector<64x256xf32> to vector<64x256xbf16>
    %c0_7 = arith.constant 0 : index
    %c0_8 = arith.constant 0 : index
    %12 = vector.load %arg4[%c0_7, %c0_8] : memref<256x512xbf16, #tpu.memory_space<vmem>>, vector<256x512xbf16>
    %cst_9 = arith.constant dense<0.000000e+00> : vector<64x512xf32>
    %13 = tpu.matmul %11, %12, %cst_9 {dimension_numbers = #tpu.dot_dimension_numbers<[1], [0], [0], [1], [0, 0, 1, 1], [], []>} : vector<64x256xbf16>, vector<256x512xbf16>, vector<64x512xf32> -> vector<64x512xf32>
    %c0_10 = arith.constant 0 : index
    %c0_11 = arith.constant 0 : index
    %14 = vector.load %arg5[%c0_10, %c0_11] : memref<1x512xf32, #tpu.memory_space<vmem>>, vector<1x512xf32>
    %15 = vector.broadcast %14 : vector<1x512xf32> to vector<64x512xf32>
    %16 = arith.addf %13, %15 : vector<64x512xf32>
    %cst_12 = arith.constant 0.000000e+00 : f32
    %17 = vector.broadcast %cst_12 : f32 to vector<64x512xf32>
    %18 = arith.cmpf ogt, %16, %17 : vector<64x512xf32>
    %cst_13 = arith.constant 2.000000e-01 : f32
    %19 = vector.broadcast %cst_13 : f32 to vector<64x512xf32>
    %20 = arith.mulf %19, %16 : vector<64x512xf32>
    %21 = arith.select %18, %16, %20 : vector<64x512xi1>, vector<64x512xf32>
    %22 = arith.truncf %21 : vector<64x512xf32> to vector<64x512xbf16>
    %c0_14 = arith.constant 0 : index
    %c0_15 = arith.constant 0 : index
    %23 = vector.load %arg6[%c0_14, %c0_15] : memref<512x1024xbf16, #tpu.memory_space<vmem>>, vector<512x1024xbf16>
    %cst_16 = arith.constant dense<0.000000e+00> : vector<64x1024xf32>
    %24 = tpu.matmul %22, %23, %cst_16 {dimension_numbers = #tpu.dot_dimension_numbers<[1], [0], [0], [1], [0, 0, 1, 1], [], []>} : vector<64x512xbf16>, vector<512x1024xbf16>, vector<64x1024xf32> -> vector<64x1024xf32>
    %c0_17 = arith.constant 0 : index
    %c0_18 = arith.constant 0 : index
    %25 = vector.load %arg7[%c0_17, %c0_18] : memref<1x1024xf32, #tpu.memory_space<vmem>>, vector<1x1024xf32>
    %26 = vector.broadcast %25 : vector<1x1024xf32> to vector<64x1024xf32>
    %27 = arith.addf %24, %26 : vector<64x1024xf32>
    %cst_19 = arith.constant 0.000000e+00 : f32
    %28 = vector.broadcast %cst_19 : f32 to vector<64x1024xf32>
    %29 = arith.cmpf ogt, %27, %28 : vector<64x1024xf32>
    %cst_20 = arith.constant 2.000000e-01 : f32
    %30 = vector.broadcast %cst_20 : f32 to vector<64x1024xf32>
    %31 = arith.mulf %30, %27 : vector<64x1024xf32>
    %32 = arith.select %29, %27, %31 : vector<64x1024xi1>, vector<64x1024xf32>
    %33 = arith.truncf %32 : vector<64x1024xf32> to vector<64x1024xbf16>
    %c0_21 = arith.constant 0 : index
    %c0_22 = arith.constant 0 : index
    %34 = vector.load %arg8[%c0_21, %c0_22] : memref<1024x256xbf16, #tpu.memory_space<vmem>>, vector<1024x256xbf16>
    %cst_23 = arith.constant dense<0.000000e+00> : vector<64x256xf32>
    %35 = tpu.matmul %33, %34, %cst_23 {dimension_numbers = #tpu.dot_dimension_numbers<[1], [0], [0], [1], [0, 0, 1, 1], [], []>} : vector<64x1024xbf16>, vector<1024x256xbf16>, vector<64x256xf32> -> vector<64x256xf32>
    %c0_24 = arith.constant 0 : index
    %c0_25 = arith.constant 0 : index
    %36 = vector.load %arg9[%c0_24, %c0_25] : memref<1x256xf32, #tpu.memory_space<vmem>>, vector<1x256xf32>
    %37 = vector.broadcast %36 : vector<1x256xf32> to vector<64x256xf32>
    %38 = arith.addf %35, %37 : vector<64x256xf32>
    %39 = arith.negf %38 : vector<64x256xf32>
    %40 = math.exp %39 : vector<64x256xf32>
    %cst_26 = arith.constant 1.000000e+00 : f32
    %41 = vector.broadcast %cst_26 : f32 to vector<64x256xf32>
    %42 = arith.addf %41, %40 : vector<64x256xf32>
    %43 = arith.divf %41, %42 : vector<64x256xf32>
    %44 = arith.truncf %43 : vector<64x256xf32> to vector<64x256xbf16>
    %c0_27 = arith.constant 0 : index
    %c0_28 = arith.constant 0 : index
    %45 = vector.load %arg10[%c0_27, %c0_28] : memref<64x256xbf16, #tpu.memory_space<vmem>>, vector<64x256xbf16>
    tpu.vector_store %arg10[%c0_27, %c0_28], %44 {strides = array<i32>} : memref<64x256xbf16, #tpu.memory_space<vmem>>, vector<64x256xbf16>,
    return
  }
  func.func @transform_0(%arg0: i32) -> (i32, i32) {
    %c0_i32 = arith.constant 0 : i32
    %c0_i32_0 = arith.constant 0 : i32
    return %arg0, %c0_i32 : i32, i32
  }
  func.func @transform_1(%arg0: i32) -> (i32, i32) {
    %c0_i32 = arith.constant 0 : i32
    %c0_i32_0 = arith.constant 0 : i32
    %c0_i32_1 = arith.constant 0 : i32
    return %c0_i32, %c0_i32_0 : i32, i32
  }
  func.func @transform_2(%arg0: i32) -> (i32, i32) {
    %c0_i32 = arith.constant 0 : i32
    %c0_i32_0 = arith.constant 0 : i32
    %c0_i32_1 = arith.constant 0 : i32
    return %c0_i32, %c0_i32_0 : i32, i32
  }
  func.func @transform_3(%arg0: i32) -> (i32, i32) {
    %c0_i32 = arith.constant 0 : i32
    %c0_i32_0 = arith.constant 0 : i32
    %c0_i32_1 = arith.constant 0 : i32
    return %c0_i32, %c0_i32_0 : i32, i32
  }
  func.func @transform_4(%arg0: i32) -> (i32, i32) {
    %c0_i32 = arith.constant 0 : i32
    %c0_i32_0 = arith.constant 0 : i32
    %c0_i32_1 = arith.constant 0 : i32
    return %c0_i32, %c0_i32_0 : i32, i32
  }
  func.func @transform_5(%arg0: i32) -> (i32, i32) {
    %c0_i32 = arith.constant 0 : i32
    %c0_i32_0 = arith.constant 0 : i32
    %c0_i32_1 = arith.constant 0 : i32
    return %c0_i32, %c0_i32_0 : i32, i32
  }
  func.func @transform_6(%arg0: i32) -> (i32, i32) {
    %c0_i32 = arith.constant 0 : i32
    %c0_i32_0 = arith.constant 0 : i32
    %c0_i32_1 = arith.constant 0 : i32
    return %c0_i32, %c0_i32_0 : i32, i32
  }
  func.func @transform_7(%arg0: i32) -> (i32, i32) {
    %c0_i32 = arith.constant 0 : i32
    %c0_i32_0 = arith.constant 0 : i32
    %c0_i32_1 = arith.constant 0 : i32
    return %c0_i32, %c0_i32_0 : i32, i32
  }
  func.func @transform_8(%arg0: i32) -> (i32, i32) {
    %c0_i32 = arith.constant 0 : i32
    %c0_i32_0 = arith.constant 0 : i32
    %c0_i32_1 = arith.constant 0 : i32
    return %c0_i32, %c0_i32_0 : i32, i32
  }
  func.func @transform_9(%arg0: i32) -> (i32, i32) {
    %c0_i32 = arith.constant 0 : i32
    %c0_i32_0 = arith.constant 0 : i32
    return %arg0, %c0_i32 : i32, i32
  }
}

module attributes {stable_mosaic.version = 11 : i64} {
  func.func @generator_kernel(%arg0: i32, %arg1: memref<64x64xbf16, #tpu.memory_space<vmem>>, %arg2: memref<64x256xbf16, #tpu.memory_space<vmem>>, %arg3: memref<1x256xf32, #tpu.memory_space<vmem>>, %arg4: memref<256x512xbf16, #tpu.memory_space<vmem>>, %arg5: memref<1x512xf32, #tpu.memory_space<vmem>>, %arg6: memref<512x1024xbf16, #tpu.memory_space<vmem>>, %arg7: memref<1x1024xf32, #tpu.memory_space<vmem>>, %arg8: memref<1024x256xbf16, #tpu.memory_space<vmem>>, %arg9: memref<1x256xf32, #tpu.memory_space<vmem>>, %arg10: memref<64x256xbf16, #tpu.memory_space<vmem>>) attributes {dimension_semantics = [#tpu.dimension_semantics<parallel>], iteration_bounds = array<i64: 1>, scalar_prefetch = 0 : i64, scratch_operands = 0 : i64, tpu.core_type = #tpu.core_type<tc>, window_params = [{transform_indices = @transform_0, window_bounds = array<i64: 64, 64>}, {pipeline_mode = #tpu.pipeline_mode<synchronous>, transform_indices = @transform_1, window_bounds = array<i64: 64, 256>}, {pipeline_mode = #tpu.pipeline_mode<synchronous>, transform_indices = @transform_2, window_bounds = array<i64: 1, 256>}, {pipeline_mode = #tpu.pipeline_mode<synchronous>, transform_indices = @transform_3, window_bounds = array<i64: 256, 512>}, {pipeline_mode = #tpu.pipeline_mode<synchronous>, transform_indices = @transform_4, window_bounds = array<i64: 1, 512>}, {pipeline_mode = #tpu.pipeline_mode<synchronous>, transform_indices = @transform_5, window_bounds = array<i64: 512, 1024>}, {pipeline_mode = #tpu.pipeline_mode<synchronous>, transform_indices = @transform_6, window_bounds = array<i64: 1, 1024>}, {pipeline_mode = #tpu.pipeline_mode<synchronous>, transform_indices = @transform_7, window_bounds = array<i64: 1024, 256>}, {pipeline_mode = #tpu.pipeline_mode<synchronous>, transform_indices = @transform_8, window_bounds = array<i64: 1, 256>}, {transform_indices = @transform_9, window_bounds = array<i64: 64, 256>}]} {
    %c0 = arith.constant 0 : index
    %c0_0 = arith.constant 0 : index
    %0 = vector.load %arg1[%c0, %c0_0] : memref<64x64xbf16, #tpu.memory_space<vmem>>, vector<64x64xbf16>
    %c0_1 = arith.constant 0 : index
    %c0_2 = arith.constant 0 : index
    %1 = vector.load %arg2[%c0_1, %c0_2] : memref<64x256xbf16, #tpu.memory_space<vmem>>, vector<64x256xbf16>
    %cst = arith.constant dense<0.000000e+00> : vector<64x256xf32>
    %2 = tpu.matmul %0, %1, %cst {dimension_numbers = #tpu.dot_dimension_numbers<[1], [0], [0], [1], [0, 0, 1, 1], [], []>} : vector<64x64xbf16>, vector<64x256xbf16>, vector<64x256xf32> -> vector<64x256xf32>
    %c0_3 = arith.constant 0 : index
    %c0_4 = arith.constant 0 : index
    %3 = vector.load %arg3[%c0_3, %c0_4] : memref<1x256xf32, #tpu.memory_space<vmem>>, vector<1x256xf32>
    %4 = vector.broadcast %3 : vector<1x256xf32> to vector<64x256xf32>
    %5 = arith.addf %2, %4 : vector<64x256xf32>
    %cst_5 = arith.constant 0.000000e+00 : f32
    %6 = vector.broadcast %cst_5 : f32 to vector<64x256xf32>
    %7 = arith.cmpf ogt, %5, %6 : vector<64x256xf32>
    %cst_6 = arith.constant 2.000000e-01 : f32
    %8 = vector.broadcast %cst_6 : f32 to vector<64x256xf32>
    %9 = arith.mulf %8, %5 : vector<64x256xf32>
    %10 = arith.select %7, %5, %9 : vector<64x256xi1>, vector<64x256xf32>
    %11 = arith.truncf %10 : vector<64x256xf32> to vector<64x256xbf16>
    %c0_7 = arith.constant 0 : index
    %c0_8 = arith.constant 0 : index
    %12 = vector.load %arg4[%c0_7, %c0_8] : memref<256x512xbf16, #tpu.memory_space<vmem>>, vector<256x512xbf16>
    %cst_9 = arith.constant dense<0.000000e+00> : vector<64x512xf32>
    %13 = tpu.matmul %11, %12, %cst_9 {dimension_numbers = #tpu.dot_dimension_numbers<[1], [0], [0], [1], [0, 0, 1, 1], [], []>} : vector<64x256xbf16>, vector<256x512xbf16>, vector<64x512xf32> -> vector<64x512xf32>
    %c0_10 = arith.constant 0 : index
    %c0_11 = arith.constant 0 : index
    %14 = vector.load %arg5[%c0_10, %c0_11] : memref<1x512xf32, #tpu.memory_space<vmem>>, vector<1x512xf32>
    %15 = vector.broadcast %14 : vector<1x512xf32> to vector<64x512xf32>
    %16 = arith.addf %13, %15 : vector<64x512xf32>
    %cst_12 = arith.constant 0.000000e+00 : f32
    %17 = vector.broadcast %cst_12 : f32 to vector<64x512xf32>
    %18 = arith.cmpf ogt, %16, %17 : vector<64x512xf32>
    %cst_13 = arith.constant 2.000000e-01 : f32
    %19 = vector.broadcast %cst_13 : f32 to vector<64x512xf32>
    %20 = arith.mulf %19, %16 : vector<64x512xf32>
    %21 = arith.select %18, %16, %20 : vector<64x512xi1>, vector<64x512xf32>
    %22 = arith.truncf %21 : vector<64x512xf32> to vector<64x512xbf16>
    %c0_14 = arith.constant 0 : index
    %c0_15 = arith.constant 0 : index
    %23 = vector.load %arg6[%c0_14, %c0_15] : memref<512x1024xbf16, #tpu.memory_space<vmem>>, vector<512x1024xbf16>
    %cst_16 = arith.constant dense<0.000000e+00> : vector<64x1024xf32>
    %24 = tpu.matmul %22, %23, %cst_16 {dimension_numbers = #tpu.dot_dimension_numbers<[1], [0], [0], [1], [0, 0, 1, 1], [], []>} : vector<64x512xbf16>, vector<512x1024xbf16>, vector<64x1024xf32> -> vector<64x1024xf32>
    %c0_17 = arith.constant 0 : index
    %c0_18 = arith.constant 0 : index
    %25 = vector.load %arg7[%c0_17, %c0_18] : memref<1x1024xf32, #tpu.memory_space<vmem>>, vector<1x1024xf32>
    %26 = vector.broadcast %25 : vector<1x1024xf32> to vector<64x1024xf32>
    %27 = arith.addf %24, %26 : vector<64x1024xf32>
    %cst_19 = arith.constant 0.000000e+00 : f32
    %28 = vector.broadcast %cst_19 : f32 to vector<64x1024xf32>
    %29 = arith.cmpf ogt, %27, %28 : vector<64x1024xf32>
    %cst_20 = arith.constant 2.000000e-01 : f32
    %30 = vector.broadcast %cst_20 : f32 to vector<64x1024xf32>
    %31 = arith.mulf %30, %27 : vector<64x1024xf32>
    %32 = arith.select %29, %27, %31 : vector<64x1024xi1>, vector<64x1024xf32>
    %33 = arith.truncf %32 : vector<64x1024xf32> to vector<64x1024xbf16>
    %c0_21 = arith.constant 0 : index
    %c0_22 = arith.constant 0 : index
    %34 = vector.load %arg8[%c0_21, %c0_22] : memref<1024x256xbf16, #tpu.memory_space<vmem>>, vector<1024x256xbf16>
    %cst_23 = arith.constant dense<0.000000e+00> : vector<64x256xf32>
    %35 = tpu.matmul %33, %34, %cst_23 {dimension_numbers = #tpu.dot_dimension_numbers<[1], [0], [0], [1], [0, 0, 1, 1], [], []>} : vector<64x1024xbf16>, vector<1024x256xbf16>, vector<64x256xf32> -> vector<64x256xf32>
    %c0_24 = arith.constant 0 : index
    %c0_25 = arith.constant 0 : index
    %36 = vector.load %arg9[%c0_24, %c0_25] : memref<1x256xf32, #tpu.memory_space<vmem>>, vector<1x256xf32>
    %37 = vector.broadcast %36 : vector<1x256xf32> to vector<64x256xf32>
    %38 = arith.addf %35, %37 : vector<64x256xf32>
    %39 = arith.negf %38 : vector<64x256xf32>
    %40 = math.exp %39 : vector<64x256xf32>
    %cst_26 = arith.constant 1.000000e+00 : f32
    %41 = vector.broadcast %cst_26 : f32 to vector<64x256xf32>
    %42 = arith.addf %41, %40 : vector<64x256xf32>
    %43 = arith.divf %41, %42 : vector<64x256xf32>
    %44 = arith.truncf %43 : vector<64x256xf32> to vector<64x256xbf16>
    %c0_27 = arith.constant 0 : index
    %c0_28 = arith.constant 0 : index
    %45 = vector.load %arg10[%c0_27, %c0_28] : memref<64x256xbf16, #tpu.memory_space<vmem>>, vector<64x256xbf16>
    tpu.vector_store %arg10[%c0_27, %c0_28], %44 {strides = array<i32>} : memref<64x256xbf16, #tpu.memory_space<vmem>>, vector<64x256xbf16>,
    return
  }
  func.func @transform_0(%arg0: i32) -> (i32, i32) {
    %c0_i32 = arith.constant 0 : i32
    %c0_i32_0 = arith.constant 0 : i32
    return %arg0, %c0_i32 : i32, i32
  }
  func.func @transform_1(%arg0: i32) -> (i32, i32) {
    %c0_i32 = arith.constant 0 : i32
    %c0_i32_0 = arith.constant 0 : i32
    %c0_i32_1 = arith.constant 0 : i32
    return %c0_i32, %c0_i32_0 : i32, i32
  }
  func.func @transform_2(%arg0: i32) -> (i32, i32) {
    %c0_i32 = arith.constant 0 : i32
    %c0_i32_0 = arith.constant 0 : i32
    %c0_i32_1 = arith.constant 0 : i32
    return %c0_i32, %c0_i32_0 : i32, i32
  }
  func.func @transform_3(%arg0: i32) -> (i32, i32) {
    %c0_i32 = arith.constant 0 : i32
    %c0_i32_0 = arith.constant 0 : i32
    %c0_i32_1 = arith.constant 0 : i32
    return %c0_i32, %c0_i32_0 : i32, i32
  }
  func.func @transform_4(%arg0: i32) -> (i32, i32) {
    %c0_i32 = arith.constant 0 : i32
    %c0_i32_0 = arith.constant 0 : i32
    %c0_i32_1 = arith.constant 0 : i32
    return %c0_i32, %c0_i32_0 : i32, i32
  }
  func.func @transform_5(%arg0: i32) -> (i32, i32) {
    %c0_i32 = arith.constant 0 : i32
    %c0_i32_0 = arith.constant 0 : i32
    %c0_i32_1 = arith.constant 0 : i32
    return %c0_i32, %c0_i32_0 : i32, i32
  }
  func.func @transform_6(%arg0: i32) -> (i32, i32) {
    %c0_i32 = arith.constant 0 : i32
    %c0_i32_0 = arith.constant 0 : i32
    %c0_i32_1 = arith.constant 0 : i32
    return %c0_i32, %c0_i32_0 : i32, i32
  }
  func.func @transform_7(%arg0: i32) -> (i32, i32) {
    %c0_i32 = arith.constant 0 : i32
    %c0_i32_0 = arith.constant 0 : i32
    %c0_i32_1 = arith.constant 0 : i32
    return %c0_i32, %c0_i32_0 : i32, i32
  }
  func.func @transform_8(%arg0: i32) -> (i32, i32) {
    %c0_i32 = arith.constant 0 : i32
    %c0_i32_0 = arith.constant 0 : i32
    %c0_i32_1 = arith.constant 0 : i32
    return %c0_i32, %c0_i32_0 : i32, i32
  }
  func.func @transform_9(%arg0: i32) -> (i32, i32) {
    %c0_i32 = arith.constant 0 : i32
    %c0_i32_0 = arith.constant 0 : i32
    return %arg0, %c0_i32 : i32, i32
  }
}

</mosaic_0001>

<bundles_post_ra>
// kernel: _generator_forward_impl.1
= control target key start
LH: loop header
LB: loop body
LE: loop exit
PB: predicated region body
PF: predicated region fallthrough
CT: control target
= control target key end

     0   :  { %14 = vsyncpa [#allocation3], 0  ;;  %s6408_s0 = inlined_call_operand.hbm [shape: bf16[64,64], index: 0, kind: input, shape index: {}]   ;;  %s6409_s1 = inlined_call_operand.hbm [shape: bf16[64,256], index: 1, kind: input, shape index: {}]   ;;  %s6410_s2 = inlined_call_operand.vmem [shape: f32[1,256], index: 2, kind: input, shape index: {}]   ;;  %s6411_s3 = inlined_call_operand.hbm [shape: bf16[256,512], index: 3, kind: input, shape index: {}]   ;;  %s6412_s4 = inlined_call_operand.vmem [shape: f32[1,512], index: 4, kind: input, shape index: {}]   ;;  %s6413_s5 = inlined_call_operand.hbm [shape: bf16[512,1024], index: 5, kind: input, shape index: {}]   ;;  %s6414_s6 = inlined_call_operand.vmem [shape: f32[1,1024], index: 6, kind: input, shape index: {}]   ;;  %s6415_s7 = inlined_call_operand.hbm [shape: bf16[1024,256], index: 7, kind: input, shape index: {}]   ;;  %s6416_s8 = inlined_call_operand.vmem [shape: f32[1,256], index: 8, kind: input, shape index: {}]   ;;  %s6417_s9 = inlined_call_operand.hbm [shape: bf16[64,256], index: 9, kind: output, shape index: {}]  }
   0x1   :  { %15 = vsyncpa [#allocation6], 0 }
   0x2   :  { %16 = vsyncpa [#allocation9], 0 }
   0x3   :  { %17 = vsyncpa [#allocation4], 0  ;;  %s5836_s30 = smov [#allocation5]   ;;  %s5696_s13 = scalar_lea.hbm %s6409_s1, 1024 }
   0x4   :  { %s35_s10 = sshll.u32 %s5836_s30, 4  ;;  %p5697_p0 = scmp.ne.s32.totalorder %s6409_s1, %s5696_s13  ;;  %s36_s10 = int_to_ptr.vmem [resolvable:$true] %s35_s10 }
   0x5   :  { %p5700_p1 = scmp.lt.u32.totalorder %s5696_s13, %s6409_s1 }
   0x7   :  { %p5702_p2 = pnand %p5700_p1, %p5697_p0 }
   0x9   :  { %5705 = shalt.err (!%p5702_p2)
}
   0xa   :  { %s5706_s18 = scalar_lea.vmem %s36_s10, 1024  ;;  %p5711_p4 = scmp.lt.s32.totalorder %s36_s10, %s36_s10 }
   0xb   :  { %p5707_p3 = scmp.ne.s32.totalorder %s36_s10, %s5706_s18  ;;  %p5712_p5 = scmp.lt.s32.totalorder %s5706_s18, %s5706_s18 }
   0xd   :  { %p5713_p6 = por %p5712_p5, %p5711_p4 }
   0xf   :  { %p5714_p7 = pnand %p5713_p6, %p5707_p3 }
  0x11   :  { %5717 = shalt.err (!%p5714_p7)
}
  0x12   :  { %s5837_s19 = smov 128   ;;  %s5838_s20 = smov 8  }
  0x13   :  { %41 = dma.hbm_to_vmem [thread:$0]  %s6409_s1, 1024, %s36_s10, [#allocation6], %s5837_s19, %s5837_s19, %s5838_s20  }
  0x14   :  { %s5839_s23 = smov [#allocation8]   ;;  %s5718_s27 = scalar_lea.hbm %s6413_s5, 32768 }
  0x15   :  { %s63_s24 = sshll.u32 %s5839_s23, 4  ;;  %p5719_p8 = scmp.ne.s32.totalorder %s6413_s5, %s5718_s27  ;;  %s64_s24 = int_to_ptr.vmem [resolvable:$true] %s63_s24 }
  0x16   :  { %p5722_p9 = scmp.lt.u32.totalorder %s5718_s27, %s6413_s5 }
  0x18   :  { %p5724_p10 = pnand %p5722_p9, %p5719_p8 }
  0x1a   :  { %5727 = shalt.err (!%p5724_p10)
}
  0x1b   :  { %s5728_s12 = scalar_lea.vmem %s64_s24, 32768  ;;  %p5733_p12 = scmp.lt.s32.totalorder %s64_s24, %s64_s24 }
  0x1c   :  { %p5729_p11 = scmp.ne.s32.totalorder %s64_s24, %s5728_s12  ;;  %p5734_p13 = scmp.lt.s32.totalorder %s5728_s12, %s5728_s12 }
  0x1e   :  { %p5735_p0 = por %p5734_p13, %p5733_p12 }
  0x20   :  { %p5736_p1 = pnand %p5735_p0, %p5729_p11 }
  0x22   :  { %5739 = shalt.err (!%p5736_p1)
}
  0x23   :  { %s5840_s1 = smov 512   ;;  %s5841_s10 = smov 32  }
  0x24   :  { %69 = dma.hbm_to_vmem [thread:$0]  %s6413_s5, 32768, %s64_s24, [#allocation9], %s5840_s1, %s5840_s1, %s5841_s10  }
  0x25   :  { %s5842_s15 = smov [#allocation2]   ;;  %s5740_s21 = scalar_lea.hbm %s6408_s0, 512 }
  0x26   :  { %s23_s16 = sshll.u32 %s5842_s15, 4  ;;  %p5741_p2 = scmp.ne.s32.totalorder %s6408_s0, %s5740_s21  ;;  %s24_s16 = int_to_ptr.vmem [resolvable:$true] %s23_s16 }
  0x27   :  { %p5744_p3 = scmp.lt.u32.totalorder %s5740_s21, %s6408_s0 }
  0x29   :  { %p5746_p4 = pnand %p5744_p3, %p5741_p2 }
  0x2b   :  { %5749 = shalt.err (!%p5746_p4)
}
  0x2c   :  { %s5750_s27 = scalar_lea.vmem %s24_s16, 512  ;;  %p5755_p6 = scmp.lt.s32.totalorder %s24_s16, %s24_s16 }
  0x2d   :  { %p5751_p5 = scmp.ne.s32.totalorder %s24_s16, %s5750_s27  ;;  %p5756_p7 = scmp.lt.s32.totalorder %s5750_s27, %s5750_s27 }
  0x2f   :  { %p5757_p8 = por %p5756_p7, %p5755_p6 }
  0x31   :  { %p5758_p9 = pnand %p5757_p8, %p5751_p5 }
  0x33   :  { %5761 = shalt.err (!%p5758_p9)
}
  0x34   :  { %s5843_s5 = smov 64   ;;  %s5844_s24 = smov 4  }
  0x35   :  { %29 = dma.hbm_to_vmem [thread:$0]  %s6408_s0, 512, %s24_s16, [#allocation3], %s5843_s5, %s5843_s5, %s5844_s24  }
  0x36   :  { %s5845_s30 = smov [#allocation7]   ;;  %s5762_s10 = scalar_lea.hbm %s6411_s3, 8192 }
  0x37   :  { %s49_s11 = sshll.u32 %s5845_s30, 4  ;;  %p5763_p10 = scmp.ne.s32.totalorder %s6411_s3, %s5762_s10  ;;  %s50_s11 = int_to_ptr.vmem [resolvable:$true] %s49_s11 }
  0x38   :  { %p5766_p11 = scmp.lt.u32.totalorder %s5762_s10, %s6411_s3 }
  0x3a   :  { %p5768_p12 = pnand %p5766_p11, %p5763_p10 }
  0x3c   :  { %5771 = shalt.err (!%p5768_p12)
}
  0x3d   :  { %s5772_s18 = scalar_lea.vmem %s50_s11, 8192  ;;  %p5777_p0 = scmp.lt.s32.totalorder %s50_s11, %s50_s11 }
  0x3e   :  { %p5773_p13 = scmp.ne.s32.totalorder %s50_s11, %s5772_s18  ;;  %p5778_p1 = scmp.lt.s32.totalorder %s5772_s18, %s5772_s18 }
  0x40   :  { %p5779_p2 = por %p5778_p1, %p5777_p0 }
  0x42   :  { %p5780_p3 = pnand %p5779_p2, %p5773_p13 }
  0x44   :  { %5783 = shalt.err (!%p5780_p3)
}
  0x45   :  { %s5846_s0 = smov 256   ;;  %s5847_s16 = smov 16  }
  0x46   :  { %55 = dma.hbm_to_vmem [thread:$0]  %s6411_s3, 8192, %s50_s11, [#allocation6], %s5846_s0, %s5846_s0, %s5847_s16  }
  0x47   :  { %s5848_s23 = smov [#allocation10]   ;;  %s5784_s5 = scalar_lea.hbm %s6415_s7, 16384 }
  0x48   :  { %s77_s25 = sshll.u32 %s5848_s23, 4  ;;  %p5785_p4 = scmp.ne.s32.totalorder %s6415_s7, %s5784_s5  ;;  %s78_s25 = int_to_ptr.vmem [resolvable:$true] %s77_s25 }
  0x49   :  { %p5788_p5 = scmp.lt.u32.totalorder %s5784_s5, %s6415_s7 }
  0x4b   :  { %p5790_p6 = pnand %p5788_p5, %p5785_p4 }
  0x4d   :  { %5793 = shalt.err (!%p5790_p6)
}
  0x4e   :  { %s5794_s12 = scalar_lea.vmem %s78_s25, 16384  ;;  %p5799_p8 = scmp.lt.s32.totalorder %s78_s25, %s78_s25 }
  0x4f   :  { %p5795_p7 = scmp.ne.s32.totalorder %s78_s25, %s5794_s12  ;;  %p5800_p9 = scmp.lt.s32.totalorder %s5794_s12, %s5794_s12 }
  0x51   :  { %p5801_p10 = por %p5800_p9, %p5799_p8 }
  0x53   :  { %p5802_p11 = pnand %p5801_p10, %p5795_p7 }
  0x55   :  { %5805 = shalt.err (!%p5802_p11)
}
  0x56   :  { %83 = dma.hbm_to_vmem [thread:$0]  %s6415_s7, 16384, %s78_s25, [#allocation9], %s5837_s19, %s5837_s19, %s5838_s20  }
  0x57   :  { %5828 = dma.done.wait [#allocation3], 512  }
  0x58   :  { %5829 = vsyncadd [#allocation3], 4294966784 }
  0x59   :  { %5830 = dma.done.wait [#allocation6], 9216  }
  0x5a   :  { %5831 = vsyncadd [#allocation6], 4294958080 }
  0x5b   :  { %5832 = dma.done.wait [#allocation9], 49152  }
  0x5c   :  { %5833 = vsyncadd [#allocation9], 4294918144  ;;  %v5849_v0 = vmov 0   ;;  %v5328_v1 = vld [vmem:[#allocation5 + $0x4] ss:$8 sps:$4 sm:$0xff]   ;;  %vm190_vm0 = vcmask 523264   ;;  %v120_v46 = vlaneseq }
  0x5d   :  { %235 = vmatprep.mubr.bf16.mxu0 %v5849_v0  ;;  %v5330_v2 = vld [vmem:[#allocation5] ss:$8 sps:$4 sm:$0xff]   ;;  %203 = vmatprep.subr.bf16.mxu0 %v5328_v1  ;;  %v5331_v3 = vld [vmem:[#allocation5 + $0x14] ss:$8 sps:$4 sm:$0xff]   ;;  %v5333_v4 = vld [vmem:[#allocation5 + $0x10] ss:$8 sps:$4 sm:$0xff]  }
  0x5e   :  { %204 = vmatpush1.bf16.msra.mxu0 %v5330_v2  ;;  %v5334_v5 = vld [vmem:[#allocation5 + $0x24] ss:$8 sps:$4 sm:$0xff]   ;;  %v5336_v6 = vld [vmem:[#allocation5 + $0x20] ss:$8 sps:$4 sm:$0xff]   ;;  %v5337_v7 = vld [vmem:[#allocation5 + $0x34] ss:$8 sps:$4 sm:$0xff]  }
  0x5f   :  { %205 = vmatprep.subr.bf16.mxu0 %v5331_v3  ;;  %v5339_v8 = vld [vmem:[#allocation5 + $0x30] ss:$8 sps:$4 sm:$0xff]   ;;  %v5346_v9 = vld [vmem:[#allocation7 + $0x4] ss:$16 sps:$4 sm:$0xff]   ;;  %v5341_v15 = vld [vmem:[#allocation2 + $0x8] sm:$0xff]   ;;  %v5971_v47 = vshrl.u32 %v120_v46, 7 }
  0x60   :  { %v5340_v10 = vld [vmem:[#allocation2] sm:$0xff]   ;;  %v5342_v19 = vld [vmem:[#allocation2 + $0x10] sm:$0xff]   ;;  %v5343_v25 = vld [vmem:[#allocation2 + $0x18] sm:$0xff]  }
  0x61   :  { %v5344_v11 = vld [vmem:[#allocation7] ss:$16 sps:$4 sm:$0xff]   ;;  %v5349_v12 = vld [vmem:[#allocation7 + $0x24] ss:$16 sps:$4 sm:$0xff]   ;;  %v5394_v45 = vld [vmem:[#allocation7 + $0xc] ss:$16 sps:$4 sm:$0xff]  }
  0x62   :  { %206 = vmatpush1.bf16.msra.mxu0 %v5333_v4  ;;  %v5347_v13 = vld [vmem:[#allocation7 + $0x20] ss:$16 sps:$4 sm:$0xff]   ;;  %v5352_v14 = vld [vmem:[#allocation7 + $0x44] ss:$16 sps:$4 sm:$0xff]   ;;  %v5974_v48 = vsub.s32 0, %v5971_v47  ;;  %v5980_v50 = vsub.s32 1, %v5971_v47 }
  0x63   :  { %207 = vmatprep.subr.bf16.mxu0 %v5334_v5  ;;  %v5350_v16 = vld [vmem:[#allocation7 + $0x40] ss:$16 sps:$4 sm:$0xff]   ;;  %v5355_v17 = vld [vmem:[#allocation7 + $0x64] ss:$16 sps:$4 sm:$0xff]   ;;  %v5406_v46 = vld [vmem:[#allocation7 + $0x8c] ss:$16 sps:$4 sm:$0xff]  }
  0x64   :  { %v5353_v18 = vld [vmem:[#allocation7 + $0x60] ss:$16 sps:$4 sm:$0xff]   ;;  %v5358_v20 = vld [vmem:[#allocation7 + $0x84] ss:$16 sps:$4 sm:$0xff]  }
  0x65   :  { %v5356_v21 = vld [vmem:[#allocation7 + $0x80] ss:$16 sps:$4 sm:$0xff]   ;;  %v5361_v22 = vld [vmem:[#allocation7 + $0xa4] ss:$16 sps:$4 sm:$0xff]  }
  0x66   :  { %208 = vmatpush1.bf16.msra.mxu0 %v5336_v6  ;;  %v5359_v23 = vld [vmem:[#allocation7 + $0xa0] ss:$16 sps:$4 sm:$0xff]   ;;  %v5364_v24 = vld [vmem:[#allocation7 + $0xc4] ss:$16 sps:$4 sm:$0xff]  }
  0x67   :  { %209 = vmatprep.subr.bf16.mxu0 %v5337_v7  ;;  %v5362_v26 = vld [vmem:[#allocation7 + $0xc0] ss:$16 sps:$4 sm:$0xff]   ;;  %v5367_v27 = vld [vmem:[#allocation7 + $0xe4] ss:$16 sps:$4 sm:$0xff]  }
  0x68   :  { %v5365_v28 = vld [vmem:[#allocation7 + $0xe0] ss:$16 sps:$4 sm:$0xff]   ;;  %v5370_v29 = vld [vmem:[#allocation7 + $0x104] ss:$16 sps:$4 sm:$0xff]  }
  0x69   :  { %v5368_v30 = vld [vmem:[#allocation7 + $0x100] ss:$16 sps:$4 sm:$0xff]   ;;  %v5373_v31 = vld [vmem:[#allocation7 + $0x124] ss:$16 sps:$4 sm:$0xff]  }
  0x6a   :  { %210 = vmatpush1.bf16.msra.mxu0 %v5339_v8  ;;  %v5371_v32 = vld [vmem:[#allocation7 + $0x120] ss:$16 sps:$4 sm:$0xff]   ;;  %v5376_v33 = vld [vmem:[#allocation7 + $0x144] ss:$16 sps:$4 sm:$0xff]  }
  0x6b   :  { %738 = vmatprep.subr.bf16.mxu0 %v5346_v9  ;;  %v5374_v34 = vld [vmem:[#allocation7 + $0x140] ss:$16 sps:$4 sm:$0xff]   ;;  %v5379_v35 = vld [vmem:[#allocation7 + $0x164] ss:$16 sps:$4 sm:$0xff]  }
  0x6c   :  { %v5377_v36 = vld [vmem:[#allocation7 + $0x160] ss:$16 sps:$4 sm:$0xff]   ;;  %v5382_v37 = vld [vmem:[#allocation7 + $0x184] ss:$16 sps:$4 sm:$0xff]  }
  0x6d   :  { %4637 = vmatmul.mubr.msk.bf16.vlgmr.msra.gmra.mrb[0].mxu0 %vm190_vm0, %v5340_v10  ;;  %v5380_v38 = vld [vmem:[#allocation7 + $0x180] ss:$16 sps:$4 sm:$0xff]   ;;  %v5385_v39 = vld [vmem:[#allocation7 + $0x1a4] ss:$16 sps:$4 sm:$0xff]   ;;  %v5392_v10 = vld [vmem:[#allocation7 + $0x8] ss:$16 sps:$4 sm:$0xff]  }
  0x6e   :  { %245 = vmatprep.mubr.bf16.mxu0 %v5849_v0  ;;  %739 = vmatpush1.bf16.msra.mxu0 %v5344_v11  ;;  %v5383_v40 = vld [vmem:[#allocation7 + $0x1a0] ss:$16 sps:$4 sm:$0xff]   ;;  %v5388_v41 = vld [vmem:[#allocation7 + $0x1c4] ss:$16 sps:$4 sm:$0xff]  }
  0x6f   :  { %740 = vmatprep.subr.bf16.mxu0 %v5349_v12  ;;  %v5386_v42 = vld [vmem:[#allocation7 + $0x1c0] ss:$16 sps:$4 sm:$0xff]   ;;  %v5391_v43 = vld [vmem:[#allocation7 + $0x1e4] ss:$16 sps:$4 sm:$0xff]  }
  0x70   :  { %v5389_v44 = vld [vmem:[#allocation7 + $0x1e0] ss:$16 sps:$4 sm:$0xff]  }
  0x71   :  { %v118_v49 = vld [vmem:[%s6410_s2] sm:$0x3] }
  0x72   :  { %741 = vmatpush1.bf16.msra.mxu0 %v5347_v13  ;;  %v5983_v51 = vrot.slane %v118_v49, %v5974_v48  ;;  %v5986_v52 = vrot.slane %v118_v49, %v5980_v50  ;;  %v5397_v13 = vld [vmem:[#allocation7 + $0x2c] ss:$16 sps:$4 sm:$0xff]  }
  0x73   :  { %742 = vmatprep.subr.bf16.mxu0 %v5352_v14 }
  0x75   :  { %4638 = vmatmul.mubr.msk.bf16.gmra.mrb[4].mxu0 %vm190_vm0, %v5341_v15 }
  0x76   :  { %255 = vmatprep.mubr.bf16.mxu0 %v5849_v0  ;;  %743 = vmatpush1.bf16.msra.mxu0 %v5350_v16 }
  0x77   :  { %744 = vmatprep.subr.bf16.mxu0 %v5355_v17 }
  0x7a   :  { %745 = vmatpush1.bf16.msra.mxu0 %v5353_v18 }
  0x7b   :  { %746 = vmatprep.subr.bf16.mxu0 %v5358_v20  ;;  %v5395_v20 = vld [vmem:[#allocation7 + $0x28] ss:$16 sps:$4 sm:$0xff]  }
  0x7d   :  { %4639 = vmatmul.mubr.msk.bf16.gmra.mrb[8].mxu0 %vm190_vm0, %v5342_v19 }
  0x7e   :  { %265 = vmatprep.mubr.bf16.mxu0 %v5849_v0  ;;  %747 = vmatpush1.bf16.msra.mxu0 %v5356_v21 }
  0x7f   :  { %748 = vmatprep.subr.bf16.mxu0 %v5361_v22 }
  0x82   :  { %749 = vmatpush1.bf16.msra.mxu0 %v5359_v23 }
  0x83   :  { %750 = vmatprep.subr.bf16.mxu0 %v5364_v24  ;;  %v5400_v24 = vld [vmem:[#allocation7 + $0x4c] ss:$16 sps:$4 sm:$0xff]  }
  0x85   :  { %4640 = vmatmul.mubr.msk.bf16.gmra.mrb[12].mxu0 %vm190_vm0, %v5343_v25 }
  0x86   :  { %751 = vmatpush1.bf16.msra.mxu0 %v5362_v26 }
  0x87   :  { %752 = vmatprep.subr.bf16.mxu0 %v5367_v27 }
  0x8a   :  { %753 = vmatpush1.bf16.msra.mxu0 %v5365_v28 }
  0x8b   :  { %754 = vmatprep.subr.bf16.mxu0 %v5370_v29 }
  0x8e   :  { %755 = vmatpush1.bf16.msra.mxu0 %v5368_v30 }
  0x8f   :  { %756 = vmatprep.subr.bf16.mxu0 %v5373_v31 }
  0x92   :  { %757 = vmatpush1.bf16.msra.mxu0 %v5371_v32  ;;  %v5398_v32 = vld [vmem:[#allocation7 + $0x48] ss:$16 sps:$4 sm:$0xff]  }
  0x93   :  { %758 = vmatprep.subr.bf16.mxu0 %v5376_v33 }
  0x96   :  { %759 = vmatpush1.bf16.msra.mxu0 %v5374_v34 }
  0x97   :  { %760 = vmatprep.subr.bf16.mxu0 %v5379_v35  ;;  %v5403_v35 = vld [vmem:[#allocation7 + $0x6c] ss:$16 sps:$4 sm:$0xff]  }
  0x9a   :  { %761 = vmatpush1.bf16.msra.mxu0 %v5377_v36 }
  0x9b   :  { %762 = vmatprep.subr.bf16.mxu0 %v5382_v37 }
  0x9e   :  { %763 = vmatpush1.bf16.msra.mxu0 %v5380_v38 }
  0x9f   :  { %764 = vmatprep.subr.bf16.mxu0 %v5385_v39 }
  0xa2   :  { %765 = vmatpush1.bf16.msra.mxu0 %v5383_v40 }
  0xa3   :  { %766 = vmatprep.subr.bf16.mxu0 %v5388_v41 }
  0xa6   :  { %767 = vmatpush1.bf16.msra.mxu0 %v5386_v42  ;;  %v5401_v42 = vld [vmem:[#allocation7 + $0x68] ss:$16 sps:$4 sm:$0xff]  }
  0xa7   :  { %768 = vmatprep.subr.bf16.mxu0 %v5391_v43 }
  0xaa   :  { %769 = vmatpush1.bf16.msra.mxu0 %v5389_v44 }
  0xab   :  { %811 = vmatprep.subr.bf16.mxu0 %v5394_v45 }
 0x140   :  { %v237_v53 = vpop.f32.mrb[0].mxu0 }
 0x141   :  { %v238_v54 = vadd.f32 %v237_v53, %v5983_v51  ;;  %v239_v55 = vpop.f32.mrb[1].mxu0 }
 0x142   :  { %v240_v56 = vadd.f32 %v239_v55, %v5986_v52  ;;  %v241_v57 = vpop.f32.mrb[2].mxu0 }
 0x143   :  { %v292_v58 = vmul.f32 0.2, %v238_v54  ;;  %v242_v59 = vadd.f32 %v241_v57, %v5983_v51  ;;  %v243_v60 = vpop.f32.mrb[3].mxu0  ;;  %vm276_vm1 = vcmp.gt.f32.partialorder %v238_v54, 0.0 }
 0x144   :  { %v293_v61 = vmul.f32 0.2, %v240_v56  ;;  %v244_v62 = vadd.f32 %v243_v60, %v5986_v52  ;;  %vm277_vm2 = vcmp.gt.f32.partialorder %v240_v56, 0.0 }
 0x145   :  { %vm278_vm3 = vcmp.gt.f32.partialorder %v242_v59, 0.0  ;;  %v294_v63 = vmul.f32 0.2, %v242_v59  ;;  %v308_v1 = vsel %vm276_vm1, %v238_v54, %v292_v58 }
 0x146   :  { %vm279_vm4 = vcmp.gt.f32.partialorder %v244_v62, 0.0  ;;  %v295_v0 = vmul.f32 0.2, %v244_v62  ;;  %v309_v5 = vsel %vm277_vm2, %v240_v56, %v293_v61 }
 0x147   :  { %v310_v2 = vsel %vm278_vm3, %v242_v59, %v294_v63  ;;  %v5404_v59 = vld [vmem:[#allocation7 + $0x88] ss:$16 sps:$4 sm:$0xff]  }
 0x148   :  { %v5992_v3 = vpack.c.bf16 %v310_v2, %v308_v1  ;;  %v247_v4 = vpop.f32.mrb[4].mxu0  ;;  %v311_v6 = vsel %vm279_vm4, %v244_v62, %v295_v0  ;;  %v5409_v62 = vld [vmem:[#allocation7 + $0xac] ss:$16 sps:$4 sm:$0xff]  }
 0x149   :  { %v248_v7 = vadd.f32 %v247_v4, %v5983_v51  ;;  %v249_v8 = vpop.f32.mrb[5].mxu0  ;;  %v5995_v9 = vpack.c.bf16 %v311_v6, %v309_v5  ;;  %v5407_v6 = vld [vmem:[#allocation7 + $0xa8] ss:$16 sps:$4 sm:$0xff]  }
 0x14a   :  { %v250_v11 = vadd.f32 %v249_v8, %v5986_v52  ;;  %v251_v12 = vpop.f32.mrb[6].mxu0 }
 0x14b   :  { %vm280_vm5 = vcmp.gt.f32.partialorder %v248_v7, 0.0  ;;  %v296_v14 = vmul.f32 0.2, %v248_v7  ;;  %v252_v15 = vadd.f32 %v251_v12, %v5983_v51  ;;  %v253_v16 = vpop.f32.mrb[7].mxu0  ;;  %770 = vmatprep.mubr.bf16.mxu0 %v5995_v9 }
 0x14c   :  { %vm281_vm6 = vcmp.gt.f32.partialorder %v250_v11, 0.0  ;;  %v297_v17 = vmul.f32 0.2, %v250_v11  ;;  %v254_v18 = vadd.f32 %v253_v16, %v5986_v52  ;;  %771 = vmatmul.mubr.bf16.vlgmr.msra.gmra.mrb[16].mxu0 %v5992_v3  ;;  %v5413_v16 = vld [vmem:[#allocation7 + $0xe8] ss:$16 sps:$4 sm:$0xff]  }
 0x14d   :  { %vm282_vm7 = vcmp.gt.f32.partialorder %v252_v15, 0.0  ;;  %v298_v19 = vmul.f32 0.2, %v252_v15  ;;  %812 = vmatpush1.bf16.msra.mxu0 %v5392_v10  ;;  %v312_v21 = vsel %vm280_vm5, %v248_v7, %v296_v14 }
 0x14e   :  { %vm283_vm8 = vcmp.gt.f32.partialorder %v254_v18, 0.0  ;;  %v299_v22 = vmul.f32 0.2, %v254_v18  ;;  %813 = vmatprep.subr.bf16.mxu0 %v5397_v13  ;;  %v313_v23 = vsel %vm281_vm6, %v250_v11, %v297_v17  ;;  %v5412_v11 = vld [vmem:[#allocation7 + $0xcc] ss:$16 sps:$4 sm:$0xff]  }
 0x14f   :  { %v314_v25 = vsel %vm282_vm7, %v252_v15, %v298_v19  ;;  %v5415_v15 = vld [vmem:[#allocation7 + $0xec] ss:$16 sps:$4 sm:$0xff]  }
 0x150   :  { %v257_v26 = vpop.f32.mrb[8].mxu0  ;;  %v315_v27 = vsel %vm283_vm8, %v254_v18, %v299_v22  ;;  %v6002_v28 = vpack.c.bf16 %v314_v25, %v312_v21  ;;  %v5418_v17 = vld [vmem:[#allocation7 + $0x10c] ss:$16 sps:$4 sm:$0xff]   ;;  %v5416_v18 = vld [vmem:[#allocation7 + $0x108] ss:$16 sps:$4 sm:$0xff]  }
 0x151   :  { %v258_v29 = vadd.f32 %v257_v26, %v5983_v51  ;;  %814 = vmatpush1.bf16.msra.mxu0 %v5395_v20  ;;  %v259_v30 = vpop.f32.mrb[9].mxu0  ;;  %v6005_v31 = vpack.c.bf16 %v315_v27, %v313_v23  ;;  %v5421_v19 = vld [vmem:[#allocation7 + $0x12c] ss:$16 sps:$4 sm:$0xff]   ;;  %v5419_v20 = vld [vmem:[#allocation7 + $0x128] ss:$16 sps:$4 sm:$0xff]  }
 0x152   :  { %v260_v33 = vadd.f32 %v259_v30, %v5986_v52  ;;  %v261_v34 = vpop.f32.mrb[10].mxu0  ;;  %815 = vmatprep.subr.bf16.mxu0 %v5400_v24  ;;  %v5424_v21 = vld [vmem:[#allocation7 + $0x14c] ss:$16 sps:$4 sm:$0xff]   ;;  %v5422_v22 = vld [vmem:[#allocation7 + $0x148] ss:$16 sps:$4 sm:$0xff]  }
 0x153   :  { %vm284_vm9 = vcmp.gt.f32.partialorder %v258_v29, 0.0  ;;  %v300_v36 = vmul.f32 0.2, %v258_v29  ;;  %v262_v37 = vadd.f32 %v261_v34, %v5983_v51  ;;  %v263_v38 = vpop.f32.mrb[11].mxu0  ;;  %780 = vmatprep.mubr.bf16.mxu0 %v6005_v31  ;;  %v5427_v23 = vld [vmem:[#allocation7 + $0x16c] ss:$16 sps:$4 sm:$0xff]  }
 0x154   :  { %vm285_vm10 = vcmp.gt.f32.partialorder %v260_v33, 0.0  ;;  %v301_v39 = vmul.f32 0.2, %v260_v33  ;;  %v264_v40 = vadd.f32 %v263_v38, %v5986_v52  ;;  %781 = vmatmul.mubr.bf16.gmra.mrb[20].mxu0 %v6002_v28  ;;  %v5425_v24 = vld [vmem:[#allocation7 + $0x168] ss:$16 sps:$4 sm:$0xff]   ;;  %v1000_v34 = vld [vmem:[#allocation8 + $0x20] sm:$0xff] }
 0x155   :  { %vm286_vm11 = vcmp.gt.f32.partialorder %v262_v37, 0.0  ;;  %v302_v41 = vmul.f32 0.2, %v262_v37  ;;  %816 = vmatpush1.bf16.msra.mxu0 %v5398_v32  ;;  %v316_v43 = vsel %vm284_vm9, %v258_v29, %v300_v36  ;;  %v5430_v25 = vld [vmem:[#allocation7 + $0x18c] ss:$16 sps:$4 sm:$0xff]   ;;  %v1008_v38 = vld [vmem:[#allocation8 + $0x60] sm:$0xff] }
 0x156   :  { %vm287_vm12 = vcmp.gt.f32.partialorder %v264_v40, 0.0  ;;  %v303_v44 = vmul.f32 0.2, %v264_v40  ;;  %817 = vmatprep.subr.bf16.mxu0 %v5403_v35  ;;  %v317_v45 = vsel %vm285_vm10, %v260_v33, %v301_v39  ;;  %v5433_v26 = vld [vmem:[#allocation7 + $0x1ac] ss:$16 sps:$4 sm:$0xff]   ;;  %v996_v33 = vld [vmem:[#allocation8] sm:$0xff] }
 0x157   :  { %v318_v49 = vsel %vm286_vm11, %v262_v37, %v302_v41  ;;  %v5431_v27 = vld [vmem:[#allocation7 + $0x1a8] ss:$16 sps:$4 sm:$0xff]   ;;  %v5436_v29 = vld [vmem:[#allocation7 + $0x1cc] ss:$16 sps:$4 sm:$0xff]   ;;  %v4706_v36 = vcombine.high %v996_v33, %v1000_v34  ;;  %v1004_v37 = vld [vmem:[#allocation8 + $0x40] sm:$0xff]  ;;  %v4705_v39 = vcombine.low %v996_v33, %v1000_v34 }
 0x158   :  { %v267_v53 = vpop.f32.mrb[12].mxu0  ;;  %v319_v54 = vsel %vm287_vm12, %v264_v40, %v303_v44  ;;  %v6012_v55 = vpack.c.bf16 %v318_v49, %v316_v43  ;;  %v5434_v30 = vld [vmem:[#allocation7 + $0x1c8] ss:$16 sps:$4 sm:$0xff]   ;;  %v5439_v32 = vld [vmem:[#allocation7 + $0x1ec] ss:$16 sps:$4 sm:$0xff]   ;;  %v4714_v40 = vcombine.high %v1004_v37, %v1008_v38  ;;  %v1012_v41 = vld [vmem:[#allocation8 + $0x80] sm:$0xff]  ;;  %v4713_v43 = vcombine.low %v1004_v37, %v1008_v38 }
 0x159   :  { %v268_v56 = vadd.f32 %v267_v53, %v5983_v51  ;;  %818 = vmatpush1.bf16.msra.mxu0 %v5401_v42  ;;  %v269_v57 = vpop.f32.mrb[13].mxu0  ;;  %v6015_v58 = vpack.c.bf16 %v319_v54, %v317_v45  ;;  %v5437_v35 = vld [vmem:[#allocation7 + $0x1e8] ss:$16 sps:$4 sm:$0xff]   ;;  %v1016_v42 = vld [vmem:[#allocation8 + $0xa0] sm:$0xff] }
 0x15a   :  { %v270_v60 = vadd.f32 %v269_v57, %v5986_v52  ;;  %v271_v61 = vpop.f32.mrb[14].mxu0  ;;  %819 = vmatprep.subr.bf16.mxu0 %v5406_v46  ;;  %v4722_v44 = vcombine.high %v1012_v41, %v1016_v42  ;;  %v1020_v45 = vld [vmem:[#allocation8 + $0xc0] sm:$0xff]  ;;  %v4721_v49 = vcombine.low %v1012_v41, %v1016_v42 }
 0x15b   :  { %vm288_vm13 = vcmp.gt.f32.partialorder %v268_v56, 0.0  ;;  %v304_v63 = vmul.f32 0.2, %v268_v56  ;;  %v272_v0 = vadd.f32 %v271_v61, %v5983_v51  ;;  %v273_v1 = vpop.f32.mrb[15].mxu0  ;;  %790 = vmatprep.mubr.bf16.mxu0 %v6015_v58  ;;  %v1024_v46 = vld [vmem:[#allocation8 + $0xe0] sm:$0xff] }
 0x15c   :  { %vm289_vm14 = vcmp.gt.f32.partialorder %v270_v60, 0.0  ;;  %v305_v2 = vmul.f32 0.2, %v270_v60  ;;  %v274_v4 = vadd.f32 %v273_v1, %v5986_v52  ;;  %791 = vmatmul.mubr.bf16.gmra.mrb[24].mxu0 %v6012_v55  ;;  %v5410_v52 = vld [vmem:[#allocation7 + $0xc8] ss:$16 sps:$4 sm:$0xff]   ;;  %v4730_v53 = vcombine.high %v1020_v45, %v1024_v46  ;;  %v1028_v54 = vld [vmem:[#allocation8 + $0x100] sm:$0xff] }
 0x15d   :  { %vm290_vm15 = vcmp.gt.f32.partialorder %v272_v0, 0.0  ;;  %v306_v5 = vmul.f32 0.2, %v272_v0  ;;  %820 = vmatpush1.bf16.msra.mxu0 %v5404_v59  ;;  %v320_v7 = vsel %vm288_vm13, %v268_v56, %v304_v63  ;;  %v1032_v56 = vld [vmem:[#allocation8 + $0x120] sm:$0xff] }
 0x15e   :  { %vm291_vm0 = vcmp.gt.f32.partialorder %v274_v4, 0.0  ;;  %v307_v8 = vmul.f32 0.2, %v274_v4  ;;  %821 = vmatprep.subr.bf16.mxu0 %v5409_v62  ;;  %v321_v10 = vsel %vm289_vm14, %v270_v60, %v305_v2  ;;  %v1036_v57 = vld [vmem:[#allocation8 + $0x140] sm:$0xff]  ;;  %v4737_v60 = vcombine.low %v1028_v54, %v1032_v56 }
 0x15f   :  { %v322_v51 = vsel %vm290_vm15, %v272_v0, %v306_v5  ;;  %v1040_v59 = vld [vmem:[#allocation8 + $0x160] sm:$0xff] }
 0x160   :  { %v323_v12 = vsel %vm291_vm0, %v274_v4, %v307_v8  ;;  %v6022_v13 = vpack.c.bf16 %v322_v51, %v320_v7  ;;  %v4746_v61 = vcombine.high %v1036_v57, %v1040_v59  ;;  %v1044_v62 = vld [vmem:[#allocation8 + $0x180] sm:$0xff] }
 0x161   :  { %822 = vmatpush1.bf16.msra.mxu0 %v5407_v6  ;;  %v6024_v14 = vpack.c.bf16 %v323_v12, %v321_v10  ;;  %v1048_v63 = vld [vmem:[#allocation8 + $0x1a0] sm:$0xff] }
 0x162   :  { %823 = vmatprep.subr.bf16.mxu0 %v5412_v11  ;;  %v1052_v0 = vld [vmem:[#allocation8 + $0x1c0] sm:$0xff]  ;;  %v4753_v2 = vcombine.low %v1044_v62, %v1048_v63 }
 0x163   :  { %800 = vmatprep.mubr.bf16.mxu0 %v6024_v14  ;;  %v1056_v1 = vld [vmem:[#allocation8 + $0x1e0] sm:$0xff] }
 0x164   :  { %801 = vmatmul.mubr.bf16.gmra.mrb[28].mxu0 %v6022_v13  ;;  %v4762_v4 = vcombine.high %v1052_v0, %v1056_v1  ;;  %v1060_v5 = vld [vmem:[#allocation8 + $0x200] sm:$0xff]  ;;  %v4761_v7 = vcombine.low %v1052_v0, %v1056_v1 }
 0x165   :  { %824 = vmatpush1.bf16.msra.mxu0 %v5410_v52  ;;  %843 = vmatprep.mubr.bf16.mxu0 %v5995_v9  ;;  %v5428_v9 = vld [vmem:[#allocation7 + $0x188] ss:$16 sps:$4 sm:$0xff]   ;;  %v1064_v6 = vld [vmem:[#allocation8 + $0x220] sm:$0xff] }
 0x166   :  { %825 = vmatprep.subr.bf16.mxu0 %v5415_v15  ;;  %v1068_v8 = vld [vmem:[#allocation8 + $0x240] sm:$0xff]  ;;  %v6038_v52 = vld [vmem:[#allocation8 + $0x28] sm:$0xff]  ;;  %v4769_v15 = vcombine.low %v1060_v5, %v1064_v6 }
 0x167   :  { %v1072_v10 = vld [vmem:[#allocation8 + $0x260] sm:$0xff] }
 0x168   :  { %v1124_v11 = vld [vmem:[#allocation8 + $0x400] sm:$0xff] }
 0x169   :  { %826 = vmatpush1.bf16.msra.mxu0 %v5413_v16  ;;  %v1128_v51 = vld [vmem:[#allocation8 + $0x420] sm:$0xff] }
 0x16a   :  { %827 = vmatprep.subr.bf16.mxu0 %v5418_v17  ;;  %v4834_v12 = vcombine.high %v1124_v11, %v1128_v51  ;;  %v4833_v16 = vcombine.low %v1124_v11, %v1128_v51  ;;  %v4778_v17 = vcombine.high %v1068_v8, %v1072_v10  ;;  %v1148_v37 = vld [vmem:[#allocation8 + $0x4c0] sm:$0xff] }
 0x16b   :  { %v1152_v38 = vld [vmem:[#allocation8 + $0x4e0] sm:$0xff] }
 0x16c   :  { %2647 = vmatprep.subr.bf16.mxu1 %v4834_v12  ;;  %v4857_v41 = vcombine.low %v1148_v37, %v1152_v38  ;;  %v1172_v0 = vld [vmem:[#allocation8 + $0x580] sm:$0xff] }
 0x16d   :  { %828 = vmatpush1.bf16.msra.mxu0 %v5416_v18  ;;  %v1076_v18 = vld [vmem:[#allocation8 + $0x280] sm:$0xff]  ;;  %2648 = vmatpush1.bf16.msra.mxu1 %v4833_v16 }
 0x16e   :  { %829 = vmatprep.subr.bf16.mxu0 %v5421_v19  ;;  %v1080_v19 = vld [vmem:[#allocation8 + $0x2a0] sm:$0xff] }
 0x16f   :  { %v1176_v1 = vld [vmem:[#allocation8 + $0x5a0] sm:$0xff] }
 0x170   :  { %v1188_v12 = vld [vmem:[#allocation8 + $0x600] sm:$0xff] }
 0x171   :  { %830 = vmatpush1.bf16.msra.mxu0 %v5419_v20  ;;  %v1132_v20 = vld [vmem:[#allocation8 + $0x440] sm:$0xff] }
 0x172   :  { %831 = vmatprep.subr.bf16.mxu0 %v5424_v21  ;;  %v1136_v21 = vld [vmem:[#allocation8 + $0x460] sm:$0xff] }
 0x175   :  { %832 = vmatpush1.bf16.msra.mxu0 %v5422_v22  ;;  %v4842_v22 = vcombine.high %v1132_v20, %v1136_v21 }
 0x176   :  { %833 = vmatprep.subr.bf16.mxu0 %v5427_v23  ;;  %v4777_v23 = vcombine.low %v1068_v8, %v1072_v10 }
 0x177   :  { %2649 = vmatprep.subr.bf16.mxu1 %v4842_v22  ;;  %v1204_v22 = vld [vmem:[#allocation8 + $0x680] sm:$0xff] }
 0x179   :  { %834 = vmatpush1.bf16.msra.mxu0 %v5425_v24  ;;  %v4841_v24 = vcombine.low %v1132_v20, %v1136_v21 }
 0x17a   :  { %835 = vmatprep.subr.bf16.mxu0 %v5430_v25  ;;  %v4786_v25 = vcombine.high %v1076_v18, %v1080_v19 }
 0x17b   :  { %2650 = vmatpush1.bf16.msra.mxu1 %v4841_v24 }
 0x17d   :  { %836 = vmatpush1.bf16.msra.mxu0 %v5428_v9  ;;  %v1084_v9 = vld [vmem:[#allocation8 + $0x2c0] sm:$0xff] }
 0x17e   :  { %837 = vmatprep.subr.bf16.mxu0 %v5433_v26  ;;  %v1088_v26 = vld [vmem:[#allocation8 + $0x2e0] sm:$0xff] }
 0x17f   :  { %v4794_v34 = vcombine.high %v1084_v9, %v1088_v26 }
 0x181   :  { %838 = vmatpush1.bf16.msra.mxu0 %v5431_v27  ;;  %v1140_v27 = vld [vmem:[#allocation8 + $0x480] sm:$0xff] }
 0x182   :  { %839 = vmatprep.subr.bf16.mxu0 %v5436_v29  ;;  %v1144_v29 = vld [vmem:[#allocation8 + $0x4a0] sm:$0xff] }
 0x183   :  { %v4849_v33 = vcombine.low %v1140_v27, %v1144_v29 }
 0x185   :  { %840 = vmatpush1.bf16.msra.mxu0 %v5434_v30  ;;  %v4850_v30 = vcombine.high %v1140_v27, %v1144_v29 }
 0x186   :  { %841 = vmatprep.subr.bf16.mxu0 %v5439_v32  ;;  %v4785_v32 = vcombine.low %v1076_v18, %v1080_v19  ;;  %v1196_v18 = vld [vmem:[#allocation8 + $0x640] sm:$0xff] }
 0x187   :  { %2651 = vmatprep.subr.bf16.mxu1 %v4850_v30  ;;  %v1200_v19 = vld [vmem:[#allocation8 + $0x660] sm:$0xff] }
 0x188   :  { %2652 = vmatpush1.bf16.msra.mxu1 %v4849_v33  ;;  %v4906_v20 = vcombine.high %v1196_v18, %v1200_v19  ;;  %v4905_v21 = vcombine.low %v1196_v18, %v1200_v19  ;;  %v1220_v30 = vld [vmem:[#allocation8 + $0x700] sm:$0xff] }
 0x189   :  { %842 = vmatpush1.bf16.msra.mxu0 %v5437_v35  ;;  %v1092_v35 = vld [vmem:[#allocation8 + $0x300] sm:$0xff] }
 0x18a   :  { %2574 = vmatprep.subr.bf16.mxu0 %v4706_v36  ;;  %v1096_v36 = vld [vmem:[#allocation8 + $0x320] sm:$0xff] }
 0x18b   :  { %v4802_v42 = vcombine.high %v1092_v35, %v1096_v36 }
 0x18c   :  { %844 = vmatmul.mubr.bf16.vlgmr.msra.gmra.mrb[32].mxu0 %v5992_v3  ;;  %v4729_v3 = vcombine.low %v1020_v45, %v1024_v46  ;;  %v1156_v45 = vld [vmem:[#allocation8 + $0x500] sm:$0xff] }
 0x18d   :  { %853 = vmatprep.mubr.bf16.mxu0 %v6005_v31  ;;  %2575 = vmatpush1.bf16.msra.mxu0 %v4705_v39  ;;  %v4738_v31 = vcombine.high %v1028_v54, %v1032_v56  ;;  %v4858_v39 = vcombine.high %v1148_v37, %v1152_v38  ;;  %v1160_v46 = vld [vmem:[#allocation8 + $0x520] sm:$0xff] }
 0x18e   :  { %2576 = vmatprep.subr.bf16.mxu0 %v4714_v40  ;;  %v4793_v40 = vcombine.low %v1084_v9, %v1088_v26  ;;  %v4865_v54 = vcombine.low %v1156_v45, %v1160_v46  ;;  %v1212_v9 = vld [vmem:[#allocation8 + $0x6c0] sm:$0xff] }
 0x18f   :  { %2653 = vmatprep.subr.bf16.mxu1 %v4858_v39  ;;  %v1216_v26 = vld [vmem:[#allocation8 + $0x6e0] sm:$0xff] }
 0x190   :  { %2654 = vmatpush1.bf16.msra.mxu1 %v4857_v41  ;;  %v4922_v27 = vcombine.high %v1212_v9, %v1216_v26  ;;  %v4921_v29 = vcombine.low %v1212_v9, %v1216_v26  ;;  %v1236_v39 = vld [vmem:[#allocation8 + $0x780] sm:$0xff] }
 0x191   :  { %2577 = vmatpush1.bf16.msra.mxu0 %v4713_v43  ;;  %v1100_v43 = vld [vmem:[#allocation8 + $0x340] sm:$0xff] }
 0x192   :  { %2578 = vmatprep.subr.bf16.mxu0 %v4722_v44  ;;  %v1104_v44 = vld [vmem:[#allocation8 + $0x360] sm:$0xff] }
 0x193   :  { %v4810_v56 = vcombine.high %v1100_v43, %v1104_v44 }
 0x194   :  { %854 = vmatmul.mubr.bf16.gmra.mrb[36].mxu0 %v6002_v28  ;;  %v4745_v28 = vcombine.low %v1036_v57, %v1040_v59  ;;  %v1164_v57 = vld [vmem:[#allocation8 + $0x540] sm:$0xff] }
 0x195   :  { %863 = vmatprep.mubr.bf16.mxu0 %v6015_v58  ;;  %2579 = vmatpush1.bf16.msra.mxu0 %v4721_v49  ;;  %v4754_v58 = vcombine.high %v1044_v62, %v1048_v63  ;;  %v4866_v49 = vcombine.high %v1156_v45, %v1160_v46  ;;  %v1168_v59 = vld [vmem:[#allocation8 + $0x560] sm:$0xff] }
 0x196   :  { %2580 = vmatprep.subr.bf16.mxu0 %v4730_v53  ;;  %v4801_v53 = vcombine.low %v1092_v35, %v1096_v36  ;;  %v4873_v62 = vcombine.low %v1164_v57, %v1168_v59  ;;  %v1228_v35 = vld [vmem:[#allocation8 + $0x740] sm:$0xff] }
 0x197   :  { %2655 = vmatprep.subr.bf16.mxu1 %v4866_v49  ;;  %v1232_v36 = vld [vmem:[#allocation8 + $0x760] sm:$0xff]  ;;  %v6044_v49 = vld [vmem:[#allocation8 + $0x10] sm:$0xff] }
 0x198   :  { %2656 = vmatpush1.bf16.msra.mxu1 %v4865_v54  ;;  %v4938_v37 = vcombine.high %v1228_v35, %v1232_v36  ;;  %v4937_v38 = vcombine.low %v1228_v35, %v1232_v36  ;;  %v1021_v36 = vld [vmem:[#allocation8 + $0xc8] sm:$0xff] }
 0x199   :  { %2581 = vmatpush1.bf16.msra.mxu0 %v4729_v3  ;;  %v1108_v3 = vld [vmem:[#allocation8 + $0x380] sm:$0xff] }
 0x19a   :  { %2582 = vmatprep.subr.bf16.mxu0 %v4738_v31  ;;  %v1112_v31 = vld [vmem:[#allocation8 + $0x3a0] sm:$0xff] }
 0x19b   :  { %v4818_v63 = vcombine.high %v1108_v3, %v1112_v31 }
 0x19c   :  { %864 = vmatmul.mubr.bf16.gmra.mrb[40].mxu0 %v6012_v55  ;;  %v4770_v55 = vcombine.high %v1060_v5, %v1064_v6  ;;  %v4881_v5 = vcombine.low %v1172_v0, %v1176_v1 }
 0x19d   :  { %873 = vmatprep.mubr.bf16.mxu0 %v6024_v14  ;;  %2583 = vmatpush1.bf16.msra.mxu0 %v4737_v60  ;;  %v6036_v14 = vld [vmem:[#allocation8 + $0x8] sm:$0xff]  ;;  %v4874_v60 = vcombine.high %v1164_v57, %v1168_v59 }
 0x19e   :  { %2584 = vmatprep.subr.bf16.mxu0 %v4746_v61  ;;  %v4809_v61 = vcombine.low %v1100_v43, %v1104_v44  ;;  %v4708_v51 = vcombine.high %v6036_v14, %v6038_v52  ;;  %v1244_v43 = vld [vmem:[#allocation8 + $0x7c0] sm:$0xff] }
 0x19f   :  { %2657 = vmatprep.subr.bf16.mxu1 %v4874_v60  ;;  %v1248_v44 = vld [vmem:[#allocation8 + $0x7e0] sm:$0xff] }
 0x1a0   :  { %2658 = vmatpush1.bf16.msra.mxu1 %v4873_v62  ;;  %v4954_v45 = vcombine.high %v1244_v43, %v1248_v44  ;;  %v4953_v46 = vcombine.low %v1244_v43, %v1248_v44 }
 0x1a1   :  { %2585 = vmatpush1.bf16.msra.mxu0 %v4745_v28  ;;  %v1116_v28 = vld [vmem:[#allocation8 + $0x3c0] sm:$0xff] }
 0x1a2   :  { %2586 = vmatprep.subr.bf16.mxu0 %v4754_v58  ;;  %v1120_v58 = vld [vmem:[#allocation8 + $0x3e0] sm:$0xff] }
 0x1a3   :  { %v4826_v6 = vcombine.high %v1116_v28, %v1120_v58  ;;  %v4825_v11 = vcombine.low %v1116_v28, %v1120_v58 }
 0x1a4   :  { %874 = vmatmul.mubr.bf16.gmra.mrb[44].mxu0 %v6022_v13  ;;  %v4707_v13 = vcombine.low %v6036_v14, %v6038_v52 }
 0x1a5   :  { %2587 = vmatpush1.bf16.msra.mxu0 %v4753_v2  ;;  %v4882_v2 = vcombine.high %v1172_v0, %v1176_v1 }
 0x1a6   :  { %2588 = vmatprep.subr.bf16.mxu0 %v4762_v4  ;;  %v4817_v4 = vcombine.low %v1108_v3, %v1112_v31  ;;  %v6055_v3 = vld [vmem:[%s6412_s4] sm:$0xf] }
 0x1a7   :  { %2659 = vmatprep.subr.bf16.mxu1 %v4882_v2  ;;  %v6059_v31 = vrot.slane %v6055_v3, %v5974_v48  ;;  %v6063_v57 = vrot.slane %v6055_v3, %v5980_v50 }
 0x1a8   :  { %2660 = vmatpush1.bf16.msra.mxu1 %v4881_v5 }
 0x1a9   :  { %2589 = vmatpush1.bf16.msra.mxu0 %v4761_v7  ;;  %v1180_v7 = vld [vmem:[#allocation8 + $0x5c0] sm:$0xff] }
 0x1aa   :  { %2590 = vmatprep.subr.bf16.mxu0 %v4770_v55  ;;  %v1184_v55 = vld [vmem:[#allocation8 + $0x5e0] sm:$0xff] }
 0x1ab   :  { %v4890_v8 = vcombine.high %v1180_v7, %v1184_v55  ;;  %v4889_v10 = vcombine.low %v1180_v7, %v1184_v55  ;;  %v1005_v55 = vld [vmem:[#allocation8 + $0x48] sm:$0xff] }
 0x1ad   :  { %2591 = vmatpush1.bf16.msra.mxu0 %v4769_v15  ;;  %2661 = vmatprep.subr.bf16.mxu1 %v4890_v8  ;;  %v1192_v15 = vld [vmem:[#allocation8 + $0x620] sm:$0xff]  ;;  %v1009_v8 = vld [vmem:[#allocation8 + $0x68] sm:$0xff] }
 0x1ae   :  { %2592 = vmatprep.subr.bf16.mxu0 %v4778_v17  ;;  %2662 = vmatpush1.bf16.msra.mxu1 %v4889_v10  ;;  %v4898_v16 = vcombine.high %v1188_v12, %v1192_v15  ;;  %v4897_v17 = vcombine.low %v1188_v12, %v1192_v15 }
 0x1b0   :  { %2663 = vmatprep.subr.bf16.mxu1 %v4898_v16 }
 0x1b1   :  { %2593 = vmatpush1.bf16.msra.mxu0 %v4777_v23  ;;  %v1208_v23 = vld [vmem:[#allocation8 + $0x6a0] sm:$0xff] }
 0x1b2   :  { %2594 = vmatprep.subr.bf16.mxu0 %v4786_v25  ;;  %2664 = vmatpush1.bf16.msra.mxu1 %v4897_v17  ;;  %v4914_v24 = vcombine.high %v1204_v22, %v1208_v23  ;;  %v4913_v25 = vcombine.low %v1204_v22, %v1208_v23 }
 0x1b3   :  { %2665 = vmatprep.subr.bf16.mxu1 %v4906_v20  ;;  %v4716_v20 = vcombine.high %v1005_v55, %v1009_v8 }
 0x1b5   :  { %2595 = vmatpush1.bf16.msra.mxu0 %v4785_v32  ;;  %v1224_v32 = vld [vmem:[#allocation8 + $0x720] sm:$0xff] }
 0x1b6   :  { %2596 = vmatprep.subr.bf16.mxu0 %v4794_v34  ;;  %2666 = vmatpush1.bf16.msra.mxu1 %v4905_v21  ;;  %v4930_v33 = vcombine.high %v1220_v30, %v1224_v32  ;;  %v4929_v34 = vcombine.low %v1220_v30, %v1224_v32  ;;  %v4715_v30 = vcombine.low %v1005_v55, %v1009_v8 }
 0x1b7   :  { %2667 = vmatprep.subr.bf16.mxu1 %v4914_v24  ;;  %v1013_v24 = vld [vmem:[#allocation8 + $0x88] sm:$0xff] }
 0x1b9   :  { %2597 = vmatpush1.bf16.msra.mxu0 %v4793_v40  ;;  %v1240_v40 = vld [vmem:[#allocation8 + $0x7a0] sm:$0xff] }
 0x1ba   :  { %2598 = vmatprep.subr.bf16.mxu0 %v4802_v42  ;;  %2668 = vmatpush1.bf16.msra.mxu1 %v4913_v25  ;;  %v4946_v41 = vcombine.high %v1236_v39, %v1240_v40  ;;  %v4945_v42 = vcombine.low %v1236_v39, %v1240_v40  ;;  %v1017_v25 = vld [vmem:[#allocation8 + $0xa8] sm:$0xff] }
 0x1bb   :  { %2669 = vmatprep.subr.bf16.mxu1 %v4922_v27  ;;  %v4723_v52 = vcombine.low %v1013_v24, %v1017_v25 }
 0x1bd   :  { %2599 = vmatpush1.bf16.msra.mxu0 %v4801_v53  ;;  %v6046_v53 = vld [vmem:[#allocation8 + $0x30] sm:$0xff] }
 0x1be   :  { %2600 = vmatprep.subr.bf16.mxu0 %v4810_v56  ;;  %2670 = vmatpush1.bf16.msra.mxu1 %v4921_v29  ;;  %v4710_v54 = vcombine.high %v6044_v49, %v6046_v53  ;;  %v4709_v56 = vcombine.low %v6044_v49, %v6046_v53 }
 0x1bf   :  { %2671 = vmatprep.subr.bf16.mxu1 %v4930_v33 }
 0x1c1   :  { %2601 = vmatpush1.bf16.msra.mxu0 %v4809_v61 }
 0x1c2   :  { %2602 = vmatprep.subr.bf16.mxu0 %v4818_v63  ;;  %2672 = vmatpush1.bf16.msra.mxu1 %v4929_v34  ;;  %v4724_v34 = vcombine.high %v1013_v24, %v1017_v25  ;;  %v1049_v24 = vld [vmem:[#allocation8 + $0x1a8] sm:$0xff] }
 0x1c3   :  { %2673 = vmatprep.subr.bf16.mxu1 %v4938_v37  ;;  %v1025_v37 = vld [vmem:[#allocation8 + $0xe8] sm:$0xff] }
 0x1c4   :  { %v4732_v44 = vcombine.high %v1021_v36, %v1025_v37 }
 0x1c5   :  { %2603 = vmatpush1.bf16.msra.mxu0 %v4817_v4 }
 0x1c6   :  { %2604 = vmatprep.subr.bf16.mxu0 %v4826_v6  ;;  %2674 = vmatpush1.bf16.msra.mxu1 %v4937_v38 }
 0x1c7   :  { %2675 = vmatprep.subr.bf16.mxu1 %v4946_v41 }
 0x1c9   :  { %2605 = vmatpush1.bf16.msra.mxu0 %v4825_v11 }
 0x1ca   :  { %2720 = vmatprep.subr.bf16.mxu0 %v4708_v51  ;;  %2676 = vmatpush1.bf16.msra.mxu1 %v4945_v42 }
 0x1cb   :  { %2677 = vmatprep.subr.bf16.mxu1 %v4954_v45 }
 0x1ce   :  { %2678 = vmatpush1.bf16.msra.mxu1 %v4953_v46 }
 0x1cf   :  { %2866 = vmatprep.subr.bf16.mxu1 %v4710_v54 }
 0x21f   :  { %v772_v59 = vpop.f32.mrb[16].mxu0 }
 0x220   :  { %v773_v60 = vadd.f32 %v772_v59, %v6059_v31  ;;  %v774_v61 = vpop.f32.mrb[17].mxu0  ;;  %v1029_v59 = vld [vmem:[#allocation8 + $0x108] sm:$0xff] }
 0x221   :  { %v775_v62 = vadd.f32 %v774_v61, %v6063_v57  ;;  %v776_v63 = vpop.f32.mrb[18].mxu0 }
 0x222   :  { %v916_v28 = vmul.f32 0.2, %v773_v60  ;;  %v777_v58 = vadd.f32 %v776_v63, %v6059_v31  ;;  %v778_v0 = vpop.f32.mrb[19].mxu0  ;;  %vm884_vm1 = vcmp.gt.f32.partialorder %v773_v60, 0.0 }
 0x223   :  { %v917_v1 = vmul.f32 0.2, %v775_v62  ;;  %v779_v2 = vadd.f32 %v778_v0, %v6063_v57  ;;  %vm885_vm2 = vcmp.gt.f32.partialorder %v775_v62, 0.0 }
 0x224   :  { %vm888_vm3 = vcmp.gt.f32.partialorder %v777_v58, 0.0  ;;  %v920_v4 = vmul.f32 0.2, %v777_v58  ;;  %v948_v6 = vsel %vm884_vm1, %v773_v60, %v916_v28  ;;  %v1033_v60 = vld [vmem:[#allocation8 + $0x128] sm:$0xff] }
 0x225   :  { %vm889_vm4 = vcmp.gt.f32.partialorder %v779_v2, 0.0  ;;  %v921_v5 = vmul.f32 0.2, %v779_v2  ;;  %v949_v10 = vsel %vm885_vm2, %v775_v62, %v917_v1 }
 0x226   :  { %v952_v7 = vsel %vm888_vm3, %v777_v58, %v920_v4  ;;  %v4731_v58 = vcombine.low %v1021_v36, %v1025_v37 }
 0x227   :  { %v6069_v11 = vpack.c.bf16 %v952_v7, %v948_v6  ;;  %v953_v51 = vsel %vm889_vm4, %v779_v2, %v921_v5  ;;  %v782_v12 = vpop.f32.mrb[20].mxu0  ;;  %v4740_v2 = vcombine.high %v1029_v59, %v1033_v60  ;;  %v1037_v5 = vld [vmem:[#allocation8 + $0x148] sm:$0xff] }
 0x228   :  { %v6071_v15 = vpack.c.bf16 %v953_v51, %v949_v10  ;;  %v783_v16 = vadd.f32 %v782_v12, %v6059_v31  ;;  %v784_v17 = vpop.f32.mrb[21].mxu0  ;;  %v1041_v6 = vld [vmem:[#allocation8 + $0x168] sm:$0xff] }
 0x229   :  { %v785_v18 = vadd.f32 %v784_v17, %v6063_v57  ;;  %v786_v19 = vpop.f32.mrb[22].mxu0 }
 0x22a   :  { %vm892_vm5 = vcmp.gt.f32.partialorder %v783_v16, 0.0  ;;  %v924_v21 = vmul.f32 0.2, %v783_v16  ;;  %v787_v22 = vadd.f32 %v786_v19, %v6059_v31  ;;  %v788_v23 = vpop.f32.mrb[23].mxu0  ;;  %2606 = vmatprep.mubr.bf16.mxu0 %v6071_v15  ;;  %v4748_v19 = vcombine.high %v1037_v5, %v1041_v6 }
 0x22b   :  { %vm893_vm6 = vcmp.gt.f32.partialorder %v785_v18, 0.0  ;;  %v925_v9 = vmul.f32 0.2, %v785_v18  ;;  %v789_v26 = vadd.f32 %v788_v23, %v6063_v57  ;;  %2607 = vmatmul.mubr.bf16.vlgmr.msra.gmra.mrb[48].mxu0 %v6069_v11  ;;  %v1045_v23 = vld [vmem:[#allocation8 + $0x188] sm:$0xff] }
 0x22c   :  { %v956_v27 = vsel %vm892_vm5, %v783_v16, %v924_v21  ;;  %vm896_vm7 = vcmp.gt.f32.partialorder %v787_v22, 0.0  ;;  %v928_v29 = vmul.f32 0.2, %v787_v22  ;;  %2721 = vmatpush1.bf16.msra.mxu0 %v4707_v13  ;;  %v4739_v16 = vcombine.low %v1029_v59, %v1033_v60  ;;  %v1081_v59 = vld [vmem:[#allocation8 + $0x2a8] sm:$0xff] }
 0x22d   :  { %v957_v32 = vsel %vm893_vm6, %v785_v18, %v925_v9  ;;  %vm897_vm8 = vcmp.gt.f32.partialorder %v789_v26, 0.0  ;;  %v929_v33 = vmul.f32 0.2, %v789_v26  ;;  %2722 = vmatprep.subr.bf16.mxu0 %v4716_v20 }
 0x22e   :  { %v960_v35 = vsel %vm896_vm7, %v787_v22, %v928_v29  ;;  %v4747_v29 = vcombine.low %v1037_v5, %v1041_v6  ;;  %v1101_v5 = vld [vmem:[#allocation8 + $0x348] sm:$0xff] }
 0x22f   :  { %v6082_v38 = vpack.c.bf16 %v960_v35, %v956_v27  ;;  %v961_v39 = vsel %vm897_vm8, %v789_v26, %v929_v33  ;;  %v792_v40 = vpop.f32.mrb[24].mxu0  ;;  %v1057_v35 = vld [vmem:[#allocation8 + $0x1e8] sm:$0xff] }
 0x230   :  { %v6084_v41 = vpack.c.bf16 %v961_v39, %v957_v32  ;;  %v793_v42 = vadd.f32 %v792_v40, %v6059_v31  ;;  %2723 = vmatpush1.bf16.msra.mxu0 %v4715_v30  ;;  %v794_v14 = vpop.f32.mrb[25].mxu0  ;;  %v1105_v6 = vld [vmem:[#allocation8 + $0x368] sm:$0xff] }
 0x231   :  { %v795_v13 = vadd.f32 %v794_v14, %v6063_v57  ;;  %v796_v43 = vpop.f32.mrb[26].mxu0  ;;  %2724 = vmatprep.subr.bf16.mxu0 %v4724_v34  ;;  %v1053_v34 = vld [vmem:[#allocation8 + $0x1c8] sm:$0xff] }
 0x232   :  { %vm900_vm9 = vcmp.gt.f32.partialorder %v793_v42, 0.0  ;;  %v932_v45 = vmul.f32 0.2, %v793_v42  ;;  %v797_v46 = vadd.f32 %v796_v43, %v6059_v31  ;;  %v798_v54 = vpop.f32.mrb[27].mxu0  ;;  %2616 = vmatprep.mubr.bf16.mxu0 %v6084_v41  ;;  %v4764_v40 = vcombine.high %v1053_v34, %v1057_v35  ;;  %v1065_v14 = vld [vmem:[#allocation8 + $0x228] sm:$0xff] }
 0x233   :  { %vm901_vm10 = vcmp.gt.f32.partialorder %v795_v13, 0.0  ;;  %v933_v61 = vmul.f32 0.2, %v795_v13  ;;  %v799_v62 = vadd.f32 %v798_v54, %v6063_v57  ;;  %2617 = vmatmul.mubr.bf16.gmra.mrb[52].mxu0 %v6082_v38  ;;  %v1069_v43 = vld [vmem:[#allocation8 + $0x248] sm:$0xff] }
 0x234   :  { %v964_v63 = vsel %vm900_vm9, %v793_v42, %v932_v45  ;;  %vm904_vm11 = vcmp.gt.f32.partialorder %v797_v46, 0.0  ;;  %v936_v28 = vmul.f32 0.2, %v797_v46  ;;  %2725 = vmatpush1.bf16.msra.mxu0 %v4723_v52  ;;  %v1061_v42 = vld [vmem:[#allocation8 + $0x208] sm:$0xff]  ;;  %v4763_v52 = vcombine.low %v1053_v34, %v1057_v35 }
 0x235   :  { %v965_v0 = vsel %vm901_vm10, %v795_v13, %v933_v61  ;;  %vm905_vm12 = vcmp.gt.f32.partialorder %v799_v62, 0.0  ;;  %v937_v1 = vmul.f32 0.2, %v799_v62  ;;  %2726 = vmatprep.subr.bf16.mxu0 %v4732_v44  ;;  %v4772_v13 = vcombine.high %v1061_v42, %v1065_v14  ;;  %v1073_v44 = vld [vmem:[#allocation8 + $0x268] sm:$0xff] }
 0x236   :  { %v968_v4 = vsel %vm904_vm11, %v797_v46, %v936_v28  ;;  %v4771_v45 = vcombine.low %v1061_v42, %v1065_v14  ;;  %v4780_v46 = vcombine.high %v1069_v43, %v1073_v44  ;;  %v1077_v54 = vld [vmem:[#allocation8 + $0x288] sm:$0xff]  ;;  %v4779_v60 = vcombine.low %v1069_v43, %v1073_v44  ;;  %v1006_v43 = vld [vmem:[#allocation8 + $0x50] sm:$0xff] }
 0x237   :  { %v6092_v7 = vpack.c.bf16 %v968_v4, %v964_v63  ;;  %v969_v55 = vsel %vm905_vm12, %v799_v62, %v937_v1  ;;  %v802_v8 = vpop.f32.mrb[28].mxu0  ;;  %v4788_v61 = vcombine.high %v1077_v54, %v1081_v59  ;;  %v1085_v62 = vld [vmem:[#allocation8 + $0x2c8] sm:$0xff]  ;;  %v4787_v28 = vcombine.low %v1077_v54, %v1081_v59  ;;  %v1010_v44 = vld [vmem:[#allocation8 + $0x70] sm:$0xff] }
 0x238   :  { %v6094_v10 = vpack.c.bf16 %v969_v55, %v965_v0  ;;  %v803_v51 = vadd.f32 %v802_v8, %v6059_v31  ;;  %2727 = vmatpush1.bf16.msra.mxu0 %v4731_v58  ;;  %v804_v12 = vpop.f32.mrb[29].mxu0  ;;  %v1089_v63 = vld [vmem:[#allocation8 + $0x2e8] sm:$0xff]  ;;  %v408_v8 = vsub.s32 2, %v5971_v47 }
 0x239   :  { %v805_v17 = vadd.f32 %v804_v12, %v6063_v57  ;;  %v806_v18 = vpop.f32.mrb[30].mxu0  ;;  %2728 = vmatprep.subr.bf16.mxu0 %v4740_v2  ;;  %v4796_v58 = vcombine.high %v1085_v62, %v1089_v63  ;;  %v1093_v0 = vld [vmem:[#allocation8 + $0x308] sm:$0xff]  ;;  %v4795_v2 = vcombine.low %v1085_v62, %v1089_v63  ;;  %v412_v12 = vsub.s32 3, %v5971_v47 }
 0x23a   :  { %vm908_vm13 = vcmp.gt.f32.partialorder %v803_v51, 0.0  ;;  %v940_v20 = vmul.f32 0.2, %v803_v51  ;;  %v807_v21 = vadd.f32 %v806_v18, %v6059_v31  ;;  %v808_v22 = vpop.f32.mrb[31].mxu0  ;;  %2626 = vmatprep.mubr.bf16.mxu0 %v6094_v10  ;;  %v4756_v31 = vcombine.high %v1045_v23, %v1049_v24  ;;  %v1097_v1 = vld [vmem:[#allocation8 + $0x328] sm:$0xff] }
 0x23b   :  { %vm909_vm14 = vcmp.gt.f32.partialorder %v805_v17, 0.0  ;;  %v941_v25 = vmul.f32 0.2, %v805_v17  ;;  %v809_v9 = vadd.f32 %v808_v22, %v6063_v57  ;;  %2627 = vmatmul.mubr.bf16.gmra.mrb[56].mxu0 %v6092_v7  ;;  %v4755_v57 = vcombine.low %v1045_v23, %v1049_v24  ;;  %v1117_v22 = vld [vmem:[#allocation8 + $0x3c8] sm:$0xff] }
 0x23c   :  { %v972_v26 = vsel %vm908_vm13, %v803_v51, %v940_v20  ;;  %vm912_vm15 = vcmp.gt.f32.partialorder %v807_v21, 0.0  ;;  %v944_v27 = vmul.f32 0.2, %v807_v21  ;;  %2729 = vmatpush1.bf16.msra.mxu0 %v4739_v16  ;;  %v4804_v4 = vcombine.high %v1093_v0, %v1097_v1  ;;  %v1109_v16 = vld [vmem:[#allocation8 + $0x388] sm:$0xff] }
 0x23d   :  { %v973_v30 = vsel %vm909_vm14, %v805_v17, %v941_v25  ;;  %vm913_vm0 = vcmp.gt.f32.partialorder %v809_v9, 0.0  ;;  %v945_v32 = vmul.f32 0.2, %v809_v9  ;;  %2730 = vmatprep.subr.bf16.mxu0 %v4748_v19  ;;  %v4803_v55 = vcombine.low %v1093_v0, %v1097_v1  ;;  %v1113_v17 = vld [vmem:[#allocation8 + $0x3a8] sm:$0xff] }
 0x23e   :  { %v976_v33 = vsel %vm912_vm15, %v807_v21, %v944_v27  ;;  %v4812_v51 = vcombine.high %v1101_v5, %v1105_v6  ;;  %v6114_v18 = vrot.slane %v6055_v3, %v408_v8  ;;  %v4811_v19 = vcombine.low %v1101_v5, %v1105_v6  ;;  %v1121_v23 = vld [vmem:[#allocation8 + $0x3e8] sm:$0xff] }
 0x23f   :  { %v6102_v36 = vpack.c.bf16 %v976_v33, %v972_v26  ;;  %v977_v37 = vsel %vm913_vm0, %v809_v9, %v945_v32  ;;  %v6119_v20 = vrot.slane %v6055_v3, %v412_v12  ;;  %v4820_v21 = vcombine.high %v1109_v16, %v1113_v17  ;;  %v1125_v3 = vld [vmem:[#allocation8 + $0x408] sm:$0xff] }
 0x240   :  { %v6104_v39 = vpack.c.bf16 %v977_v37, %v973_v30  ;;  %2731 = vmatpush1.bf16.msra.mxu0 %v4747_v29  ;;  %v4819_v26 = vcombine.low %v1109_v16, %v1113_v17  ;;  %v4828_v30 = vcombine.high %v1117_v22, %v1121_v23  ;;  %v1129_v34 = vld [vmem:[#allocation8 + $0x428] sm:$0xff]  ;;  %v1018_v16 = vld [vmem:[#allocation8 + $0xb0] sm:$0xff] }
 0x241   :  { %2732 = vmatprep.subr.bf16.mxu0 %v4756_v31  ;;  %v4836_v14 = vcombine.high %v1125_v3, %v1129_v34  ;;  %v4835_v1 = vcombine.low %v1125_v3, %v1129_v34  ;;  %v1149_v3 = vld [vmem:[#allocation8 + $0x4c8] sm:$0xff] }
 0x242   :  { %2636 = vmatprep.mubr.bf16.mxu0 %v6104_v39  ;;  %v1153_v34 = vld [vmem:[#allocation8 + $0x4e8] sm:$0xff] }
 0x243   :  { %2637 = vmatmul.mubr.bf16.gmra.mrb[60].mxu0 %v6102_v36 }
 0x244   :  { %2733 = vmatpush1.bf16.msra.mxu0 %v4755_v57  ;;  %2752 = vmatprep.mubr.bf16.mxu0 %v6071_v15 }
 0x245   :  { %2734 = vmatprep.subr.bf16.mxu0 %v4764_v40  ;;  %v4827_v40 = vcombine.low %v1117_v22, %v1121_v23  ;;  %v1145_v22 = vld [vmem:[#allocation8 + $0x4a8] sm:$0xff] }
 0x248   :  { %2735 = vmatpush1.bf16.msra.mxu0 %v4763_v52 }
 0x249   :  { %2736 = vmatprep.subr.bf16.mxu0 %v4772_v13 }
 0x24c   :  { %2737 = vmatpush1.bf16.msra.mxu0 %v4771_v45 }
 0x24d   :  { %2738 = vmatprep.subr.bf16.mxu0 %v4780_v46 }
 0x250   :  { %2739 = vmatpush1.bf16.msra.mxu0 %v4779_v60  ;;  %v1133_v60 = vld [vmem:[#allocation8 + $0x448] sm:$0xff] }
 0x251   :  { %2740 = vmatprep.subr.bf16.mxu0 %v4788_v61  ;;  %v1137_v61 = vld [vmem:[#allocation8 + $0x468] sm:$0xff] }
 0x254   :  { %2741 = vmatpush1.bf16.msra.mxu0 %v4787_v28 }
 0x255   :  { %2742 = vmatprep.subr.bf16.mxu0 %v4796_v58 }
 0x258   :  { %2743 = vmatpush1.bf16.msra.mxu0 %v4795_v2  ;;  %v4718_v2 = vcombine.high %v1006_v43, %v1010_v44 }
 0x259   :  { %2744 = vmatprep.subr.bf16.mxu0 %v4804_v4 }
 0x25c   :  { %2745 = vmatpush1.bf16.msra.mxu0 %v4803_v55  ;;  %v4844_v55 = vcombine.high %v1133_v60, %v1137_v61 }
 0x25d   :  { %2746 = vmatprep.subr.bf16.mxu0 %v4812_v51  ;;  %v1014_v51 = vld [vmem:[#allocation8 + $0x90] sm:$0xff] }
 0x25f   :  { %v845_v24 = vpop.f32.mrb[32].mxu0 }
 0x260   :  { %v846_v25 = vadd.f32 %v845_v24, %v6114_v18  ;;  %v847_v9 = vpop.f32.mrb[33].mxu0  ;;  %2747 = vmatpush1.bf16.msra.mxu0 %v4811_v19  ;;  %v4717_v24 = vcombine.low %v1006_v43, %v1010_v44 }
 0x261   :  { %v848_v27 = vadd.f32 %v847_v9, %v6119_v20  ;;  %v849_v29 = vpop.f32.mrb[34].mxu0  ;;  %2748 = vmatprep.subr.bf16.mxu0 %v4820_v21  ;;  %v1141_v21 = vld [vmem:[#allocation8 + $0x488] sm:$0xff]  ;;  %v4843_v9 = vcombine.low %v1133_v60, %v1137_v61  ;;  %v1034_v60 = vld [vmem:[#allocation8 + $0x130] sm:$0xff] }
 0x262   :  { %v918_v32 = vmul.f32 0.2, %v846_v25  ;;  %v850_v31 = vadd.f32 %v849_v29, %v6114_v18  ;;  %v851_v33 = vpop.f32.mrb[35].mxu0  ;;  %vm886_vm1 = vcmp.gt.f32.partialorder %v846_v25, 0.0 }
 0x263   :  { %v919_v35 = vmul.f32 0.2, %v848_v27  ;;  %v852_v37 = vadd.f32 %v851_v33, %v6119_v20  ;;  %vm887_vm2 = vcmp.gt.f32.partialorder %v848_v27, 0.0 }
 0x264   :  { %vm890_vm3 = vcmp.gt.f32.partialorder %v850_v31, 0.0  ;;  %v922_v57 = vmul.f32 0.2, %v850_v31  ;;  %2749 = vmatpush1.bf16.msra.mxu0 %v4819_v26  ;;  %v950_v52 = vsel %vm886_vm1, %v846_v25, %v918_v32  ;;  %v4726_v26 = vcombine.high %v1014_v51, %v1018_v16  ;;  %v1022_v32 = vld [vmem:[#allocation8 + $0xd0] sm:$0xff] }
 0x265   :  { %vm891_vm4 = vcmp.gt.f32.partialorder %v852_v37, 0.0  ;;  %v923_v42 = vmul.f32 0.2, %v852_v37  ;;  %2750 = vmatprep.subr.bf16.mxu0 %v4828_v30  ;;  %v951_v45 = vsel %vm887_vm2, %v848_v27, %v919_v35  ;;  %v4852_v30 = vcombine.high %v1141_v21, %v1145_v22 }
 0x266   :  { %v954_v13 = vsel %vm890_vm3, %v850_v31, %v922_v57  ;;  %v1026_v31 = vld [vmem:[#allocation8 + $0xf0] sm:$0xff] }
 0x267   :  { %v6125_v46 = vpack.c.bf16 %v954_v13, %v950_v52  ;;  %v955_v54 = vsel %vm891_vm4, %v852_v37, %v923_v42  ;;  %v855_v59 = vpop.f32.mrb[36].mxu0  ;;  %v4851_v52 = vcombine.low %v1141_v21, %v1145_v22  ;;  %v4734_v13 = vcombine.high %v1022_v32, %v1026_v31 }
 0x268   :  { %v6127_v62 = vpack.c.bf16 %v955_v54, %v951_v45  ;;  %v856_v63 = vadd.f32 %v855_v59, %v6114_v18  ;;  %v857_v28 = vpop.f32.mrb[37].mxu0  ;;  %2751 = vmatpush1.bf16.msra.mxu0 %v4827_v40  ;;  %v4725_v40 = vcombine.low %v1014_v51, %v1018_v16  ;;  %v4860_v54 = vcombine.high %v1149_v3, %v1153_v34  ;;  %v1030_v59 = vld [vmem:[#allocation8 + $0x110] sm:$0xff] }
 0x269   :  { %v858_v58 = vadd.f32 %v857_v28, %v6119_v20  ;;  %v859_v0 = vpop.f32.mrb[38].mxu0  ;;  %2793 = vmatprep.subr.bf16.mxu0 %v4836_v14  ;;  %v1157_v28 = vld [vmem:[#allocation8 + $0x508] sm:$0xff]  ;;  %v1038_v16 = vld [vmem:[#allocation8 + $0x150] sm:$0xff] }
 0x26a   :  { %v926_v4 = vmul.f32 0.2, %v856_v63  ;;  %v860_v5 = vadd.f32 %v859_v0, %v6114_v18  ;;  %v861_v6 = vpop.f32.mrb[39].mxu0  ;;  %2679 = vmatprep.mubr.bf16.mxu1 %v6127_v62  ;;  %vm894_vm5 = vcmp.gt.f32.partialorder %v856_v63, 0.0 }
 0x26b   :  { %v927_v17 = vmul.f32 0.2, %v858_v58  ;;  %v862_v19 = vadd.f32 %v861_v6, %v6119_v20  ;;  %2680 = vmatmul.mubr.bf16.vlgmr.msra.gmra.mrb[0].mxu1 %v6125_v46  ;;  %2753 = vmatmul.mubr.bf16.vlgmr.msra.gmra.mrb[64].mxu0 %v6069_v11  ;;  %vm895_vm6 = vcmp.gt.f32.partialorder %v858_v58, 0.0 }
 0x26c   :  { %vm898_vm7 = vcmp.gt.f32.partialorder %v860_v5, 0.0  ;;  %v930_v23 = vmul.f32 0.2, %v860_v5  ;;  %2867 = vmatpush1.bf16.msra.mxu1 %v4709_v56  ;;  %2762 = vmatprep.mubr.bf16.mxu0 %v6084_v41  ;;  %v958_v27 = vsel %vm894_vm5, %v856_v63, %v926_v4  ;;  %v4859_v4 = vcombine.low %v1149_v3, %v1153_v34 }
 0x26d   :  { %vm899_vm8 = vcmp.gt.f32.partialorder %v862_v19, 0.0  ;;  %v931_v25 = vmul.f32 0.2, %v862_v19  ;;  %2794 = vmatpush1.bf16.msra.mxu0 %v4835_v1  ;;  %2868 = vmatprep.subr.bf16.mxu1 %v4718_v2  ;;  %v959_v33 = vsel %vm895_vm6, %v858_v58, %v927_v17  ;;  %v1161_v58 = vld [vmem:[#allocation8 + $0x528] sm:$0xff]  ;;  %v4733_v1 = vcombine.low %v1022_v32, %v1026_v31  ;;  %v1042_v17 = vld [vmem:[#allocation8 + $0x170] sm:$0xff] }
 0x26e   :  { %v962_v29 = vsel %vm898_vm7, %v860_v5, %v930_v23  ;;  %2795 = vmatprep.subr.bf16.mxu0 %v4844_v55  ;;  %v4742_v5 = vcombine.high %v1030_v59, %v1034_v60  ;;  %v4868_v51 = vcombine.high %v1157_v28, %v1161_v58  ;;  %v4867_v31 = vcombine.low %v1157_v28, %v1161_v58  ;;  %v1058_v58 = vld [vmem:[#allocation8 + $0x1f0] sm:$0xff] }
 0x26f   :  { %v6142_v49 = vpack.c.bf16 %v962_v29, %v958_v27  ;;  %v963_v53 = vsel %vm899_vm8, %v862_v19, %v931_v25  ;;  %v865_v56 = vpop.f32.mrb[40].mxu0  ;;  %v1169_v25 = vld [vmem:[#allocation8 + $0x568] sm:$0xff]  ;;  %v4741_v29 = vcombine.low %v1030_v59, %v1034_v60  ;;  %v1054_v60 = vld [vmem:[#allocation8 + $0x1d0] sm:$0xff] }
 0x270   :  { %v6144_v35 = vpack.c.bf16 %v963_v53, %v959_v33  ;;  %v866_v37 = vadd.f32 %v865_v56, %v6114_v18  ;;  %2869 = vmatpush1.bf16.msra.mxu1 %v4717_v24  ;;  %v867_v57 = vpop.f32.mrb[41].mxu0  ;;  %v1165_v24 = vld [vmem:[#allocation8 + $0x548] sm:$0xff]  ;;  %v4750_v33 = vcombine.high %v1038_v16, %v1042_v17 }
 0x271   :  { %v868_v42 = vadd.f32 %v867_v57, %v6119_v20  ;;  %2796 = vmatpush1.bf16.msra.mxu0 %v4843_v9  ;;  %v869_v14 = vpop.f32.mrb[42].mxu0  ;;  %2870 = vmatprep.subr.bf16.mxu1 %v4726_v26  ;;  %v4876_v34 = vcombine.high %v1165_v24, %v1169_v25  ;;  %v1050_v57 = vld [vmem:[#allocation8 + $0x1b0] sm:$0xff] }
 0x272   :  { %v934_v43 = vmul.f32 0.2, %v866_v37  ;;  %v870_v44 = vadd.f32 %v869_v14, %v6114_v18  ;;  %v871_v45 = vpop.f32.mrb[43].mxu0  ;;  %2689 = vmatprep.mubr.bf16.mxu1 %v6144_v35  ;;  %2797 = vmatprep.subr.bf16.mxu0 %v4852_v30  ;;  %vm902_vm9 = vcmp.gt.f32.partialorder %v866_v37, 0.0  ;;  %v1173_v14 = vld [vmem:[#allocation8 + $0x588] sm:$0xff] }
 0x273   :  { %v935_v61 = vmul.f32 0.2, %v868_v42  ;;  %v872_v63 = vadd.f32 %v871_v45, %v6119_v20  ;;  %2690 = vmatmul.mubr.bf16.gmra.mrb[4].mxu1 %v6142_v49  ;;  %2763 = vmatmul.mubr.bf16.gmra.mrb[68].mxu0 %v6082_v38  ;;  %vm903_vm10 = vcmp.gt.f32.partialorder %v868_v42, 0.0 }
 0x274   :  { %vm906_vm11 = vcmp.gt.f32.partialorder %v870_v44, 0.0  ;;  %v938_v0 = vmul.f32 0.2, %v870_v44  ;;  %2871 = vmatpush1.bf16.msra.mxu1 %v4725_v40  ;;  %2772 = vmatprep.mubr.bf16.mxu0 %v6094_v10  ;;  %v966_v6 = vsel %vm902_vm9, %v866_v37, %v934_v43  ;;  %v1046_v37 = vld [vmem:[#allocation8 + $0x190] sm:$0xff] }
 0x275   :  { %vm907_vm12 = vcmp.gt.f32.partialorder %v872_v63, 0.0  ;;  %v939_v2 = vmul.f32 0.2, %v872_v63  ;;  %2798 = vmatpush1.bf16.msra.mxu0 %v4851_v52  ;;  %2872 = vmatprep.subr.bf16.mxu1 %v4734_v13  ;;  %v967_v19 = vsel %vm903_vm10, %v868_v42, %v935_v61  ;;  %v1177_v52 = vld [vmem:[#allocation8 + $0x5a8] sm:$0xff]  ;;  %v4749_v13 = vcombine.low %v1038_v16, %v1042_v17  ;;  %v1066_v16 = vld [vmem:[#allocation8 + $0x230] sm:$0xff] }
 0x276   :  { %v970_v55 = vsel %vm906_vm11, %v870_v44, %v938_v0  ;;  %2799 = vmatprep.subr.bf16.mxu0 %v4860_v54  ;;  %v4875_v44 = vcombine.low %v1165_v24, %v1169_v25  ;;  %v4758_v45 = vcombine.high %v1046_v37, %v1050_v57  ;;  %v4884_v59 = vcombine.high %v1173_v14, %v1177_v52  ;;  %v1181_v0 = vld [vmem:[#allocation8 + $0x5c8] sm:$0xff] }
 0x277   :  { %v6156_v21 = vpack.c.bf16 %v970_v55, %v966_v6  ;;  %v971_v22 = vsel %vm907_vm12, %v872_v63, %v939_v2  ;;  %v875_v23 = vpop.f32.mrb[44].mxu0  ;;  %v4766_v6 = vcombine.high %v1054_v60, %v1058_v58  ;;  %v1189_v17 = vld [vmem:[#allocation8 + $0x608] sm:$0xff] }
 0x278   :  { %v6158_v9 = vpack.c.bf16 %v971_v22, %v967_v19  ;;  %v876_v26 = vadd.f32 %v875_v23, %v6114_v18  ;;  %2873 = vmatpush1.bf16.msra.mxu1 %v4733_v1  ;;  %v877_v27 = vpop.f32.mrb[45].mxu0  ;;  %v1185_v1 = vld [vmem:[#allocation8 + $0x5e8] sm:$0xff]  ;;  %v4765_v22 = vcombine.low %v1054_v60, %v1058_v58  ;;  %v1098_v60 = vld [vmem:[#allocation8 + $0x330] sm:$0xff] }
 0x279   :  { %v878_v30 = vadd.f32 %v877_v27, %v6119_v20  ;;  %2800 = vmatpush1.bf16.msra.mxu0 %v4859_v4  ;;  %v879_v32 = vpop.f32.mrb[46].mxu0  ;;  %2874 = vmatprep.subr.bf16.mxu1 %v4742_v5  ;;  %v4757_v4 = vcombine.low %v1046_v37, %v1050_v57  ;;  %v4883_v5 = vcombine.low %v1173_v14, %v1177_v52  ;;  %v1193_v19 = vld [vmem:[#allocation8 + $0x628] sm:$0xff]  ;;  %v1074_v27 = vld [vmem:[#allocation8 + $0x270] sm:$0xff] }
 0x27a   :  { %v942_v53 = vmul.f32 0.2, %v876_v26  ;;  %v880_v56 = vadd.f32 %v879_v32, %v6114_v18  ;;  %v881_v3 = vpop.f32.mrb[47].mxu0  ;;  %2699 = vmatprep.mubr.bf16.mxu1 %v6158_v9  ;;  %2801 = vmatprep.subr.bf16.mxu0 %v4868_v51  ;;  %vm910_vm13 = vcmp.gt.f32.partialorder %v876_v26, 0.0  ;;  %v4892_v55 = vcombine.high %v1181_v0, %v1185_v1  ;;  %v1062_v51 = vld [vmem:[#allocation8 + $0x210] sm:$0xff]  ;;  %v1209_v37 = vld [vmem:[#allocation8 + $0x6a8] sm:$0xff] }
 0x27b   :  { %v943_v40 = vmul.f32 0.2, %v878_v30  ;;  %v882_v42 = vadd.f32 %v881_v3, %v6119_v20  ;;  %2700 = vmatmul.mubr.bf16.gmra.mrb[8].mxu1 %v6156_v21  ;;  %2773 = vmatmul.mubr.bf16.gmra.mrb[72].mxu0 %v6092_v7  ;;  %vm911_vm14 = vcmp.gt.f32.partialorder %v878_v30, 0.0  ;;  %v4891_v23 = vcombine.low %v1181_v0, %v1185_v1  ;;  %v1082_v3 = vld [vmem:[#allocation8 + $0x2b0] sm:$0xff] }
 0x27c   :  { %vm914_vm15 = vcmp.gt.f32.partialorder %v880_v56, 0.0  ;;  %v946_v18 = vmul.f32 0.2, %v880_v56  ;;  %2875 = vmatpush1.bf16.msra.mxu1 %v4741_v29  ;;  %2782 = vmatprep.mubr.bf16.mxu0 %v6104_v39  ;;  %v974_v20 = vsel %vm910_vm13, %v876_v26, %v942_v53  ;;  %v4774_v24 = vcombine.high %v1062_v51, %v1066_v16  ;;  %v1070_v26 = vld [vmem:[#allocation8 + $0x250] sm:$0xff]  ;;  %v1197_v29 = vld [vmem:[#allocation8 + $0x648] sm:$0xff] }
 0x27d   :  { %vm915_vm0 = vcmp.gt.f32.partialorder %v882_v42, 0.0  ;;  %v947_v43 = vmul.f32 0.2, %v882_v42  ;;  %2802 = vmatpush1.bf16.msra.mxu0 %v4867_v31  ;;  %2876 = vmatprep.subr.bf16.mxu1 %v4750_v33  ;;  %v975_v61 = vsel %vm911_vm14, %v878_v30, %v943_v40  ;;  %v4900_v25 = vcombine.high %v1189_v17, %v1193_v19  ;;  %v1201_v30 = vld [vmem:[#allocation8 + $0x668] sm:$0xff]  ;;  %v1086_v52 = vld [vmem:[#allocation8 + $0x2d0] sm:$0xff] }
 0x27e   :  { %v978_v54 = vsel %vm914_vm15, %v880_v56, %v946_v18  ;;  %2803 = vmatprep.subr.bf16.mxu0 %v4876_v34  ;;  %v4773_v32 = vcombine.low %v1062_v51, %v1066_v16  ;;  %v4899_v31 = vcombine.low %v1189_v17, %v1193_v19  ;;  %v4782_v33 = vcombine.high %v1070_v26, %v1074_v27  ;;  %v1078_v56 = vld [vmem:[#allocation8 + $0x290] sm:$0xff]  ;;  %v1205_v34 = vld [vmem:[#allocation8 + $0x688] sm:$0xff] }
 0x27f   :  { %v6170_v63 = vpack.c.bf16 %v978_v54, %v974_v20  ;;  %v979_v28 = vsel %vm915_vm0, %v882_v42, %v947_v43  ;;  %v4908_v53 = vcombine.high %v1197_v29, %v1201_v30  ;;  %v4781_v57 = vcombine.low %v1070_v26, %v1074_v27  ;;  %v1090_v18 = vld [vmem:[#allocation8 + $0x2f0] sm:$0xff]  ;;  %v1217_v43 = vld [vmem:[#allocation8 + $0x6e8] sm:$0xff] }
 0x280   :  { %v6172_v2 = vpack.c.bf16 %v979_v28, %v975_v61  ;;  %2877 = vmatpush1.bf16.msra.mxu1 %v4749_v13  ;;  %v4907_v40 = vcombine.low %v1197_v29, %v1201_v30  ;;  %v4790_v42 = vcombine.high %v1078_v56, %v1082_v3  ;;  %v4916_v14 = vcombine.high %v1205_v34, %v1209_v37  ;;  %v1213_v13 = vld [vmem:[#allocation8 + $0x6c8] sm:$0xff] }
 0x281   :  { %2804 = vmatpush1.bf16.msra.mxu0 %v4875_v44  ;;  %2878 = vmatprep.subr.bf16.mxu1 %v4758_v45  ;;  %v4789_v44 = vcombine.low %v1078_v56, %v1082_v3  ;;  %v4915_v45 = vcombine.low %v1205_v34, %v1209_v37  ;;  %v4798_v20 = vcombine.high %v1086_v52, %v1090_v18  ;;  %v1221_v61 = vld [vmem:[#allocation8 + $0x708] sm:$0xff] }
 0x282   :  { %2709 = vmatprep.mubr.bf16.mxu1 %v6172_v2  ;;  %2805 = vmatprep.subr.bf16.mxu0 %v4884_v59  ;;  %v4924_v54 = vcombine.high %v1213_v13, %v1217_v43  ;;  %v1094_v59 = vld [vmem:[#allocation8 + $0x310] sm:$0xff]  ;;  %v1225_v28 = vld [vmem:[#allocation8 + $0x728] sm:$0xff]  ;;  %v4797_v58 = vcombine.low %v1086_v52, %v1090_v18  ;;  %v4923_v0 = vcombine.low %v1213_v13, %v1217_v43  ;;  %v1003_v52 = vld [vmem:[#allocation8 + $0x38] sm:$0xff] }
 0x283   :  { %2710 = vmatmul.mubr.bf16.gmra.mrb[12].mxu1 %v6170_v63  ;;  %2783 = vmatmul.mubr.bf16.gmra.mrb[76].mxu0 %v6102_v36  ;;  %v4806_v1 = vcombine.high %v1094_v59, %v1098_v60  ;;  %v1233_v51 = vld [vmem:[#allocation8 + $0x768] sm:$0xff]  ;;  %v4805_v16 = vcombine.low %v1094_v59, %v1098_v60  ;;  %v4931_v17 = vcombine.low %v1221_v61, %v1225_v28  ;;  %v1011_v59 = vld [vmem:[#allocation8 + $0x78] sm:$0xff] }
 0x284   :  { %2879 = vmatpush1.bf16.msra.mxu1 %v4757_v4  ;;  %2825 = vmatprep.mubr.bf16.mxu0 %v6127_v62  ;;  %v4932_v4 = vcombine.high %v1221_v61, %v1225_v28  ;;  %v1241_v26 = vld [vmem:[#allocation8 + $0x7a8] sm:$0xff] }
 0x285   :  { %2806 = vmatpush1.bf16.msra.mxu0 %v4883_v5  ;;  %2898 = vmatprep.mubr.bf16.mxu1 %v6071_v15  ;;  %v1102_v5 = vld [vmem:[#allocation8 + $0x350] sm:$0xff]  ;;  %v1249_v56 = vld [vmem:[#allocation8 + $0x7e8] sm:$0xff] }
 0x286   :  { %2880 = vmatprep.subr.bf16.mxu1 %v4766_v6  ;;  %2807 = vmatprep.subr.bf16.mxu0 %v4892_v55  ;;  %v1106_v6 = vld [vmem:[#allocation8 + $0x370] sm:$0xff]  ;;  %v1229_v55 = vld [vmem:[#allocation8 + $0x748] sm:$0xff] }
 0x287   :  { %v4814_v19 = vcombine.high %v1102_v5, %v1106_v6  ;;  %v4813_v27 = vcombine.low %v1102_v5, %v1106_v6  ;;  %v4939_v29 = vcombine.low %v1229_v55, %v1233_v51  ;;  %v1019_v5 = vld [vmem:[#allocation8 + $0xb8] sm:$0xff] }
 0x288   :  { %2881 = vmatpush1.bf16.msra.mxu1 %v4765_v22  ;;  %v4940_v22 = vcombine.high %v1229_v55, %v1233_v51 }
 0x289   :  { %2808 = vmatpush1.bf16.msra.mxu0 %v4891_v23  ;;  %2882 = vmatprep.subr.bf16.mxu1 %v4774_v24  ;;  %v1110_v23 = vld [vmem:[#allocation8 + $0x390] sm:$0xff] }
 0x28a   :  { %2809 = vmatprep.subr.bf16.mxu0 %v4900_v25  ;;  %v1114_v24 = vld [vmem:[#allocation8 + $0x3b0] sm:$0xff]  ;;  %v1237_v25 = vld [vmem:[#allocation8 + $0x788] sm:$0xff] }
 0x28b   :  { %v4822_v30 = vcombine.high %v1110_v23, %v1114_v24  ;;  %v4821_v3 = vcombine.low %v1110_v23, %v1114_v24  ;;  %v4947_v34 = vcombine.low %v1237_v25, %v1241_v26  ;;  %v1027_v23 = vld [vmem:[#allocation8 + $0xf8] sm:$0xff] }
 0x28c   :  { %2883 = vmatpush1.bf16.msra.mxu1 %v4773_v32  ;;  %v4948_v32 = vcombine.high %v1237_v25, %v1241_v26 }
 0x28d   :  { %2810 = vmatpush1.bf16.msra.mxu0 %v4899_v31  ;;  %2884 = vmatprep.subr.bf16.mxu1 %v4782_v33  ;;  %v1118_v31 = vld [vmem:[#allocation8 + $0x3d0] sm:$0xff] }
 0x28e   :  { %2811 = vmatprep.subr.bf16.mxu0 %v4908_v53  ;;  %v1122_v33 = vld [vmem:[#allocation8 + $0x3f0] sm:$0xff]  ;;  %v1245_v53 = vld [vmem:[#allocation8 + $0x7c8] sm:$0xff] }
 0x28f   :  { %v4830_v37 = vcombine.high %v1118_v31, %v1122_v33  ;;  %v4829_v18 = vcombine.low %v1118_v31, %v1122_v33  ;;  %v4955_v13 = vcombine.low %v1245_v53, %v1249_v56  ;;  %v1035_v31 = vld [vmem:[#allocation8 + $0x138] sm:$0xff] }
 0x290   :  { %2885 = vmatpush1.bf16.msra.mxu1 %v4781_v57  ;;  %v4956_v57 = vcombine.high %v1245_v53, %v1249_v56 }
 0x291   :  { %2812 = vmatpush1.bf16.msra.mxu0 %v4907_v40  ;;  %2886 = vmatprep.subr.bf16.mxu1 %v4790_v42  ;;  %v1126_v40 = vld [vmem:[#allocation8 + $0x410] sm:$0xff] }
 0x292   :  { %2813 = vmatprep.subr.bf16.mxu0 %v4916_v14  ;;  %v1130_v42 = vld [vmem:[#allocation8 + $0x430] sm:$0xff]  ;;  %v999_v14 = vld [vmem:[#allocation8 + $0x18] sm:$0xff] }
 0x293   :  { %v4838_v43 = vcombine.high %v1126_v40, %v1130_v42  ;;  %v4837_v60 = vcombine.low %v1126_v40, %v1130_v42  ;;  %v4711_v61 = vcombine.low %v999_v14, %v1003_v52  ;;  %v1043_v40 = vld [vmem:[#allocation8 + $0x178] sm:$0xff] }
 0x294   :  { %2887 = vmatpush1.bf16.msra.mxu1 %v4789_v44  ;;  %v4712_v44 = vcombine.high %v999_v14, %v1003_v52 }
 0x295   :  { %2814 = vmatpush1.bf16.msra.mxu0 %v4915_v45  ;;  %2888 = vmatprep.subr.bf16.mxu1 %v4798_v20  ;;  %v1134_v45 = vld [vmem:[#allocation8 + $0x450] sm:$0xff] }
 0x296   :  { %2815 = vmatprep.subr.bf16.mxu0 %v4924_v54  ;;  %v1138_v20 = vld [vmem:[#allocation8 + $0x470] sm:$0xff]  ;;  %v1007_v54 = vld [vmem:[#allocation8 + $0x58] sm:$0xff] }
 0x297   :  { %v4846_v28 = vcombine.high %v1134_v45, %v1138_v20  ;;  %v4845_v6 = vcombine.low %v1134_v45, %v1138_v20  ;;  %v4719_v55 = vcombine.low %v1007_v54, %v1011_v59  ;;  %v1051_v45 = vld [vmem:[#allocation8 + $0x1b8] sm:$0xff] }
 0x298   :  { %2889 = vmatpush1.bf16.msra.mxu1 %v4797_v58  ;;  %v4720_v58 = vcombine.high %v1007_v54, %v1011_v59 }
 0x299   :  { %2816 = vmatpush1.bf16.msra.mxu0 %v4923_v0  ;;  %2890 = vmatprep.subr.bf16.mxu1 %v4806_v1  ;;  %v1142_v0 = vld [vmem:[#allocation8 + $0x490] sm:$0xff] }
 0x29a   :  { %2817 = vmatprep.subr.bf16.mxu0 %v4932_v4  ;;  %v1146_v1 = vld [vmem:[#allocation8 + $0x4b0] sm:$0xff]  ;;  %v1015_v4 = vld [vmem:[#allocation8 + $0x98] sm:$0xff] }
 0x29b   :  { %v4854_v51 = vcombine.high %v1142_v0, %v1146_v1  ;;  %v4853_v24 = vcombine.low %v1142_v0, %v1146_v1  ;;  %v4727_v25 = vcombine.low %v1015_v4, %v1019_v5  ;;  %v1059_v0 = vld [vmem:[#allocation8 + $0x1f8] sm:$0xff] }
 0x29c   :  { %2891 = vmatpush1.bf16.msra.mxu1 %v4805_v16  ;;  %v4728_v16 = vcombine.high %v1015_v4, %v1019_v5 }
 0x29d   :  { %2818 = vmatpush1.bf16.msra.mxu0 %v4931_v17  ;;  %2892 = vmatprep.subr.bf16.mxu1 %v4814_v19  ;;  %v1150_v17 = vld [vmem:[#allocation8 + $0x4d0] sm:$0xff] }
 0x29e   :  { %2819 = vmatprep.subr.bf16.mxu0 %v4940_v22  ;;  %v1154_v19 = vld [vmem:[#allocation8 + $0x4f0] sm:$0xff]  ;;  %v1023_v22 = vld [vmem:[#allocation8 + $0xd8] sm:$0xff] }
 0x29f   :  { %v4862_v26 = vcombine.high %v1150_v17, %v1154_v19  ;;  %v4861_v33 = vcombine.low %v1150_v17, %v1154_v19  ;;  %v4735_v53 = vcombine.low %v1023_v22, %v1027_v23  ;;  %v1067_v17 = vld [vmem:[#allocation8 + $0x238] sm:$0xff] }
 0x2a0   :  { %2893 = vmatpush1.bf16.msra.mxu1 %v4813_v27  ;;  %v4736_v27 = vcombine.high %v1023_v22, %v1027_v23 }
 0x2a1   :  { %2820 = vmatpush1.bf16.msra.mxu0 %v4939_v29  ;;  %2894 = vmatprep.subr.bf16.mxu1 %v4822_v30  ;;  %v1158_v29 = vld [vmem:[#allocation8 + $0x510] sm:$0xff] }
 0x2a2   :  { %2821 = vmatprep.subr.bf16.mxu0 %v4948_v32  ;;  %v1162_v30 = vld [vmem:[#allocation8 + $0x530] sm:$0xff]  ;;  %v1031_v32 = vld [vmem:[#allocation8 + $0x118] sm:$0xff] }
 0x2a3   :  { %v4870_v56 = vcombine.high %v1158_v29, %v1162_v30  ;;  %v4869_v42 = vcombine.low %v1158_v29, %v1162_v30  ;;  %v4743_v14 = vcombine.low %v1031_v32, %v1035_v31  ;;  %v1075_v29 = vld [vmem:[#allocation8 + $0x278] sm:$0xff] }
 0x2a4   :  { %2895 = vmatpush1.bf16.msra.mxu1 %v4821_v3  ;;  %v4744_v3 = vcombine.high %v1031_v32, %v1035_v31 }
 0x2a5   :  { %2822 = vmatpush1.bf16.msra.mxu0 %v4947_v34  ;;  %2896 = vmatprep.subr.bf16.mxu1 %v4830_v37  ;;  %v1166_v34 = vld [vmem:[#allocation8 + $0x550] sm:$0xff] }
 0x2a6   :  { %2823 = vmatprep.subr.bf16.mxu0 %v4956_v57  ;;  %v1170_v37 = vld [vmem:[#allocation8 + $0x570] sm:$0xff]  ;;  %v1039_v57 = vld [vmem:[#allocation8 + $0x158] sm:$0xff] }
 0x2a7   :  { %v4878_v52 = vcombine.high %v1166_v34, %v1170_v37  ;;  %v4877_v20 = vcombine.low %v1166_v34, %v1170_v37  ;;  %v4751_v54 = vcombine.low %v1039_v57, %v1043_v40 }
 0x2a8   :  { %2897 = vmatpush1.bf16.msra.mxu1 %v4829_v18  ;;  %v4752_v18 = vcombine.high %v1039_v57, %v1043_v40 }
 0x2a9   :  { %2824 = vmatpush1.bf16.msra.mxu0 %v4955_v13  ;;  %2939 = vmatprep.subr.bf16.mxu1 %v4838_v43  ;;  %v1174_v13 = vld [vmem:[#allocation8 + $0x590] sm:$0xff] }
 0x2aa   :  { %3012 = vmatprep.subr.bf16.mxu0 %v4712_v44  ;;  %v1178_v43 = vld [vmem:[#allocation8 + $0x5b0] sm:$0xff]  ;;  %v1047_v44 = vld [vmem:[#allocation8 + $0x198] sm:$0xff] }
 0x2ab   :  { %2899 = vmatmul.mubr.bf16.vlgmr.msra.gmra.mrb[16].mxu1 %v6069_v11  ;;  %v4886_v59 = vcombine.high %v1174_v13, %v1178_v43  ;;  %v4885_v1 = vcombine.low %v1174_v13, %v1178_v43  ;;  %v4759_v4 = vcombine.low %v1047_v44, %v1051_v45 }
 0x2ac   :  { %2826 = vmatmul.mubr.bf16.vlgmr.msra.gmra.mrb[64].mxu0 %v6125_v46  ;;  %2908 = vmatprep.mubr.bf16.mxu1 %v6084_v41 }
 0x2ad   :  { %2940 = vmatpush1.bf16.msra.mxu1 %v4837_v60  ;;  %2835 = vmatprep.mubr.bf16.mxu0 %v6144_v35  ;;  %v4760_v60 = vcombine.high %v1047_v44, %v1051_v45 }
 0x2ae   :  { %3013 = vmatpush1.bf16.msra.mxu0 %v4711_v61  ;;  %2941 = vmatprep.subr.bf16.mxu1 %v4846_v28  ;;  %v1182_v61 = vld [vmem:[#allocation8 + $0x5d0] sm:$0xff] }
 0x2af   :  { %3014 = vmatprep.subr.bf16.mxu0 %v4720_v58  ;;  %v1186_v28 = vld [vmem:[#allocation8 + $0x5f0] sm:$0xff]  ;;  %v1055_v58 = vld [vmem:[#allocation8 + $0x1d8] sm:$0xff] }
 0x2b0   :  { %v4894_v5 = vcombine.high %v1182_v61, %v1186_v28  ;;  %v4893_v19 = vcombine.low %v1182_v61, %v1186_v28  ;;  %v4767_v22 = vcombine.low %v1055_v58, %v1059_v0 }
 0x2b1   :  { %2942 = vmatpush1.bf16.msra.mxu1 %v4845_v6  ;;  %v4768_v6 = vcombine.high %v1055_v58, %v1059_v0 }
 0x2b2   :  { %3015 = vmatpush1.bf16.msra.mxu0 %v4719_v55  ;;  %2943 = vmatprep.subr.bf16.mxu1 %v4854_v51  ;;  %v1190_v55 = vld [vmem:[#allocation8 + $0x610] sm:$0xff] }
 0x2b3   :  { %2909 = vmatmul.mubr.bf16.gmra.mrb[20].mxu1 %v6082_v38  ;;  %3016 = vmatprep.subr.bf16.mxu0 %v4728_v16  ;;  %v1194_v51 = vld [vmem:[#allocation8 + $0x630] sm:$0xff]  ;;  %v1063_v16 = vld [vmem:[#allocation8 + $0x218] sm:$0xff] }
 0x2b4   :  { %2836 = vmatmul.mubr.bf16.gmra.mrb[68].mxu0 %v6142_v49  ;;  %2918 = vmatprep.mubr.bf16.mxu1 %v6094_v10  ;;  %v4902_v23 = vcombine.high %v1190_v55, %v1194_v51  ;;  %v4901_v30 = vcombine.low %v1190_v55, %v1194_v51  ;;  %v4775_v32 = vcombine.low %v1063_v16, %v1067_v17 }
 0x2b5   :  { %2944 = vmatpush1.bf16.msra.mxu1 %v4853_v24  ;;  %2845 = vmatprep.mubr.bf16.mxu0 %v6158_v9  ;;  %v4776_v24 = vcombine.high %v1063_v16, %v1067_v17 }
 0x2b6   :  { %3017 = vmatpush1.bf16.msra.mxu0 %v4727_v25  ;;  %2945 = vmatprep.subr.bf16.mxu1 %v4862_v26  ;;  %v1198_v25 = vld [vmem:[#allocation8 + $0x650] sm:$0xff] }
 0x2b7   :  { %3018 = vmatprep.subr.bf16.mxu0 %v4736_v27  ;;  %v1202_v26 = vld [vmem:[#allocation8 + $0x670] sm:$0xff]  ;;  %v1071_v27 = vld [vmem:[#allocation8 + $0x258] sm:$0xff] }
 0x2b8   :  { %v4910_v31 = vcombine.high %v1198_v25, %v1202_v26  ;;  %v4909_v34 = vcombine.low %v1198_v25, %v1202_v26  ;;  %v4783_v37 = vcombine.low %v1071_v27, %v1075_v29 }
 0x2b9   :  { %2946 = vmatpush1.bf16.msra.mxu1 %v4861_v33  ;;  %v4784_v33 = vcombine.high %v1071_v27, %v1075_v29 }
 0x2ba   :  { %3019 = vmatpush1.bf16.msra.mxu0 %v4735_v53  ;;  %2947 = vmatprep.subr.bf16.mxu1 %v4870_v56  ;;  %v1210_v53 = vld [vmem:[#allocation8 + $0x6b0] sm:$0xff]  ;;  %v1079_v56 = vld [vmem:[#allocation8 + $0x298] sm:$0xff] }
 0x2bb   :  { %2919 = vmatmul.mubr.bf16.gmra.mrb[24].mxu1 %v6092_v7  ;;  %3020 = vmatprep.subr.bf16.mxu0 %v4744_v3  ;;  %v1083_v3 = vld [vmem:[#allocation8 + $0x2b8] sm:$0xff] }
 0x2bc   :  { %2846 = vmatmul.mubr.bf16.gmra.mrb[72].mxu0 %v6156_v21  ;;  %2928 = vmatprep.mubr.bf16.mxu1 %v6104_v39  ;;  %v4792_v40 = vcombine.high %v1079_v56, %v1083_v3  ;;  %v4791_v43 = vcombine.low %v1079_v56, %v1083_v3 }
 0x2bd   :  { %2948 = vmatpush1.bf16.msra.mxu1 %v4869_v42  ;;  %2855 = vmatprep.mubr.bf16.mxu0 %v6172_v2  ;;  %v1214_v42 = vld [vmem:[#allocation8 + $0x6d0] sm:$0xff] }
 0x2be   :  { %3021 = vmatpush1.bf16.msra.mxu0 %v4743_v14  ;;  %2949 = vmatprep.subr.bf16.mxu1 %v4878_v52  ;;  %v1218_v14 = vld [vmem:[#allocation8 + $0x6f0] sm:$0xff]  ;;  %v1087_v52 = vld [vmem:[#allocation8 + $0x2d8] sm:$0xff] }
 0x2bf   :  { %3022 = vmatprep.subr.bf16.mxu0 %v4752_v18  ;;  %v1091_v18 = vld [vmem:[#allocation8 + $0x2f8] sm:$0xff]  ;;  %v4926_v44 = vcombine.high %v1214_v42, %v1218_v14  ;;  %v4925_v61 = vcombine.low %v1214_v42, %v1218_v14  ;;  %v5442_v42 = vld [vmem:[#allocation10 + $0x4] ss:$8 sps:$4 sm:$0xff]  }
 0x2c0   :  { %v4800_v45 = vcombine.high %v1087_v52, %v1091_v18  ;;  %v4799_v28 = vcombine.low %v1087_v52, %v1091_v18  ;;  %v1135_v52 = vld [vmem:[#allocation8 + $0x458] sm:$0xff] }
 0x2c1   :  { %2950 = vmatpush1.bf16.msra.mxu1 %v4877_v20  ;;  %v1222_v20 = vld [vmem:[#allocation8 + $0x710] sm:$0xff]  ;;  %v1139_v18 = vld [vmem:[#allocation8 + $0x478] sm:$0xff] }
 0x2c2   :  { %3023 = vmatpush1.bf16.msra.mxu0 %v4751_v54  ;;  %2951 = vmatprep.subr.bf16.mxu1 %v4886_v59  ;;  %v1226_v54 = vld [vmem:[#allocation8 + $0x730] sm:$0xff]  ;;  %v1095_v59 = vld [vmem:[#allocation8 + $0x318] sm:$0xff] }
 0x2c3   :  { %2929 = vmatmul.mubr.bf16.gmra.mrb[28].mxu1 %v6102_v36  ;;  %3024 = vmatprep.subr.bf16.mxu0 %v4760_v60  ;;  %v1099_v60 = vld [vmem:[#allocation8 + $0x338] sm:$0xff]  ;;  %v4934_v58 = vcombine.high %v1222_v20, %v1226_v54  ;;  %v4933_v55 = vcombine.low %v1222_v20, %v1226_v54 }
 0x2c4   :  { %2856 = vmatmul.mubr.bf16.gmra.mrb[76].mxu0 %v6170_v63  ;;  %2971 = vmatprep.mubr.bf16.mxu1 %v6127_v62  ;;  %v4808_v0 = vcombine.high %v1095_v59, %v1099_v60  ;;  %v4807_v51 = vcombine.low %v1095_v59, %v1099_v60  ;;  %v1147_v20 = vld [vmem:[#allocation8 + $0x4b8] sm:$0xff]  ;;  %v4847_v59 = vcombine.low %v1135_v52, %v1139_v18 }
 0x2c5   :  { %2952 = vmatpush1.bf16.msra.mxu1 %v4885_v1  ;;  %3044 = vmatprep.mubr.bf16.mxu0 %v6071_v15  ;;  %v1206_v15 = vld [vmem:[#allocation8 + $0x690] sm:$0xff] }
 0x2c6   :  { %3025 = vmatpush1.bf16.msra.mxu0 %v4759_v4  ;;  %2953 = vmatprep.subr.bf16.mxu1 %v4894_v5  ;;  %v4918_v57 = vcombine.high %v1206_v15, %v1210_v53  ;;  %v4917_v13 = vcombine.low %v1206_v15, %v1210_v53  ;;  %v1230_v1 = vld [vmem:[#allocation8 + $0x750] sm:$0xff]  ;;  %v1103_v5 = vld [vmem:[#allocation8 + $0x358] sm:$0xff] }
 0x2c7   :  { %3026 = vmatprep.subr.bf16.mxu0 %v4768_v6  ;;  %v1234_v4 = vld [vmem:[#allocation8 + $0x770] sm:$0xff]  ;;  %v1107_v6 = vld [vmem:[#allocation8 + $0x378] sm:$0xff] }
 0x2c8   :  { %v4942_v16 = vcombine.high %v1230_v1, %v1234_v4  ;;  %v4816_v17 = vcombine.high %v1103_v5, %v1107_v6  ;;  %v4941_v25 = vcombine.low %v1230_v1, %v1234_v4  ;;  %v4815_v26 = vcombine.low %v1103_v5, %v1107_v6  ;;  %v5445_v54 = vld [vmem:[#allocation10 + $0x14] ss:$8 sps:$4 sm:$0xff]   ;;  %v5446_v5 = vld [vmem:[#allocation10 + $0x20] ss:$8 sps:$4 sm:$0xff]  }
 0x2c9   :  { %2954 = vmatpush1.bf16.msra.mxu1 %v4893_v19  ;;  %v1238_v19 = vld [vmem:[#allocation8 + $0x790] sm:$0xff] }
 0x2ca   :  { %3027 = vmatpush1.bf16.msra.mxu0 %v4767_v22  ;;  %2955 = vmatprep.subr.bf16.mxu1 %v4902_v23  ;;  %v1242_v22 = vld [vmem:[#allocation8 + $0x7b0] sm:$0xff]  ;;  %v1111_v23 = vld [vmem:[#allocation8 + $0x398] sm:$0xff] }
 0x2cb   :  { %3028 = vmatprep.subr.bf16.mxu0 %v4776_v24  ;;  %v1115_v24 = vld [vmem:[#allocation8 + $0x3b8] sm:$0xff]  ;;  %v4950_v27 = vcombine.high %v1238_v19, %v1242_v22  ;;  %v4949_v15 = vcombine.low %v1238_v19, %v1242_v22  ;;  %v5454_v22 = vld [vmem:[#allocation10 + $0x44] ss:$8 sps:$4 sm:$0xff]  }
 0x2cc   :  { %v4824_v29 = vcombine.high %v1111_v23, %v1115_v24  ;;  %v4823_v53 = vcombine.low %v1111_v23, %v1115_v24  ;;  %v5451_v6 = vld [vmem:[#allocation10 + $0x34] ss:$8 sps:$4 sm:$0xff]  }
 0x2cd   :  { %2956 = vmatpush1.bf16.msra.mxu1 %v4901_v30  ;;  %v1246_v30 = vld [vmem:[#allocation8 + $0x7d0] sm:$0xff]  ;;  %v1171_v19 = vld [vmem:[#allocation8 + $0x578] sm:$0xff] }
 0x2ce   :  { %3029 = vmatpush1.bf16.msra.mxu0 %v4775_v32  ;;  %2957 = vmatprep.subr.bf16.mxu1 %v4910_v31  ;;  %v1250_v32 = vld [vmem:[#allocation8 + $0x7f0] sm:$0xff]  ;;  %v1119_v31 = vld [vmem:[#allocation8 + $0x3d8] sm:$0xff] }
 0x2cf   :  { %3030 = vmatprep.subr.bf16.mxu0 %v4784_v33  ;;  %v1123_v33 = vld [vmem:[#allocation8 + $0x3f8] sm:$0xff]  ;;  %v4958_v56 = vcombine.high %v1246_v30, %v1250_v32 }
 0x2d0   :  { %v4832_v3 = vcombine.high %v1119_v31, %v1123_v33 }
 0x2d1   :  { %2958 = vmatpush1.bf16.msra.mxu1 %v4909_v34  ;;  %v1127_v34 = vld [vmem:[#allocation8 + $0x418] sm:$0xff] }
 0x2d2   :  { %3031 = vmatpush1.bf16.msra.mxu0 %v4783_v37  ;;  %2959 = vmatprep.subr.bf16.mxu1 %v4918_v57  ;;  %v1131_v37 = vld [vmem:[#allocation8 + $0x438] sm:$0xff]  ;;  %v4957_v57 = vcombine.low %v1246_v30, %v1250_v32 }
 0x2d3   :  { %3032 = vmatprep.subr.bf16.mxu0 %v4792_v40  ;;  %v4831_v40 = vcombine.low %v1119_v31, %v1123_v33  ;;  %v4840_v14 = vcombine.high %v1127_v34, %v1131_v37  ;;  %v5455_v31 = vld [vmem:[#allocation10 + $0x50] ss:$8 sps:$4 sm:$0xff]  }
 0x2d5   :  { %2960 = vmatpush1.bf16.msra.mxu1 %v4917_v13  ;;  %v4839_v13 = vcombine.low %v1127_v34, %v1131_v37  ;;  %v5458_v34 = vld [vmem:[#allocation10 + $0x60] ss:$8 sps:$4 sm:$0xff]   ;;  %v1191_v37 = vld [vmem:[#allocation8 + $0x618] sm:$0xff] }
 0x2d6   :  { %3033 = vmatpush1.bf16.msra.mxu0 %v4791_v43  ;;  %2961 = vmatprep.subr.bf16.mxu1 %v4926_v44  ;;  %v4848_v43 = vcombine.high %v1135_v52, %v1139_v18  ;;  %v5440_v44 = vld [vmem:[#allocation10] ss:$8 sps:$4 sm:$0xff]  }
 0x2d7   :  { %3034 = vmatprep.subr.bf16.mxu0 %v4800_v45  ;;  %v1143_v45 = vld [vmem:[#allocation8 + $0x498] sm:$0xff] }
 0x2d8   :  { %v4856_v60 = vcombine.high %v1143_v45, %v1147_v20  ;;  %v4855_v1 = vcombine.low %v1143_v45, %v1147_v20  ;;  %v5466_v20 = vld [vmem:[#allocation10 + $0x84] ss:$8 sps:$4 sm:$0xff]  }
 0x2d9   :  { %2962 = vmatpush1.bf16.msra.mxu1 %v4925_v61  ;;  %v5443_v61 = vld [vmem:[#allocation10 + $0x10] ss:$8 sps:$4 sm:$0xff]  }
 0x2da   :  { %3035 = vmatpush1.bf16.msra.mxu0 %v4799_v28  ;;  %2963 = vmatprep.subr.bf16.mxu1 %v4934_v58  ;;  %v1151_v28 = vld [vmem:[#allocation8 + $0x4d8] sm:$0xff] }
 0x2db   :  { %3036 = vmatprep.subr.bf16.mxu0 %v4808_v0  ;;  %v1155_v58 = vld [vmem:[#allocation8 + $0x4f8] sm:$0xff]  ;;  %v5448_v0 = vld [vmem:[#allocation10 + $0x24] ss:$8 sps:$4 sm:$0xff]  }
 0x2dc   :  { %v4864_v4 = vcombine.high %v1151_v28, %v1155_v58 }
 0x2dd   :  { %2964 = vmatpush1.bf16.msra.mxu1 %v4933_v55  ;;  %v4863_v55 = vcombine.low %v1151_v28, %v1155_v58  ;;  %v5469_v28 = vld [vmem:[#allocation10 + $0x94] ss:$8 sps:$4 sm:$0xff]  }
 0x2de   :  { %3037 = vmatpush1.bf16.msra.mxu0 %v4807_v51  ;;  %2965 = vmatprep.subr.bf16.mxu1 %v4942_v16  ;;  %v5449_v16 = vld [vmem:[#allocation10 + $0x30] ss:$8 sps:$4 sm:$0xff]  }
 0x2df   :  { %3038 = vmatprep.subr.bf16.mxu0 %v4816_v17  ;;  %v1167_v17 = vld [vmem:[#allocation8 + $0x558] sm:$0xff] }
 0x2e0   :  { %v4880_v24 = vcombine.high %v1167_v17, %v1171_v19 }
 0x2e1   :  { %2966 = vmatpush1.bf16.msra.mxu1 %v4941_v25  ;;  %v5452_v25 = vld [vmem:[#allocation10 + $0x40] ss:$8 sps:$4 sm:$0xff]  }
 0x2e2   :  { %3039 = vmatpush1.bf16.msra.mxu0 %v4815_v26  ;;  %2967 = vmatprep.subr.bf16.mxu1 %v4950_v27  ;;  %v5457_v26 = vld [vmem:[#allocation10 + $0x54] ss:$8 sps:$4 sm:$0xff]  }
 0x2e3   :  { %3040 = vmatprep.subr.bf16.mxu0 %v4824_v29  ;;  %v4879_v29 = vcombine.low %v1167_v17, %v1171_v19  ;;  %v5470_v19 = vld [vmem:[#allocation10 + $0xa0] ss:$8 sps:$4 sm:$0xff]  }
 0x2e5   :  { %2968 = vmatpush1.bf16.msra.mxu1 %v4949_v15  ;;  %v1183_v15 = vld [vmem:[#allocation8 + $0x5d8] sm:$0xff] }
 0x2e6   :  { %3041 = vmatpush1.bf16.msra.mxu0 %v4823_v53  ;;  %2969 = vmatprep.subr.bf16.mxu1 %v4958_v56  ;;  %v1187_v53 = vld [vmem:[#allocation8 + $0x5f8] sm:$0xff]  ;;  %v5460_v56 = vld [vmem:[#allocation10 + $0x64] ss:$8 sps:$4 sm:$0xff]  }
 0x2e7   :  { %3042 = vmatprep.subr.bf16.mxu0 %v4832_v3 }
 0x2e9   :  { %2970 = vmatpush1.bf16.msra.mxu1 %v4957_v57  ;;  %v1195_v57 = vld [vmem:[#allocation8 + $0x638] sm:$0xff] }
 0x2ea   :  { %3043 = vmatpush1.bf16.msra.mxu0 %v4831_v40  ;;  %4162 = vmatprep.subr.bf16.mxu1 %v5442_v42  ;;  %v5463_v40 = vld [vmem:[#allocation10 + $0x74] ss:$8 sps:$4 sm:$0xff]   ;;  %v4895_v42 = vcombine.low %v1183_v15, %v1187_v53  ;;  %v4904_v52 = vcombine.high %v1191_v37, %v1195_v57 }
 0x2eb   :  { %3085 = vmatprep.subr.bf16.mxu0 %v4840_v14 }
 0x2ec   :  { %2972 = vmatmul.mubr.bf16.vlgmr.msra.gmra.mrb[16].mxu1 %v6125_v46 }
 0x2ed   :  { %2981 = vmatprep.mubr.bf16.mxu1 %v6144_v35  ;;  %3045 = vmatmul.mubr.bf16.vlgmr.msra.gmra.mrb[80].mxu0 %v6069_v11  ;;  %v1159_v11 = vld [vmem:[#allocation8 + $0x518] sm:$0xff] }
 0x2ee   :  { %3054 = vmatprep.mubr.bf16.mxu0 %v6084_v41  ;;  %3086 = vmatpush1.bf16.msra.mxu0 %v4839_v13  ;;  %v1163_v41 = vld [vmem:[#allocation8 + $0x538] sm:$0xff] }
 0x2ef   :  { %3087 = vmatprep.subr.bf16.mxu0 %v4848_v43  ;;  %4163 = vmatpush1.bf16.msra.mxu1 %v5440_v44  ;;  %v4872_v51 = vcombine.high %v1159_v11, %v1163_v41  ;;  %v4871_v23 = vcombine.low %v1159_v11, %v1163_v41  ;;  %v5461_v13 = vld [vmem:[#allocation10 + $0x70] ss:$8 sps:$4 sm:$0xff]  }
 0x2f0   :  { %4164 = vmatprep.subr.bf16.mxu1 %v5445_v54  ;;  %v1199_v43 = vld [vmem:[#allocation8 + $0x658] sm:$0xff] }
 0x2f1   :  { %v1203_v44 = vld [vmem:[#allocation8 + $0x678] sm:$0xff] }
 0x2f2   :  { %3088 = vmatpush1.bf16.msra.mxu0 %v4847_v59  ;;  %v5464_v59 = vld [vmem:[#allocation10 + $0x80] ss:$8 sps:$4 sm:$0xff]   ;;  %v4911_v58 = vcombine.low %v1199_v43, %v1203_v44  ;;  %v1215_v11 = vld [vmem:[#allocation8 + $0x6d8] sm:$0xff] }
 0x2f3   :  { %3089 = vmatprep.subr.bf16.mxu0 %v4856_v60  ;;  %4165 = vmatpush1.bf16.msra.mxu1 %v5443_v61  ;;  %v1207_v60 = vld [vmem:[#allocation8 + $0x698] sm:$0xff] }
 0x2f4   :  { %2982 = vmatmul.mubr.bf16.gmra.mrb[20].mxu1 %v6142_v49  ;;  %4166 = vmatprep.subr.bf16.mxu1 %v5448_v0  ;;  %v1211_v61 = vld [vmem:[#allocation8 + $0x6b8] sm:$0xff] }
 0x2f5   :  { %2991 = vmatprep.mubr.bf16.mxu1 %v6158_v9  ;;  %3055 = vmatmul.mubr.bf16.gmra.mrb[84].mxu0 %v6082_v38  ;;  %v1175_v38 = vld [vmem:[#allocation8 + $0x598] sm:$0xff] }
 0x2f6   :  { %3064 = vmatprep.mubr.bf16.mxu0 %v6094_v10  ;;  %3090 = vmatpush1.bf16.msra.mxu0 %v4855_v1  ;;  %v1179_v10 = vld [vmem:[#allocation8 + $0x5b8] sm:$0xff]  ;;  %v4920_v1 = vcombine.high %v1207_v60, %v1211_v61 }
 0x2f7   :  { %3091 = vmatprep.subr.bf16.mxu0 %v4864_v4  ;;  %4167 = vmatpush1.bf16.msra.mxu1 %v5446_v5  ;;  %v4888_v32 = vcombine.high %v1175_v38, %v1179_v10  ;;  %v5467_v5 = vld [vmem:[#allocation10 + $0x90] ss:$8 sps:$4 sm:$0xff]  }
 0x2f8   :  { %4168 = vmatprep.subr.bf16.mxu1 %v5451_v6  ;;  %v1219_v41 = vld [vmem:[#allocation8 + $0x6f8] sm:$0xff] }
 0x2f9   :  { %v4928_v17 = vcombine.high %v1215_v11, %v1219_v41 }
 0x2fa   :  { %3092 = vmatpush1.bf16.msra.mxu0 %v4863_v55  ;;  %v5472_v55 = vld [vmem:[#allocation10 + $0xa4] ss:$8 sps:$4 sm:$0xff]  }
 0x2fb   :  { %3093 = vmatprep.subr.bf16.mxu0 %v4872_v51  ;;  %4169 = vmatpush1.bf16.msra.mxu1 %v5449_v16  ;;  %v4919_v16 = vcombine.low %v1207_v60, %v1211_v61  ;;  %v5487_v60 = vld [vmem:[#allocation10 + $0xf4] ss:$8 sps:$4 sm:$0xff]  }
 0x2fc   :  { %2992 = vmatmul.mubr.bf16.gmra.mrb[24].mxu1 %v6156_v21  ;;  %4170 = vmatprep.subr.bf16.mxu1 %v5454_v22  ;;  %v1223_v22 = vld [vmem:[#allocation8 + $0x718] sm:$0xff] }
 0x2fd   :  { %3001 = vmatprep.mubr.bf16.mxu1 %v6172_v2  ;;  %3065 = vmatmul.mubr.bf16.gmra.mrb[88].mxu0 %v6092_v7  ;;  %v4887_v7 = vcombine.low %v1175_v38, %v1179_v10 }
 0x2fe   :  { %3074 = vmatprep.mubr.bf16.mxu0 %v6104_v39  ;;  %3094 = vmatpush1.bf16.msra.mxu0 %v4871_v23  ;;  %v6207_v27 = vpop.f32.mrb[48].mxu0  ;;  %v4896_v39 = vcombine.high %v1183_v15, %v1187_v53  ;;  %v1227_v23 = vld [vmem:[#allocation8 + $0x738] sm:$0xff]  ;;  %v5478_v53 = vld [vmem:[#allocation10 + $0xc4] ss:$8 sps:$4 sm:$0xff]  }
 0x2ff   :  { %3095 = vmatprep.subr.bf16.mxu0 %v4880_v24  ;;  %v6209_v30 = vpop.f32.mrb[49].mxu0  ;;  %4171 = vmatpush1.bf16.msra.mxu1 %v5452_v25  ;;  %v5475_v24 = vld [vmem:[#allocation10 + $0xb4] ss:$8 sps:$4 sm:$0xff]   ;;  %v4927_v25 = vcombine.low %v1215_v11, %v1219_v41  ;;  %v4936_v10 = vcombine.high %v1223_v22, %v1227_v23 }
 0x300   :  { %v6211_v33 = vpop.f32.mrb[50].mxu0  ;;  %4172 = vmatprep.subr.bf16.mxu1 %v5457_v26 }
 0x301   :  { %v6213_v3 = vpop.f32.mrb[51].mxu0 }
 0x302   :  { %3096 = vmatpush1.bf16.msra.mxu0 %v4879_v29  ;;  %v5473_v29 = vld [vmem:[#allocation10 + $0xb0] ss:$8 sps:$4 sm:$0xff]  }
 0x303   :  { %3097 = vmatprep.subr.bf16.mxu0 %v4888_v32  ;;  %4173 = vmatpush1.bf16.msra.mxu1 %v5455_v31  ;;  %v1231_v32 = vld [vmem:[#allocation8 + $0x758] sm:$0xff] }
 0x304   :  { %3002 = vmatmul.mubr.bf16.gmra.mrb[28].mxu1 %v6170_v63  ;;  %4174 = vmatprep.subr.bf16.mxu1 %v5460_v56  ;;  %v1235_v31 = vld [vmem:[#allocation8 + $0x778] sm:$0xff] }
 0x305   :  { %3075 = vmatmul.mubr.bf16.gmra.mrb[92].mxu0 %v6102_v36  ;;  %v4903_v36 = vcombine.low %v1191_v37, %v1195_v57  ;;  %v1239_v37 = vld [vmem:[#allocation8 + $0x798] sm:$0xff] }
 0x306   :  { %3098 = vmatpush1.bf16.msra.mxu0 %v4887_v7  ;;  %3117 = vmatprep.mubr.bf16.mxu0 %v6127_v62  ;;  %v6218_v14 = vpop.f32.mrb[52].mxu0  ;;  %v4912_v62 = vcombine.high %v1199_v43, %v1203_v44  ;;  %v4935_v7 = vcombine.low %v1223_v22, %v1227_v23  ;;  %v1243_v57 = vld [vmem:[#allocation8 + $0x7b8] sm:$0xff] }
 0x307   :  { %3099 = vmatprep.subr.bf16.mxu0 %v4896_v39  ;;  %v6220_v18 = vpop.f32.mrb[53].mxu0  ;;  %4175 = vmatpush1.bf16.msra.mxu1 %v5458_v34  ;;  %v4944_v39 = vcombine.high %v1231_v32, %v1235_v31  ;;  %v5476_v34 = vld [vmem:[#allocation10 + $0xc0] ss:$8 sps:$4 sm:$0xff]   ;;  %v1247_v43 = vld [vmem:[#allocation8 + $0x7d8] sm:$0xff] }
 0x308   :  { %v6222_v45 = vpop.f32.mrb[54].mxu0  ;;  %4176 = vmatprep.subr.bf16.mxu1 %v5463_v40  ;;  %v5481_v40 = vld [vmem:[#allocation10 + $0xd4] ss:$8 sps:$4 sm:$0xff]  }
 0x309   :  { %v6224_v54 = vpop.f32.mrb[55].mxu0  ;;  %v1251_v44 = vld [vmem:[#allocation8 + $0x7f8] sm:$0xff] }
 0x30a   :  { %3100 = vmatpush1.bf16.msra.mxu0 %v4895_v42  ;;  %v4943_v42 = vcombine.low %v1231_v32, %v1235_v31  ;;  %v4959_v61 = vcombine.low %v1247_v43, %v1251_v44 }
 0x30b   :  { %3101 = vmatprep.subr.bf16.mxu0 %v4904_v52  ;;  %4177 = vmatpush1.bf16.msra.mxu1 %v5461_v13  ;;  %v4952_v52 = vcombine.high %v1239_v37, %v1243_v57  ;;  %v5479_v13 = vld [vmem:[#allocation10 + $0xd0] ss:$8 sps:$4 sm:$0xff]  }
 0x30c   :  { %4178 = vmatprep.subr.bf16.mxu1 %v5466_v20  ;;  %v5484_v20 = vld [vmem:[#allocation10 + $0xe4] ss:$8 sps:$4 sm:$0xff]  }
 0x30e   :  { %3102 = vmatpush1.bf16.msra.mxu0 %v4903_v36  ;;  %v6226_v0 = vpop.f32.mrb[56].mxu0  ;;  %v4951_v36 = vcombine.low %v1239_v37, %v1243_v57  ;;  %v5488_v57 = vld [vmem:[#allocation10 + $0x100] ss:$8 sps:$4 sm:$0xff]  }
 0x30f   :  { %3103 = vmatprep.subr.bf16.mxu0 %v4912_v62  ;;  %v6228_v4 = vpop.f32.mrb[57].mxu0  ;;  %4179 = vmatpush1.bf16.msra.mxu1 %v5464_v59  ;;  %v4960_v62 = vcombine.high %v1247_v43, %v1251_v44  ;;  %v5482_v59 = vld [vmem:[#allocation10 + $0xe0] ss:$8 sps:$4 sm:$0xff]  }
 0x310   :  { %v6230_v6 = vpop.f32.mrb[58].mxu0  ;;  %4180 = vmatprep.subr.bf16.mxu1 %v5469_v28  ;;  %v5485_v28 = vld [vmem:[#allocation10 + $0xf0] ss:$8 sps:$4 sm:$0xff]  }
 0x311   :  { %v6232_v51 = vpop.f32.mrb[59].mxu0 }
 0x312   :  { %3104 = vmatpush1.bf16.msra.mxu0 %v4911_v58  ;;  %v5490_v58 = vld [vmem:[#allocation10 + $0x104] ss:$8 sps:$4 sm:$0xff]  }
 0x313   :  { %3105 = vmatprep.subr.bf16.mxu0 %v4920_v1  ;;  %4181 = vmatpush1.bf16.msra.mxu1 %v5467_v5  ;;  %v6248_v1 = vld [vmem:[%s6414_s6] sm:$0xff] }
 0x314   :  { %4182 = vmatprep.subr.bf16.mxu1 %v5472_v55  ;;  %v6253_v5 = vrot.slane %v6248_v1, %v5974_v48  ;;  %v6257_v11 = vrot.slane %v6248_v1, %v5980_v50 }
 0x316   :  { %3106 = vmatpush1.bf16.msra.mxu0 %v4919_v16  ;;  %v6234_v38 = vpop.f32.mrb[60].mxu0  ;;  %v2615_v16 = vadd.f32 %v6213_v3, %v6257_v11  ;;  %v2621_v3 = vadd.f32 %v6220_v18, %v6257_v11 }
 0x317   :  { %3107 = vmatprep.subr.bf16.mxu0 %v4928_v17  ;;  %v6236_v26 = vpop.f32.mrb[61].mxu0  ;;  %4183 = vmatpush1.bf16.msra.mxu1 %v5470_v19 }
 0x318   :  { %v6238_v15 = vpop.f32.mrb[62].mxu0  ;;  %4184 = vmatprep.subr.bf16.mxu1 %v5475_v24 }
 0x319   :  { %v6240_v56 = vpop.f32.mrb[63].mxu0 }
 0x31a   :  { %3108 = vmatpush1.bf16.msra.mxu0 %v4927_v25 }
 0x31b   :  { %3109 = vmatprep.subr.bf16.mxu0 %v4936_v10  ;;  %4185 = vmatpush1.bf16.msra.mxu1 %v5473_v29 }
 0x31c   :  { %4186 = vmatprep.subr.bf16.mxu1 %v5478_v53 }
 0x31e   :  { %3110 = vmatpush1.bf16.msra.mxu0 %v4935_v7  ;;  %v2623_v7 = vadd.f32 %v6222_v45, %v6253_v5 }
 0x31f   :  { %3111 = vmatprep.subr.bf16.mxu0 %v4944_v39  ;;  %4187 = vmatpush1.bf16.msra.mxu1 %v5476_v34 }
 0x320   :  { %4188 = vmatprep.subr.bf16.mxu1 %v5481_v40 }
 0x322   :  { %3112 = vmatpush1.bf16.msra.mxu0 %v4943_v42 }
 0x323   :  { %3113 = vmatprep.subr.bf16.mxu0 %v4952_v52  ;;  %4189 = vmatpush1.bf16.msra.mxu1 %v5479_v13 }
 0x324   :  { %4190 = vmatprep.subr.bf16.mxu1 %v5484_v20  ;;  %v5491_v20 = vld [vmem:[#allocation10 + $0x110] ss:$8 sps:$4 sm:$0xff]  }
 0x326   :  { %3114 = vmatpush1.bf16.msra.mxu0 %v4951_v36 }
 0x327   :  { %3115 = vmatprep.subr.bf16.mxu0 %v4960_v62  ;;  %4191 = vmatpush1.bf16.msra.mxu1 %v5482_v59  ;;  %v2629_v62 = vadd.f32 %v6226_v0, %v6253_v5  ;;  %v2635_v0 = vadd.f32 %v6232_v51, %v6257_v11  ;;  %v5502_v51 = vld [vmem:[#allocation10 + $0x144] ss:$8 sps:$4 sm:$0xff]  }
 0x328   :  { %4192 = vmatprep.subr.bf16.mxu1 %v5487_v60 }
 0x32a   :  { %3116 = vmatpush1.bf16.msra.mxu0 %v4959_v61  ;;  %v2631_v61 = vadd.f32 %v6228_v4, %v6257_v11 }
 0x32b   :  { %4193 = vmatpush1.bf16.msra.mxu1 %v5485_v28 }
 0x32c   :  { %4235 = vmatprep.subr.bf16.mxu1 %v5490_v58 }
 0x32d   :  { %3118 = vmatmul.mubr.bf16.vlgmr.msra.gmra.mrb[80].mxu0 %v6125_v46  ;;  %v2609_v46 = vadd.f32 %v6207_v27, %v6253_v5 }
 0x32e   :  { %3127 = vmatprep.mubr.bf16.mxu0 %v6144_v35 }
 0x335   :  { %3128 = vmatmul.mubr.bf16.gmra.mrb[84].mxu0 %v6142_v49  ;;  %v2611_v49 = vadd.f32 %v6209_v30, %v6257_v11 }
 0x336   :  { %3137 = vmatprep.mubr.bf16.mxu0 %v6158_v9  ;;  %v2613_v9 = vadd.f32 %v6211_v33, %v6253_v5  ;;  %v2619_v33 = vadd.f32 %v6218_v14, %v6253_v5  ;;  %v2625_v14 = vadd.f32 %v6224_v54, %v6257_v11  ;;  %v5496_v54 = vld [vmem:[#allocation10 + $0x124] ss:$8 sps:$4 sm:$0xff]  }
 0x33d   :  { %3138 = vmatmul.mubr.bf16.gmra.mrb[88].mxu0 %v6156_v21 }
 0x33e   :  { %3147 = vmatprep.mubr.bf16.mxu0 %v6172_v2  ;;  %v2681_v35 = vpop.f32.mrb[0].mxu1 }
 0x33f   :  { %v2682_v41 = vadd.f32 %v2681_v35, %v2609_v46  ;;  %v2683_v55 = vpop.f32.mrb[1].mxu1  ;;  %v2633_v35 = vadd.f32 %v6230_v6, %v6253_v5 }
 0x340   :  { %v2684_v17 = vadd.f32 %v2683_v55, %v2611_v49  ;;  %v2685_v19 = vpop.f32.mrb[2].mxu1 }
 0x341   :  { %v3222_v22 = vmul.f32 0.2, %v2682_v41  ;;  %v2686_v27 = vadd.f32 %v2685_v19, %v2613_v9  ;;  %v2687_v23 = vpop.f32.mrb[3].mxu1  ;;  %vm3158_vm1 = vcmp.gt.f32.partialorder %v2682_v41, 0.0 }
 0x342   :  { %v3223_v21 = vmul.f32 0.2, %v2684_v17  ;;  %v2688_v24 = vadd.f32 %v2687_v23, %v2615_v16  ;;  %vm3159_vm2 = vcmp.gt.f32.partialorder %v2684_v17, 0.0  ;;  %v5494_v16 = vld [vmem:[#allocation10 + $0x120] ss:$8 sps:$4 sm:$0xff]  }
 0x343   :  { %vm3166_vm3 = vcmp.gt.f32.partialorder %v2686_v27, 0.0  ;;  %v3230_v2 = vmul.f32 0.2, %v2686_v27  ;;  %v3286_v25 = vsel %vm3158_vm1, %v2682_v41, %v3222_v22  ;;  %v5499_v22 = vld [vmem:[#allocation10 + $0x134] ss:$8 sps:$4 sm:$0xff]  }
 0x344   :  { %vm3167_vm4 = vcmp.gt.f32.partialorder %v2688_v24, 0.0  ;;  %v3231_v30 = vmul.f32 0.2, %v2688_v24  ;;  %v3287_v31 = vsel %vm3159_vm2, %v2684_v17, %v3223_v21 }
 0x345   :  { %v3294_v10 = vsel %vm3166_vm3, %v2686_v27, %v3230_v2  ;;  %3148 = vmatmul.mubr.bf16.gmra.mrb[92].mxu0 %v6170_v63  ;;  %v5493_v63 = vld [vmem:[#allocation10 + $0x114] ss:$8 sps:$4 sm:$0xff]   ;;  %v5497_v2 = vld [vmem:[#allocation10 + $0x130] ss:$8 sps:$4 sm:$0xff]  }
 0x346   :  { %v3350_v29 = vpack.c.bf16 %v3294_v10, %v3286_v25  ;;  %v2691_v32 = vpop.f32.mrb[4].mxu1  ;;  %v3295_v53 = vsel %vm3167_vm4, %v2688_v24, %v3231_v30 }
 0x347   :  { %v2692_v39 = vadd.f32 %v2691_v32, %v2619_v33  ;;  %v2693_v34 = vpop.f32.mrb[5].mxu1  ;;  %v3351_v37 = vpack.c.bf16 %v3295_v53, %v3287_v31  ;;  %v2639_v33 = vadd.f32 %v6234_v38, %v6253_v5  ;;  %v2645_v38 = vadd.f32 %v6240_v56, %v6257_v11  ;;  %v5508_v56 = vld [vmem:[#allocation10 + $0x164] ss:$8 sps:$4 sm:$0xff]  }
 0x348   :  { %v2694_v40 = vadd.f32 %v2693_v34, %v2621_v3  ;;  %v2695_v42 = vpop.f32.mrb[6].mxu1  ;;  %v2641_v3 = vadd.f32 %v6236_v26, %v6257_v11 }
 0x349   :  { %v3238_v52 = vmul.f32 0.2, %v2692_v39  ;;  %v2696_v13 = vadd.f32 %v2695_v42, %v2623_v7  ;;  %v2697_v18 = vpop.f32.mrb[7].mxu1  ;;  %4194 = vmatprep.mubr.bf16.mxu1 %v3351_v37  ;;  %vm3174_vm5 = vcmp.gt.f32.partialorder %v2692_v39, 0.0  ;;  %v2643_v7 = vadd.f32 %v6238_v15, %v6253_v5  ;;  %v5505_v42 = vld [vmem:[#allocation10 + $0x154] ss:$8 sps:$4 sm:$0xff]  }
 0x34a   :  { %v3239_v43 = vmul.f32 0.2, %v2694_v40  ;;  %v2698_v44 = vadd.f32 %v2697_v18, %v2625_v14  ;;  %4195 = vmatmul.mubr.bf16.vlgmr.msra.gmra.mrb[32].mxu1 %v3350_v29  ;;  %vm3175_vm6 = vcmp.gt.f32.partialorder %v2694_v40, 0.0  ;;  %v5503_v5 = vld [vmem:[#allocation10 + $0x150] ss:$8 sps:$4 sm:$0xff]  }
 0x34b   :  { %vm3182_vm7 = vcmp.gt.f32.partialorder %v2696_v13, 0.0  ;;  %v3246_v45 = vmul.f32 0.2, %v2696_v13  ;;  %4236 = vmatpush1.bf16.msra.mxu1 %v5488_v57  ;;  %v3302_v59 = vsel %vm3174_vm5, %v2692_v39, %v3238_v52  ;;  %v5500_v57 = vld [vmem:[#allocation10 + $0x140] ss:$8 sps:$4 sm:$0xff]  }
 0x34c   :  { %vm3183_vm8 = vcmp.gt.f32.partialorder %v2698_v44, 0.0  ;;  %v3247_v36 = vmul.f32 0.2, %v2698_v44  ;;  %4237 = vmatprep.subr.bf16.mxu1 %v5493_v63  ;;  %v3303_v58 = vsel %vm3175_vm6, %v2694_v40, %v3239_v43 }
 0x34d   :  { %v3310_v60 = vsel %vm3182_vm7, %v2696_v13, %v3246_v45 }
 0x34e   :  { %v2701_v28 = vpop.f32.mrb[8].mxu1  ;;  %v3311_v46 = vsel %vm3183_vm8, %v2698_v44, %v3247_v36  ;;  %v3358_v49 = vpack.c.bf16 %v3310_v60, %v3302_v59  ;;  %v5511_v59 = vld [vmem:[#allocation10 + $0x174] ss:$8 sps:$4 sm:$0xff]   ;;  %v5509_v60 = vld [vmem:[#allocation10 + $0x170] ss:$8 sps:$4 sm:$0xff]  }
 0x34f   :  { %v2702_v9 = vadd.f32 %v2701_v28, %v2629_v62  ;;  %4238 = vmatpush1.bf16.msra.mxu1 %v5491_v20  ;;  %v2703_v41 = vpop.f32.mrb[9].mxu1  ;;  %v3359_v55 = vpack.c.bf16 %v3311_v46, %v3303_v58  ;;  %v5506_v62 = vld [vmem:[#allocation10 + $0x160] ss:$8 sps:$4 sm:$0xff]   ;;  %v5517_v58 = vld [vmem:[#allocation10 + $0x194] ss:$8 sps:$4 sm:$0xff]  }
 0x350   :  { %v2704_v17 = vadd.f32 %v2703_v41, %v2631_v61  ;;  %v2705_v19 = vpop.f32.mrb[10].mxu1  ;;  %4239 = vmatprep.subr.bf16.mxu1 %v5496_v54  ;;  %v5514_v61 = vld [vmem:[#allocation10 + $0x184] ss:$8 sps:$4 sm:$0xff]   ;;  %v5512_v28 = vld [vmem:[#allocation10 + $0x180] ss:$8 sps:$4 sm:$0xff]  }
 0x351   :  { %v3254_v4 = vmul.f32 0.2, %v2702_v9  ;;  %v2706_v27 = vadd.f32 %v2705_v19, %v2633_v35  ;;  %v2707_v23 = vpop.f32.mrb[11].mxu1  ;;  %4204 = vmatprep.mubr.bf16.mxu1 %v3359_v55  ;;  %vm3190_vm9 = vcmp.gt.f32.partialorder %v2702_v9, 0.0  ;;  %v5515_v46 = vld [vmem:[#allocation10 + $0x190] ss:$8 sps:$4 sm:$0xff]   ;;  %v6297_v19 = vrot.slane %v6248_v1, %v408_v8 }
 0x352   :  { %v3255_v21 = vmul.f32 0.2, %v2704_v17  ;;  %v2708_v24 = vadd.f32 %v2707_v23, %v2635_v0  ;;  %4205 = vmatmul.mubr.bf16.gmra.mrb[36].mxu1 %v3358_v49  ;;  %vm3191_vm10 = vcmp.gt.f32.partialorder %v2704_v17, 0.0  ;;  %v5520_v49 = vld [vmem:[#allocation10 + $0x1a4] ss:$8 sps:$4 sm:$0xff]  }
 0x353   :  { %vm3198_vm11 = vcmp.gt.f32.partialorder %v2706_v27, 0.0  ;;  %v3262_v6 = vmul.f32 0.2, %v2706_v27  ;;  %4240 = vmatpush1.bf16.msra.mxu1 %v5494_v16  ;;  %v3318_v25 = vsel %vm3190_vm9, %v2702_v9, %v3254_v4  ;;  %v5518_v35 = vld [vmem:[#allocation10 + $0x1a0] ss:$8 sps:$4 sm:$0xff]   ;;  %v6302_v4 = vrot.slane %v6248_v1, %v412_v12 }
 0x354   :  { %vm3199_vm12 = vcmp.gt.f32.partialorder %v2708_v24, 0.0  ;;  %v3263_v30 = vmul.f32 0.2, %v2708_v24  ;;  %4241 = vmatprep.subr.bf16.mxu1 %v5499_v22  ;;  %v3319_v32 = vsel %vm3191_vm10, %v2704_v17, %v3255_v21  ;;  %v5523_v9 = vld [vmem:[#allocation10 + $0x1b4] ss:$8 sps:$4 sm:$0xff]  }
 0x355   :  { %v3326_v10 = vsel %vm3198_vm11, %v2706_v27, %v3262_v6  ;;  %v5521_v41 = vld [vmem:[#allocation10 + $0x1b0] ss:$8 sps:$4 sm:$0xff]   ;;  %v5526_v55 = vld [vmem:[#allocation10 + $0x1c4] ss:$8 sps:$4 sm:$0xff]   ;;  %v5524_v16 = vld [vmem:[#allocation10 + $0x1c0] ss:$8 sps:$4 sm:$0xff]  }
 0x356   :  { %v2711_v29 = vpop.f32.mrb[12].mxu1  ;;  %v3327_v31 = vsel %vm3199_vm12, %v2708_v24, %v3263_v30  ;;  %v3366_v53 = vpack.c.bf16 %v3326_v10, %v3318_v25  ;;  %v5529_v0 = vld [vmem:[#allocation10 + $0x1d4] ss:$8 sps:$4 sm:$0xff]   ;;  %v5527_v17 = vld [vmem:[#allocation10 + $0x1d0] ss:$8 sps:$4 sm:$0xff]  }
 0x357   :  { %v2712_v39 = vadd.f32 %v2711_v29, %v2639_v33  ;;  %4242 = vmatpush1.bf16.msra.mxu1 %v5497_v2  ;;  %v2713_v34 = vpop.f32.mrb[13].mxu1  ;;  %v3367_v37 = vpack.c.bf16 %v3327_v31, %v3319_v32  ;;  %v5532_v22 = vld [vmem:[#allocation10 + $0x1e4] ss:$8 sps:$4 sm:$0xff]   ;;  %v5530_v23 = vld [vmem:[#allocation10 + $0x1e0] ss:$8 sps:$4 sm:$0xff]  }
 0x358   :  { %v2714_v14 = vadd.f32 %v2713_v34, %v2641_v3  ;;  %v2715_v40 = vpop.f32.mrb[14].mxu1  ;;  %4243 = vmatprep.subr.bf16.mxu1 %v5502_v51  ;;  %v5535_v6 = vld [vmem:[#allocation10 + $0x1f4] ss:$8 sps:$4 sm:$0xff]   ;;  %v5533_v10 = vld [vmem:[#allocation10 + $0x1f0] ss:$8 sps:$4 sm:$0xff]  }
 0x359   :  { %v3270_v26 = vmul.f32 0.2, %v2712_v39  ;;  %v2716_v63 = vadd.f32 %v2715_v40, %v2643_v7  ;;  %v2717_v52 = vpop.f32.mrb[15].mxu1  ;;  %4214 = vmatprep.mubr.bf16.mxu1 %v3367_v37  ;;  %vm3206_vm13 = vcmp.gt.f32.partialorder %v2712_v39, 0.0  ;;  %v5538_v29 = vld [vmem:[#allocation10 + $0x204] ss:$8 sps:$4 sm:$0xff]  }
 0x35a   :  { %v3271_v13 = vmul.f32 0.2, %v2714_v14  ;;  %v2718_v18 = vadd.f32 %v2717_v52, %v2645_v38  ;;  %4215 = vmatmul.mubr.bf16.gmra.mrb[40].mxu1 %v3366_v53  ;;  %vm3207_vm14 = vcmp.gt.f32.partialorder %v2714_v14, 0.0  ;;  %v5536_v40 = vld [vmem:[#allocation10 + $0x200] ss:$8 sps:$4 sm:$0xff]  }
 0x35b   :  { %vm3214_vm15 = vcmp.gt.f32.partialorder %v2716_v63, 0.0  ;;  %v3278_v15 = vmul.f32 0.2, %v2716_v63  ;;  %4244 = vmatpush1.bf16.msra.mxu1 %v5500_v57  ;;  %v3334_v11 = vsel %vm3206_vm13, %v2712_v39, %v3270_v26 }
 0x35c   :  { %vm3215_vm0 = vcmp.gt.f32.partialorder %v2718_v18, 0.0  ;;  %v3279_v43 = vmul.f32 0.2, %v2718_v18  ;;  %4245 = vmatprep.subr.bf16.mxu1 %v5505_v42  ;;  %v3335_v45 = vsel %vm3207_vm14, %v2714_v14, %v3271_v13 }
 0x35d   :  { %v3342_v44 = vsel %vm3214_vm15, %v2716_v63, %v3278_v15  ;;  %v5541_v63 = vld [vmem:[#allocation10 + $0x214] ss:$8 sps:$4 sm:$0xff]  }
 0x35e   :  { %v3343_v20 = vsel %vm3215_vm0, %v2718_v18, %v3279_v43  ;;  %v3374_v36 = vpack.c.bf16 %v3342_v44, %v3334_v11  ;;  %v5544_v44 = vld [vmem:[#allocation10 + $0x224] ss:$8 sps:$4 sm:$0xff]  }
 0x35f   :  { %4246 = vmatpush1.bf16.msra.mxu1 %v5503_v5  ;;  %v3375_v54 = vpack.c.bf16 %v3343_v20, %v3335_v45 }
 0x360   :  { %4247 = vmatprep.subr.bf16.mxu1 %v5508_v56  ;;  %v5539_v56 = vld [vmem:[#allocation10 + $0x210] ss:$8 sps:$4 sm:$0xff]  }
 0x361   :  { %4224 = vmatprep.mubr.bf16.mxu1 %v3375_v54 }
 0x362   :  { %4225 = vmatmul.mubr.bf16.gmra.mrb[44].mxu1 %v3374_v36 }
 0x363   :  { %4248 = vmatpush1.bf16.msra.mxu1 %v5506_v62 }
 0x364   :  { %4249 = vmatprep.subr.bf16.mxu1 %v5511_v59 }
 0x367   :  { %4250 = vmatpush1.bf16.msra.mxu1 %v5509_v60 }
 0x368   :  { %4251 = vmatprep.subr.bf16.mxu1 %v5514_v61 }
 0x36b   :  { %4252 = vmatpush1.bf16.msra.mxu1 %v5512_v28 }
 0x36c   :  { %4253 = vmatprep.subr.bf16.mxu1 %v5517_v58  ;;  %v5542_v58 = vld [vmem:[#allocation10 + $0x220] ss:$8 sps:$4 sm:$0xff]  }
 0x36f   :  { %4254 = vmatpush1.bf16.msra.mxu1 %v5515_v46 }
 0x370   :  { %4255 = vmatprep.subr.bf16.mxu1 %v5520_v49 }
 0x373   :  { %4256 = vmatpush1.bf16.msra.mxu1 %v5518_v35  ;;  %v5547_v35 = vld [vmem:[#allocation10 + $0x234] ss:$8 sps:$4 sm:$0xff]  }
 0x374   :  { %4257 = vmatprep.subr.bf16.mxu1 %v5523_v9 }
 0x377   :  { %4258 = vmatpush1.bf16.msra.mxu1 %v5521_v41 }
 0x378   :  { %4259 = vmatprep.subr.bf16.mxu1 %v5526_v55 }
 0x37b   :  { %4260 = vmatpush1.bf16.msra.mxu1 %v5524_v16 }
 0x37c   :  { %4261 = vmatprep.subr.bf16.mxu1 %v5529_v0 }
 0x37f   :  { %v2827_v27 = vpop.f32.mrb[64].mxu0  ;;  %4262 = vmatpush1.bf16.msra.mxu1 %v5527_v17 }
 0x380   :  { %v5153_v21 = vadd.f32 %v2827_v27, %v6297_v19  ;;  %v2829_v24 = vpop.f32.mrb[65].mxu0  ;;  %4263 = vmatprep.subr.bf16.mxu1 %v5532_v22  ;;  %v5545_v22 = vld [vmem:[#allocation10 + $0x230] ss:$8 sps:$4 sm:$0xff]  }
 0x381   :  { %v5154_v2 = vadd.f32 %v2829_v24, %v6302_v4  ;;  %v2831_v30 = vpop.f32.mrb[66].mxu0 }
 0x382   :  { %v3224_v51 = vmul.f32 0.2, %v5153_v21  ;;  %v5155_v8 = vadd.f32 %v2831_v30, %v6297_v19  ;;  %v2833_v33 = vpop.f32.mrb[67].mxu0  ;;  %vm3160_vm1 = vcmp.gt.f32.partialorder %v5153_v21, 0.0 }
 0x383   :  { %v3225_v25 = vmul.f32 0.2, %v5154_v2  ;;  %v5156_v12 = vadd.f32 %v2833_v33, %v6302_v4  ;;  %4264 = vmatpush1.bf16.msra.mxu1 %v5530_v23  ;;  %vm3161_vm2 = vcmp.gt.f32.partialorder %v5154_v2, 0.0  ;;  %v5550_v23 = vld [vmem:[#allocation10 + $0x244] ss:$8 sps:$4 sm:$0xff]  }
 0x384   :  { %vm3168_vm3 = vcmp.gt.f32.partialorder %v5155_v8, 0.0  ;;  %v3232_v3 = vmul.f32 0.2, %v5155_v8  ;;  %4265 = vmatprep.subr.bf16.mxu1 %v5535_v6  ;;  %v3288_v31 = vsel %vm3160_vm1, %v5153_v21, %v3224_v51 }
 0x385   :  { %vm3169_vm4 = vcmp.gt.f32.partialorder %v5156_v12, 0.0  ;;  %v3233_v32 = vmul.f32 0.2, %v5156_v12  ;;  %v3289_v34 = vsel %vm3161_vm2, %v5154_v2, %v3225_v25 }
 0x386   :  { %v3296_v53 = vsel %vm3168_vm3, %v5155_v8, %v3232_v3 }
 0x387   :  { %v3352_v7 = vpack.c.bf16 %v3296_v53, %v3288_v31  ;;  %v2837_v39 = vpop.f32.mrb[68].mxu0  ;;  %4266 = vmatpush1.bf16.msra.mxu1 %v5533_v10  ;;  %v3297_v37 = vsel %vm3169_vm4, %v5156_v12, %v3233_v32  ;;  %v5548_v12 = vld [vmem:[#allocation10 + $0x240] ss:$8 sps:$4 sm:$0xff]  }
 0x388   :  { %v5157_v57 = vadd.f32 %v2837_v39, %v6297_v19  ;;  %v2839_v38 = vpop.f32.mrb[69].mxu0  ;;  %v3353_v14 = vpack.c.bf16 %v3297_v37, %v3289_v34  ;;  %4308 = vmatprep.subr.bf16.mxu1 %v5538_v29  ;;  %v5553_v29 = vld [vmem:[#allocation10 + $0x254] ss:$8 sps:$4 sm:$0xff]   ;;  %v5551_v37 = vld [vmem:[#allocation10 + $0x250] ss:$8 sps:$4 sm:$0xff]  }
 0x389   :  { %v5158_v42 = vadd.f32 %v2839_v38, %v6302_v4  ;;  %v2841_v26 = vpop.f32.mrb[70].mxu0  ;;  %v5556_v38 = vld [vmem:[#allocation10 + $0x264] ss:$8 sps:$4 sm:$0xff]  }
 0x38a   :  { %v3240_v52 = vmul.f32 0.2, %v5157_v57  ;;  %v5159_v13 = vadd.f32 %v2841_v26, %v6297_v19  ;;  %v2843_v18 = vpop.f32.mrb[71].mxu0  ;;  %4267 = vmatprep.mubr.bf16.mxu1 %v3353_v14  ;;  %vm3176_vm5 = vcmp.gt.f32.partialorder %v5157_v57, 0.0 }
 0x38b   :  { %v3241_v15 = vmul.f32 0.2, %v5158_v42  ;;  %v5160_v5 = vadd.f32 %v2843_v18, %v6302_v4  ;;  %4268 = vmatmul.mubr.bf16.vlgmr.msra.gmra.mrb[32].mxu1 %v3352_v7  ;;  %vm3177_vm6 = vcmp.gt.f32.partialorder %v5158_v42, 0.0  ;;  %v5562_v18 = vld [vmem:[#allocation10 + $0x284] ss:$8 sps:$4 sm:$0xff]  }
 0x38c   :  { %vm3184_vm7 = vcmp.gt.f32.partialorder %v5159_v13, 0.0  ;;  %v3248_v43 = vmul.f32 0.2, %v5159_v13  ;;  %4309 = vmatpush1.bf16.msra.mxu1 %v5536_v40  ;;  %v3304_v45 = vsel %vm3176_vm5, %v5157_v57, %v3240_v52  ;;  %v5554_v52 = vld [vmem:[#allocation10 + $0x260] ss:$8 sps:$4 sm:$0xff]  }
 0x38d   :  { %vm3185_vm8 = vcmp.gt.f32.partialorder %v5160_v5, 0.0  ;;  %v3249_v11 = vmul.f32 0.2, %v5160_v5  ;;  %4310 = vmatprep.subr.bf16.mxu1 %v5541_v63  ;;  %v3305_v54 = vsel %vm3177_vm6, %v5158_v42, %v3241_v15  ;;  %v5560_v15 = vld [vmem:[#allocation10 + $0x280] ss:$8 sps:$4 sm:$0xff]  }
 0x38e   :  { %v3312_v20 = vsel %vm3184_vm7, %v5159_v13, %v3248_v43  ;;  %v5557_v13 = vld [vmem:[#allocation10 + $0x270] ss:$8 sps:$4 sm:$0xff]  }
 0x38f   :  { %v2847_v36 = vpop.f32.mrb[72].mxu0  ;;  %v3313_v62 = vsel %vm3185_vm8, %v5160_v5, %v3249_v11  ;;  %v3360_v59 = vpack.c.bf16 %v3312_v20, %v3304_v45  ;;  %v5565_v5 = vld [vmem:[#allocation10 + $0x294] ss:$8 sps:$4 sm:$0xff]   ;;  %v5563_v43 = vld [vmem:[#allocation10 + $0x290] ss:$8 sps:$4 sm:$0xff]  }
 0x390   :  { %v5161_v60 = vadd.f32 %v2847_v36, %v6297_v19  ;;  %4311 = vmatpush1.bf16.msra.mxu1 %v5539_v56  ;;  %v2849_v61 = vpop.f32.mrb[73].mxu0  ;;  %v3361_v28 = vpack.c.bf16 %v3313_v62, %v3305_v54  ;;  %v5568_v56 = vld [vmem:[#allocation10 + $0x2a4] ss:$8 sps:$4 sm:$0xff]   ;;  %v5566_v11 = vld [vmem:[#allocation10 + $0x2a0] ss:$8 sps:$4 sm:$0xff]   ;;  %v1272_v54 = vsub.s32 4, %v5971_v47 }
 0x391   :  { %v5162_v46 = vadd.f32 %v2849_v61, %v6302_v4  ;;  %v2851_v49 = vpop.f32.mrb[74].mxu0  ;;  %4312 = vmatprep.subr.bf16.mxu1 %v5544_v44  ;;  %v5571_v44 = vld [vmem:[#allocation10 + $0x2b4] ss:$8 sps:$4 sm:$0xff]   ;;  %v5569_v45 = vld [vmem:[#allocation10 + $0x2b0] ss:$8 sps:$4 sm:$0xff]  }
 0x392   :  { %v3256_v9 = vmul.f32 0.2, %v5161_v60  ;;  %v5163_v41 = vadd.f32 %v2851_v49, %v6297_v19  ;;  %v2853_v55 = vpop.f32.mrb[75].mxu0  ;;  %4277 = vmatprep.mubr.bf16.mxu1 %v3361_v28  ;;  %vm3192_vm9 = vcmp.gt.f32.partialorder %v5161_v60, 0.0  ;;  %v5574_v20 = vld [vmem:[#allocation10 + $0x2c4] ss:$8 sps:$4 sm:$0xff]  }
 0x393   :  { %v3257_v16 = vmul.f32 0.2, %v5162_v46  ;;  %v5164_v0 = vadd.f32 %v2853_v55, %v6302_v4  ;;  %4278 = vmatmul.mubr.bf16.gmra.mrb[36].mxu1 %v3360_v59  ;;  %vm3193_vm10 = vcmp.gt.f32.partialorder %v5162_v46, 0.0  ;;  %v5572_v36 = vld [vmem:[#allocation10 + $0x2c0] ss:$8 sps:$4 sm:$0xff]   ;;  %v1276_v59 = vsub.s32 5, %v5971_v47 }
 0x394   :  { %vm3200_vm11 = vcmp.gt.f32.partialorder %v5163_v41, 0.0  ;;  %v3264_v17 = vmul.f32 0.2, %v5163_v41  ;;  %4313 = vmatpush1.bf16.msra.mxu1 %v5542_v58  ;;  %v3320_v21 = vsel %vm3192_vm9, %v5161_v60, %v3256_v9  ;;  %v5577_v62 = vld [vmem:[#allocation10 + $0x2d4] ss:$8 sps:$4 sm:$0xff]   ;;  %v6323_v60 = vrot.slane %v6248_v1, %v1272_v54 }
 0x395   :  { %vm3201_vm12 = vcmp.gt.f32.partialorder %v5164_v0, 0.0  ;;  %v3265_v27 = vmul.f32 0.2, %v5164_v0  ;;  %4314 = vmatprep.subr.bf16.mxu1 %v5547_v35  ;;  %v3321_v2 = vsel %vm3193_vm10, %v5162_v46, %v3257_v16  ;;  %v5575_v61 = vld [vmem:[#allocation10 + $0x2d0] ss:$8 sps:$4 sm:$0xff]   ;;  %v6326_v28 = vrot.slane %v6248_v1, %v1276_v59 }
 0x396   :  { %v3328_v24 = vsel %vm3200_vm11, %v5163_v41, %v3264_v17  ;;  %v5580_v58 = vld [vmem:[#allocation10 + $0x2e4] ss:$8 sps:$4 sm:$0xff]   ;;  %v5578_v9 = vld [vmem:[#allocation10 + $0x2e0] ss:$8 sps:$4 sm:$0xff]   ;;  %v5583_v16 = vld [vmem:[#allocation10 + $0x2f4] ss:$8 sps:$4 sm:$0xff]  }
 0x397   :  { %v2857_v6 = vpop.f32.mrb[76].mxu0  ;;  %v3329_v30 = vsel %vm3201_vm12, %v5164_v0, %v3265_v27  ;;  %v3368_v51 = vpack.c.bf16 %v3328_v24, %v3320_v21  ;;  %v5581_v24 = vld [vmem:[#allocation10 + $0x2f0] ss:$8 sps:$4 sm:$0xff]  }
 0x398   :  { %v5165_v8 = vadd.f32 %v2857_v6, %v6297_v19  ;;  %4315 = vmatpush1.bf16.msra.mxu1 %v5545_v22  ;;  %v2859_v33 = vpop.f32.mrb[77].mxu0  ;;  %v3369_v25 = vpack.c.bf16 %v3329_v30, %v3321_v2  ;;  %v5586_v2 = vld [vmem:[#allocation10 + $0x304] ss:$8 sps:$4 sm:$0xff]  }
 0x399   :  { %v5166_v10 = vadd.f32 %v2859_v33, %v6302_v4  ;;  %v2861_v3 = vpop.f32.mrb[78].mxu0  ;;  %4316 = vmatprep.subr.bf16.mxu1 %v5550_v23 }
 0x39a   :  { %v3272_v32 = vmul.f32 0.2, %v5165_v8  ;;  %v5167_v31 = vadd.f32 %v2861_v3, %v6297_v19  ;;  %v2863_v53 = vpop.f32.mrb[79].mxu0  ;;  %4287 = vmatprep.mubr.bf16.mxu1 %v3369_v25  ;;  %vm3208_vm13 = vcmp.gt.f32.partialorder %v5165_v8, 0.0 }
 0x39b   :  { %v3273_v7 = vmul.f32 0.2, %v5166_v10  ;;  %v5168_v39 = vadd.f32 %v2863_v53, %v6302_v4  ;;  %4288 = vmatmul.mubr.bf16.gmra.mrb[40].mxu1 %v3368_v51  ;;  %vm3209_vm14 = vcmp.gt.f32.partialorder %v5166_v10, 0.0  ;;  %v5559_v4 = vld [vmem:[#allocation10 + $0x274] ss:$8 sps:$4 sm:$0xff]  }
 0x39c   :  { %vm3216_vm15 = vcmp.gt.f32.partialorder %v5167_v31, 0.0  ;;  %v3280_v34 = vmul.f32 0.2, %v5167_v31  ;;  %4317 = vmatpush1.bf16.msra.mxu1 %v5548_v12  ;;  %v3336_v14 = vsel %vm3208_vm13, %v5165_v8, %v3272_v32  ;;  %v5584_v32 = vld [vmem:[#allocation10 + $0x300] ss:$8 sps:$4 sm:$0xff]  }
 0x39d   :  { %vm3217_vm0 = vcmp.gt.f32.partialorder %v5168_v39, 0.0  ;;  %v3281_v57 = vmul.f32 0.2, %v5168_v39  ;;  %4318 = vmatprep.subr.bf16.mxu1 %v5553_v29  ;;  %v3337_v42 = vsel %vm3209_vm14, %v5166_v10, %v3273_v7  ;;  %v5589_v7 = vld [vmem:[#allocation10 + $0x314] ss:$8 sps:$4 sm:$0xff]  }
 0x39e   :  { %v3344_v40 = vsel %vm3216_vm15, %v5167_v31, %v3280_v34 }
 0x39f   :  { %v3345_v19 = vsel %vm3217_vm0, %v5168_v39, %v3281_v57  ;;  %v3376_v26 = vpack.c.bf16 %v3344_v40, %v3336_v14  ;;  %v5587_v40 = vld [vmem:[#allocation10 + $0x310] ss:$8 sps:$4 sm:$0xff]  }
 0x3a0   :  { %4319 = vmatpush1.bf16.msra.mxu1 %v5551_v37  ;;  %v3377_v63 = vpack.c.bf16 %v3345_v19, %v3337_v42  ;;  %v5592_v19 = vld [vmem:[#allocation10 + $0x324] ss:$8 sps:$4 sm:$0xff]  }
 0x3a1   :  { %4320 = vmatprep.subr.bf16.mxu1 %v5556_v38 }
 0x3a2   :  { %4297 = vmatprep.mubr.bf16.mxu1 %v3377_v63 }
 0x3a3   :  { %4298 = vmatmul.mubr.bf16.gmra.mrb[44].mxu1 %v3376_v26 }
 0x3a4   :  { %4321 = vmatpush1.bf16.msra.mxu1 %v5554_v52 }
 0x3a5   :  { %4322 = vmatprep.subr.bf16.mxu1 %v5559_v4 }
 0x3a8   :  { %4323 = vmatpush1.bf16.msra.mxu1 %v5557_v13 }
 0x3a9   :  { %4324 = vmatprep.subr.bf16.mxu1 %v5562_v18 }
 0x3ac   :  { %4325 = vmatpush1.bf16.msra.mxu1 %v5560_v15 }
 0x3ad   :  { %4326 = vmatprep.subr.bf16.mxu1 %v5565_v5 }
 0x3b0   :  { %4327 = vmatpush1.bf16.msra.mxu1 %v5563_v43 }
 0x3b1   :  { %4328 = vmatprep.subr.bf16.mxu1 %v5568_v56  ;;  %v5590_v56 = vld [vmem:[#allocation10 + $0x320] ss:$8 sps:$4 sm:$0xff]  }
 0x3b4   :  { %4329 = vmatpush1.bf16.msra.mxu1 %v5566_v11 }
 0x3b5   :  { %4330 = vmatprep.subr.bf16.mxu1 %v5571_v44 }
 0x3b8   :  { %4331 = vmatpush1.bf16.msra.mxu1 %v5569_v45  ;;  %v5595_v45 = vld [vmem:[#allocation10 + $0x334] ss:$8 sps:$4 sm:$0xff]  }
 0x3b9   :  { %4332 = vmatprep.subr.bf16.mxu1 %v5574_v20 }
 0x3bc   :  { %4333 = vmatpush1.bf16.msra.mxu1 %v5572_v36 }
 0x3bd   :  { %4334 = vmatprep.subr.bf16.mxu1 %v5577_v62 }
 0x3bf   :  { %v2973_v46 = vpop.f32.mrb[16].mxu1 }
 0x3c0   :  { %v5169_v49 = vadd.f32 %v2973_v46, %v6323_v60  ;;  %v2975_v35 = vpop.f32.mrb[17].mxu1  ;;  %4335 = vmatpush1.bf16.msra.mxu1 %v5575_v61 }
 0x3c1   :  { %v5170_v41 = vadd.f32 %v2975_v35, %v6326_v28  ;;  %v2977_v55 = vpop.f32.mrb[18].mxu1  ;;  %4336 = vmatprep.subr.bf16.mxu1 %v5580_v58  ;;  %v5593_v58 = vld [vmem:[#allocation10 + $0x330] ss:$8 sps:$4 sm:$0xff]  }
 0x3c2   :  { %v3226_v0 = vmul.f32 0.2, %v5169_v49  ;;  %v5171_v17 = vadd.f32 %v2977_v55, %v6323_v60  ;;  %v2979_v22 = vpop.f32.mrb[19].mxu1  ;;  %vm3162_vm1 = vcmp.gt.f32.partialorder %v5169_v49, 0.0 }
 0x3c3   :  { %v3227_v27 = vmul.f32 0.2, %v5170_v41  ;;  %v5172_v23 = vadd.f32 %v2979_v22, %v6326_v28  ;;  %vm3163_vm2 = vcmp.gt.f32.partialorder %v5170_v41, 0.0 }
 0x3c4   :  { %vm3170_vm3 = vcmp.gt.f32.partialorder %v5171_v17, 0.0  ;;  %v3234_v21 = vmul.f32 0.2, %v5171_v17  ;;  %4337 = vmatpush1.bf16.msra.mxu1 %v5578_v9  ;;  %v3290_v30 = vsel %vm3162_vm1, %v5169_v49, %v3226_v0  ;;  %v5598_v49 = vld [vmem:[#allocation10 + $0x344] ss:$8 sps:$4 sm:$0xff]  }
 0x3c5   :  { %vm3171_vm4 = vcmp.gt.f32.partialorder %v5172_v23, 0.0  ;;  %v3235_v6 = vmul.f32 0.2, %v5172_v23  ;;  %4338 = vmatprep.subr.bf16.mxu1 %v5583_v16  ;;  %v3291_v25 = vsel %vm3163_vm2, %v5170_v41, %v3227_v27 }
 0x3c6   :  { %v3298_v51 = vsel %vm3170_vm3, %v5171_v17, %v3234_v21 }
 0x3c7   :  { %v3354_v8 = vpack.c.bf16 %v3298_v51, %v3290_v30  ;;  %v2983_v33 = vpop.f32.mrb[20].mxu1  ;;  %v3299_v12 = vsel %vm3171_vm4, %v5172_v23, %v3235_v6  ;;  %v5596_v23 = vld [vmem:[#allocation10 + $0x340] ss:$8 sps:$4 sm:$0xff]   ;;  %v5601_v6 = vld [vmem:[#allocation10 + $0x354] ss:$8 sps:$4 sm:$0xff]  }
 0x3c8   :  { %v5173_v10 = vadd.f32 %v2983_v33, %v6323_v60  ;;  %v2985_v3 = vpop.f32.mrb[21].mxu1  ;;  %4339 = vmatpush1.bf16.msra.mxu1 %v5581_v24  ;;  %v3355_v29 = vpack.c.bf16 %v3299_v12, %v3291_v25  ;;  %v5599_v12 = vld [vmem:[#allocation10 + $0x350] ss:$8 sps:$4 sm:$0xff]  }
 0x3c9   :  { %v5174_v31 = vadd.f32 %v2985_v3, %v6326_v28  ;;  %v2987_v53 = vpop.f32.mrb[22].mxu1  ;;  %4381 = vmatprep.subr.bf16.mxu1 %v5586_v2  ;;  %v5604_v3 = vld [vmem:[#allocation10 + $0x364] ss:$8 sps:$4 sm:$0xff]  }
 0x3ca   :  { %v3242_v39 = vmul.f32 0.2, %v5173_v10  ;;  %v5175_v34 = vadd.f32 %v2987_v53, %v6323_v60  ;;  %v2989_v37 = vpop.f32.mrb[23].mxu1  ;;  %4340 = vmatprep.mubr.bf16.mxu1 %v3355_v29  ;;  %vm3178_vm5 = vcmp.gt.f32.partialorder %v5173_v10, 0.0 }
 0x3cb   :  { %v3243_v57 = vmul.f32 0.2, %v5174_v31  ;;  %v5176_v38 = vadd.f32 %v2989_v37, %v6326_v28  ;;  %4341 = vmatmul.mubr.bf16.vlgmr.msra.gmra.mrb[32].mxu1 %v3354_v8  ;;  %vm3179_vm6 = vcmp.gt.f32.partialorder %v5174_v31, 0.0  ;;  %v5610_v37 = vld [vmem:[#allocation10 + $0x384] ss:$8 sps:$4 sm:$0xff]  }
 0x3cc   :  { %vm3186_vm7 = vcmp.gt.f32.partialorder %v5175_v34, 0.0  ;;  %v3250_v14 = vmul.f32 0.2, %v5175_v34  ;;  %4382 = vmatpush1.bf16.msra.mxu1 %v5584_v32  ;;  %v3306_v26 = vsel %vm3178_vm5, %v5173_v10, %v3242_v39  ;;  %v5602_v39 = vld [vmem:[#allocation10 + $0x360] ss:$8 sps:$4 sm:$0xff]  }
 0x3cd   :  { %vm3187_vm8 = vcmp.gt.f32.partialorder %v5176_v38, 0.0  ;;  %v3251_v42 = vmul.f32 0.2, %v5176_v38  ;;  %4383 = vmatprep.subr.bf16.mxu1 %v5589_v7  ;;  %v3307_v4 = vsel %vm3179_vm6, %v5174_v31, %v3243_v57  ;;  %v5608_v57 = vld [vmem:[#allocation10 + $0x380] ss:$8 sps:$4 sm:$0xff]  }
 0x3ce   :  { %v3314_v63 = vsel %vm3186_vm7, %v5175_v34, %v3250_v14  ;;  %v5605_v34 = vld [vmem:[#allocation10 + $0x370] ss:$8 sps:$4 sm:$0xff]  }
 0x3cf   :  { %v2993_v52 = vpop.f32.mrb[24].mxu1  ;;  %v3315_v13 = vsel %vm3187_vm8, %v5176_v38, %v3251_v42  ;;  %v3362_v18 = vpack.c.bf16 %v3314_v63, %v3306_v26  ;;  %v5613_v38 = vld [vmem:[#allocation10 + $0x394] ss:$8 sps:$4 sm:$0xff]   ;;  %v5611_v14 = vld [vmem:[#allocation10 + $0x390] ss:$8 sps:$4 sm:$0xff]  }
 0x3d0   :  { %v5177_v15 = vadd.f32 %v2993_v52, %v6323_v60  ;;  %v2995_v5 = vpop.f32.mrb[25].mxu1  ;;  %4384 = vmatpush1.bf16.msra.mxu1 %v5587_v40  ;;  %v3363_v43 = vpack.c.bf16 %v3315_v13, %v3307_v4  ;;  %v5616_v40 = vld [vmem:[#allocation10 + $0x3a4] ss:$8 sps:$4 sm:$0xff]   ;;  %v5614_v42 = vld [vmem:[#allocation10 + $0x3a0] ss:$8 sps:$4 sm:$0xff]   ;;  %v1280_v4 = vsub.s32 6, %v5971_v47 }
 0x3d1   :  { %v5178_v11 = vadd.f32 %v2995_v5, %v6326_v28  ;;  %v2997_v44 = vpop.f32.mrb[26].mxu1  ;;  %4385 = vmatprep.subr.bf16.mxu1 %v5592_v19  ;;  %v5619_v19 = vld [vmem:[#allocation10 + $0x3b4] ss:$8 sps:$4 sm:$0xff]   ;;  %v5617_v26 = vld [vmem:[#allocation10 + $0x3b0] ss:$8 sps:$4 sm:$0xff]  }
 0x3d2   :  { %v3258_v20 = vmul.f32 0.2, %v5177_v15  ;;  %v5179_v36 = vadd.f32 %v2997_v44, %v6323_v60  ;;  %v2999_v54 = vpop.f32.mrb[27].mxu1  ;;  %4350 = vmatprep.mubr.bf16.mxu1 %v3363_v43  ;;  %vm3194_vm9 = vcmp.gt.f32.partialorder %v5177_v15, 0.0  ;;  %v5622_v63 = vld [vmem:[#allocation10 + $0x3c4] ss:$8 sps:$4 sm:$0xff]   ;;  %v6347_v5 = vrot.slane %v6248_v1, %v1280_v4 }
 0x3d3   :  { %v3259_v62 = vmul.f32 0.2, %v5178_v11  ;;  %v5180_v59 = vadd.f32 %v2999_v54, %v6326_v28  ;;  %4351 = vmatmul.mubr.bf16.gmra.mrb[36].mxu1 %v3362_v18  ;;  %vm3195_vm10 = vcmp.gt.f32.partialorder %v5178_v11, 0.0  ;;  %v5620_v52 = vld [vmem:[#allocation10 + $0x3c0] ss:$8 sps:$4 sm:$0xff]   ;;  %v1284_v18 = vsub.s32 7, %v5971_v47 }
 0x3d4   :  { %vm3202_vm11 = vcmp.gt.f32.partialorder %v5179_v36, 0.0  ;;  %v3266_v61 = vmul.f32 0.2, %v5179_v36  ;;  %4386 = vmatpush1.bf16.msra.mxu1 %v5590_v56  ;;  %v3322_v35 = vsel %vm3194_vm9, %v5177_v15, %v3258_v20  ;;  %v5625_v13 = vld [vmem:[#allocation10 + $0x3d4] ss:$8 sps:$4 sm:$0xff]  }
 0x3d5   :  { %vm3203_vm12 = vcmp.gt.f32.partialorder %v5180_v59, 0.0  ;;  %v3267_v46 = vmul.f32 0.2, %v5180_v59  ;;  %4387 = vmatprep.subr.bf16.mxu1 %v5595_v45  ;;  %v3323_v55 = vsel %vm3195_vm10, %v5178_v11, %v3259_v62  ;;  %v5623_v15 = vld [vmem:[#allocation10 + $0x3d0] ss:$8 sps:$4 sm:$0xff]   ;;  %v6350_v56 = vrot.slane %v6248_v1, %v1284_v18 }
 0x3d6   :  { %v3330_v9 = vsel %vm3202_vm11, %v5179_v36, %v3266_v61  ;;  %v5628_v43 = vld [vmem:[#allocation10 + $0x3e4] ss:$8 sps:$4 sm:$0xff]   ;;  %v5626_v44 = vld [vmem:[#allocation10 + $0x3e0] ss:$8 sps:$4 sm:$0xff]   ;;  %v5631_v36 = vld [vmem:[#allocation10 + $0x3f4] ss:$8 sps:$4 sm:$0xff]  }
 0x3d7   :  { %v3003_v41 = vpop.f32.mrb[28].mxu1  ;;  %v3331_v16 = vsel %vm3203_vm12, %v5180_v59, %v3267_v46  ;;  %v3370_v0 = vpack.c.bf16 %v3330_v9, %v3322_v35  ;;  %v5629_v46 = vld [vmem:[#allocation10 + $0x3f0] ss:$8 sps:$4 sm:$0xff]  }
 0x3d8   :  { %v5181_v17 = vadd.f32 %v3003_v41, %v6323_v60  ;;  %v3005_v22 = vpop.f32.mrb[29].mxu1  ;;  %4388 = vmatpush1.bf16.msra.mxu1 %v5593_v58  ;;  %v3371_v27 = vpack.c.bf16 %v3331_v16, %v3323_v55 }
 0x3d9   :  { %v5182_v21 = vadd.f32 %v3005_v22, %v6326_v28  ;;  %v3007_v24 = vpop.f32.mrb[30].mxu1  ;;  %4389 = vmatprep.subr.bf16.mxu1 %v5598_v49 }
 0x3da   :  { %v3274_v2 = vmul.f32 0.2, %v5181_v17  ;;  %v5183_v30 = vadd.f32 %v3007_v24, %v6323_v60  ;;  %v3009_v51 = vpop.f32.mrb[31].mxu1  ;;  %4360 = vmatprep.mubr.bf16.mxu1 %v3371_v27  ;;  %vm3210_vm13 = vcmp.gt.f32.partialorder %v5181_v17, 0.0 }
 0x3db   :  { %v3275_v8 = vmul.f32 0.2, %v5182_v21  ;;  %v5184_v33 = vadd.f32 %v3009_v51, %v6326_v28  ;;  %4361 = vmatmul.mubr.bf16.gmra.mrb[40].mxu1 %v3370_v0  ;;  %vm3211_vm14 = vcmp.gt.f32.partialorder %v5182_v21, 0.0  ;;  %v5607_v28 = vld [vmem:[#allocation10 + $0x374] ss:$8 sps:$4 sm:$0xff]  }
 0x3dc   :  { %vm3218_vm15 = vcmp.gt.f32.partialorder %v5183_v30, 0.0  ;;  %v3282_v25 = vmul.f32 0.2, %v5183_v30  ;;  %4390 = vmatpush1.bf16.msra.mxu1 %v5596_v23  ;;  %v3338_v29 = vsel %vm3210_vm13, %v5181_v17, %v3274_v2 }
 0x3dd   :  { %vm3219_vm0 = vcmp.gt.f32.partialorder %v5184_v33, 0.0  ;;  %v3283_v10 = vmul.f32 0.2, %v5184_v33  ;;  %4391 = vmatprep.subr.bf16.mxu1 %v5601_v6  ;;  %v3339_v31 = vsel %vm3211_vm14, %v5182_v21, %v3275_v8 }
 0x3de   :  { %v3346_v32 = vsel %vm3218_vm15, %v5183_v30, %v3282_v25 }
 0x3df   :  { %v3347_v60 = vsel %vm3219_vm0, %v5184_v33, %v3283_v10  ;;  %v3378_v53 = vpack.c.bf16 %v3346_v32, %v3338_v29 }
 0x3e0   :  { %4392 = vmatpush1.bf16.msra.mxu1 %v5599_v12  ;;  %v3379_v7 = vpack.c.bf16 %v3347_v60, %v3339_v31 }
 0x3e1   :  { %4393 = vmatprep.subr.bf16.mxu1 %v5604_v3 }
 0x3e2   :  { %4370 = vmatprep.mubr.bf16.mxu1 %v3379_v7 }
 0x3e3   :  { %4371 = vmatmul.mubr.bf16.gmra.mrb[44].mxu1 %v3378_v53 }
 0x3e4   :  { %4394 = vmatpush1.bf16.msra.mxu1 %v5602_v39 }
 0x3e5   :  { %4395 = vmatprep.subr.bf16.mxu1 %v5607_v28 }
 0x3e8   :  { %4396 = vmatpush1.bf16.msra.mxu1 %v5605_v34 }
 0x3e9   :  { %4397 = vmatprep.subr.bf16.mxu1 %v5610_v37 }
 0x3ec   :  { %4398 = vmatpush1.bf16.msra.mxu1 %v5608_v57 }
 0x3ed   :  { %4399 = vmatprep.subr.bf16.mxu1 %v5613_v38 }
 0x3f0   :  { %4400 = vmatpush1.bf16.msra.mxu1 %v5611_v14 }
 0x3f1   :  { %4401 = vmatprep.subr.bf16.mxu1 %v5616_v40 }
 0x3f4   :  { %4402 = vmatpush1.bf16.msra.mxu1 %v5614_v42 }
 0x3f5   :  { %4403 = vmatprep.subr.bf16.mxu1 %v5619_v19 }
 0x3f8   :  { %4404 = vmatpush1.bf16.msra.mxu1 %v5617_v26 }
 0x3f9   :  { %4405 = vmatprep.subr.bf16.mxu1 %v5622_v63 }
 0x3fc   :  { %4406 = vmatpush1.bf16.msra.mxu1 %v5620_v52 }
 0x3fd   :  { %4407 = vmatprep.subr.bf16.mxu1 %v5625_v13 }
 0x400   :  { %v3119_v11 = vpop.f32.mrb[80].mxu0  ;;  %4408 = vmatpush1.bf16.msra.mxu1 %v5623_v15 }
 0x401   :  { %v5185_v45 = vadd.f32 %v3119_v11, %v6347_v5  ;;  %v3121_v20 = vpop.f32.mrb[81].mxu0  ;;  %4409 = vmatprep.subr.bf16.mxu1 %v5628_v43 }
 0x402   :  { %v5186_v47 = vadd.f32 %v3121_v20, %v6350_v56  ;;  %v3123_v54 = vpop.f32.mrb[82].mxu0 }
 0x403   :  { %v3228_v62 = vmul.f32 0.2, %v5185_v45  ;;  %v5187_v59 = vadd.f32 %v3123_v54, %v6347_v5  ;;  %v3125_v61 = vpop.f32.mrb[83].mxu0  ;;  %vm3164_vm1 = vcmp.gt.f32.partialorder %v5185_v45, 0.0 }
 0x404   :  { %v3229_v58 = vmul.f32 0.2, %v5186_v47  ;;  %v5188_v1 = vadd.f32 %v3125_v61, %v6350_v56  ;;  %4410 = vmatpush1.bf16.msra.mxu1 %v5626_v44  ;;  %vm3165_vm2 = vcmp.gt.f32.partialorder %v5186_v47, 0.0 }
 0x405   :  { %vm3172_vm3 = vcmp.gt.f32.partialorder %v5187_v59, 0.0  ;;  %v3236_v49 = vmul.f32 0.2, %v5187_v59  ;;  %4411 = vmatprep.subr.bf16.mxu1 %v5631_v36  ;;  %v3292_v9 = vsel %vm3164_vm1, %v5185_v45, %v3228_v62 }
 0x406   :  { %vm3173_vm4 = vcmp.gt.f32.partialorder %v5188_v1, 0.0  ;;  %v3237_v35 = vmul.f32 0.2, %v5188_v1  ;;  %v3293_v0 = vsel %vm3165_vm2, %v5186_v47, %v3229_v58 }
 0x407   :  { %v3300_v41 = vsel %vm3172_vm3, %v5187_v59, %v3236_v49 }
 0x408   :  { %v3356_v55 = vpack.c.bf16 %v3300_v41, %v3292_v9  ;;  %v3129_v16 = vpop.f32.mrb[84].mxu0  ;;  %4412 = vmatpush1.bf16.msra.mxu1 %v5629_v46  ;;  %v3301_v17 = vsel %vm3173_vm4, %v5188_v1, %v3237_v35 }
 0x409   :  { %v5189_v22 = vadd.f32 %v3129_v16, %v6347_v5  ;;  %v3131_v27 = vpop.f32.mrb[85].mxu0  ;;  %v3357_v23 = vpack.c.bf16 %v3301_v17, %v3293_v0 }
 0x40a   :  { %v5190_v21 = vadd.f32 %v3131_v27, %v6350_v56  ;;  %v3133_v24 = vpop.f32.mrb[86].mxu0 }
 0x40b   :  { %v3244_v6 = vmul.f32 0.2, %v5189_v22  ;;  %v5191_v2 = vadd.f32 %v3133_v24, %v6347_v5  ;;  %v3135_v30 = vpop.f32.mrb[87].mxu0  ;;  %4413 = vmatprep.mubr.bf16.mxu1 %v3357_v23  ;;  %vm3180_vm5 = vcmp.gt.f32.partialorder %v5189_v22, 0.0 }
 0x40c   :  { %v3245_v51 = vmul.f32 0.2, %v5190_v21  ;;  %v5192_v8 = vadd.f32 %v3135_v30, %v6350_v56  ;;  %4414 = vmatmul.mubr.bf16.vlgmr.msra.gmra.mrb[32].mxu1 %v3356_v55  ;;  %vm3181_vm6 = vcmp.gt.f32.partialorder %v5190_v21, 0.0 }
 0x40d   :  { %vm3188_vm7 = vcmp.gt.f32.partialorder %v5191_v2, 0.0  ;;  %v3252_v33 = vmul.f32 0.2, %v5191_v2  ;;  %v3308_v12 = vsel %vm3180_vm5, %v5189_v22, %v3244_v6 }
 0x40e   :  { %vm3189_vm8 = vcmp.gt.f32.partialorder %v5192_v8, 0.0  ;;  %v3253_v25 = vmul.f32 0.2, %v5192_v8  ;;  %v3309_v29 = vsel %vm3181_vm6, %v5190_v21, %v3245_v51 }
 0x40f   :  { %v3316_v10 = vsel %vm3188_vm7, %v5191_v2, %v3252_v33 }
 0x410   :  { %v3139_v3 = vpop.f32.mrb[88].mxu0  ;;  %v3317_v32 = vsel %vm3189_vm8, %v5192_v8, %v3253_v25  ;;  %v3364_v31 = vpack.c.bf16 %v3316_v10, %v3308_v12 }
 0x411   :  { %v5193_v60 = vadd.f32 %v3139_v3, %v6347_v5  ;;  %v3141_v53 = vpop.f32.mrb[89].mxu0  ;;  %v3365_v7 = vpack.c.bf16 %v3317_v32, %v3309_v29 }
 0x412   :  { %v5194_v39 = vadd.f32 %v3141_v53, %v6350_v56  ;;  %v3143_v28 = vpop.f32.mrb[90].mxu0 }
 0x413   :  { %v3260_v34 = vmul.f32 0.2, %v5193_v60  ;;  %v5195_v37 = vadd.f32 %v3143_v28, %v6347_v5  ;;  %v3145_v57 = vpop.f32.mrb[91].mxu0  ;;  %4423 = vmatprep.mubr.bf16.mxu1 %v3365_v7  ;;  %vm3196_vm9 = vcmp.gt.f32.partialorder %v5193_v60, 0.0 }
 0x414   :  { %v3261_v38 = vmul.f32 0.2, %v5194_v39  ;;  %v5196_v14 = vadd.f32 %v3145_v57, %v6350_v56  ;;  %4424 = vmatmul.mubr.bf16.gmra.mrb[36].mxu1 %v3364_v31  ;;  %vm3197_vm10 = vcmp.gt.f32.partialorder %v5194_v39, 0.0 }
 0x415   :  { %vm3204_vm11 = vcmp.gt.f32.partialorder %v5195_v37, 0.0  ;;  %v3268_v40 = vmul.f32 0.2, %v5195_v37  ;;  %v3324_v19 = vsel %vm3196_vm9, %v5193_v60, %v3260_v34 }
 0x416   :  { %vm3205_vm12 = vcmp.gt.f32.partialorder %v5196_v14, 0.0  ;;  %v3269_v42 = vmul.f32 0.2, %v5196_v14  ;;  %v3325_v52 = vsel %vm3197_vm10, %v5194_v39, %v3261_v38 }
 0x417   :  { %v3332_v26 = vsel %vm3204_vm11, %v5195_v37, %v3268_v40 }
 0x418   :  { %v3149_v63 = vpop.f32.mrb[92].mxu0  ;;  %v3333_v4 = vsel %vm3205_vm12, %v5196_v14, %v3269_v42  ;;  %v3372_v13 = vpack.c.bf16 %v3332_v26, %v3324_v19 }
 0x419   :  { %v5197_v18 = vadd.f32 %v3149_v63, %v6347_v5  ;;  %v3151_v15 = vpop.f32.mrb[93].mxu0  ;;  %v3373_v43 = vpack.c.bf16 %v3333_v4, %v3325_v52 }
 0x41a   :  { %v5198_v11 = vadd.f32 %v3151_v15, %v6350_v56  ;;  %v3153_v44 = vpop.f32.mrb[94].mxu0 }
 0x41b   :  { %v3276_v45 = vmul.f32 0.2, %v5197_v18  ;;  %v5199_v20 = vadd.f32 %v3153_v44, %v6347_v5  ;;  %v3155_v36 = vpop.f32.mrb[95].mxu0  ;;  %4433 = vmatprep.mubr.bf16.mxu1 %v3373_v43  ;;  %vm3212_vm13 = vcmp.gt.f32.partialorder %v5197_v18, 0.0  ;;  %v3510_v5 = vld [vmem:[%s6416_s8] sm:$0x3] }
 0x41c   :  { %v3277_v47 = vmul.f32 0.2, %v5198_v11  ;;  %v5200_v54 = vadd.f32 %v3155_v36, %v6350_v56  ;;  %4434 = vmatmul.mubr.bf16.gmra.mrb[40].mxu1 %v3372_v13  ;;  %vm3213_vm14 = vcmp.gt.f32.partialorder %v5198_v11, 0.0  ;;  %v6372_v56 = vrot.slane %v3510_v5, %v5974_v48  ;;  %s5850_s8 = smov [#allocation11]  }
 0x41d   :  { %vm3220_vm15 = vcmp.gt.f32.partialorder %v5199_v20, 0.0  ;;  %v3284_v62 = vmul.f32 0.2, %v5199_v20  ;;  %v3340_v61 = vsel %vm3212_vm13, %v5197_v18, %v3276_v45  ;;  %v6375_v9 = vrot.slane %v3510_v5, %v5980_v50  ;;  %s4611_s15 = sshll.u32 %s5850_s8, 4  ;;  %s4612_s15 = int_to_ptr.vmem [resolvable:$true] %s4611_s15 }
 0x41e   :  { %vm3221_vm0 = vcmp.gt.f32.partialorder %v5200_v54, 0.0  ;;  %v3285_v59 = vmul.f32 0.2, %v5200_v54  ;;  %v3341_v1 = vsel %vm3213_vm14, %v5198_v11, %v3277_v47  ;;  %s5806_s17 = scalar_lea.vmem %s4612_s15, 1024  ;;  %p5811_p13 = scmp.lt.s32.totalorder %s4612_s15, %s4612_s15 }
 0x41f   :  { %v3348_v58 = vsel %vm3220_vm15, %v5199_v20, %v3284_v62  ;;  %p5807_p12 = scmp.ne.s32.totalorder %s4612_s15, %s5806_s17  ;;  %p5812_p0 = scmp.lt.s32.totalorder %s5806_s17, %s5806_s17 }
 0x420   :  { %v3349_v46 = vsel %vm3221_vm0, %v5200_v54, %v3285_v59  ;;  %v3380_v49 = vpack.c.bf16 %v3348_v58, %v3340_v61 }
 0x421   :  { %v3381_v35 = vpack.c.bf16 %v3349_v46, %v3341_v1  ;;  %p5813_p1 = por %p5812_p0, %p5811_p13 }
 0x423   :  { %4443 = vmatprep.mubr.bf16.mxu1 %v3381_v35  ;;  %p5814_p2 = pnand %p5813_p1, %p5807_p12 }
 0x424   :  { %4444 = vmatmul.mubr.bf16.gmra.mrb[44].mxu1 %v3380_v49 }
 0x4df   :  { %v4415_v41 = vpop.f32.mrb[32].mxu1 }
 0x4e0   :  { %v5201_v55 = vadd.f32 %v4415_v41, %v6372_v56  ;;  %v4417_v16 = vpop.f32.mrb[33].mxu1 }
 0x4e1   :  { %v5202_v0 = vadd.f32 %v4417_v16, %v6375_v9  ;;  %v4419_v17 = vpop.f32.mrb[34].mxu1 }
 0x4e2   :  { %v5089_v22 = vmul.f32 -1.442695, %v5201_v55  ;;  %v5203_v27 = vadd.f32 %v4419_v17, %v6372_v56  ;;  %v4421_v23 = vpop.f32.mrb[35].mxu1 }
 0x4e3   :  { %v5090_v21 = vmul.f32 -1.442695, %v5202_v0  ;;  %v5204_v24 = vadd.f32 %v4421_v23, %v6375_v9 }
 0x4e4   :  { %5632 = vpow2.f32 %v5089_v22  ;;  %v5091_v48 = vmul.f32 -1.442695, %v5203_v27 }
 0x4e5   :  { %5634 = vpow2.f32 %v5090_v21  ;;  %v5092_v6 = vmul.f32 -1.442695, %v5204_v24 }
 0x4e6   :  { %5636 = vpow2.f32 %v5091_v48 }
 0x4e7   :  { %5638 = vpow2.f32 %v5092_v6  ;;  %v4425_v50 = vpop.f32.mrb[36].mxu1 }
 0x4e8   :  { %v5205_v2 = vadd.f32 %v4425_v50, %v6372_v56  ;;  %v4427_v30 = vpop.f32.mrb[37].mxu1 }
 0x4e9   :  { %v5206_v51 = vadd.f32 %v4427_v30, %v6375_v9  ;;  %v4429_v8 = vpop.f32.mrb[38].mxu1 }
 0x4ea   :  { %v5093_v33 = vmul.f32 -1.442695, %v5205_v2  ;;  %v5207_v25 = vadd.f32 %v4429_v8, %v6372_v56  ;;  %v4431_v12 = vpop.f32.mrb[39].mxu1 }
 0x4eb   :  { %v5094_v10 = vmul.f32 -1.442695, %v5206_v51  ;;  %v5208_v3 = vadd.f32 %v4431_v12, %v6375_v9 }
 0x4ec   :  { %5640 = vpow2.f32 %v5093_v33  ;;  %v5095_v29 = vmul.f32 -1.442695, %v5207_v25 }
 0x4ed   :  { %5642 = vpow2.f32 %v5094_v10  ;;  %v5096_v32 = vmul.f32 -1.442695, %v5208_v3 }
 0x4ee   :  { %v5633_v31 = vpop.eup %5632  ;;  %5644 = vpow2.f32 %v5095_v29 }
 0x4ef   :  { %v5635_v60 = vpop.eup %5634  ;;  %v4502_v53 = vadd.f32 1.0, %v5633_v31  ;;  %5646 = vpow2.f32 %v5096_v32  ;;  %v4435_v7 = vpop.f32.mrb[40].mxu1 }
 0x4f0   :  { %v5637_v39 = vpop.eup %5636  ;;  %v4503_v28 = vadd.f32 1.0, %v5635_v60  ;;  %v5209_v34 = vadd.f32 %v4435_v7, %v6372_v56  ;;  %v4437_v37 = vpop.f32.mrb[41].mxu1 }
 0x4f1   :  { %v5639_v57 = vpop.eup %5638  ;;  %5648 = vrcp.f32 %v4502_v53  ;;  %v4504_v38 = vadd.f32 1.0, %v5637_v39  ;;  %v5210_v14 = vadd.f32 %v4437_v37, %v6375_v9  ;;  %v4439_v40 = vpop.f32.mrb[42].mxu1 }
 0x4f2   :  { %5650 = vrcp.f32 %v4503_v28  ;;  %v4505_v42 = vadd.f32 1.0, %v5639_v57  ;;  %v5097_v19 = vmul.f32 -1.442695, %v5209_v34  ;;  %v5211_v26 = vadd.f32 %v4439_v40, %v6372_v56  ;;  %v4441_v63 = vpop.f32.mrb[43].mxu1 }
 0x4f3   :  { %5652 = vrcp.f32 %v4504_v38  ;;  %v5098_v52 = vmul.f32 -1.442695, %v5210_v14  ;;  %v5212_v4 = vadd.f32 %v4441_v63, %v6375_v9 }
 0x4f4   :  { %5654 = vrcp.f32 %v4505_v42  ;;  %v5099_v13 = vmul.f32 -1.442695, %v5211_v26 }
 0x4f5   :  { %5656 = vpow2.f32 %v5097_v19  ;;  %v5100_v18 = vmul.f32 -1.442695, %v5212_v4 }
 0x4f6   :  { %v5641_v15 = vpop.eup %5640  ;;  %5658 = vpow2.f32 %v5098_v52 }
 0x4f7   :  { %v5643_v43 = vpop.eup %5642  ;;  %v4506_v11 = vadd.f32 1.0, %v5641_v15  ;;  %5660 = vpow2.f32 %v5099_v13  ;;  %v4445_v44 = vpop.f32.mrb[44].mxu1 }
 0x4f8   :  { %v5645_v45 = vpop.eup %5644  ;;  %v4507_v20 = vadd.f32 1.0, %v5643_v43  ;;  %5662 = vpow2.f32 %v5100_v18  ;;  %v5213_v36 = vadd.f32 %v4445_v44, %v6372_v56  ;;  %v4447_v47 = vpop.f32.mrb[45].mxu1 }
 0x4f9   :  { %v5647_v54 = vpop.eup %5646  ;;  %5664 = vrcp.f32 %v4506_v11  ;;  %v4508_v62 = vadd.f32 1.0, %v5645_v45  ;;  %v5214_v59 = vadd.f32 %v4447_v47, %v6375_v9  ;;  %v4449_v61 = vpop.f32.mrb[46].mxu1 }
 0x4fa   :  { %5666 = vrcp.f32 %v4507_v20  ;;  %v4509_v58 = vadd.f32 1.0, %v5647_v54  ;;  %v5101_v1 = vmul.f32 -1.442695, %v5213_v36  ;;  %v5215_v46 = vadd.f32 %v4449_v61, %v6372_v56  ;;  %v4451_v49 = vpop.f32.mrb[47].mxu1 }
 0x4fb   :  { %v5649_v35 = vpop.eup %5648  ;;  %5668 = vrcp.f32 %v4508_v62  ;;  %v5102_v5 = vmul.f32 -1.442695, %v5214_v59  ;;  %v5216_v41 = vadd.f32 %v4451_v49, %v6375_v9 }
 0x4fc   :  { %v5651_v55 = vpop.eup %5650  ;;  %5670 = vrcp.f32 %v4509_v58  ;;  %v5103_v16 = vmul.f32 -1.442695, %v5215_v46 }
 0x4fd   :  { %v5653_v0 = vpop.eup %5652  ;;  %v5113_v17 = vpack.c.bf16 %v5651_v55, %v5649_v35  ;;  %5672 = vpow2.f32 %v5101_v1  ;;  %v5104_v22 = vmul.f32 -1.442695, %v5216_v41 }
 0x4fe   :  { %v5655_v27 = vpop.eup %5654  ;;  %5674 = vpow2.f32 %v5102_v5 }
 0x4ff   :  { %v5657_v23 = vpop.eup %5656  ;;  %4598 = vst [vmem:[#allocation11] sm:$0xff] %v5113_v17  ;;  %v5114_v21 = vpack.c.bf16 %v5655_v27, %v5653_v0  ;;  %5676 = vpow2.f32 %v5103_v16 }
 0x500   :  { %v5659_v56 = vpop.eup %5658  ;;  %v4510_v24 = vadd.f32 1.0, %v5657_v23  ;;  %5678 = vpow2.f32 %v5104_v22 }
 0x501   :  { %v5661_v48 = vpop.eup %5660  ;;  %4599 = vst [vmem:[#allocation11 + $0x8] sm:$0xff] %v5114_v21  ;;  %v4511_v6 = vadd.f32 1.0, %v5659_v56 }
 0x502   :  { %v5663_v9 = vpop.eup %5662  ;;  %5680 = vrcp.f32 %v4510_v24  ;;  %v4512_v50 = vadd.f32 1.0, %v5661_v48 }
 0x503   :  { %v5665_v2 = vpop.eup %5664  ;;  %5682 = vrcp.f32 %v4511_v6  ;;  %v4513_v30 = vadd.f32 1.0, %v5663_v9 }
 0x504   :  { %v5667_v51 = vpop.eup %5666  ;;  %5684 = vrcp.f32 %v4512_v50 }
 0x505   :  { %v5669_v8 = vpop.eup %5668  ;;  %v5115_v33 = vpack.c.bf16 %v5667_v51, %v5665_v2  ;;  %5686 = vrcp.f32 %v4513_v30 }
 0x506   :  { %v5671_v25 = vpop.eup %5670 }
 0x507   :  { %v5673_v12 = vpop.eup %5672  ;;  %4600 = vst [vmem:[#allocation11 + $0x10] sm:$0xff] %v5115_v33  ;;  %v5116_v10 = vpack.c.bf16 %v5671_v25, %v5669_v8 }
 0x508   :  { %v5675_v3 = vpop.eup %5674  ;;  %v4514_v29 = vadd.f32 1.0, %v5673_v12 }
 0x509   :  { %v5677_v32 = vpop.eup %5676  ;;  %4601 = vst [vmem:[#allocation11 + $0x18] sm:$0xff] %v5116_v10  ;;  %v4515_v31 = vadd.f32 1.0, %v5675_v3 }
 0x50a   :  { %v5679_v60 = vpop.eup %5678  ;;  %5688 = vrcp.f32 %v4514_v29  ;;  %v4516_v53 = vadd.f32 1.0, %v5677_v32 }
 0x50b   :  { %5690 = vrcp.f32 %v4515_v31  ;;  %v4517_v7 = vadd.f32 1.0, %v5679_v60 }
 0x50c   :  { %v5681_v39 = vpop.eup %5680  ;;  %5692 = vrcp.f32 %v4516_v53 }
 0x50d   :  { %v5683_v28 = vpop.eup %5682  ;;  %5694 = vrcp.f32 %v4517_v7 }
 0x50e   :  { %v5685_v34 = vpop.eup %5684  ;;  %v5117_v37 = vpack.c.bf16 %v5683_v28, %v5681_v39 }
 0x50f   :  { %v5687_v57 = vpop.eup %5686 }
 0x510   :  { %4602 = vst [vmem:[#allocation11 + $0x20] sm:$0xff] %v5117_v37  ;;  %v5118_v38 = vpack.c.bf16 %v5687_v57, %v5685_v34 }
 0x512   :  { %4603 = vst [vmem:[#allocation11 + $0x28] sm:$0xff] %v5118_v38 }
 0x514   :  { %v5689_v14 = vpop.eup %5688 }
 0x515   :  { %v5691_v40 = vpop.eup %5690 }
 0x516   :  { %v5693_v42 = vpop.eup %5692  ;;  %v5119_v19 = vpack.c.bf16 %v5691_v40, %v5689_v14 }
 0x517   :  { %v5695_v26 = vpop.eup %5694 }
 0x518   :  { %4604 = vst [vmem:[#allocation11 + $0x30] sm:$0xff] %v5119_v19  ;;  %v5120_v63 = vpack.c.bf16 %v5695_v26, %v5693_v42 }
 0x51a   :  { %4605 = vst [vmem:[#allocation11 + $0x38] sm:$0xff] %v5120_v63 }
 0x51b   :  { %5817 = shalt.err (!%p5814_p2)
}
 0x51c   :  { %s5818_s16 = scalar_lea.hbm %s6417_s9, 1024 }
 0x51d   :  { %p5819_p3 = scmp.ne.s32.totalorder %s6417_s9, %s5818_s16  ;;  %p5822_p4 = scmp.lt.u32.totalorder %s5818_s16, %s6417_s9 }
 0x51f   :  { %p5824_p5 = pnand %p5822_p4, %p5819_p3 }
 0x521   :  { %5827 = shalt.err (!%p5824_p5)
}
 0x522   :  { %4617 = dma.vmem_to_hbm [thread:$0]  %s4612_s15, 1024, %s6417_s9, [#allocation4], %s5837_s19, %s5837_s19, %s5838_s20  }
 0x523   :  { %5834 = dma.done.wait [#allocation4], 1024  }
 0x524   :  { %5835 = vsyncadd [#allocation4], 4294966272 }
 0x525   :  { %4621 = vsyncpa [#allocation3], 1 }
 0x526   :  { %4622 = vsyncpa [#allocation6], 1 }
 0x527   :  { %4623 = vsyncpa [#allocation9], 1 }
 0x528   :  { %4624 = vsyncpa [#allocation4], 1 }

// kernel: _generator_forward_impl.1
= control target key start
LH: loop header
LB: loop body
LE: loop exit
PB: predicated region body
PF: predicated region fallthrough
CT: control target
= control target key end

     0   :  { %14 = vsyncpa [#allocation3], 0  ;;  %s6408_s0 = inlined_call_operand.hbm [shape: bf16[64,64], index: 0, kind: input, shape index: {}]   ;;  %s6409_s1 = inlined_call_operand.hbm [shape: bf16[64,256], index: 1, kind: input, shape index: {}]   ;;  %s6410_s2 = inlined_call_operand.vmem [shape: f32[1,256], index: 2, kind: input, shape index: {}]   ;;  %s6411_s3 = inlined_call_operand.hbm [shape: bf16[256,512], index: 3, kind: input, shape index: {}]   ;;  %s6412_s4 = inlined_call_operand.vmem [shape: f32[1,512], index: 4, kind: input, shape index: {}]   ;;  %s6413_s5 = inlined_call_operand.hbm [shape: bf16[512,1024], index: 5, kind: input, shape index: {}]   ;;  %s6414_s6 = inlined_call_operand.vmem [shape: f32[1,1024], index: 6, kind: input, shape index: {}]   ;;  %s6415_s7 = inlined_call_operand.hbm [shape: bf16[1024,256], index: 7, kind: input, shape index: {}]   ;;  %s6416_s8 = inlined_call_operand.vmem [shape: f32[1,256], index: 8, kind: input, shape index: {}]   ;;  %s6417_s9 = inlined_call_operand.hbm [shape: bf16[64,256], index: 9, kind: output, shape index: {}]  }
   0x1   :  { %15 = vsyncpa [#allocation6], 0 }
   0x2   :  { %16 = vsyncpa [#allocation9], 0 }
   0x3   :  { %17 = vsyncpa [#allocation4], 0  ;;  %s5836_s30 = smov [#allocation5]   ;;  %s5696_s13 = scalar_lea.hbm %s6409_s1, 1024 }
   0x4   :  { %s35_s10 = sshll.u32 %s5836_s30, 4  ;;  %p5697_p0 = scmp.ne.s32.totalorder %s6409_s1, %s5696_s13  ;;  %s36_s10 = int_to_ptr.vmem [resolvable:$true] %s35_s10 }
   0x5   :  { %p5700_p1 = scmp.lt.u32.totalorder %s5696_s13, %s6409_s1 }
   0x7   :  { %p5702_p2 = pnand %p5700_p1, %p5697_p0 }
   0x9   :  { %5705 = shalt.err (!%p5702_p2)
}
   0xa   :  { %s5706_s18 = scalar_lea.vmem %s36_s10, 1024  ;;  %p5711_p4 = scmp.lt.s32.totalorder %s36_s10, %s36_s10 }
   0xb   :  { %p5707_p3 = scmp.ne.s32.totalorder %s36_s10, %s5706_s18  ;;  %p5712_p5 = scmp.lt.s32.totalorder %s5706_s18, %s5706_s18 }
   0xd   :  { %p5713_p6 = por %p5712_p5, %p5711_p4 }
   0xf   :  { %p5714_p7 = pnand %p5713_p6, %p5707_p3 }
  0x11   :  { %5717 = shalt.err (!%p5714_p7)
}
  0x12   :  { %s5837_s19 = smov 128   ;;  %s5838_s20 = smov 8  }
  0x13   :  { %41 = dma.hbm_to_vmem [thread:$0]  %s6409_s1, 1024, %s36_s10, [#allocation6], %s5837_s19, %s5837_s19, %s5838_s20  }
  0x14   :  { %s5839_s23 = smov [#allocation8]   ;;  %s5718_s27 = scalar_lea.hbm %s6413_s5, 32768 }
  0x15   :  { %s63_s24 = sshll.u32 %s5839_s23, 4  ;;  %p5719_p8 = scmp.ne.s32.totalorder %s6413_s5, %s5718_s27  ;;  %s64_s24 = int_to_ptr.vmem [resolvable:$true] %s63_s24 }
  0x16   :  { %p5722_p9 = scmp.lt.u32.totalorder %s5718_s27, %s6413_s5 }
  0x18   :  { %p5724_p10 = pnand %p5722_p9, %p5719_p8 }
  0x1a   :  { %5727 = shalt.err (!%p5724_p10)
}
  0x1b   :  { %s5728_s12 = scalar_lea.vmem %s64_s24, 32768  ;;  %p5733_p12 = scmp.lt.s32.totalorder %s64_s24, %s64_s24 }
  0x1c   :  { %p5729_p11 = scmp.ne.s32.totalorder %s64_s24, %s5728_s12  ;;  %p5734_p13 = scmp.lt.s32.totalorder %s5728_s12, %s5728_s12 }
  0x1e   :  { %p5735_p0 = por %p5734_p13, %p5733_p12 }
  0x20   :  { %p5736_p1 = pnand %p5735_p0, %p5729_p11 }
  0x22   :  { %5739 = shalt.err (!%p5736_p1)
}
  0x23   :  { %s5840_s1 = smov 512   ;;  %s5841_s10 = smov 32  }
  0x24   :  { %69 = dma.hbm_to_vmem [thread:$0]  %s6413_s5, 32768, %s64_s24, [#allocation9], %s5840_s1, %s5840_s1, %s5841_s10  }
  0x25   :  { %s5842_s15 = smov [#allocation2]   ;;  %s5740_s21 = scalar_lea.hbm %s6408_s0, 512 }
  0x26   :  { %s23_s16 = sshll.u32 %s5842_s15, 4  ;;  %p5741_p2 = scmp.ne.s32.totalorder %s6408_s0, %s5740_s21  ;;  %s24_s16 = int_to_ptr.vmem [resolvable:$true] %s23_s16 }
  0x27   :  { %p5744_p3 = scmp.lt.u32.totalorder %s5740_s21, %s6408_s0 }
  0x29   :  { %p5746_p4 = pnand %p5744_p3, %p5741_p2 }
  0x2b   :  { %5749 = shalt.err (!%p5746_p4)
}
  0x2c   :  { %s5750_s27 = scalar_lea.vmem %s24_s16, 512  ;;  %p5755_p6 = scmp.lt.s32.totalorder %s24_s16, %s24_s16 }
  0x2d   :  { %p5751_p5 = scmp.ne.s32.totalorder %s24_s16, %s5750_s27  ;;  %p5756_p7 = scmp.lt.s32.totalorder %s5750_s27, %s5750_s27 }
  0x2f   :  { %p5757_p8 = por %p5756_p7, %p5755_p6 }
  0x31   :  { %p5758_p9 = pnand %p5757_p8, %p5751_p5 }
  0x33   :  { %5761 = shalt.err (!%p5758_p9)
}
  0x34   :  { %s5843_s5 = smov 64   ;;  %s5844_s24 = smov 4  }
  0x35   :  { %29 = dma.hbm_to_vmem [thread:$0]  %s6408_s0, 512, %s24_s16, [#allocation3], %s5843_s5, %s5843_s5, %s5844_s24  }
  0x36   :  { %s5845_s30 = smov [#allocation7]   ;;  %s5762_s10 = scalar_lea.hbm %s6411_s3, 8192 }
  0x37   :  { %s49_s11 = sshll.u32 %s5845_s30, 4  ;;  %p5763_p10 = scmp.ne.s32.totalorder %s6411_s3, %s5762_s10  ;;  %s50_s11 = int_to_ptr.vmem [resolvable:$true] %s49_s11 }
  0x38   :  { %p5766_p11 = scmp.lt.u32.totalorder %s5762_s10, %s6411_s3 }
  0x3a   :  { %p5768_p12 = pnand %p5766_p11, %p5763_p10 }
  0x3c   :  { %5771 = shalt.err (!%p5768_p12)
}
  0x3d   :  { %s5772_s18 = scalar_lea.vmem %s50_s11, 8192  ;;  %p5777_p0 = scmp.lt.s32.totalorder %s50_s11, %s50_s11 }
  0x3e   :  { %p5773_p13 = scmp.ne.s32.totalorder %s50_s11, %s5772_s18  ;;  %p5778_p1 = scmp.lt.s32.totalorder %s5772_s18, %s5772_s18 }
  0x40   :  { %p5779_p2 = por %p5778_p1, %p5777_p0 }
  0x42   :  { %p5780_p3 = pnand %p5779_p2, %p5773_p13 }
  0x44   :  { %5783 = shalt.err (!%p5780_p3)
}
  0x45   :  { %s5846_s0 = smov 256   ;;  %s5847_s16 = smov 16  }
  0x46   :  { %55 = dma.hbm_to_vmem [thread:$0]  %s6411_s3, 8192, %s50_s11, [#allocation6], %s5846_s0, %s5846_s0, %s5847_s16  }
  0x47   :  { %s5848_s23 = smov [#allocation10]   ;;  %s5784_s5 = scalar_lea.hbm %s6415_s7, 16384 }
  0x48   :  { %s77_s25 = sshll.u32 %s5848_s23, 4  ;;  %p5785_p4 = scmp.ne.s32.totalorder %s6415_s7, %s5784_s5  ;;  %s78_s25 = int_to_ptr.vmem [resolvable:$true] %s77_s25 }
  0x49   :  { %p5788_p5 = scmp.lt.u32.totalorder %s5784_s5, %s6415_s7 }
  0x4b   :  { %p5790_p6 = pnand %p5788_p5, %p5785_p4 }
  0x4d   :  { %5793 = shalt.err (!%p5790_p6)
}
  0x4e   :  { %s5794_s12 = scalar_lea.vmem %s78_s25, 16384  ;;  %p5799_p8 = scmp.lt.s32.totalorder %s78_s25, %s78_s25 }
  0x4f   :  { %p5795_p7 = scmp.ne.s32.totalorder %s78_s25, %s5794_s12  ;;  %p5800_p9 = scmp.lt.s32.totalorder %s5794_s12, %s5794_s12 }
  0x51   :  { %p5801_p10 = por %p5800_p9, %p5799_p8 }
  0x53   :  { %p5802_p11 = pnand %p5801_p10, %p5795_p7 }
  0x55   :  { %5805 = shalt.err (!%p5802_p11)
}
  0x56   :  { %83 = dma.hbm_to_vmem [thread:$0]  %s6415_s7, 16384, %s78_s25, [#allocation9], %s5837_s19, %s5837_s19, %s5838_s20  }
  0x57   :  { %5828 = dma.done.wait [#allocation3], 512  }
  0x58   :  { %5829 = vsyncadd [#allocation3], 4294966784 }
  0x59   :  { %5830 = dma.done.wait [#allocation6], 9216  }
  0x5a   :  { %5831 = vsyncadd [#allocation6], 4294958080 }
  0x5b   :  { %5832 = dma.done.wait [#allocation9], 49152  }
  0x5c   :  { %5833 = vsyncadd [#allocation9], 4294918144  ;;  %v5849_v0 = vmov 0   ;;  %v5328_v1 = vld [vmem:[#allocation5 + $0x4] ss:$8 sps:$4 sm:$0xff]   ;;  %vm190_vm0 = vcmask 523264   ;;  %v120_v46 = vlaneseq }
  0x5d   :  { %235 = vmatprep.mubr.bf16.mxu0 %v5849_v0  ;;  %v5330_v2 = vld [vmem:[#allocation5] ss:$8 sps:$4 sm:$0xff]   ;;  %203 = vmatprep.subr.bf16.mxu0 %v5328_v1  ;;  %v5331_v3 = vld [vmem:[#allocation5 + $0x14] ss:$8 sps:$4 sm:$0xff]   ;;  %v5333_v4 = vld [vmem:[#allocation5 + $0x10] ss:$8 sps:$4 sm:$0xff]  }
  0x5e   :  { %204 = vmatpush1.bf16.msra.mxu0 %v5330_v2  ;;  %v5334_v5 = vld [vmem:[#allocation5 + $0x24] ss:$8 sps:$4 sm:$0xff]   ;;  %v5336_v6 = vld [vmem:[#allocation5 + $0x20] ss:$8 sps:$4 sm:$0xff]   ;;  %v5337_v7 = vld [vmem:[#allocation5 + $0x34] ss:$8 sps:$4 sm:$0xff]  }
  0x5f   :  { %205 = vmatprep.subr.bf16.mxu0 %v5331_v3  ;;  %v5339_v8 = vld [vmem:[#allocation5 + $0x30] ss:$8 sps:$4 sm:$0xff]   ;;  %v5346_v9 = vld [vmem:[#allocation7 + $0x4] ss:$16 sps:$4 sm:$0xff]   ;;  %v5341_v15 = vld [vmem:[#allocation2 + $0x8] sm:$0xff]   ;;  %v5971_v47 = vshrl.u32 %v120_v46, 7 }
  0x60   :  { %v5340_v10 = vld [vmem:[#allocation2] sm:$0xff]   ;;  %v5342_v19 = vld [vmem:[#allocation2 + $0x10] sm:$0xff]   ;;  %v5343_v25 = vld [vmem:[#allocation2 + $0x18] sm:$0xff]  }
  0x61   :  { %v5344_v11 = vld [vmem:[#allocation7] ss:$16 sps:$4 sm:$0xff]   ;;  %v5349_v12 = vld [vmem:[#allocation7 + $0x24] ss:$16 sps:$4 sm:$0xff]   ;;  %v5394_v45 = vld [vmem:[#allocation7 + $0xc] ss:$16 sps:$4 sm:$0xff]  }
  0x62   :  { %206 = vmatpush1.bf16.msra.mxu0 %v5333_v4  ;;  %v5347_v13 = vld [vmem:[#allocation7 + $0x20] ss:$16 sps:$4 sm:$0xff]   ;;  %v5352_v14 = vld [vmem:[#allocation7 + $0x44] ss:$16 sps:$4 sm:$0xff]   ;;  %v5974_v48 = vsub.s32 0, %v5971_v47  ;;  %v5980_v50 = vsub.s32 1, %v5971_v47 }
  0x63   :  { %207 = vmatprep.subr.bf16.mxu0 %v5334_v5  ;;  %v5350_v16 = vld [vmem:[#allocation7 + $0x40] ss:$16 sps:$4 sm:$0xff]   ;;  %v5355_v17 = vld [vmem:[#allocation7 + $0x64] ss:$16 sps:$4 sm:$0xff]   ;;  %v5406_v46 = vld [vmem:[#allocation7 + $0x8c] ss:$16 sps:$4 sm:$0xff]  }
  0x64   :  { %v5353_v18 = vld [vmem:[#allocation7 + $0x60] ss:$16 sps:$4 sm:$0xff]   ;;  %v5358_v20 = vld [vmem:[#allocation7 + $0x84] ss:$16 sps:$4 sm:$0xff]  }
  0x65   :  { %v5356_v21 = vld [vmem:[#allocation7 + $0x80] ss:$16 sps:$4 sm:$0xff]   ;;  %v5361_v22 = vld [vmem:[#allocation7 + $0xa4] ss:$16 sps:$4 sm:$0xff]  }
  0x66   :  { %208 = vmatpush1.bf16.msra.mxu0 %v5336_v6  ;;  %v5359_v23 = vld [vmem:[#allocation7 + $0xa0] ss:$16 sps:$4 sm:$0xff]   ;;  %v5364_v24 = vld [vmem:[#allocation7 + $0xc4] ss:$16 sps:$4 sm:$0xff]  }
  0x67   :  { %209 = vmatprep.subr.bf16.mxu0 %v5337_v7  ;;  %v5362_v26 = vld [vmem:[#allocation7 + $0xc0] ss:$16 sps:$4 sm:$0xff]   ;;  %v5367_v27 = vld [vmem:[#allocation7 + $0xe4] ss:$16 sps:$4 sm:$0xff]  }
  0x68   :  { %v5365_v28 = vld [vmem:[#allocation7 + $0xe0] ss:$16 sps:$4 sm:$0xff]   ;;  %v5370_v29 = vld [vmem:[#allocation7 + $0x104] ss:$16 sps:$4 sm:$0xff]  }
  0x69   :  { %v5368_v30 = vld [vmem:[#allocation7 + $0x100] ss:$16 sps:$4 sm:$0xff]   ;;  %v5373_v31 = vld [vmem:[#allocation7 + $0x124] ss:$16 sps:$4 sm:$0xff]  }
  0x6a   :  { %210 = vmatpush1.bf16.msra.mxu0 %v5339_v8  ;;  %v5371_v32 = vld [vmem:[#allocation7 + $0x120] ss:$16 sps:$4 sm:$0xff]   ;;  %v5376_v33 = vld [vmem:[#allocation7 + $0x144] ss:$16 sps:$4 sm:$0xff]  }
  0x6b   :  { %738 = vmatprep.subr.bf16.mxu0 %v5346_v9  ;;  %v5374_v34 = vld [vmem:[#allocation7 + $0x140] ss:$16 sps:$4 sm:$0xff]   ;;  %v5379_v35 = vld [vmem:[#allocation7 + $0x164] ss:$16 sps:$4 sm:$0xff]  }
  0x6c   :  { %v5377_v36 = vld [vmem:[#allocation7 + $0x160] ss:$16 sps:$4 sm:$0xff]   ;;  %v5382_v37 = vld [vmem:[#allocation7 + $0x184] ss:$16 sps:$4 sm:$0xff]  }
  0x6d   :  { %4637 = vmatmul.mubr.msk.bf16.vlgmr.msra.gmra.mrb[0].mxu0 %vm190_vm0, %v5340_v10  ;;  %v5380_v38 = vld [vmem:[#allocation7 + $0x180] ss:$16 sps:$4 sm:$0xff]   ;;  %v5385_v39 = vld [vmem:[#allocation7 + $0x1a4] ss:$16 sps:$4 sm:$0xff]   ;;  %v5392_v10 = vld [vmem:[#allocation7 + $0x8] ss:$16 sps:$4 sm:$0xff]  }
  0x6e   :  { %245 = vmatprep.mubr.bf16.mxu0 %v5849_v0  ;;  %739 = vmatpush1.bf16.msra.mxu0 %v5344_v11  ;;  %v5383_v40 = vld [vmem:[#allocation7 + $0x1a0] ss:$16 sps:$4 sm:$0xff]   ;;  %v5388_v41 = vld [vmem:[#allocation7 + $0x1c4] ss:$16 sps:$4 sm:$0xff]  }
  0x6f   :  { %740 = vmatprep.subr.bf16.mxu0 %v5349_v12  ;;  %v5386_v42 = vld [vmem:[#allocation7 + $0x1c0] ss:$16 sps:$4 sm:$0xff]   ;;  %v5391_v43 = vld [vmem:[#allocation7 + $0x1e4] ss:$16 sps:$4 sm:$0xff]  }
  0x70   :  { %v5389_v44 = vld [vmem:[#allocation7 + $0x1e0] ss:$16 sps:$4 sm:$0xff]  }
  0x71   :  { %v118_v49 = vld [vmem:[%s6410_s2] sm:$0x3] }
  0x72   :  { %741 = vmatpush1.bf16.msra.mxu0 %v5347_v13  ;;  %v5983_v51 = vrot.slane %v118_v49, %v5974_v48  ;;  %v5986_v52 = vrot.slane %v118_v49, %v5980_v50  ;;  %v5397_v13 = vld [vmem:[#allocation7 + $0x2c] ss:$16 sps:$4 sm:$0xff]  }
  0x73   :  { %742 = vmatprep.subr.bf16.mxu0 %v5352_v14 }
  0x75   :  { %4638 = vmatmul.mubr.msk.bf16.gmra.mrb[4].mxu0 %vm190_vm0, %v5341_v15 }
  0x76   :  { %255 = vmatprep.mubr.bf16.mxu0 %v5849_v0  ;;  %743 = vmatpush1.bf16.msra.mxu0 %v5350_v16 }
  0x77   :  { %744 = vmatprep.subr.bf16.mxu0 %v5355_v17 }
  0x7a   :  { %745 = vmatpush1.bf16.msra.mxu0 %v5353_v18 }
  0x7b   :  { %746 = vmatprep.subr.bf16.mxu0 %v5358_v20  ;;  %v5395_v20 = vld [vmem:[#allocation7 + $0x28] ss:$16 sps:$4 sm:$0xff]  }
  0x7d   :  { %4639 = vmatmul.mubr.msk.bf16.gmra.mrb[8].mxu0 %vm190_vm0, %v5342_v19 }
  0x7e   :  { %265 = vmatprep.mubr.bf16.mxu0 %v5849_v0  ;;  %747 = vmatpush1.bf16.msra.mxu0 %v5356_v21 }
  0x7f   :  { %748 = vmatprep.subr.bf16.mxu0 %v5361_v22 }
  0x82   :  { %749 = vmatpush1.bf16.msra.mxu0 %v5359_v23 }
  0x83   :  { %750 = vmatprep.subr.bf16.mxu0 %v5364_v24  ;;  %v5400_v24 = vld [vmem:[#allocation7 + $0x4c] ss:$16 sps:$4 sm:$0xff]  }
  0x85   :  { %4640 = vmatmul.mubr.msk.bf16.gmra.mrb[12].mxu0 %vm190_vm0, %v5343_v25 }
  0x86   :  { %751 = vmatpush1.bf16.msra.mxu0 %v5362_v26 }
  0x87   :  { %752 = vmatprep.subr.bf16.mxu0 %v5367_v27 }
  0x8a   :  { %753 = vmatpush1.bf16.msra.mxu0 %v5365_v28 }
  0x8b   :  { %754 = vmatprep.subr.bf16.mxu0 %v5370_v29 }
  0x8e   :  { %755 = vmatpush1.bf16.msra.mxu0 %v5368_v30 }
  0x8f   :  { %756 = vmatprep.subr.bf16.mxu0 %v5373_v31 }
  0x92   :  { %757 = vmatpush1.bf16.msra.mxu0 %v5371_v32  ;;  %v5398_v32 = vld [vmem:[#allocation7 + $0x48] ss:$16 sps:$4 sm:$0xff]  }
  0x93   :  { %758 = vmatprep.subr.bf16.mxu0 %v5376_v33 }
  0x96   :  { %759 = vmatpush1.bf16.msra.mxu0 %v5374_v34 }
  0x97   :  { %760 = vmatprep.subr.bf16.mxu0 %v5379_v35  ;;  %v5403_v35 = vld [vmem:[#allocation7 + $0x6c] ss:$16 sps:$4 sm:$0xff]  }
  0x9a   :  { %761 = vmatpush1.bf16.msra.mxu0 %v5377_v36 }
  0x9b   :  { %762 = vmatprep.subr.bf16.mxu0 %v5382_v37 }
  0x9e   :  { %763 = vmatpush1.bf16.msra.mxu0 %v5380_v38 }
  0x9f   :  { %764 = vmatprep.subr.bf16.mxu0 %v5385_v39 }
  0xa2   :  { %765 = vmatpush1.bf16.msra.mxu0 %v5383_v40 }
  0xa3   :  { %766 = vmatprep.subr.bf16.mxu0 %v5388_v41 }
  0xa6   :  { %767 = vmatpush1.bf16.msra.mxu0 %v5386_v42  ;;  %v5401_v42 = vld [vmem:[#allocation7 + $0x68] ss:$16 sps:$4 sm:$0xff]  }
  0xa7   :  { %768 = vmatprep.subr.bf16.mxu0 %v5391_v43 }
  0xaa   :  { %769 = vmatpush1.bf16.msra.mxu0 %v5389_v44 }
  0xab   :  { %811 = vmatprep.subr.bf16.mxu0 %v5394_v45 }
 0x140   :  { %v237_v53 = vpop.f32.mrb[0].mxu0 }
 0x141   :  { %v238_v54 = vadd.f32 %v237_v53, %v5983_v51  ;;  %v239_v55 = vpop.f32.mrb[1].mxu0 }
 0x142   :  { %v240_v56 = vadd.f32 %v239_v55, %v5986_v52  ;;  %v241_v57 = vpop.f32.mrb[2].mxu0 }
 0x143   :  { %v292_v58 = vmul.f32 0.2, %v238_v54  ;;  %v242_v59 = vadd.f32 %v241_v57, %v5983_v51  ;;  %v243_v60 = vpop.f32.mrb[3].mxu0  ;;  %vm276_vm1 = vcmp.gt.f32.partialorder %v238_v54, 0.0 }
 0x144   :  { %v293_v61 = vmul.f32 0.2, %v240_v56  ;;  %v244_v62 = vadd.f32 %v243_v60, %v5986_v52  ;;  %vm277_vm2 = vcmp.gt.f32.partialorder %v240_v56, 0.0 }
 0x145   :  { %vm278_vm3 = vcmp.gt.f32.partialorder %v242_v59, 0.0  ;;  %v294_v63 = vmul.f32 0.2, %v242_v59  ;;  %v308_v1 = vsel %vm276_vm1, %v238_v54, %v292_v58 }
 0x146   :  { %vm279_vm4 = vcmp.gt.f32.partialorder %v244_v62, 0.0  ;;  %v295_v0 = vmul.f32 0.2, %v244_v62  ;;  %v309_v5 = vsel %vm277_vm2, %v240_v56, %v293_v61 }
 0x147   :  { %v310_v2 = vsel %vm278_vm3, %v242_v59, %v294_v63  ;;  %v5404_v59 = vld [vmem:[#allocation7 + $0x88] ss:$16 sps:$4 sm:$0xff]  }
 0x148   :  { %v5992_v3 = vpack.c.bf16 %v310_v2, %v308_v1  ;;  %v247_v4 = vpop.f32.mrb[4].mxu0  ;;  %v311_v6 = vsel %vm279_vm4, %v244_v62, %v295_v0  ;;  %v5409_v62 = vld [vmem:[#allocation7 + $0xac] ss:$16 sps:$4 sm:$0xff]  }
 0x149   :  { %v248_v7 = vadd.f32 %v247_v4, %v5983_v51  ;;  %v249_v8 = vpop.f32.mrb[5].mxu0  ;;  %v5995_v9 = vpack.c.bf16 %v311_v6, %v309_v5  ;;  %v5407_v6 = vld [vmem:[#allocation7 + $0xa8] ss:$16 sps:$4 sm:$0xff]  }
 0x14a   :  { %v250_v11 = vadd.f32 %v249_v8, %v5986_v52  ;;  %v251_v12 = vpop.f32.mrb[6].mxu0 }
 0x14b   :  { %vm280_vm5 = vcmp.gt.f32.partialorder %v248_v7, 0.0  ;;  %v296_v14 = vmul.f32 0.2, %v248_v7  ;;  %v252_v15 = vadd.f32 %v251_v12, %v5983_v51  ;;  %v253_v16 = vpop.f32.mrb[7].mxu0  ;;  %770 = vmatprep.mubr.bf16.mxu0 %v5995_v9 }
 0x14c   :  { %vm281_vm6 = vcmp.gt.f32.partialorder %v250_v11, 0.0  ;;  %v297_v17 = vmul.f32 0.2, %v250_v11  ;;  %v254_v18 = vadd.f32 %v253_v16, %v5986_v52  ;;  %771 = vmatmul.mubr.bf16.vlgmr.msra.gmra.mrb[16].mxu0 %v5992_v3  ;;  %v5413_v16 = vld [vmem:[#allocation7 + $0xe8] ss:$16 sps:$4 sm:$0xff]  }
 0x14d   :  { %vm282_vm7 = vcmp.gt.f32.partialorder %v252_v15, 0.0  ;;  %v298_v19 = vmul.f32 0.2, %v252_v15  ;;  %812 = vmatpush1.bf16.msra.mxu0 %v5392_v10  ;;  %v312_v21 = vsel %vm280_vm5, %v248_v7, %v296_v14 }
 0x14e   :  { %vm283_vm8 = vcmp.gt.f32.partialorder %v254_v18, 0.0  ;;  %v299_v22 = vmul.f32 0.2, %v254_v18  ;;  %813 = vmatprep.subr.bf16.mxu0 %v5397_v13  ;;  %v313_v23 = vsel %vm281_vm6, %v250_v11, %v297_v17  ;;  %v5412_v11 = vld [vmem:[#allocation7 + $0xcc] ss:$16 sps:$4 sm:$0xff]  }
 0x14f   :  { %v314_v25 = vsel %vm282_vm7, %v252_v15, %v298_v19  ;;  %v5415_v15 = vld [vmem:[#allocation7 + $0xec] ss:$16 sps:$4 sm:$0xff]  }
 0x150   :  { %v257_v26 = vpop.f32.mrb[8].mxu0  ;;  %v315_v27 = vsel %vm283_vm8, %v254_v18, %v299_v22  ;;  %v6002_v28 = vpack.c.bf16 %v314_v25, %v312_v21  ;;  %v5418_v17 = vld [vmem:[#allocation7 + $0x10c] ss:$16 sps:$4 sm:$0xff]   ;;  %v5416_v18 = vld [vmem:[#allocation7 + $0x108] ss:$16 sps:$4 sm:$0xff]  }
 0x151   :  { %v258_v29 = vadd.f32 %v257_v26, %v5983_v51  ;;  %814 = vmatpush1.bf16.msra.mxu0 %v5395_v20  ;;  %v259_v30 = vpop.f32.mrb[9].mxu0  ;;  %v6005_v31 = vpack.c.bf16 %v315_v27, %v313_v23  ;;  %v5421_v19 = vld [vmem:[#allocation7 + $0x12c] ss:$16 sps:$4 sm:$0xff]   ;;  %v5419_v20 = vld [vmem:[#allocation7 + $0x128] ss:$16 sps:$4 sm:$0xff]  }
 0x152   :  { %v260_v33 = vadd.f32 %v259_v30, %v5986_v52  ;;  %v261_v34 = vpop.f32.mrb[10].mxu0  ;;  %815 = vmatprep.subr.bf16.mxu0 %v5400_v24  ;;  %v5424_v21 = vld [vmem:[#allocation7 + $0x14c] ss:$16 sps:$4 sm:$0xff]   ;;  %v5422_v22 = vld [vmem:[#allocation7 + $0x148] ss:$16 sps:$4 sm:$0xff]  }
 0x153   :  { %vm284_vm9 = vcmp.gt.f32.partialorder %v258_v29, 0.0  ;;  %v300_v36 = vmul.f32 0.2, %v258_v29  ;;  %v262_v37 = vadd.f32 %v261_v34, %v5983_v51  ;;  %v263_v38 = vpop.f32.mrb[11].mxu0  ;;  %780 = vmatprep.mubr.bf16.mxu0 %v6005_v31  ;;  %v5427_v23 = vld [vmem:[#allocation7 + $0x16c] ss:$16 sps:$4 sm:$0xff]  }
 0x154   :  { %vm285_vm10 = vcmp.gt.f32.partialorder %v260_v33, 0.0  ;;  %v301_v39 = vmul.f32 0.2, %v260_v33  ;;  %v264_v40 = vadd.f32 %v263_v38, %v5986_v52  ;;  %781 = vmatmul.mubr.bf16.gmra.mrb[20].mxu0 %v6002_v28  ;;  %v5425_v24 = vld [vmem:[#allocation7 + $0x168] ss:$16 sps:$4 sm:$0xff]   ;;  %v1000_v34 = vld [vmem:[#allocation8 + $0x20] sm:$0xff] }
 0x155   :  { %vm286_vm11 = vcmp.gt.f32.partialorder %v262_v37, 0.0  ;;  %v302_v41 = vmul.f32 0.2, %v262_v37  ;;  %816 = vmatpush1.bf16.msra.mxu0 %v5398_v32  ;;  %v316_v43 = vsel %vm284_vm9, %v258_v29, %v300_v36  ;;  %v5430_v25 = vld [vmem:[#allocation7 + $0x18c] ss:$16 sps:$4 sm:$0xff]   ;;  %v1008_v38 = vld [vmem:[#allocation8 + $0x60] sm:$0xff] }
 0x156   :  { %vm287_vm12 = vcmp.gt.f32.partialorder %v264_v40, 0.0  ;;  %v303_v44 = vmul.f32 0.2, %v264_v40  ;;  %817 = vmatprep.subr.bf16.mxu0 %v5403_v35  ;;  %v317_v45 = vsel %vm285_vm10, %v260_v33, %v301_v39  ;;  %v5433_v26 = vld [vmem:[#allocation7 + $0x1ac] ss:$16 sps:$4 sm:$0xff]   ;;  %v996_v33 = vld [vmem:[#allocation8] sm:$0xff] }
 0x157   :  { %v318_v49 = vsel %vm286_vm11, %v262_v37, %v302_v41  ;;  %v5431_v27 = vld [vmem:[#allocation7 + $0x1a8] ss:$16 sps:$4 sm:$0xff]   ;;  %v5436_v29 = vld [vmem:[#allocation7 + $0x1cc] ss:$16 sps:$4 sm:$0xff]   ;;  %v4706_v36 = vcombine.high %v996_v33, %v1000_v34  ;;  %v1004_v37 = vld [vmem:[#allocation8 + $0x40] sm:$0xff]  ;;  %v4705_v39 = vcombine.low %v996_v33, %v1000_v34 }
 0x158   :  { %v267_v53 = vpop.f32.mrb[12].mxu0  ;;  %v319_v54 = vsel %vm287_vm12, %v264_v40, %v303_v44  ;;  %v6012_v55 = vpack.c.bf16 %v318_v49, %v316_v43  ;;  %v5434_v30 = vld [vmem:[#allocation7 + $0x1c8] ss:$16 sps:$4 sm:$0xff]   ;;  %v5439_v32 = vld [vmem:[#allocation7 + $0x1ec] ss:$16 sps:$4 sm:$0xff]   ;;  %v4714_v40 = vcombine.high %v1004_v37, %v1008_v38  ;;  %v1012_v41 = vld [vmem:[#allocation8 + $0x80] sm:$0xff]  ;;  %v4713_v43 = vcombine.low %v1004_v37, %v1008_v38 }
 0x159   :  { %v268_v56 = vadd.f32 %v267_v53, %v5983_v51  ;;  %818 = vmatpush1.bf16.msra.mxu0 %v5401_v42  ;;  %v269_v57 = vpop.f32.mrb[13].mxu0  ;;  %v6015_v58 = vpack.c.bf16 %v319_v54, %v317_v45  ;;  %v5437_v35 = vld [vmem:[#allocation7 + $0x1e8] ss:$16 sps:$4 sm:$0xff]   ;;  %v1016_v42 = vld [vmem:[#allocation8 + $0xa0] sm:$0xff] }
 0x15a   :  { %v270_v60 = vadd.f32 %v269_v57, %v5986_v52  ;;  %v271_v61 = vpop.f32.mrb[14].mxu0  ;;  %819 = vmatprep.subr.bf16.mxu0 %v5406_v46  ;;  %v4722_v44 = vcombine.high %v1012_v41, %v1016_v42  ;;  %v1020_v45 = vld [vmem:[#allocation8 + $0xc0] sm:$0xff]  ;;  %v4721_v49 = vcombine.low %v1012_v41, %v1016_v42 }
 0x15b   :  { %vm288_vm13 = vcmp.gt.f32.partialorder %v268_v56, 0.0  ;;  %v304_v63 = vmul.f32 0.2, %v268_v56  ;;  %v272_v0 = vadd.f32 %v271_v61, %v5983_v51  ;;  %v273_v1 = vpop.f32.mrb[15].mxu0  ;;  %790 = vmatprep.mubr.bf16.mxu0 %v6015_v58  ;;  %v1024_v46 = vld [vmem:[#allocation8 + $0xe0] sm:$0xff] }
 0x15c   :  { %vm289_vm14 = vcmp.gt.f32.partialorder %v270_v60, 0.0  ;;  %v305_v2 = vmul.f32 0.2, %v270_v60  ;;  %v274_v4 = vadd.f32 %v273_v1, %v5986_v52  ;;  %791 = vmatmul.mubr.bf16.gmra.mrb[24].mxu0 %v6012_v55  ;;  %v5410_v52 = vld [vmem:[#allocation7 + $0xc8] ss:$16 sps:$4 sm:$0xff]   ;;  %v4730_v53 = vcombine.high %v1020_v45, %v1024_v46  ;;  %v1028_v54 = vld [vmem:[#allocation8 + $0x100] sm:$0xff] }
 0x15d   :  { %vm290_vm15 = vcmp.gt.f32.partialorder %v272_v0, 0.0  ;;  %v306_v5 = vmul.f32 0.2, %v272_v0  ;;  %820 = vmatpush1.bf16.msra.mxu0 %v5404_v59  ;;  %v320_v7 = vsel %vm288_vm13, %v268_v56, %v304_v63  ;;  %v1032_v56 = vld [vmem:[#allocation8 + $0x120] sm:$0xff] }
 0x15e   :  { %vm291_vm0 = vcmp.gt.f32.partialorder %v274_v4, 0.0  ;;  %v307_v8 = vmul.f32 0.2, %v274_v4  ;;  %821 = vmatprep.subr.bf16.mxu0 %v5409_v62  ;;  %v321_v10 = vsel %vm289_vm14, %v270_v60, %v305_v2  ;;  %v1036_v57 = vld [vmem:[#allocation8 + $0x140] sm:$0xff]  ;;  %v4737_v60 = vcombine.low %v1028_v54, %v1032_v56 }
 0x15f   :  { %v322_v51 = vsel %vm290_vm15, %v272_v0, %v306_v5  ;;  %v1040_v59 = vld [vmem:[#allocation8 + $0x160] sm:$0xff] }
 0x160   :  { %v323_v12 = vsel %vm291_vm0, %v274_v4, %v307_v8  ;;  %v6022_v13 = vpack.c.bf16 %v322_v51, %v320_v7  ;;  %v4746_v61 = vcombine.high %v1036_v57, %v1040_v59  ;;  %v1044_v62 = vld [vmem:[#allocation8 + $0x180] sm:$0xff] }
 0x161   :  { %822 = vmatpush1.bf16.msra.mxu0 %v5407_v6  ;;  %v6024_v14 = vpack.c.bf16 %v323_v12, %v321_v10  ;;  %v1048_v63 = vld [vmem:[#allocation8 + $0x1a0] sm:$0xff] }
 0x162   :  { %823 = vmatprep.subr.bf16.mxu0 %v5412_v11  ;;  %v1052_v0 = vld [vmem:[#allocation8 + $0x1c0] sm:$0xff]  ;;  %v4753_v2 = vcombine.low %v1044_v62, %v1048_v63 }
 0x163   :  { %800 = vmatprep.mubr.bf16.mxu0 %v6024_v14  ;;  %v1056_v1 = vld [vmem:[#allocation8 + $0x1e0] sm:$0xff] }
 0x164   :  { %801 = vmatmul.mubr.bf16.gmra.mrb[28].mxu0 %v6022_v13  ;;  %v4762_v4 = vcombine.high %v1052_v0, %v1056_v1  ;;  %v1060_v5 = vld [vmem:[#allocation8 + $0x200] sm:$0xff]  ;;  %v4761_v7 = vcombine.low %v1052_v0, %v1056_v1 }
 0x165   :  { %824 = vmatpush1.bf16.msra.mxu0 %v5410_v52  ;;  %843 = vmatprep.mubr.bf16.mxu0 %v5995_v9  ;;  %v5428_v9 = vld [vmem:[#allocation7 + $0x188] ss:$16 sps:$4 sm:$0xff]   ;;  %v1064_v6 = vld [vmem:[#allocation8 + $0x220] sm:$0xff] }
 0x166   :  { %825 = vmatprep.subr.bf16.mxu0 %v5415_v15  ;;  %v1068_v8 = vld [vmem:[#allocation8 + $0x240] sm:$0xff]  ;;  %v6038_v52 = vld [vmem:[#allocation8 + $0x28] sm:$0xff]  ;;  %v4769_v15 = vcombine.low %v1060_v5, %v1064_v6 }
 0x167   :  { %v1072_v10 = vld [vmem:[#allocation8 + $0x260] sm:$0xff] }
 0x168   :  { %v1124_v11 = vld [vmem:[#allocation8 + $0x400] sm:$0xff] }
 0x169   :  { %826 = vmatpush1.bf16.msra.mxu0 %v5413_v16  ;;  %v1128_v51 = vld [vmem:[#allocation8 + $0x420] sm:$0xff] }
 0x16a   :  { %827 = vmatprep.subr.bf16.mxu0 %v5418_v17  ;;  %v4834_v12 = vcombine.high %v1124_v11, %v1128_v51  ;;  %v4833_v16 = vcombine.low %v1124_v11, %v1128_v51  ;;  %v4778_v17 = vcombine.high %v1068_v8, %v1072_v10  ;;  %v1148_v37 = vld [vmem:[#allocation8 + $0x4c0] sm:$0xff] }
 0x16b   :  { %v1152_v38 = vld [vmem:[#allocation8 + $0x4e0] sm:$0xff] }
 0x16c   :  { %2647 = vmatprep.subr.bf16.mxu1 %v4834_v12  ;;  %v4857_v41 = vcombine.low %v1148_v37, %v1152_v38  ;;  %v1172_v0 = vld [vmem:[#allocation8 + $0x580] sm:$0xff] }
 0x16d   :  { %828 = vmatpush1.bf16.msra.mxu0 %v5416_v18  ;;  %v1076_v18 = vld [vmem:[#allocation8 + $0x280] sm:$0xff]  ;;  %2648 = vmatpush1.bf16.msra.mxu1 %v4833_v16 }
 0x16e   :  { %829 = vmatprep.subr.bf16.mxu0 %v5421_v19  ;;  %v1080_v19 = vld [vmem:[#allocation8 + $0x2a0] sm:$0xff] }
 0x16f   :  { %v1176_v1 = vld [vmem:[#allocation8 + $0x5a0] sm:$0xff] }
 0x170   :  { %v1188_v12 = vld [vmem:[#allocation8 + $0x600] sm:$0xff] }
 0x171   :  { %830 = vmatpush1.bf16.msra.mxu0 %v5419_v20  ;;  %v1132_v20 = vld [vmem:[#allocation8 + $0x440] sm:$0xff] }
 0x172   :  { %831 = vmatprep.subr.bf16.mxu0 %v5424_v21  ;;  %v1136_v21 = vld [vmem:[#allocation8 + $0x460] sm:$0xff] }
 0x175   :  { %832 = vmatpush1.bf16.msra.mxu0 %v5422_v22  ;;  %v4842_v22 = vcombine.high %v1132_v20, %v1136_v21 }
 0x176   :  { %833 = vmatprep.subr.bf16.mxu0 %v5427_v23  ;;  %v4777_v23 = vcombine.low %v1068_v8, %v1072_v10 }
 0x177   :  { %2649 = vmatprep.subr.bf16.mxu1 %v4842_v22  ;;  %v1204_v22 = vld [vmem:[#allocation8 + $0x680] sm:$0xff] }
 0x179   :  { %834 = vmatpush1.bf16.msra.mxu0 %v5425_v24  ;;  %v4841_v24 = vcombine.low %v1132_v20, %v1136_v21 }
 0x17a   :  { %835 = vmatprep.subr.bf16.mxu0 %v5430_v25  ;;  %v4786_v25 = vcombine.high %v1076_v18, %v1080_v19 }
 0x17b   :  { %2650 = vmatpush1.bf16.msra.mxu1 %v4841_v24 }
 0x17d   :  { %836 = vmatpush1.bf16.msra.mxu0 %v5428_v9  ;;  %v1084_v9 = vld [vmem:[#allocation8 + $0x2c0] sm:$0xff] }
 0x17e   :  { %837 = vmatprep.subr.bf16.mxu0 %v5433_v26  ;;  %v1088_v26 = vld [vmem:[#allocation8 + $0x2e0] sm:$0xff] }
 0x17f   :  { %v4794_v34 = vcombine.high %v1084_v9, %v1088_v26 }
 0x181   :  { %838 = vmatpush1.bf16.msra.mxu0 %v5431_v27  ;;  %v1140_v27 = vld [vmem:[#allocation8 + $0x480] sm:$0xff] }
 0x182   :  { %839 = vmatprep.subr.bf16.mxu0 %v5436_v29  ;;  %v1144_v29 = vld [vmem:[#allocation8 + $0x4a0] sm:$0xff] }
 0x183   :  { %v4849_v33 = vcombine.low %v1140_v27, %v1144_v29 }
 0x185   :  { %840 = vmatpush1.bf16.msra.mxu0 %v5434_v30  ;;  %v4850_v30 = vcombine.high %v1140_v27, %v1144_v29 }
 0x186   :  { %841 = vmatprep.subr.bf16.mxu0 %v5439_v32  ;;  %v4785_v32 = vcombine.low %v1076_v18, %v1080_v19  ;;  %v1196_v18 = vld [vmem:[#allocation8 + $0x640] sm:$0xff] }
 0x187   :  { %2651 = vmatprep.subr.bf16.mxu1 %v4850_v30  ;;  %v1200_v19 = vld [vmem:[#allocation8 + $0x660] sm:$0xff] }
 0x188   :  { %2652 = vmatpush1.bf16.msra.mxu1 %v4849_v33  ;;  %v4906_v20 = vcombine.high %v1196_v18, %v1200_v19  ;;  %v4905_v21 = vcombine.low %v1196_v18, %v1200_v19  ;;  %v1220_v30 = vld [vmem:[#allocation8 + $0x700] sm:$0xff] }
 0x189   :  { %842 = vmatpush1.bf16.msra.mxu0 %v5437_v35  ;;  %v1092_v35 = vld [vmem:[#allocation8 + $0x300] sm:$0xff] }
 0x18a   :  { %2574 = vmatprep.subr.bf16.mxu0 %v4706_v36  ;;  %v1096_v36 = vld [vmem:[#allocation8 + $0x320] sm:$0xff] }
 0x18b   :  { %v4802_v42 = vcombine.high %v1092_v35, %v1096_v36 }
 0x18c   :  { %844 = vmatmul.mubr.bf16.vlgmr.msra.gmra.mrb[32].mxu0 %v5992_v3  ;;  %v4729_v3 = vcombine.low %v1020_v45, %v1024_v46  ;;  %v1156_v45 = vld [vmem:[#allocation8 + $0x500] sm:$0xff] }
 0x18d   :  { %853 = vmatprep.mubr.bf16.mxu0 %v6005_v31  ;;  %2575 = vmatpush1.bf16.msra.mxu0 %v4705_v39  ;;  %v4738_v31 = vcombine.high %v1028_v54, %v1032_v56  ;;  %v4858_v39 = vcombine.high %v1148_v37, %v1152_v38  ;;  %v1160_v46 = vld [vmem:[#allocation8 + $0x520] sm:$0xff] }
 0x18e   :  { %2576 = vmatprep.subr.bf16.mxu0 %v4714_v40  ;;  %v4793_v40 = vcombine.low %v1084_v9, %v1088_v26  ;;  %v4865_v54 = vcombine.low %v1156_v45, %v1160_v46  ;;  %v1212_v9 = vld [vmem:[#allocation8 + $0x6c0] sm:$0xff] }
 0x18f   :  { %2653 = vmatprep.subr.bf16.mxu1 %v4858_v39  ;;  %v1216_v26 = vld [vmem:[#allocation8 + $0x6e0] sm:$0xff] }
 0x190   :  { %2654 = vmatpush1.bf16.msra.mxu1 %v4857_v41  ;;  %v4922_v27 = vcombine.high %v1212_v9, %v1216_v26  ;;  %v4921_v29 = vcombine.low %v1212_v9, %v1216_v26  ;;  %v1236_v39 = vld [vmem:[#allocation8 + $0x780] sm:$0xff] }
 0x191   :  { %2577 = vmatpush1.bf16.msra.mxu0 %v4713_v43  ;;  %v1100_v43 = vld [vmem:[#allocation8 + $0x340] sm:$0xff] }
 0x192   :  { %2578 = vmatprep.subr.bf16.mxu0 %v4722_v44  ;;  %v1104_v44 = vld [vmem:[#allocation8 + $0x360] sm:$0xff] }
 0x193   :  { %v4810_v56 = vcombine.high %v1100_v43, %v1104_v44 }
 0x194   :  { %854 = vmatmul.mubr.bf16.gmra.mrb[36].mxu0 %v6002_v28  ;;  %v4745_v28 = vcombine.low %v1036_v57, %v1040_v59  ;;  %v1164_v57 = vld [vmem:[#allocation8 + $0x540] sm:$0xff] }
 0x195   :  { %863 = vmatprep.mubr.bf16.mxu0 %v6015_v58  ;;  %2579 = vmatpush1.bf16.msra.mxu0 %v4721_v49  ;;  %v4754_v58 = vcombine.high %v1044_v62, %v1048_v63  ;;  %v4866_v49 = vcombine.high %v1156_v45, %v1160_v46  ;;  %v1168_v59 = vld [vmem:[#allocation8 + $0x560] sm:$0xff] }
 0x196   :  { %2580 = vmatprep.subr.bf16.mxu0 %v4730_v53  ;;  %v4801_v53 = vcombine.low %v1092_v35, %v1096_v36  ;;  %v4873_v62 = vcombine.low %v1164_v57, %v1168_v59  ;;  %v1228_v35 = vld [vmem:[#allocation8 + $0x740] sm:$0xff] }
 0x197   :  { %2655 = vmatprep.subr.bf16.mxu1 %v4866_v49  ;;  %v1232_v36 = vld [vmem:[#allocation8 + $0x760] sm:$0xff]  ;;  %v6044_v49 = vld [vmem:[#allocation8 + $0x10] sm:$0xff] }
 0x198   :  { %2656 = vmatpush1.bf16.msra.mxu1 %v4865_v54  ;;  %v4938_v37 = vcombine.high %v1228_v35, %v1232_v36  ;;  %v4937_v38 = vcombine.low %v1228_v35, %v1232_v36  ;;  %v1021_v36 = vld [vmem:[#allocation8 + $0xc8] sm:$0xff] }
 0x199   :  { %2581 = vmatpush1.bf16.msra.mxu0 %v4729_v3  ;;  %v1108_v3 = vld [vmem:[#allocation8 + $0x380] sm:$0xff] }
 0x19a   :  { %2582 = vmatprep.subr.bf16.mxu0 %v4738_v31  ;;  %v1112_v31 = vld [vmem:[#allocation8 + $0x3a0] sm:$0xff] }
 0x19b   :  { %v4818_v63 = vcombine.high %v1108_v3, %v1112_v31 }
 0x19c   :  { %864 = vmatmul.mubr.bf16.gmra.mrb[40].mxu0 %v6012_v55  ;;  %v4770_v55 = vcombine.high %v1060_v5, %v1064_v6  ;;  %v4881_v5 = vcombine.low %v1172_v0, %v1176_v1 }
 0x19d   :  { %873 = vmatprep.mubr.bf16.mxu0 %v6024_v14  ;;  %2583 = vmatpush1.bf16.msra.mxu0 %v4737_v60  ;;  %v6036_v14 = vld [vmem:[#allocation8 + $0x8] sm:$0xff]  ;;  %v4874_v60 = vcombine.high %v1164_v57, %v1168_v59 }
 0x19e   :  { %2584 = vmatprep.subr.bf16.mxu0 %v4746_v61  ;;  %v4809_v61 = vcombine.low %v1100_v43, %v1104_v44  ;;  %v4708_v51 = vcombine.high %v6036_v14, %v6038_v52  ;;  %v1244_v43 = vld [vmem:[#allocation8 + $0x7c0] sm:$0xff] }
 0x19f   :  { %2657 = vmatprep.subr.bf16.mxu1 %v4874_v60  ;;  %v1248_v44 = vld [vmem:[#allocation8 + $0x7e0] sm:$0xff] }
 0x1a0   :  { %2658 = vmatpush1.bf16.msra.mxu1 %v4873_v62  ;;  %v4954_v45 = vcombine.high %v1244_v43, %v1248_v44  ;;  %v4953_v46 = vcombine.low %v1244_v43, %v1248_v44 }
 0x1a1   :  { %2585 = vmatpush1.bf16.msra.mxu0 %v4745_v28  ;;  %v1116_v28 = vld [vmem:[#allocation8 + $0x3c0] sm:$0xff] }
 0x1a2   :  { %2586 = vmatprep.subr.bf16.mxu0 %v4754_v58  ;;  %v1120_v58 = vld [vmem:[#allocation8 + $0x3e0] sm:$0xff] }
 0x1a3   :  { %v4826_v6 = vcombine.high %v1116_v28, %v1120_v58  ;;  %v4825_v11 = vcombine.low %v1116_v28, %v1120_v58 }
 0x1a4   :  { %874 = vmatmul.mubr.bf16.gmra.mrb[44].mxu0 %v6022_v13  ;;  %v4707_v13 = vcombine.low %v6036_v14, %v6038_v52 }
 0x1a5   :  { %2587 = vmatpush1.bf16.msra.mxu0 %v4753_v2  ;;  %v4882_v2 = vcombine.high %v1172_v0, %v1176_v1 }
 0x1a6   :  { %2588 = vmatprep.subr.bf16.mxu0 %v4762_v4  ;;  %v4817_v4 = vcombine.low %v1108_v3, %v1112_v31  ;;  %v6055_v3 = vld [vmem:[%s6412_s4] sm:$0xf] }
 0x1a7   :  { %2659 = vmatprep.subr.bf16.mxu1 %v4882_v2  ;;  %v6059_v31 = vrot.slane %v6055_v3, %v5974_v48  ;;  %v6063_v57 = vrot.slane %v6055_v3, %v5980_v50 }
 0x1a8   :  { %2660 = vmatpush1.bf16.msra.mxu1 %v4881_v5 }
 0x1a9   :  { %2589 = vmatpush1.bf16.msra.mxu0 %v4761_v7  ;;  %v1180_v7 = vld [vmem:[#allocation8 + $0x5c0] sm:$0xff] }
 0x1aa   :  { %2590 = vmatprep.subr.bf16.mxu0 %v4770_v55  ;;  %v1184_v55 = vld [vmem:[#allocation8 + $0x5e0] sm:$0xff] }
 0x1ab   :  { %v4890_v8 = vcombine.high %v1180_v7, %v1184_v55  ;;  %v4889_v10 = vcombine.low %v1180_v7, %v1184_v55  ;;  %v1005_v55 = vld [vmem:[#allocation8 + $0x48] sm:$0xff] }
 0x1ad   :  { %2591 = vmatpush1.bf16.msra.mxu0 %v4769_v15  ;;  %2661 = vmatprep.subr.bf16.mxu1 %v4890_v8  ;;  %v1192_v15 = vld [vmem:[#allocation8 + $0x620] sm:$0xff]  ;;  %v1009_v8 = vld [vmem:[#allocation8 + $0x68] sm:$0xff] }
 0x1ae   :  { %2592 = vmatprep.subr.bf16.mxu0 %v4778_v17  ;;  %2662 = vmatpush1.bf16.msra.mxu1 %v4889_v10  ;;  %v4898_v16 = vcombine.high %v1188_v12, %v1192_v15  ;;  %v4897_v17 = vcombine.low %v1188_v12, %v1192_v15 }
 0x1b0   :  { %2663 = vmatprep.subr.bf16.mxu1 %v4898_v16 }
 0x1b1   :  { %2593 = vmatpush1.bf16.msra.mxu0 %v4777_v23  ;;  %v1208_v23 = vld [vmem:[#allocation8 + $0x6a0] sm:$0xff] }
 0x1b2   :  { %2594 = vmatprep.subr.bf16.mxu0 %v4786_v25  ;;  %2664 = vmatpush1.bf16.msra.mxu1 %v4897_v17  ;;  %v4914_v24 = vcombine.high %v1204_v22, %v1208_v23  ;;  %v4913_v25 = vcombine.low %v1204_v22, %v1208_v23 }
 0x1b3   :  { %2665 = vmatprep.subr.bf16.mxu1 %v4906_v20  ;;  %v4716_v20 = vcombine.high %v1005_v55, %v1009_v8 }
 0x1b5   :  { %2595 = vmatpush1.bf16.msra.mxu0 %v4785_v32  ;;  %v1224_v32 = vld [vmem:[#allocation8 + $0x720] sm:$0xff] }
 0x1b6   :  { %2596 = vmatprep.subr.bf16.mxu0 %v4794_v34  ;;  %2666 = vmatpush1.bf16.msra.mxu1 %v4905_v21  ;;  %v4930_v33 = vcombine.high %v1220_v30, %v1224_v32  ;;  %v4929_v34 = vcombine.low %v1220_v30, %v1224_v32  ;;  %v4715_v30 = vcombine.low %v1005_v55, %v1009_v8 }
 0x1b7   :  { %2667 = vmatprep.subr.bf16.mxu1 %v4914_v24  ;;  %v1013_v24 = vld [vmem:[#allocation8 + $0x88] sm:$0xff] }
 0x1b9   :  { %2597 = vmatpush1.bf16.msra.mxu0 %v4793_v40  ;;  %v1240_v40 = vld [vmem:[#allocation8 + $0x7a0] sm:$0xff] }
 0x1ba   :  { %2598 = vmatprep.subr.bf16.mxu0 %v4802_v42  ;;  %2668 = vmatpush1.bf16.msra.mxu1 %v4913_v25  ;;  %v4946_v41 = vcombine.high %v1236_v39, %v1240_v40  ;;  %v4945_v42 = vcombine.low %v1236_v39, %v1240_v40  ;;  %v1017_v25 = vld [vmem:[#allocation8 + $0xa8] sm:$0xff] }
 0x1bb   :  { %2669 = vmatprep.subr.bf16.mxu1 %v4922_v27  ;;  %v4723_v52 = vcombine.low %v1013_v24, %v1017_v25 }
 0x1bd   :  { %2599 = vmatpush1.bf16.msra.mxu0 %v4801_v53  ;;  %v6046_v53 = vld [vmem:[#allocation8 + $0x30] sm:$0xff] }
 0x1be   :  { %2600 = vmatprep.subr.bf16.mxu0 %v4810_v56  ;;  %2670 = vmatpush1.bf16.msra.mxu1 %v4921_v29  ;;  %v4710_v54 = vcombine.high %v6044_v49, %v6046_v53  ;;  %v4709_v56 = vcombine.low %v6044_v49, %v6046_v53 }
 0x1bf   :  { %2671 = vmatprep.subr.bf16.mxu1 %v4930_v33 }
 0x1c1   :  { %2601 = vmatpush1.bf16.msra.mxu0 %v4809_v61 }
 0x1c2   :  { %2602 = vmatprep.subr.bf16.mxu0 %v4818_v63  ;;  %2672 = vmatpush1.bf16.msra.mxu1 %v4929_v34  ;;  %v4724_v34 = vcombine.high %v1013_v24, %v1017_v25  ;;  %v1049_v24 = vld [vmem:[#allocation8 + $0x1a8] sm:$0xff] }
 0x1c3   :  { %2673 = vmatprep.subr.bf16.mxu1 %v4938_v37  ;;  %v1025_v37 = vld [vmem:[#allocation8 + $0xe8] sm:$0xff] }
 0x1c4   :  { %v4732_v44 = vcombine.high %v1021_v36, %v1025_v37 }
 0x1c5   :  { %2603 = vmatpush1.bf16.msra.mxu0 %v4817_v4 }
 0x1c6   :  { %2604 = vmatprep.subr.bf16.mxu0 %v4826_v6  ;;  %2674 = vmatpush1.bf16.msra.mxu1 %v4937_v38 }
 0x1c7   :  { %2675 = vmatprep.subr.bf16.mxu1 %v4946_v41 }
 0x1c9   :  { %2605 = vmatpush1.bf16.msra.mxu0 %v4825_v11 }
 0x1ca   :  { %2720 = vmatprep.subr.bf16.mxu0 %v4708_v51  ;;  %2676 = vmatpush1.bf16.msra.mxu1 %v4945_v42 }
 0x1cb   :  { %2677 = vmatprep.subr.bf16.mxu1 %v4954_v45 }
 0x1ce   :  { %2678 = vmatpush1.bf16.msra.mxu1 %v4953_v46 }
 0x1cf   :  { %2866 = vmatprep.subr.bf16.mxu1 %v4710_v54 }
 0x21f   :  { %v772_v59 = vpop.f32.mrb[16].mxu0 }
 0x220   :  { %v773_v60 = vadd.f32 %v772_v59, %v6059_v31  ;;  %v774_v61 = vpop.f32.mrb[17].mxu0  ;;  %v1029_v59 = vld [vmem:[#allocation8 + $0x108] sm:$0xff] }
 0x221   :  { %v775_v62 = vadd.f32 %v774_v61, %v6063_v57  ;;  %v776_v63 = vpop.f32.mrb[18].mxu0 }
 0x222   :  { %v916_v28 = vmul.f32 0.2, %v773_v60  ;;  %v777_v58 = vadd.f32 %v776_v63, %v6059_v31  ;;  %v778_v0 = vpop.f32.mrb[19].mxu0  ;;  %vm884_vm1 = vcmp.gt.f32.partialorder %v773_v60, 0.0 }
 0x223   :  { %v917_v1 = vmul.f32 0.2, %v775_v62  ;;  %v779_v2 = vadd.f32 %v778_v0, %v6063_v57  ;;  %vm885_vm2 = vcmp.gt.f32.partialorder %v775_v62, 0.0 }
 0x224   :  { %vm888_vm3 = vcmp.gt.f32.partialorder %v777_v58, 0.0  ;;  %v920_v4 = vmul.f32 0.2, %v777_v58  ;;  %v948_v6 = vsel %vm884_vm1, %v773_v60, %v916_v28  ;;  %v1033_v60 = vld [vmem:[#allocation8 + $0x128] sm:$0xff] }
 0x225   :  { %vm889_vm4 = vcmp.gt.f32.partialorder %v779_v2, 0.0  ;;  %v921_v5 = vmul.f32 0.2, %v779_v2  ;;  %v949_v10 = vsel %vm885_vm2, %v775_v62, %v917_v1 }
 0x226   :  { %v952_v7 = vsel %vm888_vm3, %v777_v58, %v920_v4  ;;  %v4731_v58 = vcombine.low %v1021_v36, %v1025_v37 }
 0x227   :  { %v6069_v11 = vpack.c.bf16 %v952_v7, %v948_v6  ;;  %v953_v51 = vsel %vm889_vm4, %v779_v2, %v921_v5  ;;  %v782_v12 = vpop.f32.mrb[20].mxu0  ;;  %v4740_v2 = vcombine.high %v1029_v59, %v1033_v60  ;;  %v1037_v5 = vld [vmem:[#allocation8 + $0x148] sm:$0xff] }
 0x228   :  { %v6071_v15 = vpack.c.bf16 %v953_v51, %v949_v10  ;;  %v783_v16 = vadd.f32 %v782_v12, %v6059_v31  ;;  %v784_v17 = vpop.f32.mrb[21].mxu0  ;;  %v1041_v6 = vld [vmem:[#allocation8 + $0x168] sm:$0xff] }
 0x229   :  { %v785_v18 = vadd.f32 %v784_v17, %v6063_v57  ;;  %v786_v19 = vpop.f32.mrb[22].mxu0 }
 0x22a   :  { %vm892_vm5 = vcmp.gt.f32.partialorder %v783_v16, 0.0  ;;  %v924_v21 = vmul.f32 0.2, %v783_v16  ;;  %v787_v22 = vadd.f32 %v786_v19, %v6059_v31  ;;  %v788_v23 = vpop.f32.mrb[23].mxu0  ;;  %2606 = vmatprep.mubr.bf16.mxu0 %v6071_v15  ;;  %v4748_v19 = vcombine.high %v1037_v5, %v1041_v6 }
 0x22b   :  { %vm893_vm6 = vcmp.gt.f32.partialorder %v785_v18, 0.0  ;;  %v925_v9 = vmul.f32 0.2, %v785_v18  ;;  %v789_v26 = vadd.f32 %v788_v23, %v6063_v57  ;;  %2607 = vmatmul.mubr.bf16.vlgmr.msra.gmra.mrb[48].mxu0 %v6069_v11  ;;  %v1045_v23 = vld [vmem:[#allocation8 + $0x188] sm:$0xff] }
 0x22c   :  { %v956_v27 = vsel %vm892_vm5, %v783_v16, %v924_v21  ;;  %vm896_vm7 = vcmp.gt.f32.partialorder %v787_v22, 0.0  ;;  %v928_v29 = vmul.f32 0.2, %v787_v22  ;;  %2721 = vmatpush1.bf16.msra.mxu0 %v4707_v13  ;;  %v4739_v16 = vcombine.low %v1029_v59, %v1033_v60  ;;  %v1081_v59 = vld [vmem:[#allocation8 + $0x2a8] sm:$0xff] }
 0x22d   :  { %v957_v32 = vsel %vm893_vm6, %v785_v18, %v925_v9  ;;  %vm897_vm8 = vcmp.gt.f32.partialorder %v789_v26, 0.0  ;;  %v929_v33 = vmul.f32 0.2, %v789_v26  ;;  %2722 = vmatprep.subr.bf16.mxu0 %v4716_v20 }
 0x22e   :  { %v960_v35 = vsel %vm896_vm7, %v787_v22, %v928_v29  ;;  %v4747_v29 = vcombine.low %v1037_v5, %v1041_v6  ;;  %v1101_v5 = vld [vmem:[#allocation8 + $0x348] sm:$0xff] }
 0x22f   :  { %v6082_v38 = vpack.c.bf16 %v960_v35, %v956_v27  ;;  %v961_v39 = vsel %vm897_vm8, %v789_v26, %v929_v33  ;;  %v792_v40 = vpop.f32.mrb[24].mxu0  ;;  %v1057_v35 = vld [vmem:[#allocation8 + $0x1e8] sm:$0xff] }
 0x230   :  { %v6084_v41 = vpack.c.bf16 %v961_v39, %v957_v32  ;;  %v793_v42 = vadd.f32 %v792_v40, %v6059_v31  ;;  %2723 = vmatpush1.bf16.msra.mxu0 %v4715_v30  ;;  %v794_v14 = vpop.f32.mrb[25].mxu0  ;;  %v1105_v6 = vld [vmem:[#allocation8 + $0x368] sm:$0xff] }
 0x231   :  { %v795_v13 = vadd.f32 %v794_v14, %v6063_v57  ;;  %v796_v43 = vpop.f32.mrb[26].mxu0  ;;  %2724 = vmatprep.subr.bf16.mxu0 %v4724_v34  ;;  %v1053_v34 = vld [vmem:[#allocation8 + $0x1c8] sm:$0xff] }
 0x232   :  { %vm900_vm9 = vcmp.gt.f32.partialorder %v793_v42, 0.0  ;;  %v932_v45 = vmul.f32 0.2, %v793_v42  ;;  %v797_v46 = vadd.f32 %v796_v43, %v6059_v31  ;;  %v798_v54 = vpop.f32.mrb[27].mxu0  ;;  %2616 = vmatprep.mubr.bf16.mxu0 %v6084_v41  ;;  %v4764_v40 = vcombine.high %v1053_v34, %v1057_v35  ;;  %v1065_v14 = vld [vmem:[#allocation8 + $0x228] sm:$0xff] }
 0x233   :  { %vm901_vm10 = vcmp.gt.f32.partialorder %v795_v13, 0.0  ;;  %v933_v61 = vmul.f32 0.2, %v795_v13  ;;  %v799_v62 = vadd.f32 %v798_v54, %v6063_v57  ;;  %2617 = vmatmul.mubr.bf16.gmra.mrb[52].mxu0 %v6082_v38  ;;  %v1069_v43 = vld [vmem:[#allocation8 + $0x248] sm:$0xff] }
 0x234   :  { %v964_v63 = vsel %vm900_vm9, %v793_v42, %v932_v45  ;;  %vm904_vm11 = vcmp.gt.f32.partialorder %v797_v46, 0.0  ;;  %v936_v28 = vmul.f32 0.2, %v797_v46  ;;  %2725 = vmatpush1.bf16.msra.mxu0 %v4723_v52  ;;  %v1061_v42 = vld [vmem:[#allocation8 + $0x208] sm:$0xff]  ;;  %v4763_v52 = vcombine.low %v1053_v34, %v1057_v35 }
 0x235   :  { %v965_v0 = vsel %vm901_vm10, %v795_v13, %v933_v61  ;;  %vm905_vm12 = vcmp.gt.f32.partialorder %v799_v62, 0.0  ;;  %v937_v1 = vmul.f32 0.2, %v799_v62  ;;  %2726 = vmatprep.subr.bf16.mxu0 %v4732_v44  ;;  %v4772_v13 = vcombine.high %v1061_v42, %v1065_v14  ;;  %v1073_v44 = vld [vmem:[#allocation8 + $0x268] sm:$0xff] }
 0x236   :  { %v968_v4 = vsel %vm904_vm11, %v797_v46, %v936_v28  ;;  %v4771_v45 = vcombine.low %v1061_v42, %v1065_v14  ;;  %v4780_v46 = vcombine.high %v1069_v43, %v1073_v44  ;;  %v1077_v54 = vld [vmem:[#allocation8 + $0x288] sm:$0xff]  ;;  %v4779_v60 = vcombine.low %v1069_v43, %v1073_v44  ;;  %v1006_v43 = vld [vmem:[#allocation8 + $0x50] sm:$0xff] }
 0x237   :  { %v6092_v7 = vpack.c.bf16 %v968_v4, %v964_v63  ;;  %v969_v55 = vsel %vm905_vm12, %v799_v62, %v937_v1  ;;  %v802_v8 = vpop.f32.mrb[28].mxu0  ;;  %v4788_v61 = vcombine.high %v1077_v54, %v1081_v59  ;;  %v1085_v62 = vld [vmem:[#allocation8 + $0x2c8] sm:$0xff]  ;;  %v4787_v28 = vcombine.low %v1077_v54, %v1081_v59  ;;  %v1010_v44 = vld [vmem:[#allocation8 + $0x70] sm:$0xff] }
 0x238   :  { %v6094_v10 = vpack.c.bf16 %v969_v55, %v965_v0  ;;  %v803_v51 = vadd.f32 %v802_v8, %v6059_v31  ;;  %2727 = vmatpush1.bf16.msra.mxu0 %v4731_v58  ;;  %v804_v12 = vpop.f32.mrb[29].mxu0  ;;  %v1089_v63 = vld [vmem:[#allocation8 + $0x2e8] sm:$0xff]  ;;  %v408_v8 = vsub.s32 2, %v5971_v47 }
 0x239   :  { %v805_v17 = vadd.f32 %v804_v12, %v6063_v57  ;;  %v806_v18 = vpop.f32.mrb[30].mxu0  ;;  %2728 = vmatprep.subr.bf16.mxu0 %v4740_v2  ;;  %v4796_v58 = vcombine.high %v1085_v62, %v1089_v63  ;;  %v1093_v0 = vld [vmem:[#allocation8 + $0x308] sm:$0xff]  ;;  %v4795_v2 = vcombine.low %v1085_v62, %v1089_v63  ;;  %v412_v12 = vsub.s32 3, %v5971_v47 }
 0x23a   :  { %vm908_vm13 = vcmp.gt.f32.partialorder %v803_v51, 0.0  ;;  %v940_v20 = vmul.f32 0.2, %v803_v51  ;;  %v807_v21 = vadd.f32 %v806_v18, %v6059_v31  ;;  %v808_v22 = vpop.f32.mrb[31].mxu0  ;;  %2626 = vmatprep.mubr.bf16.mxu0 %v6094_v10  ;;  %v4756_v31 = vcombine.high %v1045_v23, %v1049_v24  ;;  %v1097_v1 = vld [vmem:[#allocation8 + $0x328] sm:$0xff] }
 0x23b   :  { %vm909_vm14 = vcmp.gt.f32.partialorder %v805_v17, 0.0  ;;  %v941_v25 = vmul.f32 0.2, %v805_v17  ;;  %v809_v9 = vadd.f32 %v808_v22, %v6063_v57  ;;  %2627 = vmatmul.mubr.bf16.gmra.mrb[56].mxu0 %v6092_v7  ;;  %v4755_v57 = vcombine.low %v1045_v23, %v1049_v24  ;;  %v1117_v22 = vld [vmem:[#allocation8 + $0x3c8] sm:$0xff] }
 0x23c   :  { %v972_v26 = vsel %vm908_vm13, %v803_v51, %v940_v20  ;;  %vm912_vm15 = vcmp.gt.f32.partialorder %v807_v21, 0.0  ;;  %v944_v27 = vmul.f32 0.2, %v807_v21  ;;  %2729 = vmatpush1.bf16.msra.mxu0 %v4739_v16  ;;  %v4804_v4 = vcombine.high %v1093_v0, %v1097_v1  ;;  %v1109_v16 = vld [vmem:[#allocation8 + $0x388] sm:$0xff] }
 0x23d   :  { %v973_v30 = vsel %vm909_vm14, %v805_v17, %v941_v25  ;;  %vm913_vm0 = vcmp.gt.f32.partialorder %v809_v9, 0.0  ;;  %v945_v32 = vmul.f32 0.2, %v809_v9  ;;  %2730 = vmatprep.subr.bf16.mxu0 %v4748_v19  ;;  %v4803_v55 = vcombine.low %v1093_v0, %v1097_v1  ;;  %v1113_v17 = vld [vmem:[#allocation8 + $0x3a8] sm:$0xff] }
 0x23e   :  { %v976_v33 = vsel %vm912_vm15, %v807_v21, %v944_v27  ;;  %v4812_v51 = vcombine.high %v1101_v5, %v1105_v6  ;;  %v6114_v18 = vrot.slane %v6055_v3, %v408_v8  ;;  %v4811_v19 = vcombine.low %v1101_v5, %v1105_v6  ;;  %v1121_v23 = vld [vmem:[#allocation8 + $0x3e8] sm:$0xff] }
 0x23f   :  { %v6102_v36 = vpack.c.bf16 %v976_v33, %v972_v26  ;;  %v977_v37 = vsel %vm913_vm0, %v809_v9, %v945_v32  ;;  %v6119_v20 = vrot.slane %v6055_v3, %v412_v12  ;;  %v4820_v21 = vcombine.high %v1109_v16, %v1113_v17  ;;  %v1125_v3 = vld [vmem:[#allocation8 + $0x408] sm:$0xff] }
 0x240   :  { %v6104_v39 = vpack.c.bf16 %v977_v37, %v973_v30  ;;  %2731 = vmatpush1.bf16.msra.mxu0 %v4747_v29  ;;  %v4819_v26 = vcombine.low %v1109_v16, %v1113_v17  ;;  %v4828_v30 = vcombine.high %v1117_v22, %v1121_v23  ;;  %v1129_v34 = vld [vmem:[#allocation8 + $0x428] sm:$0xff]  ;;  %v1018_v16 = vld [vmem:[#allocation8 + $0xb0] sm:$0xff] }
 0x241   :  { %2732 = vmatprep.subr.bf16.mxu0 %v4756_v31  ;;  %v4836_v14 = vcombine.high %v1125_v3, %v1129_v34  ;;  %v4835_v1 = vcombine.low %v1125_v3, %v1129_v34  ;;  %v1149_v3 = vld [vmem:[#allocation8 + $0x4c8] sm:$0xff] }
 0x242   :  { %2636 = vmatprep.mubr.bf16.mxu0 %v6104_v39  ;;  %v1153_v34 = vld [vmem:[#allocation8 + $0x4e8] sm:$0xff] }
 0x243   :  { %2637 = vmatmul.mubr.bf16.gmra.mrb[60].mxu0 %v6102_v36 }
 0x244   :  { %2733 = vmatpush1.bf16.msra.mxu0 %v4755_v57  ;;  %2752 = vmatprep.mubr.bf16.mxu0 %v6071_v15 }
 0x245   :  { %2734 = vmatprep.subr.bf16.mxu0 %v4764_v40  ;;  %v4827_v40 = vcombine.low %v1117_v22, %v1121_v23  ;;  %v1145_v22 = vld [vmem:[#allocation8 + $0x4a8] sm:$0xff] }
 0x248   :  { %2735 = vmatpush1.bf16.msra.mxu0 %v4763_v52 }
 0x249   :  { %2736 = vmatprep.subr.bf16.mxu0 %v4772_v13 }
 0x24c   :  { %2737 = vmatpush1.bf16.msra.mxu0 %v4771_v45 }
 0x24d   :  { %2738 = vmatprep.subr.bf16.mxu0 %v4780_v46 }
 0x250   :  { %2739 = vmatpush1.bf16.msra.mxu0 %v4779_v60  ;;  %v1133_v60 = vld [vmem:[#allocation8 + $0x448] sm:$0xff] }
 0x251   :  { %2740 = vmatprep.subr.bf16.mxu0 %v4788_v61  ;;  %v1137_v61 = vld [vmem:[#allocation8 + $0x468] sm:$0xff] }
 0x254   :  { %2741 = vmatpush1.bf16.msra.mxu0 %v4787_v28 }
 0x255   :  { %2742 = vmatprep.subr.bf16.mxu0 %v4796_v58 }
 0x258   :  { %2743 = vmatpush1.bf16.msra.mxu0 %v4795_v2  ;;  %v4718_v2 = vcombine.high %v1006_v43, %v1010_v44 }
 0x259   :  { %2744 = vmatprep.subr.bf16.mxu0 %v4804_v4 }
 0x25c   :  { %2745 = vmatpush1.bf16.msra.mxu0 %v4803_v55  ;;  %v4844_v55 = vcombine.high %v1133_v60, %v1137_v61 }
 0x25d   :  { %2746 = vmatprep.subr.bf16.mxu0 %v4812_v51  ;;  %v1014_v51 = vld [vmem:[#allocation8 + $0x90] sm:$0xff] }
 0x25f   :  { %v845_v24 = vpop.f32.mrb[32].mxu0 }
 0x260   :  { %v846_v25 = vadd.f32 %v845_v24, %v6114_v18  ;;  %v847_v9 = vpop.f32.mrb[33].mxu0  ;;  %2747 = vmatpush1.bf16.msra.mxu0 %v4811_v19  ;;  %v4717_v24 = vcombine.low %v1006_v43, %v1010_v44 }
 0x261   :  { %v848_v27 = vadd.f32 %v847_v9, %v6119_v20  ;;  %v849_v29 = vpop.f32.mrb[34].mxu0  ;;  %2748 = vmatprep.subr.bf16.mxu0 %v4820_v21  ;;  %v1141_v21 = vld [vmem:[#allocation8 + $0x488] sm:$0xff]  ;;  %v4843_v9 = vcombine.low %v1133_v60, %v1137_v61  ;;  %v1034_v60 = vld [vmem:[#allocation8 + $0x130] sm:$0xff] }
 0x262   :  { %v918_v32 = vmul.f32 0.2, %v846_v25  ;;  %v850_v31 = vadd.f32 %v849_v29, %v6114_v18  ;;  %v851_v33 = vpop.f32.mrb[35].mxu0  ;;  %vm886_vm1 = vcmp.gt.f32.partialorder %v846_v25, 0.0 }
 0x263   :  { %v919_v35 = vmul.f32 0.2, %v848_v27  ;;  %v852_v37 = vadd.f32 %v851_v33, %v6119_v20  ;;  %vm887_vm2 = vcmp.gt.f32.partialorder %v848_v27, 0.0 }
 0x264   :  { %vm890_vm3 = vcmp.gt.f32.partialorder %v850_v31, 0.0  ;;  %v922_v57 = vmul.f32 0.2, %v850_v31  ;;  %2749 = vmatpush1.bf16.msra.mxu0 %v4819_v26  ;;  %v950_v52 = vsel %vm886_vm1, %v846_v25, %v918_v32  ;;  %v4726_v26 = vcombine.high %v1014_v51, %v1018_v16  ;;  %v1022_v32 = vld [vmem:[#allocation8 + $0xd0] sm:$0xff] }
 0x265   :  { %vm891_vm4 = vcmp.gt.f32.partialorder %v852_v37, 0.0  ;;  %v923_v42 = vmul.f32 0.2, %v852_v37  ;;  %2750 = vmatprep.subr.bf16.mxu0 %v4828_v30  ;;  %v951_v45 = vsel %vm887_vm2, %v848_v27, %v919_v35  ;;  %v4852_v30 = vcombine.high %v1141_v21, %v1145_v22 }
 0x266   :  { %v954_v13 = vsel %vm890_vm3, %v850_v31, %v922_v57  ;;  %v1026_v31 = vld [vmem:[#allocation8 + $0xf0] sm:$0xff] }
 0x267   :  { %v6125_v46 = vpack.c.bf16 %v954_v13, %v950_v52  ;;  %v955_v54 = vsel %vm891_vm4, %v852_v37, %v923_v42  ;;  %v855_v59 = vpop.f32.mrb[36].mxu0  ;;  %v4851_v52 = vcombine.low %v1141_v21, %v1145_v22  ;;  %v4734_v13 = vcombine.high %v1022_v32, %v1026_v31 }
 0x268   :  { %v6127_v62 = vpack.c.bf16 %v955_v54, %v951_v45  ;;  %v856_v63 = vadd.f32 %v855_v59, %v6114_v18  ;;  %v857_v28 = vpop.f32.mrb[37].mxu0  ;;  %2751 = vmatpush1.bf16.msra.mxu0 %v4827_v40  ;;  %v4725_v40 = vcombine.low %v1014_v51, %v1018_v16  ;;  %v4860_v54 = vcombine.high %v1149_v3, %v1153_v34  ;;  %v1030_v59 = vld [vmem:[#allocation8 + $0x110] sm:$0xff] }
 0x269   :  { %v858_v58 = vadd.f32 %v857_v28, %v6119_v20  ;;  %v859_v0 = vpop.f32.mrb[38].mxu0  ;;  %2793 = vmatprep.subr.bf16.mxu0 %v4836_v14  ;;  %v1157_v28 = vld [vmem:[#allocation8 + $0x508] sm:$0xff]  ;;  %v1038_v16 = vld [vmem:[#allocation8 + $0x150] sm:$0xff] }
 0x26a   :  { %v926_v4 = vmul.f32 0.2, %v856_v63  ;;  %v860_v5 = vadd.f32 %v859_v0, %v6114_v18  ;;  %v861_v6 = vpop.f32.mrb[39].mxu0  ;;  %2679 = vmatprep.mubr.bf16.mxu1 %v6127_v62  ;;  %vm894_vm5 = vcmp.gt.f32.partialorder %v856_v63, 0.0 }
 0x26b   :  { %v927_v17 = vmul.f32 0.2, %v858_v58  ;;  %v862_v19 = vadd.f32 %v861_v6, %v6119_v20  ;;  %2680 = vmatmul.mubr.bf16.vlgmr.msra.gmra.mrb[0].mxu1 %v6125_v46  ;;  %2753 = vmatmul.mubr.bf16.vlgmr.msra.gmra.mrb[64].mxu0 %v6069_v11  ;;  %vm895_vm6 = vcmp.gt.f32.partialorder %v858_v58, 0.0 }
 0x26c   :  { %vm898_vm7 = vcmp.gt.f32.partialorder %v860_v5, 0.0  ;;  %v930_v23 = vmul.f32 0.2, %v860_v5  ;;  %2867 = vmatpush1.bf16.msra.mxu1 %v4709_v56  ;;  %2762 = vmatprep.mubr.bf16.mxu0 %v6084_v41  ;;  %v958_v27 = vsel %vm894_vm5, %v856_v63, %v926_v4  ;;  %v4859_v4 = vcombine.low %v1149_v3, %v1153_v34 }
 0x26d   :  { %vm899_vm8 = vcmp.gt.f32.partialorder %v862_v19, 0.0  ;;  %v931_v25 = vmul.f32 0.2, %v862_v19  ;;  %2794 = vmatpush1.bf16.msra.mxu0 %v4835_v1  ;;  %2868 = vmatprep.subr.bf16.mxu1 %v4718_v2  ;;  %v959_v33 = vsel %vm895_vm6, %v858_v58, %v927_v17  ;;  %v1161_v58 = vld [vmem:[#allocation8 + $0x528] sm:$0xff]  ;;  %v4733_v1 = vcombine.low %v1022_v32, %v1026_v31  ;;  %v1042_v17 = vld [vmem:[#allocation8 + $0x170] sm:$0xff] }
 0x26e   :  { %v962_v29 = vsel %vm898_vm7, %v860_v5, %v930_v23  ;;  %2795 = vmatprep.subr.bf16.mxu0 %v4844_v55  ;;  %v4742_v5 = vcombine.high %v1030_v59, %v1034_v60  ;;  %v4868_v51 = vcombine.high %v1157_v28, %v1161_v58  ;;  %v4867_v31 = vcombine.low %v1157_v28, %v1161_v58  ;;  %v1058_v58 = vld [vmem:[#allocation8 + $0x1f0] sm:$0xff] }
 0x26f   :  { %v6142_v49 = vpack.c.bf16 %v962_v29, %v958_v27  ;;  %v963_v53 = vsel %vm899_vm8, %v862_v19, %v931_v25  ;;  %v865_v56 = vpop.f32.mrb[40].mxu0  ;;  %v1169_v25 = vld [vmem:[#allocation8 + $0x568] sm:$0xff]  ;;  %v4741_v29 = vcombine.low %v1030_v59, %v1034_v60  ;;  %v1054_v60 = vld [vmem:[#allocation8 + $0x1d0] sm:$0xff] }
 0x270   :  { %v6144_v35 = vpack.c.bf16 %v963_v53, %v959_v33  ;;  %v866_v37 = vadd.f32 %v865_v56, %v6114_v18  ;;  %2869 = vmatpush1.bf16.msra.mxu1 %v4717_v24  ;;  %v867_v57 = vpop.f32.mrb[41].mxu0  ;;  %v1165_v24 = vld [vmem:[#allocation8 + $0x548] sm:$0xff]  ;;  %v4750_v33 = vcombine.high %v1038_v16, %v1042_v17 }
 0x271   :  { %v868_v42 = vadd.f32 %v867_v57, %v6119_v20  ;;  %2796 = vmatpush1.bf16.msra.mxu0 %v4843_v9  ;;  %v869_v14 = vpop.f32.mrb[42].mxu0  ;;  %2870 = vmatprep.subr.bf16.mxu1 %v4726_v26  ;;  %v4876_v34 = vcombine.high %v1165_v24, %v1169_v25  ;;  %v1050_v57 = vld [vmem:[#allocation8 + $0x1b0] sm:$0xff] }
 0x272   :  { %v934_v43 = vmul.f32 0.2, %v866_v37  ;;  %v870_v44 = vadd.f32 %v869_v14, %v6114_v18  ;;  %v871_v45 = vpop.f32.mrb[43].mxu0  ;;  %2689 = vmatprep.mubr.bf16.mxu1 %v6144_v35  ;;  %2797 = vmatprep.subr.bf16.mxu0 %v4852_v30  ;;  %vm902_vm9 = vcmp.gt.f32.partialorder %v866_v37, 0.0  ;;  %v1173_v14 = vld [vmem:[#allocation8 + $0x588] sm:$0xff] }
 0x273   :  { %v935_v61 = vmul.f32 0.2, %v868_v42  ;;  %v872_v63 = vadd.f32 %v871_v45, %v6119_v20  ;;  %2690 = vmatmul.mubr.bf16.gmra.mrb[4].mxu1 %v6142_v49  ;;  %2763 = vmatmul.mubr.bf16.gmra.mrb[68].mxu0 %v6082_v38  ;;  %vm903_vm10 = vcmp.gt.f32.partialorder %v868_v42, 0.0 }
 0x274   :  { %vm906_vm11 = vcmp.gt.f32.partialorder %v870_v44, 0.0  ;;  %v938_v0 = vmul.f32 0.2, %v870_v44  ;;  %2871 = vmatpush1.bf16.msra.mxu1 %v4725_v40  ;;  %2772 = vmatprep.mubr.bf16.mxu0 %v6094_v10  ;;  %v966_v6 = vsel %vm902_vm9, %v866_v37, %v934_v43  ;;  %v1046_v37 = vld [vmem:[#allocation8 + $0x190] sm:$0xff] }
 0x275   :  { %vm907_vm12 = vcmp.gt.f32.partialorder %v872_v63, 0.0  ;;  %v939_v2 = vmul.f32 0.2, %v872_v63  ;;  %2798 = vmatpush1.bf16.msra.mxu0 %v4851_v52  ;;  %2872 = vmatprep.subr.bf16.mxu1 %v4734_v13  ;;  %v967_v19 = vsel %vm903_vm10, %v868_v42, %v935_v61  ;;  %v1177_v52 = vld [vmem:[#allocation8 + $0x5a8] sm:$0xff]  ;;  %v4749_v13 = vcombine.low %v1038_v16, %v1042_v17  ;;  %v1066_v16 = vld [vmem:[#allocation8 + $0x230] sm:$0xff] }
 0x276   :  { %v970_v55 = vsel %vm906_vm11, %v870_v44, %v938_v0  ;;  %2799 = vmatprep.subr.bf16.mxu0 %v4860_v54  ;;  %v4875_v44 = vcombine.low %v1165_v24, %v1169_v25  ;;  %v4758_v45 = vcombine.high %v1046_v37, %v1050_v57  ;;  %v4884_v59 = vcombine.high %v1173_v14, %v1177_v52  ;;  %v1181_v0 = vld [vmem:[#allocation8 + $0x5c8] sm:$0xff] }
 0x277   :  { %v6156_v21 = vpack.c.bf16 %v970_v55, %v966_v6  ;;  %v971_v22 = vsel %vm907_vm12, %v872_v63, %v939_v2  ;;  %v875_v23 = vpop.f32.mrb[44].mxu0  ;;  %v4766_v6 = vcombine.high %v1054_v60, %v1058_v58  ;;  %v1189_v17 = vld [vmem:[#allocation8 + $0x608] sm:$0xff] }
 0x278   :  { %v6158_v9 = vpack.c.bf16 %v971_v22, %v967_v19  ;;  %v876_v26 = vadd.f32 %v875_v23, %v6114_v18  ;;  %2873 = vmatpush1.bf16.msra.mxu1 %v4733_v1  ;;  %v877_v27 = vpop.f32.mrb[45].mxu0  ;;  %v1185_v1 = vld [vmem:[#allocation8 + $0x5e8] sm:$0xff]  ;;  %v4765_v22 = vcombine.low %v1054_v60, %v1058_v58  ;;  %v1098_v60 = vld [vmem:[#allocation8 + $0x330] sm:$0xff] }
 0x279   :  { %v878_v30 = vadd.f32 %v877_v27, %v6119_v20  ;;  %2800 = vmatpush1.bf16.msra.mxu0 %v4859_v4  ;;  %v879_v32 = vpop.f32.mrb[46].mxu0  ;;  %2874 = vmatprep.subr.bf16.mxu1 %v4742_v5  ;;  %v4757_v4 = vcombine.low %v1046_v37, %v1050_v57  ;;  %v4883_v5 = vcombine.low %v1173_v14, %v1177_v52  ;;  %v1193_v19 = vld [vmem:[#allocation8 + $0x628] sm:$0xff]  ;;  %v1074_v27 = vld [vmem:[#allocation8 + $0x270] sm:$0xff] }
 0x27a   :  { %v942_v53 = vmul.f32 0.2, %v876_v26  ;;  %v880_v56 = vadd.f32 %v879_v32, %v6114_v18  ;;  %v881_v3 = vpop.f32.mrb[47].mxu0  ;;  %2699 = vmatprep.mubr.bf16.mxu1 %v6158_v9  ;;  %2801 = vmatprep.subr.bf16.mxu0 %v4868_v51  ;;  %vm910_vm13 = vcmp.gt.f32.partialorder %v876_v26, 0.0  ;;  %v4892_v55 = vcombine.high %v1181_v0, %v1185_v1  ;;  %v1062_v51 = vld [vmem:[#allocation8 + $0x210] sm:$0xff]  ;;  %v1209_v37 = vld [vmem:[#allocation8 + $0x6a8] sm:$0xff] }
 0x27b   :  { %v943_v40 = vmul.f32 0.2, %v878_v30  ;;  %v882_v42 = vadd.f32 %v881_v3, %v6119_v20  ;;  %2700 = vmatmul.mubr.bf16.gmra.mrb[8].mxu1 %v6156_v21  ;;  %2773 = vmatmul.mubr.bf16.gmra.mrb[72].mxu0 %v6092_v7  ;;  %vm911_vm14 = vcmp.gt.f32.partialorder %v878_v30, 0.0  ;;  %v4891_v23 = vcombine.low %v1181_v0, %v1185_v1  ;;  %v1082_v3 = vld [vmem:[#allocation8 + $0x2b0] sm:$0xff] }
 0x27c   :  { %vm914_vm15 = vcmp.gt.f32.partialorder %v880_v56, 0.0  ;;  %v946_v18 = vmul.f32 0.2, %v880_v56  ;;  %2875 = vmatpush1.bf16.msra.mxu1 %v4741_v29  ;;  %2782 = vmatprep.mubr.bf16.mxu0 %v6104_v39  ;;  %v974_v20 = vsel %vm910_vm13, %v876_v26, %v942_v53  ;;  %v4774_v24 = vcombine.high %v1062_v51, %v1066_v16  ;;  %v1070_v26 = vld [vmem:[#allocation8 + $0x250] sm:$0xff]  ;;  %v1197_v29 = vld [vmem:[#allocation8 + $0x648] sm:$0xff] }
 0x27d   :  { %vm915_vm0 = vcmp.gt.f32.partialorder %v882_v42, 0.0  ;;  %v947_v43 = vmul.f32 0.2, %v882_v42  ;;  %2802 = vmatpush1.bf16.msra.mxu0 %v4867_v31  ;;  %2876 = vmatprep.subr.bf16.mxu1 %v4750_v33  ;;  %v975_v61 = vsel %vm911_vm14, %v878_v30, %v943_v40  ;;  %v4900_v25 = vcombine.high %v1189_v17, %v1193_v19  ;;  %v1201_v30 = vld [vmem:[#allocation8 + $0x668] sm:$0xff]  ;;  %v1086_v52 = vld [vmem:[#allocation8 + $0x2d0] sm:$0xff] }
 0x27e   :  { %v978_v54 = vsel %vm914_vm15, %v880_v56, %v946_v18  ;;  %2803 = vmatprep.subr.bf16.mxu0 %v4876_v34  ;;  %v4773_v32 = vcombine.low %v1062_v51, %v1066_v16  ;;  %v4899_v31 = vcombine.low %v1189_v17, %v1193_v19  ;;  %v4782_v33 = vcombine.high %v1070_v26, %v1074_v27  ;;  %v1078_v56 = vld [vmem:[#allocation8 + $0x290] sm:$0xff]  ;;  %v1205_v34 = vld [vmem:[#allocation8 + $0x688] sm:$0xff] }
 0x27f   :  { %v6170_v63 = vpack.c.bf16 %v978_v54, %v974_v20  ;;  %v979_v28 = vsel %vm915_vm0, %v882_v42, %v947_v43  ;;  %v4908_v53 = vcombine.high %v1197_v29, %v1201_v30  ;;  %v4781_v57 = vcombine.low %v1070_v26, %v1074_v27  ;;  %v1090_v18 = vld [vmem:[#allocation8 + $0x2f0] sm:$0xff]  ;;  %v1217_v43 = vld [vmem:[#allocation8 + $0x6e8] sm:$0xff] }
 0x280   :  { %v6172_v2 = vpack.c.bf16 %v979_v28, %v975_v61  ;;  %2877 = vmatpush1.bf16.msra.mxu1 %v4749_v13  ;;  %v4907_v40 = vcombine.low %v1197_v29, %v1201_v30  ;;  %v4790_v42 = vcombine.high %v1078_v56, %v1082_v3  ;;  %v4916_v14 = vcombine.high %v1205_v34, %v1209_v37  ;;  %v1213_v13 = vld [vmem:[#allocation8 + $0x6c8] sm:$0xff] }
 0x281   :  { %2804 = vmatpush1.bf16.msra.mxu0 %v4875_v44  ;;  %2878 = vmatprep.subr.bf16.mxu1 %v4758_v45  ;;  %v4789_v44 = vcombine.low %v1078_v56, %v1082_v3  ;;  %v4915_v45 = vcombine.low %v1205_v34, %v1209_v37  ;;  %v4798_v20 = vcombine.high %v1086_v52, %v1090_v18  ;;  %v1221_v61 = vld [vmem:[#allocation8 + $0x708] sm:$0xff] }
 0x282   :  { %2709 = vmatprep.mubr.bf16.mxu1 %v6172_v2  ;;  %2805 = vmatprep.subr.bf16.mxu0 %v4884_v59  ;;  %v4924_v54 = vcombine.high %v1213_v13, %v1217_v43  ;;  %v1094_v59 = vld [vmem:[#allocation8 + $0x310] sm:$0xff]  ;;  %v1225_v28 = vld [vmem:[#allocation8 + $0x728] sm:$0xff]  ;;  %v4797_v58 = vcombine.low %v1086_v52, %v1090_v18  ;;  %v4923_v0 = vcombine.low %v1213_v13, %v1217_v43  ;;  %v1003_v52 = vld [vmem:[#allocation8 + $0x38] sm:$0xff] }
 0x283   :  { %2710 = vmatmul.mubr.bf16.gmra.mrb[12].mxu1 %v6170_v63  ;;  %2783 = vmatmul.mubr.bf16.gmra.mrb[76].mxu0 %v6102_v36  ;;  %v4806_v1 = vcombine.high %v1094_v59, %v1098_v60  ;;  %v1233_v51 = vld [vmem:[#allocation8 + $0x768] sm:$0xff]  ;;  %v4805_v16 = vcombine.low %v1094_v59, %v1098_v60  ;;  %v4931_v17 = vcombine.low %v1221_v61, %v1225_v28  ;;  %v1011_v59 = vld [vmem:[#allocation8 + $0x78] sm:$0xff] }
 0x284   :  { %2879 = vmatpush1.bf16.msra.mxu1 %v4757_v4  ;;  %2825 = vmatprep.mubr.bf16.mxu0 %v6127_v62  ;;  %v4932_v4 = vcombine.high %v1221_v61, %v1225_v28  ;;  %v1241_v26 = vld [vmem:[#allocation8 + $0x7a8] sm:$0xff] }
 0x285   :  { %2806 = vmatpush1.bf16.msra.mxu0 %v4883_v5  ;;  %2898 = vmatprep.mubr.bf16.mxu1 %v6071_v15  ;;  %v1102_v5 = vld [vmem:[#allocation8 + $0x350] sm:$0xff]  ;;  %v1249_v56 = vld [vmem:[#allocation8 + $0x7e8] sm:$0xff] }
 0x286   :  { %2880 = vmatprep.subr.bf16.mxu1 %v4766_v6  ;;  %2807 = vmatprep.subr.bf16.mxu0 %v4892_v55  ;;  %v1106_v6 = vld [vmem:[#allocation8 + $0x370] sm:$0xff]  ;;  %v1229_v55 = vld [vmem:[#allocation8 + $0x748] sm:$0xff] }
 0x287   :  { %v4814_v19 = vcombine.high %v1102_v5, %v1106_v6  ;;  %v4813_v27 = vcombine.low %v1102_v5, %v1106_v6  ;;  %v4939_v29 = vcombine.low %v1229_v55, %v1233_v51  ;;  %v1019_v5 = vld [vmem:[#allocation8 + $0xb8] sm:$0xff] }
 0x288   :  { %2881 = vmatpush1.bf16.msra.mxu1 %v4765_v22  ;;  %v4940_v22 = vcombine.high %v1229_v55, %v1233_v51 }
 0x289   :  { %2808 = vmatpush1.bf16.msra.mxu0 %v4891_v23  ;;  %2882 = vmatprep.subr.bf16.mxu1 %v4774_v24  ;;  %v1110_v23 = vld [vmem:[#allocation8 + $0x390] sm:$0xff] }
 0x28a   :  { %2809 = vmatprep.subr.bf16.mxu0 %v4900_v25  ;;  %v1114_v24 = vld [vmem:[#allocation8 + $0x3b0] sm:$0xff]  ;;  %v1237_v25 = vld [vmem:[#allocation8 + $0x788] sm:$0xff] }
 0x28b   :  { %v4822_v30 = vcombine.high %v1110_v23, %v1114_v24  ;;  %v4821_v3 = vcombine.low %v1110_v23, %v1114_v24  ;;  %v4947_v34 = vcombine.low %v1237_v25, %v1241_v26  ;;  %v1027_v23 = vld [vmem:[#allocation8 + $0xf8] sm:$0xff] }
 0x28c   :  { %2883 = vmatpush1.bf16.msra.mxu1 %v4773_v32  ;;  %v4948_v32 = vcombine.high %v1237_v25, %v1241_v26 }
 0x28d   :  { %2810 = vmatpush1.bf16.msra.mxu0 %v4899_v31  ;;  %2884 = vmatprep.subr.bf16.mxu1 %v4782_v33  ;;  %v1118_v31 = vld [vmem:[#allocation8 + $0x3d0] sm:$0xff] }
 0x28e   :  { %2811 = vmatprep.subr.bf16.mxu0 %v4908_v53  ;;  %v1122_v33 = vld [vmem:[#allocation8 + $0x3f0] sm:$0xff]  ;;  %v1245_v53 = vld [vmem:[#allocation8 + $0x7c8] sm:$0xff] }
 0x28f   :  { %v4830_v37 = vcombine.high %v1118_v31, %v1122_v33  ;;  %v4829_v18 = vcombine.low %v1118_v31, %v1122_v33  ;;  %v4955_v13 = vcombine.low %v1245_v53, %v1249_v56  ;;  %v1035_v31 = vld [vmem:[#allocation8 + $0x138] sm:$0xff] }
 0x290   :  { %2885 = vmatpush1.bf16.msra.mxu1 %v4781_v57  ;;  %v4956_v57 = vcombine.high %v1245_v53, %v1249_v56 }
 0x291   :  { %2812 = vmatpush1.bf16.msra.mxu0 %v4907_v40  ;;  %2886 = vmatprep.subr.bf16.mxu1 %v4790_v42  ;;  %v1126_v40 = vld [vmem:[#allocation8 + $0x410] sm:$0xff] }
 0x292   :  { %2813 = vmatprep.subr.bf16.mxu0 %v4916_v14  ;;  %v1130_v42 = vld [vmem:[#allocation8 + $0x430] sm:$0xff]  ;;  %v999_v14 = vld [vmem:[#allocation8 + $0x18] sm:$0xff] }
 0x293   :  { %v4838_v43 = vcombine.high %v1126_v40, %v1130_v42  ;;  %v4837_v60 = vcombine.low %v1126_v40, %v1130_v42  ;;  %v4711_v61 = vcombine.low %v999_v14, %v1003_v52  ;;  %v1043_v40 = vld [vmem:[#allocation8 + $0x178] sm:$0xff] }
 0x294   :  { %2887 = vmatpush1.bf16.msra.mxu1 %v4789_v44  ;;  %v4712_v44 = vcombine.high %v999_v14, %v1003_v52 }
 0x295   :  { %2814 = vmatpush1.bf16.msra.mxu0 %v4915_v45  ;;  %2888 = vmatprep.subr.bf16.mxu1 %v4798_v20  ;;  %v1134_v45 = vld [vmem:[#allocation8 + $0x450] sm:$0xff] }
 0x296   :  { %2815 = vmatprep.subr.bf16.mxu0 %v4924_v54  ;;  %v1138_v20 = vld [vmem:[#allocation8 + $0x470] sm:$0xff]  ;;  %v1007_v54 = vld [vmem:[#allocation8 + $0x58] sm:$0xff] }
 0x297   :  { %v4846_v28 = vcombine.high %v1134_v45, %v1138_v20  ;;  %v4845_v6 = vcombine.low %v1134_v45, %v1138_v20  ;;  %v4719_v55 = vcombine.low %v1007_v54, %v1011_v59  ;;  %v1051_v45 = vld [vmem:[#allocation8 + $0x1b8] sm:$0xff] }
 0x298   :  { %2889 = vmatpush1.bf16.msra.mxu1 %v4797_v58  ;;  %v4720_v58 = vcombine.high %v1007_v54, %v1011_v59 }
 0x299   :  { %2816 = vmatpush1.bf16.msra.mxu0 %v4923_v0  ;;  %2890 = vmatprep.subr.bf16.mxu1 %v4806_v1  ;;  %v1142_v0 = vld [vmem:[#allocation8 + $0x490] sm:$0xff] }
 0x29a   :  { %2817 = vmatprep.subr.bf16.mxu0 %v4932_v4  ;;  %v1146_v1 = vld [vmem:[#allocation8 + $0x4b0] sm:$0xff]  ;;  %v1015_v4 = vld [vmem:[#allocation8 + $0x98] sm:$0xff] }
 0x29b   :  { %v4854_v51 = vcombine.high %v1142_v0, %v1146_v1  ;;  %v4853_v24 = vcombine.low %v1142_v0, %v1146_v1  ;;  %v4727_v25 = vcombine.low %v1015_v4, %v1019_v5  ;;  %v1059_v0 = vld [vmem:[#allocation8 + $0x1f8] sm:$0xff] }
 0x29c   :  { %2891 = vmatpush1.bf16.msra.mxu1 %v4805_v16  ;;  %v4728_v16 = vcombine.high %v1015_v4, %v1019_v5 }
 0x29d   :  { %2818 = vmatpush1.bf16.msra.mxu0 %v4931_v17  ;;  %2892 = vmatprep.subr.bf16.mxu1 %v4814_v19  ;;  %v1150_v17 = vld [vmem:[#allocation8 + $0x4d0] sm:$0xff] }
 0x29e   :  { %2819 = vmatprep.subr.bf16.mxu0 %v4940_v22  ;;  %v1154_v19 = vld [vmem:[#allocation8 + $0x4f0] sm:$0xff]  ;;  %v1023_v22 = vld [vmem:[#allocation8 + $0xd8] sm:$0xff] }
 0x29f   :  { %v4862_v26 = vcombine.high %v1150_v17, %v1154_v19  ;;  %v4861_v33 = vcombine.low %v1150_v17, %v1154_v19  ;;  %v4735_v53 = vcombine.low %v1023_v22, %v1027_v23  ;;  %v1067_v17 = vld [vmem:[#allocation8 + $0x238] sm:$0xff] }
 0x2a0   :  { %2893 = vmatpush1.bf16.msra.mxu1 %v4813_v27  ;;  %v4736_v27 = vcombine.high %v1023_v22, %v1027_v23 }
 0x2a1   :  { %2820 = vmatpush1.bf16.msra.mxu0 %v4939_v29  ;;  %2894 = vmatprep.subr.bf16.mxu1 %v4822_v30  ;;  %v1158_v29 = vld [vmem:[#allocation8 + $0x510] sm:$0xff] }
 0x2a2   :  { %2821 = vmatprep.subr.bf16.mxu0 %v4948_v32  ;;  %v1162_v30 = vld [vmem:[#allocation8 + $0x530] sm:$0xff]  ;;  %v1031_v32 = vld [vmem:[#allocation8 + $0x118] sm:$0xff] }
 0x2a3   :  { %v4870_v56 = vcombine.high %v1158_v29, %v1162_v30  ;;  %v4869_v42 = vcombine.low %v1158_v29, %v1162_v30  ;;  %v4743_v14 = vcombine.low %v1031_v32, %v1035_v31  ;;  %v1075_v29 = vld [vmem:[#allocation8 + $0x278] sm:$0xff] }
 0x2a4   :  { %2895 = vmatpush1.bf16.msra.mxu1 %v4821_v3  ;;  %v4744_v3 = vcombine.high %v1031_v32, %v1035_v31 }
 0x2a5   :  { %2822 = vmatpush1.bf16.msra.mxu0 %v4947_v34  ;;  %2896 = vmatprep.subr.bf16.mxu1 %v4830_v37  ;;  %v1166_v34 = vld [vmem:[#allocation8 + $0x550] sm:$0xff] }
 0x2a6   :  { %2823 = vmatprep.subr.bf16.mxu0 %v4956_v57  ;;  %v1170_v37 = vld [vmem:[#allocation8 + $0x570] sm:$0xff]  ;;  %v1039_v57 = vld [vmem:[#allocation8 + $0x158] sm:$0xff] }
 0x2a7   :  { %v4878_v52 = vcombine.high %v1166_v34, %v1170_v37  ;;  %v4877_v20 = vcombine.low %v1166_v34, %v1170_v37  ;;  %v4751_v54 = vcombine.low %v1039_v57, %v1043_v40 }
 0x2a8   :  { %2897 = vmatpush1.bf16.msra.mxu1 %v4829_v18  ;;  %v4752_v18 = vcombine.high %v1039_v57, %v1043_v40 }
 0x2a9   :  { %2824 = vmatpush1.bf16.msra.mxu0 %v4955_v13  ;;  %2939 = vmatprep.subr.bf16.mxu1 %v4838_v43  ;;  %v1174_v13 = vld [vmem:[#allocation8 + $0x590] sm:$0xff] }
 0x2aa   :  { %3012 = vmatprep.subr.bf16.mxu0 %v4712_v44  ;;  %v1178_v43 = vld [vmem:[#allocation8 + $0x5b0] sm:$0xff]  ;;  %v1047_v44 = vld [vmem:[#allocation8 + $0x198] sm:$0xff] }
 0x2ab   :  { %2899 = vmatmul.mubr.bf16.vlgmr.msra.gmra.mrb[16].mxu1 %v6069_v11  ;;  %v4886_v59 = vcombine.high %v1174_v13, %v1178_v43  ;;  %v4885_v1 = vcombine.low %v1174_v13, %v1178_v43  ;;  %v4759_v4 = vcombine.low %v1047_v44, %v1051_v45 }
 0x2ac   :  { %2826 = vmatmul.mubr.bf16.vlgmr.msra.gmra.mrb[64].mxu0 %v6125_v46  ;;  %2908 = vmatprep.mubr.bf16.mxu1 %v6084_v41 }
 0x2ad   :  { %2940 = vmatpush1.bf16.msra.mxu1 %v4837_v60  ;;  %2835 = vmatprep.mubr.bf16.mxu0 %v6144_v35  ;;  %v4760_v60 = vcombine.high %v1047_v44, %v1051_v45 }
 0x2ae   :  { %3013 = vmatpush1.bf16.msra.mxu0 %v4711_v61  ;;  %2941 = vmatprep.subr.bf16.mxu1 %v4846_v28  ;;  %v1182_v61 = vld [vmem:[#allocation8 + $0x5d0] sm:$0xff] }
 0x2af   :  { %3014 = vmatprep.subr.bf16.mxu0 %v4720_v58  ;;  %v1186_v28 = vld [vmem:[#allocation8 + $0x5f0] sm:$0xff]  ;;  %v1055_v58 = vld [vmem:[#allocation8 + $0x1d8] sm:$0xff] }
 0x2b0   :  { %v4894_v5 = vcombine.high %v1182_v61, %v1186_v28  ;;  %v4893_v19 = vcombine.low %v1182_v61, %v1186_v28  ;;  %v4767_v22 = vcombine.low %v1055_v58, %v1059_v0 }
 0x2b1   :  { %2942 = vmatpush1.bf16.msra.mxu1 %v4845_v6  ;;  %v4768_v6 = vcombine.high %v1055_v58, %v1059_v0 }
 0x2b2   :  { %3015 = vmatpush1.bf16.msra.mxu0 %v4719_v55  ;;  %2943 = vmatprep.subr.bf16.mxu1 %v4854_v51  ;;  %v1190_v55 = vld [vmem:[#allocation8 + $0x610] sm:$0xff] }
 0x2b3   :  { %2909 = vmatmul.mubr.bf16.gmra.mrb[20].mxu1 %v6082_v38  ;;  %3016 = vmatprep.subr.bf16.mxu0 %v4728_v16  ;;  %v1194_v51 = vld [vmem:[#allocation8 + $0x630] sm:$0xff]  ;;  %v1063_v16 = vld [vmem:[#allocation8 + $0x218] sm:$0xff] }
 0x2b4   :  { %2836 = vmatmul.mubr.bf16.gmra.mrb[68].mxu0 %v6142_v49  ;;  %2918 = vmatprep.mubr.bf16.mxu1 %v6094_v10  ;;  %v4902_v23 = vcombine.high %v1190_v55, %v1194_v51  ;;  %v4901_v30 = vcombine.low %v1190_v55, %v1194_v51  ;;  %v4775_v32 = vcombine.low %v1063_v16, %v1067_v17 }
 0x2b5   :  { %2944 = vmatpush1.bf16.msra.mxu1 %v4853_v24  ;;  %2845 = vmatprep.mubr.bf16.mxu0 %v6158_v9  ;;  %v4776_v24 = vcombine.high %v1063_v16, %v1067_v17 }
 0x2b6   :  { %3017 = vmatpush1.bf16.msra.mxu0 %v4727_v25  ;;  %2945 = vmatprep.subr.bf16.mxu1 %v4862_v26  ;;  %v1198_v25 = vld [vmem:[#allocation8 + $0x650] sm:$0xff] }
 0x2b7   :  { %3018 = vmatprep.subr.bf16.mxu0 %v4736_v27  ;;  %v1202_v26 = vld [vmem:[#allocation8 + $0x670] sm:$0xff]  ;;  %v1071_v27 = vld [vmem:[#allocation8 + $0x258] sm:$0xff] }
 0x2b8   :  { %v4910_v31 = vcombine.high %v1198_v25, %v1202_v26  ;;  %v4909_v34 = vcombine.low %v1198_v25, %v1202_v26  ;;  %v4783_v37 = vcombine.low %v1071_v27, %v1075_v29 }
 0x2b9   :  { %2946 = vmatpush1.bf16.msra.mxu1 %v4861_v33  ;;  %v4784_v33 = vcombine.high %v1071_v27, %v1075_v29 }
 0x2ba   :  { %3019 = vmatpush1.bf16.msra.mxu0 %v4735_v53  ;;  %2947 = vmatprep.subr.bf16.mxu1 %v4870_v56  ;;  %v1210_v53 = vld [vmem:[#allocation8 + $0x6b0] sm:$0xff]  ;;  %v1079_v56 = vld [vmem:[#allocation8 + $0x298] sm:$0xff] }
 0x2bb   :  { %2919 = vmatmul.mubr.bf16.gmra.mrb[24].mxu1 %v6092_v7  ;;  %3020 = vmatprep.subr.bf16.mxu0 %v4744_v3  ;;  %v1083_v3 = vld [vmem:[#allocation8 + $0x2b8] sm:$0xff] }
 0x2bc   :  { %2846 = vmatmul.mubr.bf16.gmra.mrb[72].mxu0 %v6156_v21  ;;  %2928 = vmatprep.mubr.bf16.mxu1 %v6104_v39  ;;  %v4792_v40 = vcombine.high %v1079_v56, %v1083_v3  ;;  %v4791_v43 = vcombine.low %v1079_v56, %v1083_v3 }
 0x2bd   :  { %2948 = vmatpush1.bf16.msra.mxu1 %v4869_v42  ;;  %2855 = vmatprep.mubr.bf16.mxu0 %v6172_v2  ;;  %v1214_v42 = vld [vmem:[#allocation8 + $0x6d0] sm:$0xff] }
 0x2be   :  { %3021 = vmatpush1.bf16.msra.mxu0 %v4743_v14  ;;  %2949 = vmatprep.subr.bf16.mxu1 %v4878_v52  ;;  %v1218_v14 = vld [vmem:[#allocation8 + $0x6f0] sm:$0xff]  ;;  %v1087_v52 = vld [vmem:[#allocation8 + $0x2d8] sm:$0xff] }
 0x2bf   :  { %3022 = vmatprep.subr.bf16.mxu0 %v4752_v18  ;;  %v1091_v18 = vld [vmem:[#allocation8 + $0x2f8] sm:$0xff]  ;;  %v4926_v44 = vcombine.high %v1214_v42, %v1218_v14  ;;  %v4925_v61 = vcombine.low %v1214_v42, %v1218_v14  ;;  %v5442_v42 = vld [vmem:[#allocation10 + $0x4] ss:$8 sps:$4 sm:$0xff]  }
 0x2c0   :  { %v4800_v45 = vcombine.high %v1087_v52, %v1091_v18  ;;  %v4799_v28 = vcombine.low %v1087_v52, %v1091_v18  ;;  %v1135_v52 = vld [vmem:[#allocation8 + $0x458] sm:$0xff] }
 0x2c1   :  { %2950 = vmatpush1.bf16.msra.mxu1 %v4877_v20  ;;  %v1222_v20 = vld [vmem:[#allocation8 + $0x710] sm:$0xff]  ;;  %v1139_v18 = vld [vmem:[#allocation8 + $0x478] sm:$0xff] }
 0x2c2   :  { %3023 = vmatpush1.bf16.msra.mxu0 %v4751_v54  ;;  %2951 = vmatprep.subr.bf16.mxu1 %v4886_v59  ;;  %v1226_v54 = vld [vmem:[#allocation8 + $0x730] sm:$0xff]  ;;  %v1095_v59 = vld [vmem:[#allocation8 + $0x318] sm:$0xff] }
 0x2c3   :  { %2929 = vmatmul.mubr.bf16.gmra.mrb[28].mxu1 %v6102_v36  ;;  %3024 = vmatprep.subr.bf16.mxu0 %v4760_v60  ;;  %v1099_v60 = vld [vmem:[#allocation8 + $0x338] sm:$0xff]  ;;  %v4934_v58 = vcombine.high %v1222_v20, %v1226_v54  ;;  %v4933_v55 = vcombine.low %v1222_v20, %v1226_v54 }
 0x2c4   :  { %2856 = vmatmul.mubr.bf16.gmra.mrb[76].mxu0 %v6170_v63  ;;  %2971 = vmatprep.mubr.bf16.mxu1 %v6127_v62  ;;  %v4808_v0 = vcombine.high %v1095_v59, %v1099_v60  ;;  %v4807_v51 = vcombine.low %v1095_v59, %v1099_v60  ;;  %v1147_v20 = vld [vmem:[#allocation8 + $0x4b8] sm:$0xff]  ;;  %v4847_v59 = vcombine.low %v1135_v52, %v1139_v18 }
 0x2c5   :  { %2952 = vmatpush1.bf16.msra.mxu1 %v4885_v1  ;;  %3044 = vmatprep.mubr.bf16.mxu0 %v6071_v15  ;;  %v1206_v15 = vld [vmem:[#allocation8 + $0x690] sm:$0xff] }
 0x2c6   :  { %3025 = vmatpush1.bf16.msra.mxu0 %v4759_v4  ;;  %2953 = vmatprep.subr.bf16.mxu1 %v4894_v5  ;;  %v4918_v57 = vcombine.high %v1206_v15, %v1210_v53  ;;  %v4917_v13 = vcombine.low %v1206_v15, %v1210_v53  ;;  %v1230_v1 = vld [vmem:[#allocation8 + $0x750] sm:$0xff]  ;;  %v1103_v5 = vld [vmem:[#allocation8 + $0x358] sm:$0xff] }
 0x2c7   :  { %3026 = vmatprep.subr.bf16.mxu0 %v4768_v6  ;;  %v1234_v4 = vld [vmem:[#allocation8 + $0x770] sm:$0xff]  ;;  %v1107_v6 = vld [vmem:[#allocation8 + $0x378] sm:$0xff] }
 0x2c8   :  { %v4942_v16 = vcombine.high %v1230_v1, %v1234_v4  ;;  %v4816_v17 = vcombine.high %v1103_v5, %v1107_v6  ;;  %v4941_v25 = vcombine.low %v1230_v1, %v1234_v4  ;;  %v4815_v26 = vcombine.low %v1103_v5, %v1107_v6  ;;  %v5445_v54 = vld [vmem:[#allocation10 + $0x14] ss:$8 sps:$4 sm:$0xff]   ;;  %v5446_v5 = vld [vmem:[#allocation10 + $0x20] ss:$8 sps:$4 sm:$0xff]  }
 0x2c9   :  { %2954 = vmatpush1.bf16.msra.mxu1 %v4893_v19  ;;  %v1238_v19 = vld [vmem:[#allocation8 + $0x790] sm:$0xff] }
 0x2ca   :  { %3027 = vmatpush1.bf16.msra.mxu0 %v4767_v22  ;;  %2955 = vmatprep.subr.bf16.mxu1 %v4902_v23  ;;  %v1242_v22 = vld [vmem:[#allocation8 + $0x7b0] sm:$0xff]  ;;  %v1111_v23 = vld [vmem:[#allocation8 + $0x398] sm:$0xff] }
 0x2cb   :  { %3028 = vmatprep.subr.bf16.mxu0 %v4776_v24  ;;  %v1115_v24 = vld [vmem:[#allocation8 + $0x3b8] sm:$0xff]  ;;  %v4950_v27 = vcombine.high %v1238_v19, %v1242_v22  ;;  %v4949_v15 = vcombine.low %v1238_v19, %v1242_v22  ;;  %v5454_v22 = vld [vmem:[#allocation10 + $0x44] ss:$8 sps:$4 sm:$0xff]  }
 0x2cc   :  { %v4824_v29 = vcombine.high %v1111_v23, %v1115_v24  ;;  %v4823_v53 = vcombine.low %v1111_v23, %v1115_v24  ;;  %v5451_v6 = vld [vmem:[#allocation10 + $0x34] ss:$8 sps:$4 sm:$0xff]  }
 0x2cd   :  { %2956 = vmatpush1.bf16.msra.mxu1 %v4901_v30  ;;  %v1246_v30 = vld [vmem:[#allocation8 + $0x7d0] sm:$0xff]  ;;  %v1171_v19 = vld [vmem:[#allocation8 + $0x578] sm:$0xff] }
 0x2ce   :  { %3029 = vmatpush1.bf16.msra.mxu0 %v4775_v32  ;;  %2957 = vmatprep.subr.bf16.mxu1 %v4910_v31  ;;  %v1250_v32 = vld [vmem:[#allocation8 + $0x7f0] sm:$0xff]  ;;  %v1119_v31 = vld [vmem:[#allocation8 + $0x3d8] sm:$0xff] }
 0x2cf   :  { %3030 = vmatprep.subr.bf16.mxu0 %v4784_v33  ;;  %v1123_v33 = vld [vmem:[#allocation8 + $0x3f8] sm:$0xff]  ;;  %v4958_v56 = vcombine.high %v1246_v30, %v1250_v32 }
 0x2d0   :  { %v4832_v3 = vcombine.high %v1119_v31, %v1123_v33 }
 0x2d1   :  { %2958 = vmatpush1.bf16.msra.mxu1 %v4909_v34  ;;  %v1127_v34 = vld [vmem:[#allocation8 + $0x418] sm:$0xff] }
 0x2d2   :  { %3031 = vmatpush1.bf16.msra.mxu0 %v4783_v37  ;;  %2959 = vmatprep.subr.bf16.mxu1 %v4918_v57  ;;  %v1131_v37 = vld [vmem:[#allocation8 + $0x438] sm:$0xff]  ;;  %v4957_v57 = vcombine.low %v1246_v30, %v1250_v32 }
 0x2d3   :  { %3032 = vmatprep.subr.bf16.mxu0 %v4792_v40  ;;  %v4831_v40 = vcombine.low %v1119_v31, %v1123_v33  ;;  %v4840_v14 = vcombine.high %v1127_v34, %v1131_v37  ;;  %v5455_v31 = vld [vmem:[#allocation10 + $0x50] ss:$8 sps:$4 sm:$0xff]  }
 0x2d5   :  { %2960 = vmatpush1.bf16.msra.mxu1 %v4917_v13  ;;  %v4839_v13 = vcombine.low %v1127_v34, %v1131_v37  ;;  %v5458_v34 = vld [vmem:[#allocation10 + $0x60] ss:$8 sps:$4 sm:$0xff]   ;;  %v1191_v37 = vld [vmem:[#allocation8 + $0x618] sm:$0xff] }
 0x2d6   :  { %3033 = vmatpush1.bf16.msra.mxu0 %v4791_v43  ;;  %2961 = vmatprep.subr.bf16.mxu1 %v4926_v44  ;;  %v4848_v43 = vcombine.high %v1135_v52, %v1139_v18  ;;  %v5440_v44 = vld [vmem:[#allocation10] ss:$8 sps:$4 sm:$0xff]  }
 0x2d7   :  { %3034 = vmatprep.subr.bf16.mxu0 %v4800_v45  ;;  %v1143_v45 = vld [vmem:[#allocation8 + $0x498] sm:$0xff] }
 0x2d8   :  { %v4856_v60 = vcombine.high %v1143_v45, %v1147_v20  ;;  %v4855_v1 = vcombine.low %v1143_v45, %v1147_v20  ;;  %v5466_v20 = vld [vmem:[#allocation10 + $0x84] ss:$8 sps:$4 sm:$0xff]  }
 0x2d9   :  { %2962 = vmatpush1.bf16.msra.mxu1 %v4925_v61  ;;  %v5443_v61 = vld [vmem:[#allocation10 + $0x10] ss:$8 sps:$4 sm:$0xff]  }
 0x2da   :  { %3035 = vmatpush1.bf16.msra.mxu0 %v4799_v28  ;;  %2963 = vmatprep.subr.bf16.mxu1 %v4934_v58  ;;  %v1151_v28 = vld [vmem:[#allocation8 + $0x4d8] sm:$0xff] }
 0x2db   :  { %3036 = vmatprep.subr.bf16.mxu0 %v4808_v0  ;;  %v1155_v58 = vld [vmem:[#allocation8 + $0x4f8] sm:$0xff]  ;;  %v5448_v0 = vld [vmem:[#allocation10 + $0x24] ss:$8 sps:$4 sm:$0xff]  }
 0x2dc   :  { %v4864_v4 = vcombine.high %v1151_v28, %v1155_v58 }
 0x2dd   :  { %2964 = vmatpush1.bf16.msra.mxu1 %v4933_v55  ;;  %v4863_v55 = vcombine.low %v1151_v28, %v1155_v58  ;;  %v5469_v28 = vld [vmem:[#allocation10 + $0x94] ss:$8 sps:$4 sm:$0xff]  }
 0x2de   :  { %3037 = vmatpush1.bf16.msra.mxu0 %v4807_v51  ;;  %2965 = vmatprep.subr.bf16.mxu1 %v4942_v16  ;;  %v5449_v16 = vld [vmem:[#allocation10 + $0x30] ss:$8 sps:$4 sm:$0xff]  }
 0x2df   :  { %3038 = vmatprep.subr.bf16.mxu0 %v4816_v17  ;;  %v1167_v17 = vld [vmem:[#allocation8 + $0x558] sm:$0xff] }
 0x2e0   :  { %v4880_v24 = vcombine.high %v1167_v17, %v1171_v19 }
 0x2e1   :  { %2966 = vmatpush1.bf16.msra.mxu1 %v4941_v25  ;;  %v5452_v25 = vld [vmem:[#allocation10 + $0x40] ss:$8 sps:$4 sm:$0xff]  }
 0x2e2   :  { %3039 = vmatpush1.bf16.msra.mxu0 %v4815_v26  ;;  %2967 = vmatprep.subr.bf16.mxu1 %v4950_v27  ;;  %v5457_v26 = vld [vmem:[#allocation10 + $0x54] ss:$8 sps:$4 sm:$0xff]  }
 0x2e3   :  { %3040 = vmatprep.subr.bf16.mxu0 %v4824_v29  ;;  %v4879_v29 = vcombine.low %v1167_v17, %v1171_v19  ;;  %v5470_v19 = vld [vmem:[#allocation10 + $0xa0] ss:$8 sps:$4 sm:$0xff]  }
 0x2e5   :  { %2968 = vmatpush1.bf16.msra.mxu1 %v4949_v15  ;;  %v1183_v15 = vld [vmem:[#allocation8 + $0x5d8] sm:$0xff] }
 0x2e6   :  { %3041 = vmatpush1.bf16.msra.mxu0 %v4823_v53  ;;  %2969 = vmatprep.subr.bf16.mxu1 %v4958_v56  ;;  %v1187_v53 = vld [vmem:[#allocation8 + $0x5f8] sm:$0xff]  ;;  %v5460_v56 = vld [vmem:[#allocation10 + $0x64] ss:$8 sps:$4 sm:$0xff]  }
 0x2e7   :  { %3042 = vmatprep.subr.bf16.mxu0 %v4832_v3 }
 0x2e9   :  { %2970 = vmatpush1.bf16.msra.mxu1 %v4957_v57  ;;  %v1195_v57 = vld [vmem:[#allocation8 + $0x638] sm:$0xff] }
 0x2ea   :  { %3043 = vmatpush1.bf16.msra.mxu0 %v4831_v40  ;;  %4162 = vmatprep.subr.bf16.mxu1 %v5442_v42  ;;  %v5463_v40 = vld [vmem:[#allocation10 + $0x74] ss:$8 sps:$4 sm:$0xff]   ;;  %v4895_v42 = vcombine.low %v1183_v15, %v1187_v53  ;;  %v4904_v52 = vcombine.high %v1191_v37, %v1195_v57 }
 0x2eb   :  { %3085 = vmatprep.subr.bf16.mxu0 %v4840_v14 }
 0x2ec   :  { %2972 = vmatmul.mubr.bf16.vlgmr.msra.gmra.mrb[16].mxu1 %v6125_v46 }
 0x2ed   :  { %2981 = vmatprep.mubr.bf16.mxu1 %v6144_v35  ;;  %3045 = vmatmul.mubr.bf16.vlgmr.msra.gmra.mrb[80].mxu0 %v6069_v11  ;;  %v1159_v11 = vld [vmem:[#allocation8 + $0x518] sm:$0xff] }
 0x2ee   :  { %3054 = vmatprep.mubr.bf16.mxu0 %v6084_v41  ;;  %3086 = vmatpush1.bf16.msra.mxu0 %v4839_v13  ;;  %v1163_v41 = vld [vmem:[#allocation8 + $0x538] sm:$0xff] }
 0x2ef   :  { %3087 = vmatprep.subr.bf16.mxu0 %v4848_v43  ;;  %4163 = vmatpush1.bf16.msra.mxu1 %v5440_v44  ;;  %v4872_v51 = vcombine.high %v1159_v11, %v1163_v41  ;;  %v4871_v23 = vcombine.low %v1159_v11, %v1163_v41  ;;  %v5461_v13 = vld [vmem:[#allocation10 + $0x70] ss:$8 sps:$4 sm:$0xff]  }
 0x2f0   :  { %4164 = vmatprep.subr.bf16.mxu1 %v5445_v54  ;;  %v1199_v43 = vld [vmem:[#allocation8 + $0x658] sm:$0xff] }
 0x2f1   :  { %v1203_v44 = vld [vmem:[#allocation8 + $0x678] sm:$0xff] }
 0x2f2   :  { %3088 = vmatpush1.bf16.msra.mxu0 %v4847_v59  ;;  %v5464_v59 = vld [vmem:[#allocation10 + $0x80] ss:$8 sps:$4 sm:$0xff]   ;;  %v4911_v58 = vcombine.low %v1199_v43, %v1203_v44  ;;  %v1215_v11 = vld [vmem:[#allocation8 + $0x6d8] sm:$0xff] }
 0x2f3   :  { %3089 = vmatprep.subr.bf16.mxu0 %v4856_v60  ;;  %4165 = vmatpush1.bf16.msra.mxu1 %v5443_v61  ;;  %v1207_v60 = vld [vmem:[#allocation8 + $0x698] sm:$0xff] }
 0x2f4   :  { %2982 = vmatmul.mubr.bf16.gmra.mrb[20].mxu1 %v6142_v49  ;;  %4166 = vmatprep.subr.bf16.mxu1 %v5448_v0  ;;  %v1211_v61 = vld [vmem:[#allocation8 + $0x6b8] sm:$0xff] }
 0x2f5   :  { %2991 = vmatprep.mubr.bf16.mxu1 %v6158_v9  ;;  %3055 = vmatmul.mubr.bf16.gmra.mrb[84].mxu0 %v6082_v38  ;;  %v1175_v38 = vld [vmem:[#allocation8 + $0x598] sm:$0xff] }
 0x2f6   :  { %3064 = vmatprep.mubr.bf16.mxu0 %v6094_v10  ;;  %3090 = vmatpush1.bf16.msra.mxu0 %v4855_v1  ;;  %v1179_v10 = vld [vmem:[#allocation8 + $0x5b8] sm:$0xff]  ;;  %v4920_v1 = vcombine.high %v1207_v60, %v1211_v61 }
 0x2f7   :  { %3091 = vmatprep.subr.bf16.mxu0 %v4864_v4  ;;  %4167 = vmatpush1.bf16.msra.mxu1 %v5446_v5  ;;  %v4888_v32 = vcombine.high %v1175_v38, %v1179_v10  ;;  %v5467_v5 = vld [vmem:[#allocation10 + $0x90] ss:$8 sps:$4 sm:$0xff]  }
 0x2f8   :  { %4168 = vmatprep.subr.bf16.mxu1 %v5451_v6  ;;  %v1219_v41 = vld [vmem:[#allocation8 + $0x6f8] sm:$0xff] }
 0x2f9   :  { %v4928_v17 = vcombine.high %v1215_v11, %v1219_v41 }
 0x2fa   :  { %3092 = vmatpush1.bf16.msra.mxu0 %v4863_v55  ;;  %v5472_v55 = vld [vmem:[#allocation10 + $0xa4] ss:$8 sps:$4 sm:$0xff]  }
 0x2fb   :  { %3093 = vmatprep.subr.bf16.mxu0 %v4872_v51  ;;  %4169 = vmatpush1.bf16.msra.mxu1 %v5449_v16  ;;  %v4919_v16 = vcombine.low %v1207_v60, %v1211_v61  ;;  %v5487_v60 = vld [vmem:[#allocation10 + $0xf4] ss:$8 sps:$4 sm:$0xff]  }
 0x2fc   :  { %2992 = vmatmul.mubr.bf16.gmra.mrb[24].mxu1 %v6156_v21  ;;  %4170 = vmatprep.subr.bf16.mxu1 %v5454_v22  ;;  %v1223_v22 = vld [vmem:[#allocation8 + $0x718] sm:$0xff] }
 0x2fd   :  { %3001 = vmatprep.mubr.bf16.mxu1 %v6172_v2  ;;  %3065 = vmatmul.mubr.bf16.gmra.mrb[88].mxu0 %v6092_v7  ;;  %v4887_v7 = vcombine.low %v1175_v38, %v1179_v10 }
 0x2fe   :  { %3074 = vmatprep.mubr.bf16.mxu0 %v6104_v39  ;;  %3094 = vmatpush1.bf16.msra.mxu0 %v4871_v23  ;;  %v6207_v27 = vpop.f32.mrb[48].mxu0  ;;  %v4896_v39 = vcombine.high %v1183_v15, %v1187_v53  ;;  %v1227_v23 = vld [vmem:[#allocation8 + $0x738] sm:$0xff]  ;;  %v5478_v53 = vld [vmem:[#allocation10 + $0xc4] ss:$8 sps:$4 sm:$0xff]  }
 0x2ff   :  { %3095 = vmatprep.subr.bf16.mxu0 %v4880_v24  ;;  %v6209_v30 = vpop.f32.mrb[49].mxu0  ;;  %4171 = vmatpush1.bf16.msra.mxu1 %v5452_v25  ;;  %v5475_v24 = vld [vmem:[#allocation10 + $0xb4] ss:$8 sps:$4 sm:$0xff]   ;;  %v4927_v25 = vcombine.low %v1215_v11, %v1219_v41  ;;  %v4936_v10 = vcombine.high %v1223_v22, %v1227_v23 }
 0x300   :  { %v6211_v33 = vpop.f32.mrb[50].mxu0  ;;  %4172 = vmatprep.subr.bf16.mxu1 %v5457_v26 }
 0x301   :  { %v6213_v3 = vpop.f32.mrb[51].mxu0 }
 0x302   :  { %3096 = vmatpush1.bf16.msra.mxu0 %v4879_v29  ;;  %v5473_v29 = vld [vmem:[#allocation10 + $0xb0] ss:$8 sps:$4 sm:$0xff]  }
 0x303   :  { %3097 = vmatprep.subr.bf16.mxu0 %v4888_v32  ;;  %4173 = vmatpush1.bf16.msra.mxu1 %v5455_v31  ;;  %v1231_v32 = vld [vmem:[#allocation8 + $0x758] sm:$0xff] }
 0x304   :  { %3002 = vmatmul.mubr.bf16.gmra.mrb[28].mxu1 %v6170_v63  ;;  %4174 = vmatprep.subr.bf16.mxu1 %v5460_v56  ;;  %v1235_v31 = vld [vmem:[#allocation8 + $0x778] sm:$0xff] }
 0x305   :  { %3075 = vmatmul.mubr.bf16.gmra.mrb[92].mxu0 %v6102_v36  ;;  %v4903_v36 = vcombine.low %v1191_v37, %v1195_v57  ;;  %v1239_v37 = vld [vmem:[#allocation8 + $0x798] sm:$0xff] }
 0x306   :  { %3098 = vmatpush1.bf16.msra.mxu0 %v4887_v7  ;;  %3117 = vmatprep.mubr.bf16.mxu0 %v6127_v62  ;;  %v6218_v14 = vpop.f32.mrb[52].mxu0  ;;  %v4912_v62 = vcombine.high %v1199_v43, %v1203_v44  ;;  %v4935_v7 = vcombine.low %v1223_v22, %v1227_v23  ;;  %v1243_v57 = vld [vmem:[#allocation8 + $0x7b8] sm:$0xff] }
 0x307   :  { %3099 = vmatprep.subr.bf16.mxu0 %v4896_v39  ;;  %v6220_v18 = vpop.f32.mrb[53].mxu0  ;;  %4175 = vmatpush1.bf16.msra.mxu1 %v5458_v34  ;;  %v4944_v39 = vcombine.high %v1231_v32, %v1235_v31  ;;  %v5476_v34 = vld [vmem:[#allocation10 + $0xc0] ss:$8 sps:$4 sm:$0xff]   ;;  %v1247_v43 = vld [vmem:[#allocation8 + $0x7d8] sm:$0xff] }
 0x308   :  { %v6222_v45 = vpop.f32.mrb[54].mxu0  ;;  %4176 = vmatprep.subr.bf16.mxu1 %v5463_v40  ;;  %v5481_v40 = vld [vmem:[#allocation10 + $0xd4] ss:$8 sps:$4 sm:$0xff]  }
 0x309   :  { %v6224_v54 = vpop.f32.mrb[55].mxu0  ;;  %v1251_v44 = vld [vmem:[#allocation8 + $0x7f8] sm:$0xff] }
 0x30a   :  { %3100 = vmatpush1.bf16.msra.mxu0 %v4895_v42  ;;  %v4943_v42 = vcombine.low %v1231_v32, %v1235_v31  ;;  %v4959_v61 = vcombine.low %v1247_v43, %v1251_v44 }
 0x30b   :  { %3101 = vmatprep.subr.bf16.mxu0 %v4904_v52  ;;  %4177 = vmatpush1.bf16.msra.mxu1 %v5461_v13  ;;  %v4952_v52 = vcombine.high %v1239_v37, %v1243_v57  ;;  %v5479_v13 = vld [vmem:[#allocation10 + $0xd0] ss:$8 sps:$4 sm:$0xff]  }
 0x30c   :  { %4178 = vmatprep.subr.bf16.mxu1 %v5466_v20  ;;  %v5484_v20 = vld [vmem:[#allocation10 + $0xe4] ss:$8 sps:$4 sm:$0xff]  }
 0x30e   :  { %3102 = vmatpush1.bf16.msra.mxu0 %v4903_v36  ;;  %v6226_v0 = vpop.f32.mrb[56].mxu0  ;;  %v4951_v36 = vcombine.low %v1239_v37, %v1243_v57  ;;  %v5488_v57 = vld [vmem:[#allocation10 + $0x100] ss:$8 sps:$4 sm:$0xff]  }
 0x30f   :  { %3103 = vmatprep.subr.bf16.mxu0 %v4912_v62  ;;  %v6228_v4 = vpop.f32.mrb[57].mxu0  ;;  %4179 = vmatpush1.bf16.msra.mxu1 %v5464_v59  ;;  %v4960_v62 = vcombine.high %v1247_v43, %v1251_v44  ;;  %v5482_v59 = vld [vmem:[#allocation10 + $0xe0] ss:$8 sps:$4 sm:$0xff]  }
 0x310   :  { %v6230_v6 = vpop.f32.mrb[58].mxu0  ;;  %4180 = vmatprep.subr.bf16.mxu1 %v5469_v28  ;;  %v5485_v28 = vld [vmem:[#allocation10 + $0xf0] ss:$8 sps:$4 sm:$0xff]  }
 0x311   :  { %v6232_v51 = vpop.f32.mrb[59].mxu0 }
 0x312   :  { %3104 = vmatpush1.bf16.msra.mxu0 %v4911_v58  ;;  %v5490_v58 = vld [vmem:[#allocation10 + $0x104] ss:$8 sps:$4 sm:$0xff]  }
 0x313   :  { %3105 = vmatprep.subr.bf16.mxu0 %v4920_v1  ;;  %4181 = vmatpush1.bf16.msra.mxu1 %v5467_v5  ;;  %v6248_v1 = vld [vmem:[%s6414_s6] sm:$0xff] }
 0x314   :  { %4182 = vmatprep.subr.bf16.mxu1 %v5472_v55  ;;  %v6253_v5 = vrot.slane %v6248_v1, %v5974_v48  ;;  %v6257_v11 = vrot.slane %v6248_v1, %v5980_v50 }
 0x316   :  { %3106 = vmatpush1.bf16.msra.mxu0 %v4919_v16  ;;  %v6234_v38 = vpop.f32.mrb[60].mxu0  ;;  %v2615_v16 = vadd.f32 %v6213_v3, %v6257_v11  ;;  %v2621_v3 = vadd.f32 %v6220_v18, %v6257_v11 }
 0x317   :  { %3107 = vmatprep.subr.bf16.mxu0 %v4928_v17  ;;  %v6236_v26 = vpop.f32.mrb[61].mxu0  ;;  %4183 = vmatpush1.bf16.msra.mxu1 %v5470_v19 }
 0x318   :  { %v6238_v15 = vpop.f32.mrb[62].mxu0  ;;  %4184 = vmatprep.subr.bf16.mxu1 %v5475_v24 }
 0x319   :  { %v6240_v56 = vpop.f32.mrb[63].mxu0 }
 0x31a   :  { %3108 = vmatpush1.bf16.msra.mxu0 %v4927_v25 }
 0x31b   :  { %3109 = vmatprep.subr.bf16.mxu0 %v4936_v10  ;;  %4185 = vmatpush1.bf16.msra.mxu1 %v5473_v29 }
 0x31c   :  { %4186 = vmatprep.subr.bf16.mxu1 %v5478_v53 }
 0x31e   :  { %3110 = vmatpush1.bf16.msra.mxu0 %v4935_v7  ;;  %v2623_v7 = vadd.f32 %v6222_v45, %v6253_v5 }
 0x31f   :  { %3111 = vmatprep.subr.bf16.mxu0 %v4944_v39  ;;  %4187 = vmatpush1.bf16.msra.mxu1 %v5476_v34 }
 0x320   :  { %4188 = vmatprep.subr.bf16.mxu1 %v5481_v40 }
 0x322   :  { %3112 = vmatpush1.bf16.msra.mxu0 %v4943_v42 }
 0x323   :  { %3113 = vmatprep.subr.bf16.mxu0 %v4952_v52  ;;  %4189 = vmatpush1.bf16.msra.mxu1 %v5479_v13 }
 0x324   :  { %4190 = vmatprep.subr.bf16.mxu1 %v5484_v20  ;;  %v5491_v20 = vld [vmem:[#allocation10 + $0x110] ss:$8 sps:$4 sm:$0xff]  }
 0x326   :  { %3114 = vmatpush1.bf16.msra.mxu0 %v4951_v36 }
 0x327   :  { %3115 = vmatprep.subr.bf16.mxu0 %v4960_v62  ;;  %4191 = vmatpush1.bf16.msra.mxu1 %v5482_v59  ;;  %v2629_v62 = vadd.f32 %v6226_v0, %v6253_v5  ;;  %v2635_v0 = vadd.f32 %v6232_v51, %v6257_v11  ;;  %v5502_v51 = vld [vmem:[#allocation10 + $0x144] ss:$8 sps:$4 sm:$0xff]  }
 0x328   :  { %4192 = vmatprep.subr.bf16.mxu1 %v5487_v60 }
 0x32a   :  { %3116 = vmatpush1.bf16.msra.mxu0 %v4959_v61  ;;  %v2631_v61 = vadd.f32 %v6228_v4, %v6257_v11 }
 0x32b   :  { %4193 = vmatpush1.bf16.msra.mxu1 %v5485_v28 }
 0x32c   :  { %4235 = vmatprep.subr.bf16.mxu1 %v5490_v58 }
 0x32d   :  { %3118 = vmatmul.mubr.bf16.vlgmr.msra.gmra.mrb[80].mxu0 %v6125_v46  ;;  %v2609_v46 = vadd.f32 %v6207_v27, %v6253_v5 }
 0x32e   :  { %3127 = vmatprep.mubr.bf16.mxu0 %v6144_v35 }
 0x335   :  { %3128 = vmatmul.mubr.bf16.gmra.mrb[84].mxu0 %v6142_v49  ;;  %v2611_v49 = vadd.f32 %v6209_v30, %v6257_v11 }
 0x336   :  { %3137 = vmatprep.mubr.bf16.mxu0 %v6158_v9  ;;  %v2613_v9 = vadd.f32 %v6211_v33, %v6253_v5  ;;  %v2619_v33 = vadd.f32 %v6218_v14, %v6253_v5  ;;  %v2625_v14 = vadd.f32 %v6224_v54, %v6257_v11  ;;  %v5496_v54 = vld [vmem:[#allocation10 + $0x124] ss:$8 sps:$4 sm:$0xff]  }
 0x33d   :  { %3138 = vmatmul.mubr.bf16.gmra.mrb[88].mxu0 %v6156_v21 }
 0x33e   :  { %3147 = vmatprep.mubr.bf16.mxu0 %v6172_v2  ;;  %v2681_v35 = vpop.f32.mrb[0].mxu1 }
 0x33f   :  { %v2682_v41 = vadd.f32 %v2681_v35, %v2609_v46  ;;  %v2683_v55 = vpop.f32.mrb[1].mxu1  ;;  %v2633_v35 = vadd.f32 %v6230_v6, %v6253_v5 }
 0x340   :  { %v2684_v17 = vadd.f32 %v2683_v55, %v2611_v49  ;;  %v2685_v19 = vpop.f32.mrb[2].mxu1 }
 0x341   :  { %v3222_v22 = vmul.f32 0.2, %v2682_v41  ;;  %v2686_v27 = vadd.f32 %v2685_v19, %v2613_v9  ;;  %v2687_v23 = vpop.f32.mrb[3].mxu1  ;;  %vm3158_vm1 = vcmp.gt.f32.partialorder %v2682_v41, 0.0 }
 0x342   :  { %v3223_v21 = vmul.f32 0.2, %v2684_v17  ;;  %v2688_v24 = vadd.f32 %v2687_v23, %v2615_v16  ;;  %vm3159_vm2 = vcmp.gt.f32.partialorder %v2684_v17, 0.0  ;;  %v5494_v16 = vld [vmem:[#allocation10 + $0x120] ss:$8 sps:$4 sm:$0xff]  }
 0x343   :  { %vm3166_vm3 = vcmp.gt.f32.partialorder %v2686_v27, 0.0  ;;  %v3230_v2 = vmul.f32 0.2, %v2686_v27  ;;  %v3286_v25 = vsel %vm3158_vm1, %v2682_v41, %v3222_v22  ;;  %v5499_v22 = vld [vmem:[#allocation10 + $0x134] ss:$8 sps:$4 sm:$0xff]  }
 0x344   :  { %vm3167_vm4 = vcmp.gt.f32.partialorder %v2688_v24, 0.0  ;;  %v3231_v30 = vmul.f32 0.2, %v2688_v24  ;;  %v3287_v31 = vsel %vm3159_vm2, %v2684_v17, %v3223_v21 }
 0x345   :  { %v3294_v10 = vsel %vm3166_vm3, %v2686_v27, %v3230_v2  ;;  %3148 = vmatmul.mubr.bf16.gmra.mrb[92].mxu0 %v6170_v63  ;;  %v5493_v63 = vld [vmem:[#allocation10 + $0x114] ss:$8 sps:$4 sm:$0xff]   ;;  %v5497_v2 = vld [vmem:[#allocation10 + $0x130] ss:$8 sps:$4 sm:$0xff]  }
 0x346   :  { %v3350_v29 = vpack.c.bf16 %v3294_v10, %v3286_v25  ;;  %v2691_v32 = vpop.f32.mrb[4].mxu1  ;;  %v3295_v53 = vsel %vm3167_vm4, %v2688_v24, %v3231_v30 }
 0x347   :  { %v2692_v39 = vadd.f32 %v2691_v32, %v2619_v33  ;;  %v2693_v34 = vpop.f32.mrb[5].mxu1  ;;  %v3351_v37 = vpack.c.bf16 %v3295_v53, %v3287_v31  ;;  %v2639_v33 = vadd.f32 %v6234_v38, %v6253_v5  ;;  %v2645_v38 = vadd.f32 %v6240_v56, %v6257_v11  ;;  %v5508_v56 = vld [vmem:[#allocation10 + $0x164] ss:$8 sps:$4 sm:$0xff]  }
 0x348   :  { %v2694_v40 = vadd.f32 %v2693_v34, %v2621_v3  ;;  %v2695_v42 = vpop.f32.mrb[6].mxu1  ;;  %v2641_v3 = vadd.f32 %v6236_v26, %v6257_v11 }
 0x349   :  { %v3238_v52 = vmul.f32 0.2, %v2692_v39  ;;  %v2696_v13 = vadd.f32 %v2695_v42, %v2623_v7  ;;  %v2697_v18 = vpop.f32.mrb[7].mxu1  ;;  %4194 = vmatprep.mubr.bf16.mxu1 %v3351_v37  ;;  %vm3174_vm5 = vcmp.gt.f32.partialorder %v2692_v39, 0.0  ;;  %v2643_v7 = vadd.f32 %v6238_v15, %v6253_v5  ;;  %v5505_v42 = vld [vmem:[#allocation10 + $0x154] ss:$8 sps:$4 sm:$0xff]  }
 0x34a   :  { %v3239_v43 = vmul.f32 0.2, %v2694_v40  ;;  %v2698_v44 = vadd.f32 %v2697_v18, %v2625_v14  ;;  %4195 = vmatmul.mubr.bf16.vlgmr.msra.gmra.mrb[32].mxu1 %v3350_v29  ;;  %vm3175_vm6 = vcmp.gt.f32.partialorder %v2694_v40, 0.0  ;;  %v5503_v5 = vld [vmem:[#allocation10 + $0x150] ss:$8 sps:$4 sm:$0xff]  }
 0x34b   :  { %vm3182_vm7 = vcmp.gt.f32.partialorder %v2696_v13, 0.0  ;;  %v3246_v45 = vmul.f32 0.2, %v2696_v13  ;;  %4236 = vmatpush1.bf16.msra.mxu1 %v5488_v57  ;;  %v3302_v59 = vsel %vm3174_vm5, %v2692_v39, %v3238_v52  ;;  %v5500_v57 = vld [vmem:[#allocation10 + $0x140] ss:$8 sps:$4 sm:$0xff]  }
 0x34c   :  { %vm3183_vm8 = vcmp.gt.f32.partialorder %v2698_v44, 0.0  ;;  %v3247_v36 = vmul.f32 0.2, %v2698_v44  ;;  %4237 = vmatprep.subr.bf16.mxu1 %v5493_v63  ;;  %v3303_v58 = vsel %vm3175_vm6, %v2694_v40, %v3239_v43 }
 0x34d   :  { %v3310_v60 = vsel %vm3182_vm7, %v2696_v13, %v3246_v45 }
 0x34e   :  { %v2701_v28 = vpop.f32.mrb[8].mxu1  ;;  %v3311_v46 = vsel %vm3183_vm8, %v2698_v44, %v3247_v36  ;;  %v3358_v49 = vpack.c.bf16 %v3310_v60, %v3302_v59  ;;  %v5511_v59 = vld [vmem:[#allocation10 + $0x174] ss:$8 sps:$4 sm:$0xff]   ;;  %v5509_v60 = vld [vmem:[#allocation10 + $0x170] ss:$8 sps:$4 sm:$0xff]  }
 0x34f   :  { %v2702_v9 = vadd.f32 %v2701_v28, %v2629_v62  ;;  %4238 = vmatpush1.bf16.msra.mxu1 %v5491_v20  ;;  %v2703_v41 = vpop.f32.mrb[9].mxu1  ;;  %v3359_v55 = vpack.c.bf16 %v3311_v46, %v3303_v58  ;;  %v5506_v62 = vld [vmem:[#allocation10 + $0x160] ss:$8 sps:$4 sm:$0xff]   ;;  %v5517_v58 = vld [vmem:[#allocation10 + $0x194] ss:$8 sps:$4 sm:$0xff]  }
 0x350   :  { %v2704_v17 = vadd.f32 %v2703_v41, %v2631_v61  ;;  %v2705_v19 = vpop.f32.mrb[10].mxu1  ;;  %4239 = vmatprep.subr.bf16.mxu1 %v5496_v54  ;;  %v5514_v61 = vld [vmem:[#allocation10 + $0x184] ss:$8 sps:$4 sm:$0xff]   ;;  %v5512_v28 = vld [vmem:[#allocation10 + $0x180] ss:$8 sps:$4 sm:$0xff]  }
 0x351   :  { %v3254_v4 = vmul.f32 0.2, %v2702_v9  ;;  %v2706_v27 = vadd.f32 %v2705_v19, %v2633_v35  ;;  %v2707_v23 = vpop.f32.mrb[11].mxu1  ;;  %4204 = vmatprep.mubr.bf16.mxu1 %v3359_v55  ;;  %vm3190_vm9 = vcmp.gt.f32.partialorder %v2702_v9, 0.0  ;;  %v5515_v46 = vld [vmem:[#allocation10 + $0x190] ss:$8 sps:$4 sm:$0xff]   ;;  %v6297_v19 = vrot.slane %v6248_v1, %v408_v8 }
 0x352   :  { %v3255_v21 = vmul.f32 0.2, %v2704_v17  ;;  %v2708_v24 = vadd.f32 %v2707_v23, %v2635_v0  ;;  %4205 = vmatmul.mubr.bf16.gmra.mrb[36].mxu1 %v3358_v49  ;;  %vm3191_vm10 = vcmp.gt.f32.partialorder %v2704_v17, 0.0  ;;  %v5520_v49 = vld [vmem:[#allocation10 + $0x1a4] ss:$8 sps:$4 sm:$0xff]  }
 0x353   :  { %vm3198_vm11 = vcmp.gt.f32.partialorder %v2706_v27, 0.0  ;;  %v3262_v6 = vmul.f32 0.2, %v2706_v27  ;;  %4240 = vmatpush1.bf16.msra.mxu1 %v5494_v16  ;;  %v3318_v25 = vsel %vm3190_vm9, %v2702_v9, %v3254_v4  ;;  %v5518_v35 = vld [vmem:[#allocation10 + $0x1a0] ss:$8 sps:$4 sm:$0xff]   ;;  %v6302_v4 = vrot.slane %v6248_v1, %v412_v12 }
 0x354   :  { %vm3199_vm12 = vcmp.gt.f32.partialorder %v2708_v24, 0.0  ;;  %v3263_v30 = vmul.f32 0.2, %v2708_v24  ;;  %4241 = vmatprep.subr.bf16.mxu1 %v5499_v22  ;;  %v3319_v32 = vsel %vm3191_vm10, %v2704_v17, %v3255_v21  ;;  %v5523_v9 = vld [vmem:[#allocation10 + $0x1b4] ss:$8 sps:$4 sm:$0xff]  }
 0x355   :  { %v3326_v10 = vsel %vm3198_vm11, %v2706_v27, %v3262_v6  ;;  %v5521_v41 = vld [vmem:[#allocation10 + $0x1b0] ss:$8 sps:$4 sm:$0xff]   ;;  %v5526_v55 = vld [vmem:[#allocation10 + $0x1c4] ss:$8 sps:$4 sm:$0xff]   ;;  %v5524_v16 = vld [vmem:[#allocation10 + $0x1c0] ss:$8 sps:$4 sm:$0xff]  }
 0x356   :  { %v2711_v29 = vpop.f32.mrb[12].mxu1  ;;  %v3327_v31 = vsel %vm3199_vm12, %v2708_v24, %v3263_v30  ;;  %v3366_v53 = vpack.c.bf16 %v3326_v10, %v3318_v25  ;;  %v5529_v0 = vld [vmem:[#allocation10 + $0x1d4] ss:$8 sps:$4 sm:$0xff]   ;;  %v5527_v17 = vld [vmem:[#allocation10 + $0x1d0] ss:$8 sps:$4 sm:$0xff]  }
 0x357   :  { %v2712_v39 = vadd.f32 %v2711_v29, %v2639_v33  ;;  %4242 = vmatpush1.bf16.msra.mxu1 %v5497_v2  ;;  %v2713_v34 = vpop.f32.mrb[13].mxu1  ;;  %v3367_v37 = vpack.c.bf16 %v3327_v31, %v3319_v32  ;;  %v5532_v22 = vld [vmem:[#allocation10 + $0x1e4] ss:$8 sps:$4 sm:$0xff]   ;;  %v5530_v23 = vld [vmem:[#allocation10 + $0x1e0] ss:$8 sps:$4 sm:$0xff]  }
 0x358   :  { %v2714_v14 = vadd.f32 %v2713_v34, %v2641_v3  ;;  %v2715_v40 = vpop.f32.mrb[14].mxu1  ;;  %4243 = vmatprep.subr.bf16.mxu1 %v5502_v51  ;;  %v5535_v6 = vld [vmem:[#allocation10 + $0x1f4] ss:$8 sps:$4 sm:$0xff]   ;;  %v5533_v10 = vld [vmem:[#allocation10 + $0x1f0] ss:$8 sps:$4 sm:$0xff]  }
 0x359   :  { %v3270_v26 = vmul.f32 0.2, %v2712_v39  ;;  %v2716_v63 = vadd.f32 %v2715_v40, %v2643_v7  ;;  %v2717_v52 = vpop.f32.mrb[15].mxu1  ;;  %4214 = vmatprep.mubr.bf16.mxu1 %v3367_v37  ;;  %vm3206_vm13 = vcmp.gt.f32.partialorder %v2712_v39, 0.0  ;;  %v5538_v29 = vld [vmem:[#allocation10 + $0x204] ss:$8 sps:$4 sm:$0xff]  }
 0x35a   :  { %v3271_v13 = vmul.f32 0.2, %v2714_v14  ;;  %v2718_v18 = vadd.f32 %v2717_v52, %v2645_v38  ;;  %4215 = vmatmul.mubr.bf16.gmra.mrb[40].mxu1 %v3366_v53  ;;  %vm3207_vm14 = vcmp.gt.f32.partialorder %v2714_v14, 0.0  ;;  %v5536_v40 = vld [vmem:[#allocation10 + $0x200] ss:$8 sps:$4 sm:$0xff]  }
 0x35b   :  { %vm3214_vm15 = vcmp.gt.f32.partialorder %v2716_v63, 0.0  ;;  %v3278_v15 = vmul.f32 0.2, %v2716_v63  ;;  %4244 = vmatpush1.bf16.msra.mxu1 %v5500_v57  ;;  %v3334_v11 = vsel %vm3206_vm13, %v2712_v39, %v3270_v26 }
 0x35c   :  { %vm3215_vm0 = vcmp.gt.f32.partialorder %v2718_v18, 0.0  ;;  %v3279_v43 = vmul.f32 0.2, %v2718_v18  ;;  %4245 = vmatprep.subr.bf16.mxu1 %v5505_v42  ;;  %v3335_v45 = vsel %vm3207_vm14, %v2714_v14, %v3271_v13 }
 0x35d   :  { %v3342_v44 = vsel %vm3214_vm15, %v2716_v63, %v3278_v15  ;;  %v5541_v63 = vld [vmem:[#allocation10 + $0x214] ss:$8 sps:$4 sm:$0xff]  }
 0x35e   :  { %v3343_v20 = vsel %vm3215_vm0, %v2718_v18, %v3279_v43  ;;  %v3374_v36 = vpack.c.bf16 %v3342_v44, %v3334_v11  ;;  %v5544_v44 = vld [vmem:[#allocation10 + $0x224] ss:$8 sps:$4 sm:$0xff]  }
 0x35f   :  { %4246 = vmatpush1.bf16.msra.mxu1 %v5503_v5  ;;  %v3375_v54 = vpack.c.bf16 %v3343_v20, %v3335_v45 }
 0x360   :  { %4247 = vmatprep.subr.bf16.mxu1 %v5508_v56  ;;  %v5539_v56 = vld [vmem:[#allocation10 + $0x210] ss:$8 sps:$4 sm:$0xff]  }
 0x361   :  { %4224 = vmatprep.mubr.bf16.mxu1 %v3375_v54 }
 0x362   :  { %4225 = vmatmul.mubr.bf16.gmra.mrb[44].mxu1 %v3374_v36 }
 0x363   :  { %4248 = vmatpush1.bf16.msra.mxu1 %v5506_v62 }
 0x364   :  { %4249 = vmatprep.subr.bf16.mxu1 %v5511_v59 }
 0x367   :  { %4250 = vmatpush1.bf16.msra.mxu1 %v5509_v60 }
 0x368   :  { %4251 = vmatprep.subr.bf16.mxu1 %v5514_v61 }
 0x36b   :  { %4252 = vmatpush1.bf16.msra.mxu1 %v5512_v28 }
 0x36c   :  { %4253 = vmatprep.subr.bf16.mxu1 %v5517_v58  ;;  %v5542_v58 = vld [vmem:[#allocation10 + $0x220] ss:$8 sps:$4 sm:$0xff]  }
 0x36f   :  { %4254 = vmatpush1.bf16.msra.mxu1 %v5515_v46 }
 0x370   :  { %4255 = vmatprep.subr.bf16.mxu1 %v5520_v49 }
 0x373   :  { %4256 = vmatpush1.bf16.msra.mxu1 %v5518_v35  ;;  %v5547_v35 = vld [vmem:[#allocation10 + $0x234] ss:$8 sps:$4 sm:$0xff]  }
 0x374   :  { %4257 = vmatprep.subr.bf16.mxu1 %v5523_v9 }
 0x377   :  { %4258 = vmatpush1.bf16.msra.mxu1 %v5521_v41 }
 0x378   :  { %4259 = vmatprep.subr.bf16.mxu1 %v5526_v55 }
 0x37b   :  { %4260 = vmatpush1.bf16.msra.mxu1 %v5524_v16 }
 0x37c   :  { %4261 = vmatprep.subr.bf16.mxu1 %v5529_v0 }
 0x37f   :  { %v2827_v27 = vpop.f32.mrb[64].mxu0  ;;  %4262 = vmatpush1.bf16.msra.mxu1 %v5527_v17 }
 0x380   :  { %v5153_v21 = vadd.f32 %v2827_v27, %v6297_v19  ;;  %v2829_v24 = vpop.f32.mrb[65].mxu0  ;;  %4263 = vmatprep.subr.bf16.mxu1 %v5532_v22  ;;  %v5545_v22 = vld [vmem:[#allocation10 + $0x230] ss:$8 sps:$4 sm:$0xff]  }
 0x381   :  { %v5154_v2 = vadd.f32 %v2829_v24, %v6302_v4  ;;  %v2831_v30 = vpop.f32.mrb[66].mxu0 }
 0x382   :  { %v3224_v51 = vmul.f32 0.2, %v5153_v21  ;;  %v5155_v8 = vadd.f32 %v2831_v30, %v6297_v19  ;;  %v2833_v33 = vpop.f32.mrb[67].mxu0  ;;  %vm3160_vm1 = vcmp.gt.f32.partialorder %v5153_v21, 0.0 }
 0x383   :  { %v3225_v25 = vmul.f32 0.2, %v5154_v2  ;;  %v5156_v12 = vadd.f32 %v2833_v33, %v6302_v4  ;;  %4264 = vmatpush1.bf16.msra.mxu1 %v5530_v23  ;;  %vm3161_vm2 = vcmp.gt.f32.partialorder %v5154_v2, 0.0  ;;  %v5550_v23 = vld [vmem:[#allocation10 + $0x244] ss:$8 sps:$4 sm:$0xff]  }
 0x384   :  { %vm3168_vm3 = vcmp.gt.f32.partialorder %v5155_v8, 0.0  ;;  %v3232_v3 = vmul.f32 0.2, %v5155_v8  ;;  %4265 = vmatprep.subr.bf16.mxu1 %v5535_v6  ;;  %v3288_v31 = vsel %vm3160_vm1, %v5153_v21, %v3224_v51 }
 0x385   :  { %vm3169_vm4 = vcmp.gt.f32.partialorder %v5156_v12, 0.0  ;;  %v3233_v32 = vmul.f32 0.2, %v5156_v12  ;;  %v3289_v34 = vsel %vm3161_vm2, %v5154_v2, %v3225_v25 }
 0x386   :  { %v3296_v53 = vsel %vm3168_vm3, %v5155_v8, %v3232_v3 }
 0x387   :  { %v3352_v7 = vpack.c.bf16 %v3296_v53, %v3288_v31  ;;  %v2837_v39 = vpop.f32.mrb[68].mxu0  ;;  %4266 = vmatpush1.bf16.msra.mxu1 %v5533_v10  ;;  %v3297_v37 = vsel %vm3169_vm4, %v5156_v12, %v3233_v32  ;;  %v5548_v12 = vld [vmem:[#allocation10 + $0x240] ss:$8 sps:$4 sm:$0xff]  }
 0x388   :  { %v5157_v57 = vadd.f32 %v2837_v39, %v6297_v19  ;;  %v2839_v38 = vpop.f32.mrb[69].mxu0  ;;  %v3353_v14 = vpack.c.bf16 %v3297_v37, %v3289_v34  ;;  %4308 = vmatprep.subr.bf16.mxu1 %v5538_v29  ;;  %v5553_v29 = vld [vmem:[#allocation10 + $0x254] ss:$8 sps:$4 sm:$0xff]   ;;  %v5551_v37 = vld [vmem:[#allocation10 + $0x250] ss:$8 sps:$4 sm:$0xff]  }
 0x389   :  { %v5158_v42 = vadd.f32 %v2839_v38, %v6302_v4  ;;  %v2841_v26 = vpop.f32.mrb[70].mxu0  ;;  %v5556_v38 = vld [vmem:[#allocation10 + $0x264] ss:$8 sps:$4 sm:$0xff]  }
 0x38a   :  { %v3240_v52 = vmul.f32 0.2, %v5157_v57  ;;  %v5159_v13 = vadd.f32 %v2841_v26, %v6297_v19  ;;  %v2843_v18 = vpop.f32.mrb[71].mxu0  ;;  %4267 = vmatprep.mubr.bf16.mxu1 %v3353_v14  ;;  %vm3176_vm5 = vcmp.gt.f32.partialorder %v5157_v57, 0.0 }
 0x38b   :  { %v3241_v15 = vmul.f32 0.2, %v5158_v42  ;;  %v5160_v5 = vadd.f32 %v2843_v18, %v6302_v4  ;;  %4268 = vmatmul.mubr.bf16.vlgmr.msra.gmra.mrb[32].mxu1 %v3352_v7  ;;  %vm3177_vm6 = vcmp.gt.f32.partialorder %v5158_v42, 0.0  ;;  %v5562_v18 = vld [vmem:[#allocation10 + $0x284] ss:$8 sps:$4 sm:$0xff]  }
 0x38c   :  { %vm3184_vm7 = vcmp.gt.f32.partialorder %v5159_v13, 0.0  ;;  %v3248_v43 = vmul.f32 0.2, %v5159_v13  ;;  %4309 = vmatpush1.bf16.msra.mxu1 %v5536_v40  ;;  %v3304_v45 = vsel %vm3176_vm5, %v5157_v57, %v3240_v52  ;;  %v5554_v52 = vld [vmem:[#allocation10 + $0x260] ss:$8 sps:$4 sm:$0xff]  }
 0x38d   :  { %vm3185_vm8 = vcmp.gt.f32.partialorder %v5160_v5, 0.0  ;;  %v3249_v11 = vmul.f32 0.2, %v5160_v5  ;;  %4310 = vmatprep.subr.bf16.mxu1 %v5541_v63  ;;  %v3305_v54 = vsel %vm3177_vm6, %v5158_v42, %v3241_v15  ;;  %v5560_v15 = vld [vmem:[#allocation10 + $0x280] ss:$8 sps:$4 sm:$0xff]  }
 0x38e   :  { %v3312_v20 = vsel %vm3184_vm7, %v5159_v13, %v3248_v43  ;;  %v5557_v13 = vld [vmem:[#allocation10 + $0x270] ss:$8 sps:$4 sm:$0xff]  }
 0x38f   :  { %v2847_v36 = vpop.f32.mrb[72].mxu0  ;;  %v3313_v62 = vsel %vm3185_vm8, %v5160_v5, %v3249_v11  ;;  %v3360_v59 = vpack.c.bf16 %v3312_v20, %v3304_v45  ;;  %v5565_v5 = vld [vmem:[#allocation10 + $0x294] ss:$8 sps:$4 sm:$0xff]   ;;  %v5563_v43 = vld [vmem:[#allocation10 + $0x290] ss:$8 sps:$4 sm:$0xff]  }
 0x390   :  { %v5161_v60 = vadd.f32 %v2847_v36, %v6297_v19  ;;  %4311 = vmatpush1.bf16.msra.mxu1 %v5539_v56  ;;  %v2849_v61 = vpop.f32.mrb[73].mxu0  ;;  %v3361_v28 = vpack.c.bf16 %v3313_v62, %v3305_v54  ;;  %v5568_v56 = vld [vmem:[#allocation10 + $0x2a4] ss:$8 sps:$4 sm:$0xff]   ;;  %v5566_v11 = vld [vmem:[#allocation10 + $0x2a0] ss:$8 sps:$4 sm:$0xff]   ;;  %v1272_v54 = vsub.s32 4, %v5971_v47 }
 0x391   :  { %v5162_v46 = vadd.f32 %v2849_v61, %v6302_v4  ;;  %v2851_v49 = vpop.f32.mrb[74].mxu0  ;;  %4312 = vmatprep.subr.bf16.mxu1 %v5544_v44  ;;  %v5571_v44 = vld [vmem:[#allocation10 + $0x2b4] ss:$8 sps:$4 sm:$0xff]   ;;  %v5569_v45 = vld [vmem:[#allocation10 + $0x2b0] ss:$8 sps:$4 sm:$0xff]  }
 0x392   :  { %v3256_v9 = vmul.f32 0.2, %v5161_v60  ;;  %v5163_v41 = vadd.f32 %v2851_v49, %v6297_v19  ;;  %v2853_v55 = vpop.f32.mrb[75].mxu0  ;;  %4277 = vmatprep.mubr.bf16.mxu1 %v3361_v28  ;;  %vm3192_vm9 = vcmp.gt.f32.partialorder %v5161_v60, 0.0  ;;  %v5574_v20 = vld [vmem:[#allocation10 + $0x2c4] ss:$8 sps:$4 sm:$0xff]  }
 0x393   :  { %v3257_v16 = vmul.f32 0.2, %v5162_v46  ;;  %v5164_v0 = vadd.f32 %v2853_v55, %v6302_v4  ;;  %4278 = vmatmul.mubr.bf16.gmra.mrb[36].mxu1 %v3360_v59  ;;  %vm3193_vm10 = vcmp.gt.f32.partialorder %v5162_v46, 0.0  ;;  %v5572_v36 = vld [vmem:[#allocation10 + $0x2c0] ss:$8 sps:$4 sm:$0xff]   ;;  %v1276_v59 = vsub.s32 5, %v5971_v47 }
 0x394   :  { %vm3200_vm11 = vcmp.gt.f32.partialorder %v5163_v41, 0.0  ;;  %v3264_v17 = vmul.f32 0.2, %v5163_v41  ;;  %4313 = vmatpush1.bf16.msra.mxu1 %v5542_v58  ;;  %v3320_v21 = vsel %vm3192_vm9, %v5161_v60, %v3256_v9  ;;  %v5577_v62 = vld [vmem:[#allocation10 + $0x2d4] ss:$8 sps:$4 sm:$0xff]   ;;  %v6323_v60 = vrot.slane %v6248_v1, %v1272_v54 }
 0x395   :  { %vm3201_vm12 = vcmp.gt.f32.partialorder %v5164_v0, 0.0  ;;  %v3265_v27 = vmul.f32 0.2, %v5164_v0  ;;  %4314 = vmatprep.subr.bf16.mxu1 %v5547_v35  ;;  %v3321_v2 = vsel %vm3193_vm10, %v5162_v46, %v3257_v16  ;;  %v5575_v61 = vld [vmem:[#allocation10 + $0x2d0] ss:$8 sps:$4 sm:$0xff]   ;;  %v6326_v28 = vrot.slane %v6248_v1, %v1276_v59 }
 0x396   :  { %v3328_v24 = vsel %vm3200_vm11, %v5163_v41, %v3264_v17  ;;  %v5580_v58 = vld [vmem:[#allocation10 + $0x2e4] ss:$8 sps:$4 sm:$0xff]   ;;  %v5578_v9 = vld [vmem:[#allocation10 + $0x2e0] ss:$8 sps:$4 sm:$0xff]   ;;  %v5583_v16 = vld [vmem:[#allocation10 + $0x2f4] ss:$8 sps:$4 sm:$0xff]  }
 0x397   :  { %v2857_v6 = vpop.f32.mrb[76].mxu0  ;;  %v3329_v30 = vsel %vm3201_vm12, %v5164_v0, %v3265_v27  ;;  %v3368_v51 = vpack.c.bf16 %v3328_v24, %v3320_v21  ;;  %v5581_v24 = vld [vmem:[#allocation10 + $0x2f0] ss:$8 sps:$4 sm:$0xff]  }
 0x398   :  { %v5165_v8 = vadd.f32 %v2857_v6, %v6297_v19  ;;  %4315 = vmatpush1.bf16.msra.mxu1 %v5545_v22  ;;  %v2859_v33 = vpop.f32.mrb[77].mxu0  ;;  %v3369_v25 = vpack.c.bf16 %v3329_v30, %v3321_v2  ;;  %v5586_v2 = vld [vmem:[#allocation10 + $0x304] ss:$8 sps:$4 sm:$0xff]  }
 0x399   :  { %v5166_v10 = vadd.f32 %v2859_v33, %v6302_v4  ;;  %v2861_v3 = vpop.f32.mrb[78].mxu0  ;;  %4316 = vmatprep.subr.bf16.mxu1 %v5550_v23 }
 0x39a   :  { %v3272_v32 = vmul.f32 0.2, %v5165_v8  ;;  %v5167_v31 = vadd.f32 %v2861_v3, %v6297_v19  ;;  %v2863_v53 = vpop.f32.mrb[79].mxu0  ;;  %4287 = vmatprep.mubr.bf16.mxu1 %v3369_v25  ;;  %vm3208_vm13 = vcmp.gt.f32.partialorder %v5165_v8, 0.0 }
 0x39b   :  { %v3273_v7 = vmul.f32 0.2, %v5166_v10  ;;  %v5168_v39 = vadd.f32 %v2863_v53, %v6302_v4  ;;  %4288 = vmatmul.mubr.bf16.gmra.mrb[40].mxu1 %v3368_v51  ;;  %vm3209_vm14 = vcmp.gt.f32.partialorder %v5166_v10, 0.0  ;;  %v5559_v4 = vld [vmem:[#allocation10 + $0x274] ss:$8 sps:$4 sm:$0xff]  }
 0x39c   :  { %vm3216_vm15 = vcmp.gt.f32.partialorder %v5167_v31, 0.0  ;;  %v3280_v34 = vmul.f32 0.2, %v5167_v31  ;;  %4317 = vmatpush1.bf16.msra.mxu1 %v5548_v12  ;;  %v3336_v14 = vsel %vm3208_vm13, %v5165_v8, %v3272_v32  ;;  %v5584_v32 = vld [vmem:[#allocation10 + $0x300] ss:$8 sps:$4 sm:$0xff]  }
 0x39d   :  { %vm3217_vm0 = vcmp.gt.f32.partialorder %v5168_v39, 0.0  ;;  %v3281_v57 = vmul.f32 0.2, %v5168_v39  ;;  %4318 = vmatprep.subr.bf16.mxu1 %v5553_v29  ;;  %v3337_v42 = vsel %vm3209_vm14, %v5166_v10, %v3273_v7  ;;  %v5589_v7 = vld [vmem:[#allocation10 + $0x314] ss:$8 sps:$4 sm:$0xff]  }
 0x39e   :  { %v3344_v40 = vsel %vm3216_vm15, %v5167_v31, %v3280_v34 }
 0x39f   :  { %v3345_v19 = vsel %vm3217_vm0, %v5168_v39, %v3281_v57  ;;  %v3376_v26 = vpack.c.bf16 %v3344_v40, %v3336_v14  ;;  %v5587_v40 = vld [vmem:[#allocation10 + $0x310] ss:$8 sps:$4 sm:$0xff]  }
 0x3a0   :  { %4319 = vmatpush1.bf16.msra.mxu1 %v5551_v37  ;;  %v3377_v63 = vpack.c.bf16 %v3345_v19, %v3337_v42  ;;  %v5592_v19 = vld [vmem:[#allocation10 + $0x324] ss:$8 sps:$4 sm:$0xff]  }
 0x3a1   :  { %4320 = vmatprep.subr.bf16.mxu1 %v5556_v38 }
 0x3a2   :  { %4297 = vmatprep.mubr.bf16.mxu1 %v3377_v63 }
 0x3a3   :  { %4298 = vmatmul.mubr.bf16.gmra.mrb[44].mxu1 %v3376_v26 }
 0x3a4   :  { %4321 = vmatpush1.bf16.msra.mxu1 %v5554_v52 }
 0x3a5   :  { %4322 = vmatprep.subr.bf16.mxu1 %v5559_v4 }
 0x3a8   :  { %4323 = vmatpush1.bf16.msra.mxu1 %v5557_v13 }
 0x3a9   :  { %4324 = vmatprep.subr.bf16.mxu1 %v5562_v18 }
 0x3ac   :  { %4325 = vmatpush1.bf16.msra.mxu1 %v5560_v15 }
 0x3ad   :  { %4326 = vmatprep.subr.bf16.mxu1 %v5565_v5 }
 0x3b0   :  { %4327 = vmatpush1.bf16.msra.mxu1 %v5563_v43 }
 0x3b1   :  { %4328 = vmatprep.subr.bf16.mxu1 %v5568_v56  ;;  %v5590_v56 = vld [vmem:[#allocation10 + $0x320] ss:$8 sps:$4 sm:$0xff]  }
 0x3b4   :  { %4329 = vmatpush1.bf16.msra.mxu1 %v5566_v11 }
 0x3b5   :  { %4330 = vmatprep.subr.bf16.mxu1 %v5571_v44 }
 0x3b8   :  { %4331 = vmatpush1.bf16.msra.mxu1 %v5569_v45  ;;  %v5595_v45 = vld [vmem:[#allocation10 + $0x334] ss:$8 sps:$4 sm:$0xff]  }
 0x3b9   :  { %4332 = vmatprep.subr.bf16.mxu1 %v5574_v20 }
 0x3bc   :  { %4333 = vmatpush1.bf16.msra.mxu1 %v5572_v36 }
 0x3bd   :  { %4334 = vmatprep.subr.bf16.mxu1 %v5577_v62 }
 0x3bf   :  { %v2973_v46 = vpop.f32.mrb[16].mxu1 }
 0x3c0   :  { %v5169_v49 = vadd.f32 %v2973_v46, %v6323_v60  ;;  %v2975_v35 = vpop.f32.mrb[17].mxu1  ;;  %4335 = vmatpush1.bf16.msra.mxu1 %v5575_v61 }
 0x3c1   :  { %v5170_v41 = vadd.f32 %v2975_v35, %v6326_v28  ;;  %v2977_v55 = vpop.f32.mrb[18].mxu1  ;;  %4336 = vmatprep.subr.bf16.mxu1 %v5580_v58  ;;  %v5593_v58 = vld [vmem:[#allocation10 + $0x330] ss:$8 sps:$4 sm:$0xff]  }
 0x3c2   :  { %v3226_v0 = vmul.f32 0.2, %v5169_v49  ;;  %v5171_v17 = vadd.f32 %v2977_v55, %v6323_v60  ;;  %v2979_v22 = vpop.f32.mrb[19].mxu1  ;;  %vm3162_vm1 = vcmp.gt.f32.partialorder %v5169_v49, 0.0 }
 0x3c3   :  { %v3227_v27 = vmul.f32 0.2, %v5170_v41  ;;  %v5172_v23 = vadd.f32 %v2979_v22, %v6326_v28  ;;  %vm3163_vm2 = vcmp.gt.f32.partialorder %v5170_v41, 0.0 }
 0x3c4   :  { %vm3170_vm3 = vcmp.gt.f32.partialorder %v5171_v17, 0.0  ;;  %v3234_v21 = vmul.f32 0.2, %v5171_v17  ;;  %4337 = vmatpush1.bf16.msra.mxu1 %v5578_v9  ;;  %v3290_v30 = vsel %vm3162_vm1, %v5169_v49, %v3226_v0  ;;  %v5598_v49 = vld [vmem:[#allocation10 + $0x344] ss:$8 sps:$4 sm:$0xff]  }
 0x3c5   :  { %vm3171_vm4 = vcmp.gt.f32.partialorder %v5172_v23, 0.0  ;;  %v3235_v6 = vmul.f32 0.2, %v5172_v23  ;;  %4338 = vmatprep.subr.bf16.mxu1 %v5583_v16  ;;  %v3291_v25 = vsel %vm3163_vm2, %v5170_v41, %v3227_v27 }
 0x3c6   :  { %v3298_v51 = vsel %vm3170_vm3, %v5171_v17, %v3234_v21 }
 0x3c7   :  { %v3354_v8 = vpack.c.bf16 %v3298_v51, %v3290_v30  ;;  %v2983_v33 = vpop.f32.mrb[20].mxu1  ;;  %v3299_v12 = vsel %vm3171_vm4, %v5172_v23, %v3235_v6  ;;  %v5596_v23 = vld [vmem:[#allocation10 + $0x340] ss:$8 sps:$4 sm:$0xff]   ;;  %v5601_v6 = vld [vmem:[#allocation10 + $0x354] ss:$8 sps:$4 sm:$0xff]  }
 0x3c8   :  { %v5173_v10 = vadd.f32 %v2983_v33, %v6323_v60  ;;  %v2985_v3 = vpop.f32.mrb[21].mxu1  ;;  %4339 = vmatpush1.bf16.msra.mxu1 %v5581_v24  ;;  %v3355_v29 = vpack.c.bf16 %v3299_v12, %v3291_v25  ;;  %v5599_v12 = vld [vmem:[#allocation10 + $0x350] ss:$8 sps:$4 sm:$0xff]  }
 0x3c9   :  { %v5174_v31 = vadd.f32 %v2985_v3, %v6326_v28  ;;  %v2987_v53 = vpop.f32.mrb[22].mxu1  ;;  %4381 = vmatprep.subr.bf16.mxu1 %v5586_v2  ;;  %v5604_v3 = vld [vmem:[#allocation10 + $0x364] ss:$8 sps:$4 sm:$0xff]  }
 0x3ca   :  { %v3242_v39 = vmul.f32 0.2, %v5173_v10  ;;  %v5175_v34 = vadd.f32 %v2987_v53, %v6323_v60  ;;  %v2989_v37 = vpop.f32.mrb[23].mxu1  ;;  %4340 = vmatprep.mubr.bf16.mxu1 %v3355_v29  ;;  %vm3178_vm5 = vcmp.gt.f32.partialorder %v5173_v10, 0.0 }
 0x3cb   :  { %v3243_v57 = vmul.f32 0.2, %v5174_v31  ;;  %v5176_v38 = vadd.f32 %v2989_v37, %v6326_v28  ;;  %4341 = vmatmul.mubr.bf16.vlgmr.msra.gmra.mrb[32].mxu1 %v3354_v8  ;;  %vm3179_vm6 = vcmp.gt.f32.partialorder %v5174_v31, 0.0  ;;  %v5610_v37 = vld [vmem:[#allocation10 + $0x384] ss:$8 sps:$4 sm:$0xff]  }
 0x3cc   :  { %vm3186_vm7 = vcmp.gt.f32.partialorder %v5175_v34, 0.0  ;;  %v3250_v14 = vmul.f32 0.2, %v5175_v34  ;;  %4382 = vmatpush1.bf16.msra.mxu1 %v5584_v32  ;;  %v3306_v26 = vsel %vm3178_vm5, %v5173_v10, %v3242_v39  ;;  %v5602_v39 = vld [vmem:[#allocation10 + $0x360] ss:$8 sps:$4 sm:$0xff]  }
 0x3cd   :  { %vm3187_vm8 = vcmp.gt.f32.partialorder %v5176_v38, 0.0  ;;  %v3251_v42 = vmul.f32 0.2, %v5176_v38  ;;  %4383 = vmatprep.subr.bf16.mxu1 %v5589_v7  ;;  %v3307_v4 = vsel %vm3179_vm6, %v5174_v31, %v3243_v57  ;;  %v5608_v57 = vld [vmem:[#allocation10 + $0x380] ss:$8 sps:$4 sm:$0xff]  }
 0x3ce   :  { %v3314_v63 = vsel %vm3186_vm7, %v5175_v34, %v3250_v14  ;;  %v5605_v34 = vld [vmem:[#allocation10 + $0x370] ss:$8 sps:$4 sm:$0xff]  }
 0x3cf   :  { %v2993_v52 = vpop.f32.mrb[24].mxu1  ;;  %v3315_v13 = vsel %vm3187_vm8, %v5176_v38, %v3251_v42  ;;  %v3362_v18 = vpack.c.bf16 %v3314_v63, %v3306_v26  ;;  %v5613_v38 = vld [vmem:[#allocation10 + $0x394] ss:$8 sps:$4 sm:$0xff]   ;;  %v5611_v14 = vld [vmem:[#allocation10 + $0x390] ss:$8 sps:$4 sm:$0xff]  }
 0x3d0   :  { %v5177_v15 = vadd.f32 %v2993_v52, %v6323_v60  ;;  %v2995_v5 = vpop.f32.mrb[25].mxu1  ;;  %4384 = vmatpush1.bf16.msra.mxu1 %v5587_v40  ;;  %v3363_v43 = vpack.c.bf16 %v3315_v13, %v3307_v4  ;;  %v5616_v40 = vld [vmem:[#allocation10 + $0x3a4] ss:$8 sps:$4 sm:$0xff]   ;;  %v5614_v42 = vld [vmem:[#allocation10 + $0x3a0] ss:$8 sps:$4 sm:$0xff]   ;;  %v1280_v4 = vsub.s32 6, %v5971_v47 }
 0x3d1   :  { %v5178_v11 = vadd.f32 %v2995_v5, %v6326_v28  ;;  %v2997_v44 = vpop.f32.mrb[26].mxu1  ;;  %4385 = vmatprep.subr.bf16.mxu1 %v5592_v19  ;;  %v5619_v19 = vld [vmem:[#allocation10 + $0x3b4] ss:$8 sps:$4 sm:$0xff]   ;;  %v5617_v26 = vld [vmem:[#allocation10 + $0x3b0] ss:$8 sps:$4 sm:$0xff]  }
 0x3d2   :  { %v3258_v20 = vmul.f32 0.2, %v5177_v15  ;;  %v5179_v36 = vadd.f32 %v2997_v44, %v6323_v60  ;;  %v2999_v54 = vpop.f32.mrb[27].mxu1  ;;  %4350 = vmatprep.mubr.bf16.mxu1 %v3363_v43  ;;  %vm3194_vm9 = vcmp.gt.f32.partialorder %v5177_v15, 0.0  ;;  %v5622_v63 = vld [vmem:[#allocation10 + $0x3c4] ss:$8 sps:$4 sm:$0xff]   ;;  %v6347_v5 = vrot.slane %v6248_v1, %v1280_v4 }
 0x3d3   :  { %v3259_v62 = vmul.f32 0.2, %v5178_v11  ;;  %v5180_v59 = vadd.f32 %v2999_v54, %v6326_v28  ;;  %4351 = vmatmul.mubr.bf16.gmra.mrb[36].mxu1 %v3362_v18  ;;  %vm3195_vm10 = vcmp.gt.f32.partialorder %v5178_v11, 0.0  ;;  %v5620_v52 = vld [vmem:[#allocation10 + $0x3c0] ss:$8 sps:$4 sm:$0xff]   ;;  %v1284_v18 = vsub.s32 7, %v5971_v47 }
 0x3d4   :  { %vm3202_vm11 = vcmp.gt.f32.partialorder %v5179_v36, 0.0  ;;  %v3266_v61 = vmul.f32 0.2, %v5179_v36  ;;  %4386 = vmatpush1.bf16.msra.mxu1 %v5590_v56  ;;  %v3322_v35 = vsel %vm3194_vm9, %v5177_v15, %v3258_v20  ;;  %v5625_v13 = vld [vmem:[#allocation10 + $0x3d4] ss:$8 sps:$4 sm:$0xff]  }
 0x3d5   :  { %vm3203_vm12 = vcmp.gt.f32.partialorder %v5180_v59, 0.0  ;;  %v3267_v46 = vmul.f32 0.2, %v5180_v59  ;;  %4387 = vmatprep.subr.bf16.mxu1 %v5595_v45  ;;  %v3323_v55 = vsel %vm3195_vm10, %v5178_v11, %v3259_v62  ;;  %v5623_v15 = vld [vmem:[#allocation10 + $0x3d0] ss:$8 sps:$4 sm:$0xff]   ;;  %v6350_v56 = vrot.slane %v6248_v1, %v1284_v18 }
 0x3d6   :  { %v3330_v9 = vsel %vm3202_vm11, %v5179_v36, %v3266_v61  ;;  %v5628_v43 = vld [vmem:[#allocation10 + $0x3e4] ss:$8 sps:$4 sm:$0xff]   ;;  %v5626_v44 = vld [vmem:[#allocation10 + $0x3e0] ss:$8 sps:$4 sm:$0xff]   ;;  %v5631_v36 = vld [vmem:[#allocation10 + $0x3f4] ss:$8 sps:$4 sm:$0xff]  }
 0x3d7   :  { %v3003_v41 = vpop.f32.mrb[28].mxu1  ;;  %v3331_v16 = vsel %vm3203_vm12, %v5180_v59, %v3267_v46  ;;  %v3370_v0 = vpack.c.bf16 %v3330_v9, %v3322_v35  ;;  %v5629_v46 = vld [vmem:[#allocation10 + $0x3f0] ss:$8 sps:$4 sm:$0xff]  }
 0x3d8   :  { %v5181_v17 = vadd.f32 %v3003_v41, %v6323_v60  ;;  %v3005_v22 = vpop.f32.mrb[29].mxu1  ;;  %4388 = vmatpush1.bf16.msra.mxu1 %v5593_v58  ;;  %v3371_v27 = vpack.c.bf16 %v3331_v16, %v3323_v55 }
 0x3d9   :  { %v5182_v21 = vadd.f32 %v3005_v22, %v6326_v28  ;;  %v3007_v24 = vpop.f32.mrb[30].mxu1  ;;  %4389 = vmatprep.subr.bf16.mxu1 %v5598_v49 }
 0x3da   :  { %v3274_v2 = vmul.f32 0.2, %v5181_v17  ;;  %v5183_v30 = vadd.f32 %v3007_v24, %v6323_v60  ;;  %v3009_v51 = vpop.f32.mrb[31].mxu1  ;;  %4360 = vmatprep.mubr.bf16.mxu1 %v3371_v27  ;;  %vm3210_vm13 = vcmp.gt.f32.partialorder %v5181_v17, 0.0 }
 0x3db   :  { %v3275_v8 = vmul.f32 0.2, %v5182_v21  ;;  %v5184_v33 = vadd.f32 %v3009_v51, %v6326_v28  ;;  %4361 = vmatmul.mubr.bf16.gmra.mrb[40].mxu1 %v3370_v0  ;;  %vm3211_vm14 = vcmp.gt.f32.partialorder %v5182_v21, 0.0  ;;  %v5607_v28 = vld [vmem:[#allocation10 + $0x374] ss:$8 sps:$4 sm:$0xff]  }
 0x3dc   :  { %vm3218_vm15 = vcmp.gt.f32.partialorder %v5183_v30, 0.0  ;;  %v3282_v25 = vmul.f32 0.2, %v5183_v30  ;;  %4390 = vmatpush1.bf16.msra.mxu1 %v5596_v23  ;;  %v3338_v29 = vsel %vm3210_vm13, %v5181_v17, %v3274_v2 }
 0x3dd   :  { %vm3219_vm0 = vcmp.gt.f32.partialorder %v5184_v33, 0.0  ;;  %v3283_v10 = vmul.f32 0.2, %v5184_v33  ;;  %4391 = vmatprep.subr.bf16.mxu1 %v5601_v6  ;;  %v3339_v31 = vsel %vm3211_vm14, %v5182_v21, %v3275_v8 }
 0x3de   :  { %v3346_v32 = vsel %vm3218_vm15, %v5183_v30, %v3282_v25 }
 0x3df   :  { %v3347_v60 = vsel %vm3219_vm0, %v5184_v33, %v3283_v10  ;;  %v3378_v53 = vpack.c.bf16 %v3346_v32, %v3338_v29 }
 0x3e0   :  { %4392 = vmatpush1.bf16.msra.mxu1 %v5599_v12  ;;  %v3379_v7 = vpack.c.bf16 %v3347_v60, %v3339_v31 }
 0x3e1   :  { %4393 = vmatprep.subr.bf16.mxu1 %v5604_v3 }
 0x3e2   :  { %4370 = vmatprep.mubr.bf16.mxu1 %v3379_v7 }
 0x3e3   :  { %4371 = vmatmul.mubr.bf16.gmra.mrb[44].mxu1 %v3378_v53 }
 0x3e4   :  { %4394 = vmatpush1.bf16.msra.mxu1 %v5602_v39 }
 0x3e5   :  { %4395 = vmatprep.subr.bf16.mxu1 %v5607_v28 }
 0x3e8   :  { %4396 = vmatpush1.bf16.msra.mxu1 %v5605_v34 }
 0x3e9   :  { %4397 = vmatprep.subr.bf16.mxu1 %v5610_v37 }
 0x3ec   :  { %4398 = vmatpush1.bf16.msra.mxu1 %v5608_v57 }
 0x3ed   :  { %4399 = vmatprep.subr.bf16.mxu1 %v5613_v38 }
 0x3f0   :  { %4400 = vmatpush1.bf16.msra.mxu1 %v5611_v14 }
 0x3f1   :  { %4401 = vmatprep.subr.bf16.mxu1 %v5616_v40 }
 0x3f4   :  { %4402 = vmatpush1.bf16.msra.mxu1 %v5614_v42 }
 0x3f5   :  { %4403 = vmatprep.subr.bf16.mxu1 %v5619_v19 }
 0x3f8   :  { %4404 = vmatpush1.bf16.msra.mxu1 %v5617_v26 }
 0x3f9   :  { %4405 = vmatprep.subr.bf16.mxu1 %v5622_v63 }
 0x3fc   :  { %4406 = vmatpush1.bf16.msra.mxu1 %v5620_v52 }
 0x3fd   :  { %4407 = vmatprep.subr.bf16.mxu1 %v5625_v13 }
 0x400   :  { %v3119_v11 = vpop.f32.mrb[80].mxu0  ;;  %4408 = vmatpush1.bf16.msra.mxu1 %v5623_v15 }
 0x401   :  { %v5185_v45 = vadd.f32 %v3119_v11, %v6347_v5  ;;  %v3121_v20 = vpop.f32.mrb[81].mxu0  ;;  %4409 = vmatprep.subr.bf16.mxu1 %v5628_v43 }
 0x402   :  { %v5186_v47 = vadd.f32 %v3121_v20, %v6350_v56  ;;  %v3123_v54 = vpop.f32.mrb[82].mxu0 }
 0x403   :  { %v3228_v62 = vmul.f32 0.2, %v5185_v45  ;;  %v5187_v59 = vadd.f32 %v3123_v54, %v6347_v5  ;;  %v3125_v61 = vpop.f32.mrb[83].mxu0  ;;  %vm3164_vm1 = vcmp.gt.f32.partialorder %v5185_v45, 0.0 }
 0x404   :  { %v3229_v58 = vmul.f32 0.2, %v5186_v47  ;;  %v5188_v1 = vadd.f32 %v3125_v61, %v6350_v56  ;;  %4410 = vmatpush1.bf16.msra.mxu1 %v5626_v44  ;;  %vm3165_vm2 = vcmp.gt.f32.partialorder %v5186_v47, 0.0 }
 0x405   :  { %vm3172_vm3 = vcmp.gt.f32.partialorder %v5187_v59, 0.0  ;;  %v3236_v49 = vmul.f32 0.2, %v5187_v59  ;;  %4411 = vmatprep.subr.bf16.mxu1 %v5631_v36  ;;  %v3292_v9 = vsel %vm3164_vm1, %v5185_v45, %v3228_v62 }
 0x406   :  { %vm3173_vm4 = vcmp.gt.f32.partialorder %v5188_v1, 0.0  ;;  %v3237_v35 = vmul.f32 0.2, %v5188_v1  ;;  %v3293_v0 = vsel %vm3165_vm2, %v5186_v47, %v3229_v58 }
 0x407   :  { %v3300_v41 = vsel %vm3172_vm3, %v5187_v59, %v3236_v49 }
 0x408   :  { %v3356_v55 = vpack.c.bf16 %v3300_v41, %v3292_v9  ;;  %v3129_v16 = vpop.f32.mrb[84].mxu0  ;;  %4412 = vmatpush1.bf16.msra.mxu1 %v5629_v46  ;;  %v3301_v17 = vsel %vm3173_vm4, %v5188_v1, %v3237_v35 }
 0x409   :  { %v5189_v22 = vadd.f32 %v3129_v16, %v6347_v5  ;;  %v3131_v27 = vpop.f32.mrb[85].mxu0  ;;  %v3357_v23 = vpack.c.bf16 %v3301_v17, %v3293_v0 }
 0x40a   :  { %v5190_v21 = vadd.f32 %v3131_v27, %v6350_v56  ;;  %v3133_v24 = vpop.f32.mrb[86].mxu0 }
 0x40b   :  { %v3244_v6 = vmul.f32 0.2, %v5189_v22  ;;  %v5191_v2 = vadd.f32 %v3133_v24, %v6347_v5  ;;  %v3135_v30 = vpop.f32.mrb[87].mxu0  ;;  %4413 = vmatprep.mubr.bf16.mxu1 %v3357_v23  ;;  %vm3180_vm5 = vcmp.gt.f32.partialorder %v5189_v22, 0.0 }
 0x40c   :  { %v3245_v51 = vmul.f32 0.2, %v5190_v21  ;;  %v5192_v8 = vadd.f32 %v3135_v30, %v6350_v56  ;;  %4414 = vmatmul.mubr.bf16.vlgmr.msra.gmra.mrb[32].mxu1 %v3356_v55  ;;  %vm3181_vm6 = vcmp.gt.f32.partialorder %v5190_v21, 0.0 }
 0x40d   :  { %vm3188_vm7 = vcmp.gt.f32.partialorder %v5191_v2, 0.0  ;;  %v3252_v33 = vmul.f32 0.2, %v5191_v2  ;;  %v3308_v12 = vsel %vm3180_vm5, %v5189_v22, %v3244_v6 }
 0x40e   :  { %vm3189_vm8 = vcmp.gt.f32.partialorder %v5192_v8, 0.0  ;;  %v3253_v25 = vmul.f32 0.2, %v5192_v8  ;;  %v3309_v29 = vsel %vm3181_vm6, %v5190_v21, %v3245_v51 }
 0x40f   :  { %v3316_v10 = vsel %vm3188_vm7, %v5191_v2, %v3252_v33 }
 0x410   :  { %v3139_v3 = vpop.f32.mrb[88].mxu0  ;;  %v3317_v32 = vsel %vm3189_vm8, %v5192_v8, %v3253_v25  ;;  %v3364_v31 = vpack.c.bf16 %v3316_v10, %v3308_v12 }
 0x411   :  { %v5193_v60 = vadd.f32 %v3139_v3, %v6347_v5  ;;  %v3141_v53 = vpop.f32.mrb[89].mxu0  ;;  %v3365_v7 = vpack.c.bf16 %v3317_v32, %v3309_v29 }
 0x412   :  { %v5194_v39 = vadd.f32 %v3141_v53, %v6350_v56  ;;  %v3143_v28 = vpop.f32.mrb[90].mxu0 }
 0x413   :  { %v3260_v34 = vmul.f32 0.2, %v5193_v60  ;;  %v5195_v37 = vadd.f32 %v3143_v28, %v6347_v5  ;;  %v3145_v57 = vpop.f32.mrb[91].mxu0  ;;  %4423 = vmatprep.mubr.bf16.mxu1 %v3365_v7  ;;  %vm3196_vm9 = vcmp.gt.f32.partialorder %v5193_v60, 0.0 }
 0x414   :  { %v3261_v38 = vmul.f32 0.2, %v5194_v39  ;;  %v5196_v14 = vadd.f32 %v3145_v57, %v6350_v56  ;;  %4424 = vmatmul.mubr.bf16.gmra.mrb[36].mxu1 %v3364_v31  ;;  %vm3197_vm10 = vcmp.gt.f32.partialorder %v5194_v39, 0.0 }
 0x415   :  { %vm3204_vm11 = vcmp.gt.f32.partialorder %v5195_v37, 0.0  ;;  %v3268_v40 = vmul.f32 0.2, %v5195_v37  ;;  %v3324_v19 = vsel %vm3196_vm9, %v5193_v60, %v3260_v34 }
 0x416   :  { %vm3205_vm12 = vcmp.gt.f32.partialorder %v5196_v14, 0.0  ;;  %v3269_v42 = vmul.f32 0.2, %v5196_v14  ;;  %v3325_v52 = vsel %vm3197_vm10, %v5194_v39, %v3261_v38 }
 0x417   :  { %v3332_v26 = vsel %vm3204_vm11, %v5195_v37, %v3268_v40 }
 0x418   :  { %v3149_v63 = vpop.f32.mrb[92].mxu0  ;;  %v3333_v4 = vsel %vm3205_vm12, %v5196_v14, %v3269_v42  ;;  %v3372_v13 = vpack.c.bf16 %v3332_v26, %v3324_v19 }
 0x419   :  { %v5197_v18 = vadd.f32 %v3149_v63, %v6347_v5  ;;  %v3151_v15 = vpop.f32.mrb[93].mxu0  ;;  %v3373_v43 = vpack.c.bf16 %v3333_v4, %v3325_v52 }
 0x41a   :  { %v5198_v11 = vadd.f32 %v3151_v15, %v6350_v56  ;;  %v3153_v44 = vpop.f32.mrb[94].mxu0 }
 0x41b   :  { %v3276_v45 = vmul.f32 0.2, %v5197_v18  ;;  %v5199_v20 = vadd.f32 %v3153_v44, %v6347_v5  ;;  %v3155_v36 = vpop.f32.mrb[95].mxu0  ;;  %4433 = vmatprep.mubr.bf16.mxu1 %v3373_v43  ;;  %vm3212_vm13 = vcmp.gt.f32.partialorder %v5197_v18, 0.0  ;;  %v3510_v5 = vld [vmem:[%s6416_s8] sm:$0x3] }
 0x41c   :  { %v3277_v47 = vmul.f32 0.2, %v5198_v11  ;;  %v5200_v54 = vadd.f32 %v3155_v36, %v6350_v56  ;;  %4434 = vmatmul.mubr.bf16.gmra.mrb[40].mxu1 %v3372_v13  ;;  %vm3213_vm14 = vcmp.gt.f32.partialorder %v5198_v11, 0.0  ;;  %v6372_v56 = vrot.slane %v3510_v5, %v5974_v48  ;;  %s5850_s8 = smov [#allocation11]  }
 0x41d   :  { %vm3220_vm15 = vcmp.gt.f32.partialorder %v5199_v20, 0.0  ;;  %v3284_v62 = vmul.f32 0.2, %v5199_v20  ;;  %v3340_v61 = vsel %vm3212_vm13, %v5197_v18, %v3276_v45  ;;  %v6375_v9 = vrot.slane %v3510_v5, %v5980_v50  ;;  %s4611_s15 = sshll.u32 %s5850_s8, 4  ;;  %s4612_s15 = int_to_ptr.vmem [resolvable:$true] %s4611_s15 }
 0x41e   :  { %vm3221_vm0 = vcmp.gt.f32.partialorder %v5200_v54, 0.0  ;;  %v3285_v59 = vmul.f32 0.2, %v5200_v54  ;;  %v3341_v1 = vsel %vm3213_vm14, %v5198_v11, %v3277_v47  ;;  %s5806_s17 = scalar_lea.vmem %s4612_s15, 1024  ;;  %p5811_p13 = scmp.lt.s32.totalorder %s4612_s15, %s4612_s15 }
 0x41f   :  { %v3348_v58 = vsel %vm3220_vm15, %v5199_v20, %v3284_v62  ;;  %p5807_p12 = scmp.ne.s32.totalorder %s4612_s15, %s5806_s17  ;;  %p5812_p0 = scmp.lt.s32.totalorder %s5806_s17, %s5806_s17 }
 0x420   :  { %v3349_v46 = vsel %vm3221_vm0, %v5200_v54, %v3285_v59  ;;  %v3380_v49 = vpack.c.bf16 %v3348_v58, %v3340_v61 }
 0x421   :  { %v3381_v35 = vpack.c.bf16 %v3349_v46, %v3341_v1  ;;  %p5813_p1 = por %p5812_p0, %p5811_p13 }
 0x423   :  { %4443 = vmatprep.mubr.bf16.mxu1 %v3381_v35  ;;  %p5814_p2 = pnand %p5813_p1, %p5807_p12 }
 0x424   :  { %4444 = vmatmul.mubr.bf16.gmra.mrb[44].mxu1 %v3380_v49 }
 0x4df   :  { %v4415_v41 = vpop.f32.mrb[32].mxu1 }
 0x4e0   :  { %v5201_v55 = vadd.f32 %v4415_v41, %v6372_v56  ;;  %v4417_v16 = vpop.f32.mrb[33].mxu1 }
 0x4e1   :  { %v5202_v0 = vadd.f32 %v4417_v16, %v6375_v9  ;;  %v4419_v17 = vpop.f32.mrb[34].mxu1 }
 0x4e2   :  { %v5089_v22 = vmul.f32 -1.442695, %v5201_v55  ;;  %v5203_v27 = vadd.f32 %v4419_v17, %v6372_v56  ;;  %v4421_v23 = vpop.f32.mrb[35].mxu1 }
 0x4e3   :  { %v5090_v21 = vmul.f32 -1.442695, %v5202_v0  ;;  %v5204_v24 = vadd.f32 %v4421_v23, %v6375_v9 }
 0x4e4   :  { %5632 = vpow2.f32 %v5089_v22  ;;  %v5091_v48 = vmul.f32 -1.442695, %v5203_v27 }
 0x4e5   :  { %5634 = vpow2.f32 %v5090_v21  ;;  %v5092_v6 = vmul.f32 -1.442695, %v5204_v24 }
 0x4e6   :  { %5636 = vpow2.f32 %v5091_v48 }
 0x4e7   :  { %5638 = vpow2.f32 %v5092_v6  ;;  %v4425_v50 = vpop.f32.mrb[36].mxu1 }
 0x4e8   :  { %v5205_v2 = vadd.f32 %v4425_v50, %v6372_v56  ;;  %v4427_v30 = vpop.f32.mrb[37].mxu1 }
 0x4e9   :  { %v5206_v51 = vadd.f32 %v4427_v30, %v6375_v9  ;;  %v4429_v8 = vpop.f32.mrb[38].mxu1 }
 0x4ea   :  { %v5093_v33 = vmul.f32 -1.442695, %v5205_v2  ;;  %v5207_v25 = vadd.f32 %v4429_v8, %v6372_v56  ;;  %v4431_v12 = vpop.f32.mrb[39].mxu1 }
 0x4eb   :  { %v5094_v10 = vmul.f32 -1.442695, %v5206_v51  ;;  %v5208_v3 = vadd.f32 %v4431_v12, %v6375_v9 }
 0x4ec   :  { %5640 = vpow2.f32 %v5093_v33  ;;  %v5095_v29 = vmul.f32 -1.442695, %v5207_v25 }
 0x4ed   :  { %5642 = vpow2.f32 %v5094_v10  ;;  %v5096_v32 = vmul.f32 -1.442695, %v5208_v3 }
 0x4ee   :  { %v5633_v31 = vpop.eup %5632  ;;  %5644 = vpow2.f32 %v5095_v29 }
 0x4ef   :  { %v5635_v60 = vpop.eup %5634  ;;  %v4502_v53 = vadd.f32 1.0, %v5633_v31  ;;  %5646 = vpow2.f32 %v5096_v32  ;;  %v4435_v7 = vpop.f32.mrb[40].mxu1 }
 0x4f0   :  { %v5637_v39 = vpop.eup %5636  ;;  %v4503_v28 = vadd.f32 1.0, %v5635_v60  ;;  %v5209_v34 = vadd.f32 %v4435_v7, %v6372_v56  ;;  %v4437_v37 = vpop.f32.mrb[41].mxu1 }
 0x4f1   :  { %v5639_v57 = vpop.eup %5638  ;;  %5648 = vrcp.f32 %v4502_v53  ;;  %v4504_v38 = vadd.f32 1.0, %v5637_v39  ;;  %v5210_v14 = vadd.f32 %v4437_v37, %v6375_v9  ;;  %v4439_v40 = vpop.f32.mrb[42].mxu1 }
 0x4f2   :  { %5650 = vrcp.f32 %v4503_v28  ;;  %v4505_v42 = vadd.f32 1.0, %v5639_v57  ;;  %v5097_v19 = vmul.f32 -1.442695, %v5209_v34  ;;  %v5211_v26 = vadd.f32 %v4439_v40, %v6372_v56  ;;  %v4441_v63 = vpop.f32.mrb[43].mxu1 }
 0x4f3   :  { %5652 = vrcp.f32 %v4504_v38  ;;  %v5098_v52 = vmul.f32 -1.442695, %v5210_v14  ;;  %v5212_v4 = vadd.f32 %v4441_v63, %v6375_v9 }
 0x4f4   :  { %5654 = vrcp.f32 %v4505_v42  ;;  %v5099_v13 = vmul.f32 -1.442695, %v5211_v26 }
 0x4f5   :  { %5656 = vpow2.f32 %v5097_v19  ;;  %v5100_v18 = vmul.f32 -1.442695, %v5212_v4 }
 0x4f6   :  { %v5641_v15 = vpop.eup %5640  ;;  %5658 = vpow2.f32 %v5098_v52 }
 0x4f7   :  { %v5643_v43 = vpop.eup %5642  ;;  %v4506_v11 = vadd.f32 1.0, %v5641_v15  ;;  %5660 = vpow2.f32 %v5099_v13  ;;  %v4445_v44 = vpop.f32.mrb[44].mxu1 }
 0x4f8   :  { %v5645_v45 = vpop.eup %5644  ;;  %v4507_v20 = vadd.f32 1.0, %v5643_v43  ;;  %5662 = vpow2.f32 %v5100_v18  ;;  %v5213_v36 = vadd.f32 %v4445_v44, %v6372_v56  ;;  %v4447_v47 = vpop.f32.mrb[45].mxu1 }
 0x4f9   :  { %v5647_v54 = vpop.eup %5646  ;;  %5664 = vrcp.f32 %v4506_v11  ;;  %v4508_v62 = vadd.f32 1.0, %v5645_v45  ;;  %v5214_v59 = vadd.f32 %v4447_v47, %v6375_v9  ;;  %v4449_v61 = vpop.f32.mrb[46].mxu1 }
 0x4fa   :  { %5666 = vrcp.f32 %v4507_v20  ;;  %v4509_v58 = vadd.f32 1.0, %v5647_v54  ;;  %v5101_v1 = vmul.f32 -1.442695, %v5213_v36  ;;  %v5215_v46 = vadd.f32 %v4449_v61, %v6372_v56  ;;  %v4451_v49 = vpop.f32.mrb[47].mxu1 }
 0x4fb   :  { %v5649_v35 = vpop.eup %5648  ;;  %5668 = vrcp.f32 %v4508_v62  ;;  %v5102_v5 = vmul.f32 -1.442695, %v5214_v59  ;;  %v5216_v41 = vadd.f32 %v4451_v49, %v6375_v9 }
 0x4fc   :  { %v5651_v55 = vpop.eup %5650  ;;  %5670 = vrcp.f32 %v4509_v58  ;;  %v5103_v16 = vmul.f32 -1.442695, %v5215_v46 }
 0x4fd   :  { %v5653_v0 = vpop.eup %5652  ;;  %v5113_v17 = vpack.c.bf16 %v5651_v55, %v5649_v35  ;;  %5672 = vpow2.f32 %v5101_v1  ;;  %v5104_v22 = vmul.f32 -1.442695, %v5216_v41 }
 0x4fe   :  { %v5655_v27 = vpop.eup %5654  ;;  %5674 = vpow2.f32 %v5102_v5 }
 0x4ff   :  { %v5657_v23 = vpop.eup %5656  ;;  %4598 = vst [vmem:[#allocation11] sm:$0xff] %v5113_v17  ;;  %v5114_v21 = vpack.c.bf16 %v5655_v27, %v5653_v0  ;;  %5676 = vpow2.f32 %v5103_v16 }
 0x500   :  { %v5659_v56 = vpop.eup %5658  ;;  %v4510_v24 = vadd.f32 1.0, %v5657_v23  ;;  %5678 = vpow2.f32 %v5104_v22 }
 0x501   :  { %v5661_v48 = vpop.eup %5660  ;;  %4599 = vst [vmem:[#allocation11 + $0x8] sm:$0xff] %v5114_v21  ;;  %v4511_v6 = vadd.f32 1.0, %v5659_v56 }
 0x502   :  { %v5663_v9 = vpop.eup %5662  ;;  %5680 = vrcp.f32 %v4510_v24  ;;  %v4512_v50 = vadd.f32 1.0, %v5661_v48 }
 0x503   :  { %v5665_v2 = vpop.eup %5664  ;;  %5682 = vrcp.f32 %v4511_v6  ;;  %v4513_v30 = vadd.f32 1.0, %v5663_v9 }
 0x504   :  { %v5667_v51 = vpop.eup %5666  ;;  %5684 = vrcp.f32 %v4512_v50 }
 0x505   :  { %v5669_v8 = vpop.eup %5668  ;;  %v5115_v33 = vpack.c.bf16 %v5667_v51, %v5665_v2  ;;  %5686 = vrcp.f32 %v4513_v30 }
 0x506   :  { %v5671_v25 = vpop.eup %5670 }
 0x507   :  { %v5673_v12 = vpop.eup %5672  ;;  %4600 = vst [vmem:[#allocation11 + $0x10] sm:$0xff] %v5115_v33  ;;  %v5116_v10 = vpack.c.bf16 %v5671_v25, %v5669_v8 }
 0x508   :  { %v5675_v3 = vpop.eup %5674  ;;  %v4514_v29 = vadd.f32 1.0, %v5673_v12 }
 0x509   :  { %v5677_v32 = vpop.eup %5676  ;;  %4601 = vst [vmem:[#allocation11 + $0x18] sm:$0xff] %v5116_v10  ;;  %v4515_v31 = vadd.f32 1.0, %v5675_v3 }
 0x50a   :  { %v5679_v60 = vpop.eup %5678  ;;  %5688 = vrcp.f32 %v4514_v29  ;;  %v4516_v53 = vadd.f32 1.0, %v5677_v32 }
 0x50b   :  { %5690 = vrcp.f32 %v4515_v31  ;;  %v4517_v7 = vadd.f32 1.0, %v5679_v60 }
 0x50c   :  { %v5681_v39 = vpop.eup %5680  ;;  %5692 = vrcp.f32 %v4516_v53 }
 0x50d   :  { %v5683_v28 = vpop.eup %5682  ;;  %5694 = vrcp.f32 %v4517_v7 }
 0x50e   :  { %v5685_v34 = vpop.eup %5684  ;;  %v5117_v37 = vpack.c.bf16 %v5683_v28, %v5681_v39 }
 0x50f   :  { %v5687_v57 = vpop.eup %5686 }
 0x510   :  { %4602 = vst [vmem:[#allocation11 + $0x20] sm:$0xff] %v5117_v37  ;;  %v5118_v38 = vpack.c.bf16 %v5687_v57, %v5685_v34 }
 0x512   :  { %4603 = vst [vmem:[#allocation11 + $0x28] sm:$0xff] %v5118_v38 }
 0x514   :  { %v5689_v14 = vpop.eup %5688 }
 0x515   :  { %v5691_v40 = vpop.eup %5690 }
 0x516   :  { %v5693_v42 = vpop.eup %5692  ;;  %v5119_v19 = vpack.c.bf16 %v5691_v40, %v5689_v14 }
 0x517   :  { %v5695_v26 = vpop.eup %5694 }
 0x518   :  { %4604 = vst [vmem:[#allocation11 + $0x30] sm:$0xff] %v5119_v19  ;;  %v5120_v63 = vpack.c.bf16 %v5695_v26, %v5693_v42 }
 0x51a   :  { %4605 = vst [vmem:[#allocation11 + $0x38] sm:$0xff] %v5120_v63 }
 0x51b   :  { %5817 = shalt.err (!%p5814_p2)
}
 0x51c   :  { %s5818_s16 = scalar_lea.hbm %s6417_s9, 1024 }
 0x51d   :  { %p5819_p3 = scmp.ne.s32.totalorder %s6417_s9, %s5818_s16  ;;  %p5822_p4 = scmp.lt.u32.totalorder %s5818_s16, %s6417_s9 }
 0x51f   :  { %p5824_p5 = pnand %p5822_p4, %p5819_p3 }
 0x521   :  { %5827 = shalt.err (!%p5824_p5)
}
 0x522   :  { %4617 = dma.vmem_to_hbm [thread:$0]  %s4612_s15, 1024, %s6417_s9, [#allocation4], %s5837_s19, %s5837_s19, %s5838_s20  }
 0x523   :  { %5834 = dma.done.wait [#allocation4], 1024  }
 0x524   :  { %5835 = vsyncadd [#allocation4], 4294966272 }
 0x525   :  { %4621 = vsyncpa [#allocation3], 1 }
 0x526   :  { %4622 = vsyncpa [#allocation6], 1 }
 0x527   :  { %4623 = vsyncpa [#allocation9], 1 }
 0x528   :  { %4624 = vsyncpa [#allocation4], 1 }

</bundles_post_ra>
